<compile_context>
chip_gen: v7x
topology: tpu7x:2x2x1
jax: 0.10.0
libtpu: 0.0.40
codegen_flags: <defaults>
</compile_context>

<pallas_src>
import functools

import numpy as np

import jax
import jax.numpy as jnp
from jax.experimental import pallas as pl
from jax.experimental.pallas import tpu as pltpu

_SUBLANE = 8  # channel counts are padded to a multiple of 8 for aligned slab stores


def _make_tap_masks(D, H, W):
    """(27, D*H*W) {0,1} masks: validity of tap (dd, dh, dw) at each flat position."""
    d = np.arange(D)[:, None, None]
    y = np.arange(H)[None, :, None]
    x = np.arange(W)[None, None, :]
    rows = []
    for dd in (-1, 0, 1):
        for dh in (-1, 0, 1):
            for dw in (-1, 0, 1):
                ok = ((d + dd >= 0) & (d + dd < D) &
                      (y + dh >= 0) & (y + dh < H) &
                      (x + dw >= 0) & (x + dw < W))
                rows.append(ok.reshape(-1).astype(np.float32))
    return jnp.asarray(np.stack(rows, axis=0))  # (27, L)


def _decoder_kernel(x_ref, w1_ref, b1_ref, w2_ref, b2_ref, m_ref, o_ref,
                    patch_ref, *, D, H, W):
    # x_ref    : (Cin1, L)        full-depth activation column for this batch
    # w1_ref   : (Cout1, 27*Cin1) BN-folded weights, K ordered (kd, kh, kw, ci)
    # w2_ref   : (Cout2, 27*Cout1)
    # b1/b2_ref: (Cout, 1)        fused conv-bias + BN bias
    # m_ref    : (27, L)          {0,1} boundary masks, row = tap index
    # o_ref    : (Cout2, L)       lane-dense output column
    # patch_ref: (Kmax, L)        shared im2col scratch (reused by both layers)
    HW = H * W
    L = D * HW

    def im2col(src, cin):
        # 27 shifted/masked copies of the (cin, L) volume, stacked along the
        # contraction axis in (kd, kh, kw, ci) order to match w*_ref columns.
        k = 0
        for dd in (-1, 0, 1):
            for dh in (-1, 0, 1):
                for dw in (-1, 0, 1):
                    off = dd * HW + dh * W + dw       # flat 3-D offset
                    tap = src
                    if off != 0:
                        # lane rotation so tap[s] = src[s + off]; wrapped entries
                        # (any d/h/w boundary crossing) are zeroed by the mask.
                        tap = pltpu.roll(tap, (-off) % L, axis=1)
                    if (dd, dh, dw) != (0, 0, 0):
                        tap = tap * m_ref[pl.ds(k, 1), :]
                    patch_ref[pl.ds(k * cin, cin), :] = tap
                    k += 1

    # Layer 1: conv + BN(eval) + ReLU.  Single MXU contraction over K = 27*Cin1.
    cin1 = x_ref.shape[0]
    im2col(x_ref[...], cin1)
    mid = jax.lax.dot_general(
        w1_ref[...], patch_ref[pl.ds(0, 27 * cin1), :],
        dimension_numbers=(((1,), (0,)), ((), ())),
        preferred_element_type=jnp.float32)
    mid = jnp.maximum(mid + b1_ref[...], 0.0)          # (Cout1, L), stays on-chip

    # Layer 2: same structure, intermediate never leaves VMEM/vregs.
    cin2 = mid.shape[0]
    im2col(mid, cin2)
    acc = jax.lax.dot_general(
        w2_ref[...], patch_ref[pl.ds(0, 27 * cin2), :],
        dimension_numbers=(((1,), (0,)), ((), ())),
        preferred_element_type=jnp.float32)
    o_ref[...] = jnp.maximum(acc + b2_ref[...], 0.0).astype(o_ref.dtype)


def _decoder_pallas(x, w1, b1, w2, b2, masks, D, H, W):
    """x: (N, Cin1, L) f32; returns (N, Cout2, L) f32."""
    N, cin1, L = x.shape
    cout1 = w1.shape[0]
    cout2 = w2.shape[0]
    assert L == D * H * W
    assert cin1 % _SUBLANE == 0 and cout1 % _SUBLANE == 0
    assert w1.shape[1] == 27 * cin1 and w2.shape[1] == 27 * cout1
    kmax = max(27 * cin1, 27 * cout1)

    kern = functools.partial(_decoder_kernel, D=D, H=H, W=W)
    return pl.pallas_call(
        kern,
        out_shape=jax.ShapeDtypeStruct((N, cout2, L), x.dtype),
        grid_spec=pltpu.PrefetchScalarGridSpec(
            num_scalar_prefetch=0,
            grid=(N,),
            in_specs=[
                pl.BlockSpec((None, cin1, L), lambda n: (n, 0, 0)),   # activations
                pl.BlockSpec((cout1, 27 * cin1), lambda n: (0, 0)),   # w1 (folded)
                pl.BlockSpec((cout1, 1), lambda n: (0, 0)),           # b1
                pl.BlockSpec((cout2, 27 * cout1), lambda n: (0, 0)),  # w2 (folded)
                pl.BlockSpec((cout2, 1), lambda n: (0, 0)),           # b2
                pl.BlockSpec((27, L), lambda n: (0, 0)),              # tap masks
            ],
            out_specs=pl.BlockSpec((None, cout2, L), lambda n: (n, 0, 0)),
            scratch_shapes=[pltpu.VMEM((kmax, L), jnp.float32)],
        ),
        compiler_params=pltpu.CompilerParams(
            dimension_semantics=("parallel",)),
    )(x, w1, b1, w2, b2, masks)


def _fold_bn(p, eps=1e-5):
    """Fold eval-mode BN into the conv weights/bias; pad Cin to a multiple of 8."""
    w = p["w"]                                     # (3, 3, 3, Cin, Cout)  DHWIO
    cin, cout = w.shape[3], w.shape[4]
    cpad = (-cin) % _SUBLANE
    if cpad:
        w = jnp.pad(w, ((0, 0), (0, 0), (0, 0), (0, cpad), (0, 0)))
    scale = p["gamma"] / jnp.sqrt(p["var"] + eps)                 # (Cout,)
    w2d = (w.reshape(-1, cout).T * scale[:, None]).astype(jnp.float32)
    bias = ((p["conv_b"] - p["mean"]) * scale + p["beta"]).astype(jnp.float32)
    return w2d, bias[:, None]


def decoder_forward(x_ncdhw, params, eps=1e-5):
    """Pallas implementation of Decoder.forward.  x_ncdhw: (N, Cin, D, H, W)."""
    assert len(params) == 2
    N, Cin, D, H, W = x_ncdhw.shape
    L = D * H * W

    # NCDHW -> (N, C, D*H*W): flat volume on the lane axis, pure reshape.
    x = x_ncdhw.reshape(N, Cin, L)
    cpad = (-Cin) % _SUBLANE
    if cpad:
        x = jnp.pad(x, ((0, 0), (0, cpad), (0, 0)))

    w1, b1 = _fold_bn(params[0], eps)
    w2, b2 = _fold_bn(params[1], eps)
    masks = _make_tap_masks(D, H, W)

    out = _decoder_pallas(x, w1, b1, w2, b2, masks, D, H, W)
    Cout = out.shape[1]
    return out.reshape(N, Cout, D, H, W)


def decoder_reference(x_ncdhw, params, eps=1e-5):
    """Pure-JAX reference (eval-mode BN) for validation."""
    x = jnp.transpose(x_ncdhw, (0, 2, 3, 4, 1))          # NCDHW -> NDHWC
    for p in params:
        y = jax.lax.conv_general_dilated(
            x, p["w"], window_strides=(1, 1, 1), padding="SAME",
            dimension_numbers=("NDHWC", "DHWIO", "NDHWC"))
        y = y + p["conv_b"]
        y = (y - p["mean"]) / jnp.sqrt(p["var"] + eps) * p["gamma"] + p["beta"]
        x = jnp.maximum(y, 0.0)
    return jnp.transpose(x, (0, 4, 1, 2, 3))             # NDHWC -> NCDHW


def make_layer_params(key, cin, cout):
    k = jax.random.split(key, 6)
    fan_in = cin * 27
    return {
        "w":      jax.random.normal(k[0], (3, 3, 3, cin, cout), jnp.float32)
                  / jnp.sqrt(fan_in),                                   # DHWIO
        "conv_b": 0.1 * jax.random.normal(k[1], (cout,), jnp.float32),
        "gamma":  1.0 + 0.1 * jax.random.normal(k[2], (cout,), jnp.float32),
        "beta":   0.1 * jax.random.normal(k[3], (cout,), jnp.float32),
        "mean":   0.1 * jax.random.normal(k[4], (cout,), jnp.float32),
        "var":    jax.random.uniform(k[5], (cout,), jnp.float32, 0.5, 1.5),
    }


if __name__ == "__main__":
    key = jax.random.PRNGKey(0)
    k_x, k_l1, k_l2 = jax.random.split(key, 3)

    N, C_IN, C_OUT = 2, 4, 8
    D, H, W = 8, 16, 16

    x = jax.random.normal(k_x, (N, C_IN, D, H, W), jnp.float32)  # NCDHW (PyTorch)
    params = [
        make_layer_params(k_l1, C_IN, C_OUT),
        make_layer_params(k_l2, C_OUT, C_OUT),
    ]

    out = jax.block_until_ready(decoder_forward(x, params))
    ref = jax.block_until_ready(decoder_reference(x, params))

    assert out.shape == (N, C_OUT, D, H, W), out.shape
    assert jnp.allclose(out, ref, atol=2e-3, rtol=2e-3), (
        float(jnp.max(jnp.abs(out - ref))))

    print("KERNEL_OK")
</pallas_src>

<mosaic_0001>
module attributes {stable_mosaic.version = 11 : i64} {
  func.func @_decoder_kernel(%arg0: i32, %arg1: memref<1x8x2048xf32, #tpu.memory_space<vmem>>, %arg2: memref<8x216xf32, #tpu.memory_space<vmem>>, %arg3: memref<8x1xf32, #tpu.memory_space<vmem>>, %arg4: memref<8x216xf32, #tpu.memory_space<vmem>>, %arg5: memref<8x1xf32, #tpu.memory_space<vmem>>, %arg6: memref<27x2048xf32, #tpu.memory_space<vmem>>, %arg7: memref<1x8x2048xf32, #tpu.memory_space<vmem>>, %arg8: memref<216x2048xf32, #tpu.memory_space<vmem>>) attributes {dimension_semantics = [#tpu.dimension_semantics<parallel>], iteration_bounds = array<i64: 2>, scalar_prefetch = 0 : i64, scratch_operands = 1 : i64, tpu.core_type = #tpu.core_type<tc>, window_params = [{transform_indices = @transform_0, window_bounds = array<i64: 1, 8, 2048>}, {pipeline_mode = #tpu.pipeline_mode<synchronous>, transform_indices = @transform_1, window_bounds = array<i64: 8, 216>}, {pipeline_mode = #tpu.pipeline_mode<synchronous>, transform_indices = @transform_2, window_bounds = array<i64: 8, 1>}, {pipeline_mode = #tpu.pipeline_mode<synchronous>, transform_indices = @transform_3, window_bounds = array<i64: 8, 216>}, {pipeline_mode = #tpu.pipeline_mode<synchronous>, transform_indices = @transform_4, window_bounds = array<i64: 8, 1>}, {pipeline_mode = #tpu.pipeline_mode<synchronous>, transform_indices = @transform_5, window_bounds = array<i64: 27, 2048>}, {transform_indices = @transform_6, window_bounds = array<i64: 1, 8, 2048>}]} {
    %c0 = arith.constant 0 : index
    %c0_0 = arith.constant 0 : index
    %c0_1 = arith.constant 0 : index
    %0 = vector.load %arg1[%c0, %c0_0, %c0_1] : memref<1x8x2048xf32, #tpu.memory_space<vmem>>, vector<1x8x2048xf32>
    %1 = vector.shape_cast %0 : vector<1x8x2048xf32> to vector<8x2048xf32>
    %c273_i32 = arith.constant 273 : i32
    %2 = tpu.dynamic_rotate %1 by %c273_i32 dim 1 : vector<8x2048xf32>, i32 -> vector<8x2048xf32>
    %c0_2 = arith.constant 0 : index
    %c0_3 = arith.constant 0 : index
    %3 = vector.load %arg6[%c0_2, %c0_3] : memref<27x2048xf32, #tpu.memory_space<vmem>>, vector<1x2048xf32>
    %4 = vector.broadcast %3 : vector<1x2048xf32> to vector<8x2048xf32>
    %5 = arith.mulf %2, %4 : vector<8x2048xf32>
    %c0_4 = arith.constant 0 : index
    %c0_5 = arith.constant 0 : index
    %6 = vector.load %arg8[%c0_4, %c0_5] : memref<216x2048xf32, #tpu.memory_space<vmem>>, vector<8x2048xf32>
    tpu.vector_store %arg8[%c0_4, %c0_5], %5 {strides = array<i32>} : memref<216x2048xf32, #tpu.memory_space<vmem>>, vector<8x2048xf32>,
    %c272_i32 = arith.constant 272 : i32
    %7 = tpu.dynamic_rotate %1 by %c272_i32 dim 1 : vector<8x2048xf32>, i32 -> vector<8x2048xf32>
    %c1 = arith.constant 1 : index
    %c0_6 = arith.constant 0 : index
    %8 = vector.load %arg6[%c1, %c0_6] : memref<27x2048xf32, #tpu.memory_space<vmem>>, vector<1x2048xf32>
    %9 = vector.broadcast %8 : vector<1x2048xf32> to vector<8x2048xf32>
    %10 = arith.mulf %7, %9 : vector<8x2048xf32>
    %c8 = arith.constant 8 : index
    %c0_7 = arith.constant 0 : index
    %11 = vector.load %arg8[%c8, %c0_7] : memref<216x2048xf32, #tpu.memory_space<vmem>>, vector<8x2048xf32>
    tpu.vector_store %arg8[%c8, %c0_7], %10 {strides = array<i32>} : memref<216x2048xf32, #tpu.memory_space<vmem>>, vector<8x2048xf32>,
    %c271_i32 = arith.constant 271 : i32
    %12 = tpu.dynamic_rotate %1 by %c271_i32 dim 1 : vector<8x2048xf32>, i32 -> vector<8x2048xf32>
    %c2 = arith.constant 2 : index
    %c0_8 = arith.constant 0 : index
    %13 = vector.load %arg6[%c2, %c0_8] : memref<27x2048xf32, #tpu.memory_space<vmem>>, vector<1x2048xf32>
    %14 = vector.broadcast %13 : vector<1x2048xf32> to vector<8x2048xf32>
    %15 = arith.mulf %12, %14 : vector<8x2048xf32>
    %c16 = arith.constant 16 : index
    %c0_9 = arith.constant 0 : index
    %16 = vector.load %arg8[%c16, %c0_9] : memref<216x2048xf32, #tpu.memory_space<vmem>>, vector<8x2048xf32>
    tpu.vector_store %arg8[%c16, %c0_9], %15 {strides = array<i32>} : memref<216x2048xf32, #tpu.memory_space<vmem>>, vector<8x2048xf32>,
    %c257_i32 = arith.constant 257 : i32
    %17 = tpu.dynamic_rotate %1 by %c257_i32 dim 1 : vector<8x2048xf32>, i32 -> vector<8x2048xf32>
    %c3 = arith.constant 3 : index
    %c0_10 = arith.constant 0 : index
    %18 = vector.load %arg6[%c3, %c0_10] : memref<27x2048xf32, #tpu.memory_space<vmem>>, vector<1x2048xf32>
    %19 = vector.broadcast %18 : vector<1x2048xf32> to vector<8x2048xf32>
    %20 = arith.mulf %17, %19 : vector<8x2048xf32>
    %c24 = arith.constant 24 : index
    %c0_11 = arith.constant 0 : index
    %21 = vector.load %arg8[%c24, %c0_11] : memref<216x2048xf32, #tpu.memory_space<vmem>>, vector<8x2048xf32>
    tpu.vector_store %arg8[%c24, %c0_11], %20 {strides = array<i32>} : memref<216x2048xf32, #tpu.memory_space<vmem>>, vector<8x2048xf32>,
    %c256_i32 = arith.constant 256 : i32
    %22 = tpu.dynamic_rotate %1 by %c256_i32 dim 1 : vector<8x2048xf32>, i32 -> vector<8x2048xf32>
    %c4 = arith.constant 4 : index
    %c0_12 = arith.constant 0 : index
    %23 = vector.load %arg6[%c4, %c0_12] : memref<27x2048xf32, #tpu.memory_space<vmem>>, vector<1x2048xf32>
    %24 = vector.broadcast %23 : vector<1x2048xf32> to vector<8x2048xf32>
    %25 = arith.mulf %22, %24 : vector<8x2048xf32>
    %c32 = arith.constant 32 : index
    %c0_13 = arith.constant 0 : index
    %26 = vector.load %arg8[%c32, %c0_13] : memref<216x2048xf32, #tpu.memory_space<vmem>>, vector<8x2048xf32>
    tpu.vector_store %arg8[%c32, %c0_13], %25 {strides = array<i32>} : memref<216x2048xf32, #tpu.memory_space<vmem>>, vector<8x2048xf32>,
    %c255_i32 = arith.constant 255 : i32
    %27 = tpu.dynamic_rotate %1 by %c255_i32 dim 1 : vector<8x2048xf32>, i32 -> vector<8x2048xf32>
    %c5 = arith.constant 5 : index
    %c0_14 = arith.constant 0 : index
    %28 = vector.load %arg6[%c5, %c0_14] : memref<27x2048xf32, #tpu.memory_space<vmem>>, vector<1x2048xf32>
    %29 = vector.broadcast %28 : vector<1x2048xf32> to vector<8x2048xf32>
    %30 = arith.mulf %27, %29 : vector<8x2048xf32>
    %c40 = arith.constant 40 : index
    %c0_15 = arith.constant 0 : index
    %31 = vector.load %arg8[%c40, %c0_15] : memref<216x2048xf32, #tpu.memory_space<vmem>>, vector<8x2048xf32>
    tpu.vector_store %arg8[%c40, %c0_15], %30 {strides = array<i32>} : memref<216x2048xf32, #tpu.memory_space<vmem>>, vector<8x2048xf32>,
    %c241_i32 = arith.constant 241 : i32
    %32 = tpu.dynamic_rotate %1 by %c241_i32 dim 1 : vector<8x2048xf32>, i32 -> vector<8x2048xf32>
    %c6 = arith.constant 6 : index
    %c0_16 = arith.constant 0 : index
    %33 = vector.load %arg6[%c6, %c0_16] : memref<27x2048xf32, #tpu.memory_space<vmem>>, vector<1x2048xf32>
    %34 = vector.broadcast %33 : vector<1x2048xf32> to vector<8x2048xf32>
    %35 = arith.mulf %32, %34 : vector<8x2048xf32>
    %c48 = arith.constant 48 : index
    %c0_17 = arith.constant 0 : index
    %36 = vector.load %arg8[%c48, %c0_17] : memref<216x2048xf32, #tpu.memory_space<vmem>>, vector<8x2048xf32>
    tpu.vector_store %arg8[%c48, %c0_17], %35 {strides = array<i32>} : memref<216x2048xf32, #tpu.memory_space<vmem>>, vector<8x2048xf32>,
    %c240_i32 = arith.constant 240 : i32
    %37 = tpu.dynamic_rotate %1 by %c240_i32 dim 1 : vector<8x2048xf32>, i32 -> vector<8x2048xf32>
    %c7 = arith.constant 7 : index
    %c0_18 = arith.constant 0 : index
    %38 = vector.load %arg6[%c7, %c0_18] : memref<27x2048xf32, #tpu.memory_space<vmem>>, vector<1x2048xf32>
    %39 = vector.broadcast %38 : vector<1x2048xf32> to vector<8x2048xf32>
    %40 = arith.mulf %37, %39 : vector<8x2048xf32>
    %c56 = arith.constant 56 : index
    %c0_19 = arith.constant 0 : index
    %41 = vector.load %arg8[%c56, %c0_19] : memref<216x2048xf32, #tpu.memory_space<vmem>>, vector<8x2048xf32>
    tpu.vector_store %arg8[%c56, %c0_19], %40 {strides = array<i32>} : memref<216x2048xf32, #tpu.memory_space<vmem>>, vector<8x2048xf32>,
    %c239_i32 = arith.constant 239 : i32
    %42 = tpu.dynamic_rotate %1 by %c239_i32 dim 1 : vector<8x2048xf32>, i32 -> vector<8x2048xf32>
    %c8_20 = arith.constant 8 : index
    %c0_21 = arith.constant 0 : index
    %43 = vector.load %arg6[%c8_20, %c0_21] : memref<27x2048xf32, #tpu.memory_space<vmem>>, vector<1x2048xf32>
    %44 = vector.broadcast %43 : vector<1x2048xf32> to vector<8x2048xf32>
    %45 = arith.mulf %42, %44 : vector<8x2048xf32>
    %c64 = arith.constant 64 : index
    %c0_22 = arith.constant 0 : index
    %46 = vector.load %arg8[%c64, %c0_22] : memref<216x2048xf32, #tpu.memory_space<vmem>>, vector<8x2048xf32>
    tpu.vector_store %arg8[%c64, %c0_22], %45 {strides = array<i32>} : memref<216x2048xf32, #tpu.memory_space<vmem>>, vector<8x2048xf32>,
    %c17_i32 = arith.constant 17 : i32
    %47 = tpu.dynamic_rotate %1 by %c17_i32 dim 1 : vector<8x2048xf32>, i32 -> vector<8x2048xf32>
    %c9 = arith.constant 9 : index
    %c0_23 = arith.constant 0 : index
    %48 = vector.load %arg6[%c9, %c0_23] : memref<27x2048xf32, #tpu.memory_space<vmem>>, vector<1x2048xf32>
    %49 = vector.broadcast %48 : vector<1x2048xf32> to vector<8x2048xf32>
    %50 = arith.mulf %47, %49 : vector<8x2048xf32>
    %c72 = arith.constant 72 : index
    %c0_24 = arith.constant 0 : index
    %51 = vector.load %arg8[%c72, %c0_24] : memref<216x2048xf32, #tpu.memory_space<vmem>>, vector<8x2048xf32>
    tpu.vector_store %arg8[%c72, %c0_24], %50 {strides = array<i32>} : memref<216x2048xf32, #tpu.memory_space<vmem>>, vector<8x2048xf32>,
    %c16_i32 = arith.constant 16 : i32
    %52 = tpu.dynamic_rotate %1 by %c16_i32 dim 1 : vector<8x2048xf32>, i32 -> vector<8x2048xf32>
    %c10 = arith.constant 10 : index
    %c0_25 = arith.constant 0 : index
    %53 = vector.load %arg6[%c10, %c0_25] : memref<27x2048xf32, #tpu.memory_space<vmem>>, vector<1x2048xf32>
    %54 = vector.broadcast %53 : vector<1x2048xf32> to vector<8x2048xf32>
    %55 = arith.mulf %52, %54 : vector<8x2048xf32>
    %c80 = arith.constant 80 : index
    %c0_26 = arith.constant 0 : index
    %56 = vector.load %arg8[%c80, %c0_26] : memref<216x2048xf32, #tpu.memory_space<vmem>>, vector<8x2048xf32>
    tpu.vector_store %arg8[%c80, %c0_26], %55 {strides = array<i32>} : memref<216x2048xf32, #tpu.memory_space<vmem>>, vector<8x2048xf32>,
    %c15_i32 = arith.constant 15 : i32
    %57 = tpu.dynamic_rotate %1 by %c15_i32 dim 1 : vector<8x2048xf32>, i32 -> vector<8x2048xf32>
    %c11 = arith.constant 11 : index
    %c0_27 = arith.constant 0 : index
    %58 = vector.load %arg6[%c11, %c0_27] : memref<27x2048xf32, #tpu.memory_space<vmem>>, vector<1x2048xf32>
    %59 = vector.broadcast %58 : vector<1x2048xf32> to vector<8x2048xf32>
    %60 = arith.mulf %57, %59 : vector<8x2048xf32>
    %c88 = arith.constant 88 : index
    %c0_28 = arith.constant 0 : index
    %61 = vector.load %arg8[%c88, %c0_28] : memref<216x2048xf32, #tpu.memory_space<vmem>>, vector<8x2048xf32>
    tpu.vector_store %arg8[%c88, %c0_28], %60 {strides = array<i32>} : memref<216x2048xf32, #tpu.memory_space<vmem>>, vector<8x2048xf32>,
    %c1_i32 = arith.constant 1 : i32
    %62 = tpu.dynamic_rotate %1 by %c1_i32 dim 1 : vector<8x2048xf32>, i32 -> vector<8x2048xf32>
    %c12 = arith.constant 12 : index
    %c0_29 = arith.constant 0 : index
    %63 = vector.load %arg6[%c12, %c0_29] : memref<27x2048xf32, #tpu.memory_space<vmem>>, vector<1x2048xf32>
    %64 = vector.broadcast %63 : vector<1x2048xf32> to vector<8x2048xf32>
    %65 = arith.mulf %62, %64 : vector<8x2048xf32>
    %c96 = arith.constant 96 : index
    %c0_30 = arith.constant 0 : index
    %66 = vector.load %arg8[%c96, %c0_30] : memref<216x2048xf32, #tpu.memory_space<vmem>>, vector<8x2048xf32>
    tpu.vector_store %arg8[%c96, %c0_30], %65 {strides = array<i32>} : memref<216x2048xf32, #tpu.memory_space<vmem>>, vector<8x2048xf32>,
    %c104 = arith.constant 104 : index
    %c0_31 = arith.constant 0 : index
    %67 = vector.load %arg8[%c104, %c0_31] : memref<216x2048xf32, #tpu.memory_space<vmem>>, vector<8x2048xf32>
    tpu.vector_store %arg8[%c104, %c0_31], %1 {strides = array<i32>} : memref<216x2048xf32, #tpu.memory_space<vmem>>, vector<8x2048xf32>,
    %c2047_i32 = arith.constant 2047 : i32
    %68 = tpu.dynamic_rotate %1 by %c2047_i32 dim 1 : vector<8x2048xf32>, i32 -> vector<8x2048xf32>
    %c14 = arith.constant 14 : index
    %c0_32 = arith.constant 0 : index
    %69 = vector.load %arg6[%c14, %c0_32] : memref<27x2048xf32, #tpu.memory_space<vmem>>, vector<1x2048xf32>
    %70 = vector.broadcast %69 : vector<1x2048xf32> to vector<8x2048xf32>
    %71 = arith.mulf %68, %70 : vector<8x2048xf32>
    %c112 = arith.constant 112 : index
    %c0_33 = arith.constant 0 : index
    %72 = vector.load %arg8[%c112, %c0_33] : memref<216x2048xf32, #tpu.memory_space<vmem>>, vector<8x2048xf32>
    tpu.vector_store %arg8[%c112, %c0_33], %71 {strides = array<i32>} : memref<216x2048xf32, #tpu.memory_space<vmem>>, vector<8x2048xf32>,
    %c2033_i32 = arith.constant 2033 : i32
    %73 = tpu.dynamic_rotate %1 by %c2033_i32 dim 1 : vector<8x2048xf32>, i32 -> vector<8x2048xf32>
    %c15 = arith.constant 15 : index
    %c0_34 = arith.constant 0 : index
    %74 = vector.load %arg6[%c15, %c0_34] : memref<27x2048xf32, #tpu.memory_space<vmem>>, vector<1x2048xf32>
    %75 = vector.broadcast %74 : vector<1x2048xf32> to vector<8x2048xf32>
    %76 = arith.mulf %73, %75 : vector<8x2048xf32>
    %c120 = arith.constant 120 : index
    %c0_35 = arith.constant 0 : index
    %77 = vector.load %arg8[%c120, %c0_35] : memref<216x2048xf32, #tpu.memory_space<vmem>>, vector<8x2048xf32>
    tpu.vector_store %arg8[%c120, %c0_35], %76 {strides = array<i32>} : memref<216x2048xf32, #tpu.memory_space<vmem>>, vector<8x2048xf32>,
    %c2032_i32 = arith.constant 2032 : i32
    %78 = tpu.dynamic_rotate %1 by %c2032_i32 dim 1 : vector<8x2048xf32>, i32 -> vector<8x2048xf32>
    %c16_36 = arith.constant 16 : index
    %c0_37 = arith.constant 0 : index
    %79 = vector.load %arg6[%c16_36, %c0_37] : memref<27x2048xf32, #tpu.memory_space<vmem>>, vector<1x2048xf32>
    %80 = vector.broadcast %79 : vector<1x2048xf32> to vector<8x2048xf32>
    %81 = arith.mulf %78, %80 : vector<8x2048xf32>
    %c128 = arith.constant 128 : index
    %c0_38 = arith.constant 0 : index
    %82 = vector.load %arg8[%c128, %c0_38] : memref<216x2048xf32, #tpu.memory_space<vmem>>, vector<8x2048xf32>
    tpu.vector_store %arg8[%c128, %c0_38], %81 {strides = array<i32>} : memref<216x2048xf32, #tpu.memory_space<vmem>>, vector<8x2048xf32>,
    %c2031_i32 = arith.constant 2031 : i32
    %83 = tpu.dynamic_rotate %1 by %c2031_i32 dim 1 : vector<8x2048xf32>, i32 -> vector<8x2048xf32>
    %c17 = arith.constant 17 : index
    %c0_39 = arith.constant 0 : index
    %84 = vector.load %arg6[%c17, %c0_39] : memref<27x2048xf32, #tpu.memory_space<vmem>>, vector<1x2048xf32>
    %85 = vector.broadcast %84 : vector<1x2048xf32> to vector<8x2048xf32>
    %86 = arith.mulf %83, %85 : vector<8x2048xf32>
    %c136 = arith.constant 136 : index
    %c0_40 = arith.constant 0 : index
    %87 = vector.load %arg8[%c136, %c0_40] : memref<216x2048xf32, #tpu.memory_space<vmem>>, vector<8x2048xf32>
    tpu.vector_store %arg8[%c136, %c0_40], %86 {strides = array<i32>} : memref<216x2048xf32, #tpu.memory_space<vmem>>, vector<8x2048xf32>,
    %c1809_i32 = arith.constant 1809 : i32
    %88 = tpu.dynamic_rotate %1 by %c1809_i32 dim 1 : vector<8x2048xf32>, i32 -> vector<8x2048xf32>
    %c18 = arith.constant 18 : index
    %c0_41 = arith.constant 0 : index
    %89 = vector.load %arg6[%c18, %c0_41] : memref<27x2048xf32, #tpu.memory_space<vmem>>, vector<1x2048xf32>
    %90 = vector.broadcast %89 : vector<1x2048xf32> to vector<8x2048xf32>
    %91 = arith.mulf %88, %90 : vector<8x2048xf32>
    %c144 = arith.constant 144 : index
    %c0_42 = arith.constant 0 : index
    %92 = vector.load %arg8[%c144, %c0_42] : memref<216x2048xf32, #tpu.memory_space<vmem>>, vector<8x2048xf32>
    tpu.vector_store %arg8[%c144, %c0_42], %91 {strides = array<i32>} : memref<216x2048xf32, #tpu.memory_space<vmem>>, vector<8x2048xf32>,
    %c1808_i32 = arith.constant 1808 : i32
    %93 = tpu.dynamic_rotate %1 by %c1808_i32 dim 1 : vector<8x2048xf32>, i32 -> vector<8x2048xf32>
    %c19 = arith.constant 19 : index
    %c0_43 = arith.constant 0 : index
    %94 = vector.load %arg6[%c19, %c0_43] : memref<27x2048xf32, #tpu.memory_space<vmem>>, vector<1x2048xf32>
    %95 = vector.broadcast %94 : vector<1x2048xf32> to vector<8x2048xf32>
    %96 = arith.mulf %93, %95 : vector<8x2048xf32>
    %c152 = arith.constant 152 : index
    %c0_44 = arith.constant 0 : index
    %97 = vector.load %arg8[%c152, %c0_44] : memref<216x2048xf32, #tpu.memory_space<vmem>>, vector<8x2048xf32>
    tpu.vector_store %arg8[%c152, %c0_44], %96 {strides = array<i32>} : memref<216x2048xf32, #tpu.memory_space<vmem>>, vector<8x2048xf32>,
    %c1807_i32 = arith.constant 1807 : i32
    %98 = tpu.dynamic_rotate %1 by %c1807_i32 dim 1 : vector<8x2048xf32>, i32 -> vector<8x2048xf32>
    %c20 = arith.constant 20 : index
    %c0_45 = arith.constant 0 : index
    %99 = vector.load %arg6[%c20, %c0_45] : memref<27x2048xf32, #tpu.memory_space<vmem>>, vector<1x2048xf32>
    %100 = vector.broadcast %99 : vector<1x2048xf32> to vector<8x2048xf32>
    %101 = arith.mulf %98, %100 : vector<8x2048xf32>
    %c160 = arith.constant 160 : index
    %c0_46 = arith.constant 0 : index
    %102 = vector.load %arg8[%c160, %c0_46] : memref<216x2048xf32, #tpu.memory_space<vmem>>, vector<8x2048xf32>
    tpu.vector_store %arg8[%c160, %c0_46], %101 {strides = array<i32>} : memref<216x2048xf32, #tpu.memory_space<vmem>>, vector<8x2048xf32>,
    %c1793_i32 = arith.constant 1793 : i32
    %103 = tpu.dynamic_rotate %1 by %c1793_i32 dim 1 : vector<8x2048xf32>, i32 -> vector<8x2048xf32>
    %c21 = arith.constant 21 : index
    %c0_47 = arith.constant 0 : index
    %104 = vector.load %arg6[%c21, %c0_47] : memref<27x2048xf32, #tpu.memory_space<vmem>>, vector<1x2048xf32>
    %105 = vector.broadcast %104 : vector<1x2048xf32> to vector<8x2048xf32>
    %106 = arith.mulf %103, %105 : vector<8x2048xf32>
    %c168 = arith.constant 168 : index
    %c0_48 = arith.constant 0 : index
    %107 = vector.load %arg8[%c168, %c0_48] : memref<216x2048xf32, #tpu.memory_space<vmem>>, vector<8x2048xf32>
    tpu.vector_store %arg8[%c168, %c0_48], %106 {strides = array<i32>} : memref<216x2048xf32, #tpu.memory_space<vmem>>, vector<8x2048xf32>,
    %c1792_i32 = arith.constant 1792 : i32
    %108 = tpu.dynamic_rotate %1 by %c1792_i32 dim 1 : vector<8x2048xf32>, i32 -> vector<8x2048xf32>
    %c22 = arith.constant 22 : index
    %c0_49 = arith.constant 0 : index
    %109 = vector.load %arg6[%c22, %c0_49] : memref<27x2048xf32, #tpu.memory_space<vmem>>, vector<1x2048xf32>
    %110 = vector.broadcast %109 : vector<1x2048xf32> to vector<8x2048xf32>
    %111 = arith.mulf %108, %110 : vector<8x2048xf32>
    %c176 = arith.constant 176 : index
    %c0_50 = arith.constant 0 : index
    %112 = vector.load %arg8[%c176, %c0_50] : memref<216x2048xf32, #tpu.memory_space<vmem>>, vector<8x2048xf32>
    tpu.vector_store %arg8[%c176, %c0_50], %111 {strides = array<i32>} : memref<216x2048xf32, #tpu.memory_space<vmem>>, vector<8x2048xf32>,
    %c1791_i32 = arith.constant 1791 : i32
    %113 = tpu.dynamic_rotate %1 by %c1791_i32 dim 1 : vector<8x2048xf32>, i32 -> vector<8x2048xf32>
    %c23 = arith.constant 23 : index
    %c0_51 = arith.constant 0 : index
    %114 = vector.load %arg6[%c23, %c0_51] : memref<27x2048xf32, #tpu.memory_space<vmem>>, vector<1x2048xf32>
    %115 = vector.broadcast %114 : vector<1x2048xf32> to vector<8x2048xf32>
    %116 = arith.mulf %113, %115 : vector<8x2048xf32>
    %c184 = arith.constant 184 : index
    %c0_52 = arith.constant 0 : index
    %117 = vector.load %arg8[%c184, %c0_52] : memref<216x2048xf32, #tpu.memory_space<vmem>>, vector<8x2048xf32>
    tpu.vector_store %arg8[%c184, %c0_52], %116 {strides = array<i32>} : memref<216x2048xf32, #tpu.memory_space<vmem>>, vector<8x2048xf32>,
    %c1777_i32 = arith.constant 1777 : i32
    %118 = tpu.dynamic_rotate %1 by %c1777_i32 dim 1 : vector<8x2048xf32>, i32 -> vector<8x2048xf32>
    %c24_53 = arith.constant 24 : index
    %c0_54 = arith.constant 0 : index
    %119 = vector.load %arg6[%c24_53, %c0_54] : memref<27x2048xf32, #tpu.memory_space<vmem>>, vector<1x2048xf32>
    %120 = vector.broadcast %119 : vector<1x2048xf32> to vector<8x2048xf32>
    %121 = arith.mulf %118, %120 : vector<8x2048xf32>
    %c192 = arith.constant 192 : index
    %c0_55 = arith.constant 0 : index
    %122 = vector.load %arg8[%c192, %c0_55] : memref<216x2048xf32, #tpu.memory_space<vmem>>, vector<8x2048xf32>
    tpu.vector_store %arg8[%c192, %c0_55], %121 {strides = array<i32>} : memref<216x2048xf32, #tpu.memory_space<vmem>>, vector<8x2048xf32>,
    %c1776_i32 = arith.constant 1776 : i32
    %123 = tpu.dynamic_rotate %1 by %c1776_i32 dim 1 : vector<8x2048xf32>, i32 -> vector<8x2048xf32>
    %c25 = arith.constant 25 : index
    %c0_56 = arith.constant 0 : index
    %124 = vector.load %arg6[%c25, %c0_56] : memref<27x2048xf32, #tpu.memory_space<vmem>>, vector<1x2048xf32>
    %125 = vector.broadcast %124 : vector<1x2048xf32> to vector<8x2048xf32>
    %126 = arith.mulf %123, %125 : vector<8x2048xf32>
    %c200 = arith.constant 200 : index
    %c0_57 = arith.constant 0 : index
    %127 = vector.load %arg8[%c200, %c0_57] : memref<216x2048xf32, #tpu.memory_space<vmem>>, vector<8x2048xf32>
    tpu.vector_store %arg8[%c200, %c0_57], %126 {strides = array<i32>} : memref<216x2048xf32, #tpu.memory_space<vmem>>, vector<8x2048xf32>,
    %c1775_i32 = arith.constant 1775 : i32
    %128 = tpu.dynamic_rotate %1 by %c1775_i32 dim 1 : vector<8x2048xf32>, i32 -> vector<8x2048xf32>
    %c26 = arith.constant 26 : index
    %c0_58 = arith.constant 0 : index
    %129 = vector.load %arg6[%c26, %c0_58] : memref<27x2048xf32, #tpu.memory_space<vmem>>, vector<1x2048xf32>
    %130 = vector.broadcast %129 : vector<1x2048xf32> to vector<8x2048xf32>
    %131 = arith.mulf %128, %130 : vector<8x2048xf32>
    %c208 = arith.constant 208 : index
    %c0_59 = arith.constant 0 : index
    %132 = vector.load %arg8[%c208, %c0_59] : memref<216x2048xf32, #tpu.memory_space<vmem>>, vector<8x2048xf32>
    tpu.vector_store %arg8[%c208, %c0_59], %131 {strides = array<i32>} : memref<216x2048xf32, #tpu.memory_space<vmem>>, vector<8x2048xf32>,
    %c0_60 = arith.constant 0 : index
    %c0_61 = arith.constant 0 : index
    %133 = vector.load %arg2[%c0_60, %c0_61] : memref<8x216xf32, #tpu.memory_space<vmem>>, vector<8x216xf32>
    %c0_62 = arith.constant 0 : index
    %c0_63 = arith.constant 0 : index
    %134 = vector.load %arg8[%c0_62, %c0_63] : memref<216x2048xf32, #tpu.memory_space<vmem>>, vector<216x2048xf32>
    %cst = arith.constant dense<0.000000e+00> : vector<8x2048xf32>
    %135 = tpu.matmul %133, %134, %cst {dimension_numbers = #tpu.dot_dimension_numbers<[1], [0], [0], [1], [0, 0, 1, 1], [], []>} : vector<8x216xf32>, vector<216x2048xf32>, vector<8x2048xf32> -> vector<8x2048xf32>
    %c0_64 = arith.constant 0 : index
    %c0_65 = arith.constant 0 : index
    %136 = vector.load %arg3[%c0_64, %c0_65] : memref<8x1xf32, #tpu.memory_space<vmem>>, vector<8x1xf32>
    %137 = vector.broadcast %136 : vector<8x1xf32> to vector<8x2048xf32>
    %138 = arith.addf %135, %137 : vector<8x2048xf32>
    %cst_66 = arith.constant 0.000000e+00 : f32
    %139 = vector.broadcast %cst_66 : f32 to vector<8x2048xf32>
    %140 = arith.maximumf %138, %139 : vector<8x2048xf32>
    %c273_i32_67 = arith.constant 273 : i32
    %141 = tpu.dynamic_rotate %140 by %c273_i32_67 dim 1 : vector<8x2048xf32>, i32 -> vector<8x2048xf32>
    %c0_68 = arith.constant 0 : index
    %c0_69 = arith.constant 0 : index
    %142 = vector.load %arg6[%c0_68, %c0_69] : memref<27x2048xf32, #tpu.memory_space<vmem>>, vector<1x2048xf32>
    %143 = vector.broadcast %142 : vector<1x2048xf32> to vector<8x2048xf32>
    %144 = arith.mulf %141, %143 : vector<8x2048xf32>
    %c0_70 = arith.constant 0 : index
    %c0_71 = arith.constant 0 : index
    %145 = vector.load %arg8[%c0_70, %c0_71] : memref<216x2048xf32, #tpu.memory_space<vmem>>, vector<8x2048xf32>
    tpu.vector_store %arg8[%c0_70, %c0_71], %144 {strides = array<i32>} : memref<216x2048xf32, #tpu.memory_space<vmem>>, vector<8x2048xf32>,
    %c272_i32_72 = arith.constant 272 : i32
    %146 = tpu.dynamic_rotate %140 by %c272_i32_72 dim 1 : vector<8x2048xf32>, i32 -> vector<8x2048xf32>
    %c1_73 = arith.constant 1 : index
    %c0_74 = arith.constant 0 : index
    %147 = vector.load %arg6[%c1_73, %c0_74] : memref<27x2048xf32, #tpu.memory_space<vmem>>, vector<1x2048xf32>
    %148 = vector.broadcast %147 : vector<1x2048xf32> to vector<8x2048xf32>
    %149 = arith.mulf %146, %148 : vector<8x2048xf32>
    %c8_75 = arith.constant 8 : index
    %c0_76 = arith.constant 0 : index
    %150 = vector.load %arg8[%c8_75, %c0_76] : memref<216x2048xf32, #tpu.memory_space<vmem>>, vector<8x2048xf32>
    tpu.vector_store %arg8[%c8_75, %c0_76], %149 {strides = array<i32>} : memref<216x2048xf32, #tpu.memory_space<vmem>>, vector<8x2048xf32>,
    %c271_i32_77 = arith.constant 271 : i32
    %151 = tpu.dynamic_rotate %140 by %c271_i32_77 dim 1 : vector<8x2048xf32>, i32 -> vector<8x2048xf32>
    %c2_78 = arith.constant 2 : index
    %c0_79 = arith.constant 0 : index
    %152 = vector.load %arg6[%c2_78, %c0_79] : memref<27x2048xf32, #tpu.memory_space<vmem>>, vector<1x2048xf32>
    %153 = vector.broadcast %152 : vector<1x2048xf32> to vector<8x2048xf32>
    %154 = arith.mulf %151, %153 : vector<8x2048xf32>
    %c16_80 = arith.constant 16 : index
    %c0_81 = arith.constant 0 : index
    %155 = vector.load %arg8[%c16_80, %c0_81] : memref<216x2048xf32, #tpu.memory_space<vmem>>, vector<8x2048xf32>
    tpu.vector_store %arg8[%c16_80, %c0_81], %154 {strides = array<i32>} : memref<216x2048xf32, #tpu.memory_space<vmem>>, vector<8x2048xf32>,
    %c257_i32_82 = arith.constant 257 : i32
    %156 = tpu.dynamic_rotate %140 by %c257_i32_82 dim 1 : vector<8x2048xf32>, i32 -> vector<8x2048xf32>
    %c3_83 = arith.constant 3 : index
    %c0_84 = arith.constant 0 : index
    %157 = vector.load %arg6[%c3_83, %c0_84] : memref<27x2048xf32, #tpu.memory_space<vmem>>, vector<1x2048xf32>
    %158 = vector.broadcast %157 : vector<1x2048xf32> to vector<8x2048xf32>
    %159 = arith.mulf %156, %158 : vector<8x2048xf32>
    %c24_85 = arith.constant 24 : index
    %c0_86 = arith.constant 0 : index
    %160 = vector.load %arg8[%c24_85, %c0_86] : memref<216x2048xf32, #tpu.memory_space<vmem>>, vector<8x2048xf32>
    tpu.vector_store %arg8[%c24_85, %c0_86], %159 {strides = array<i32>} : memref<216x2048xf32, #tpu.memory_space<vmem>>, vector<8x2048xf32>,
    %c256_i32_87 = arith.constant 256 : i32
    %161 = tpu.dynamic_rotate %140 by %c256_i32_87 dim 1 : vector<8x2048xf32>, i32 -> vector<8x2048xf32>
    %c4_88 = arith.constant 4 : index
    %c0_89 = arith.constant 0 : index
    %162 = vector.load %arg6[%c4_88, %c0_89] : memref<27x2048xf32, #tpu.memory_space<vmem>>, vector<1x2048xf32>
    %163 = vector.broadcast %162 : vector<1x2048xf32> to vector<8x2048xf32>
    %164 = arith.mulf %161, %163 : vector<8x2048xf32>
    %c32_90 = arith.constant 32 : index
    %c0_91 = arith.constant 0 : index
    %165 = vector.load %arg8[%c32_90, %c0_91] : memref<216x2048xf32, #tpu.memory_space<vmem>>, vector<8x2048xf32>
    tpu.vector_store %arg8[%c32_90, %c0_91], %164 {strides = array<i32>} : memref<216x2048xf32, #tpu.memory_space<vmem>>, vector<8x2048xf32>,
    %c255_i32_92 = arith.constant 255 : i32
    %166 = tpu.dynamic_rotate %140 by %c255_i32_92 dim 1 : vector<8x2048xf32>, i32 -> vector<8x2048xf32>
    %c5_93 = arith.constant 5 : index
    %c0_94 = arith.constant 0 : index
    %167 = vector.load %arg6[%c5_93, %c0_94] : memref<27x2048xf32, #tpu.memory_space<vmem>>, vector<1x2048xf32>
    %168 = vector.broadcast %167 : vector<1x2048xf32> to vector<8x2048xf32>
    %169 = arith.mulf %166, %168 : vector<8x2048xf32>
    %c40_95 = arith.constant 40 : index
    %c0_96 = arith.constant 0 : index
    %170 = vector.load %arg8[%c40_95, %c0_96] : memref<216x2048xf32, #tpu.memory_space<vmem>>, vector<8x2048xf32>
    tpu.vector_store %arg8[%c40_95, %c0_96], %169 {strides = array<i32>} : memref<216x2048xf32, #tpu.memory_space<vmem>>, vector<8x2048xf32>,
    %c241_i32_97 = arith.constant 241 : i32
    %171 = tpu.dynamic_rotate %140 by %c241_i32_97 dim 1 : vector<8x2048xf32>, i32 -> vector<8x2048xf32>
    %c6_98 = arith.constant 6 : index
    %c0_99 = arith.constant 0 : index
    %172 = vector.load %arg6[%c6_98, %c0_99] : memref<27x2048xf32, #tpu.memory_space<vmem>>, vector<1x2048xf32>
    %173 = vector.broadcast %172 : vector<1x2048xf32> to vector<8x2048xf32>
    %174 = arith.mulf %171, %173 : vector<8x2048xf32>
    %c48_100 = arith.constant 48 : index
    %c0_101 = arith.constant 0 : index
    %175 = vector.load %arg8[%c48_100, %c0_101] : memref<216x2048xf32, #tpu.memory_space<vmem>>, vector<8x2048xf32>
    tpu.vector_store %arg8[%c48_100, %c0_101], %174 {strides = array<i32>} : memref<216x2048xf32, #tpu.memory_space<vmem>>, vector<8x2048xf32>,
    %c240_i32_102 = arith.constant 240 : i32
    %176 = tpu.dynamic_rotate %140 by %c240_i32_102 dim 1 : vector<8x2048xf32>, i32 -> vector<8x2048xf32>
    %c7_103 = arith.constant 7 : index
    %c0_104 = arith.constant 0 : index
    %177 = vector.load %arg6[%c7_103, %c0_104] : memref<27x2048xf32, #tpu.memory_space<vmem>>, vector<1x2048xf32>
    %178 = vector.broadcast %177 : vector<1x2048xf32> to vector<8x2048xf32>
    %179 = arith.mulf %176, %178 : vector<8x2048xf32>
    %c56_105 = arith.constant 56 : index
    %c0_106 = arith.constant 0 : index
    %180 = vector.load %arg8[%c56_105, %c0_106] : memref<216x2048xf32, #tpu.memory_space<vmem>>, vector<8x2048xf32>
    tpu.vector_store %arg8[%c56_105, %c0_106], %179 {strides = array<i32>} : memref<216x2048xf32, #tpu.memory_space<vmem>>, vector<8x2048xf32>,
    %c239_i32_107 = arith.constant 239 : i32
    %181 = tpu.dynamic_rotate %140 by %c239_i32_107 dim 1 : vector<8x2048xf32>, i32 -> vector<8x2048xf32>
    %c8_108 = arith.constant 8 : index
    %c0_109 = arith.constant 0 : index
    %182 = vector.load %arg6[%c8_108, %c0_109] : memref<27x2048xf32, #tpu.memory_space<vmem>>, vector<1x2048xf32>
    %183 = vector.broadcast %182 : vector<1x2048xf32> to vector<8x2048xf32>
    %184 = arith.mulf %181, %183 : vector<8x2048xf32>
    %c64_110 = arith.constant 64 : index
    %c0_111 = arith.constant 0 : index
    %185 = vector.load %arg8[%c64_110, %c0_111] : memref<216x2048xf32, #tpu.memory_space<vmem>>, vector<8x2048xf32>
    tpu.vector_store %arg8[%c64_110, %c0_111], %184 {strides = array<i32>} : memref<216x2048xf32, #tpu.memory_space<vmem>>, vector<8x2048xf32>,
    %c17_i32_112 = arith.constant 17 : i32
    %186 = tpu.dynamic_rotate %140 by %c17_i32_112 dim 1 : vector<8x2048xf32>, i32 -> vector<8x2048xf32>
    %c9_113 = arith.constant 9 : index
    %c0_114 = arith.constant 0 : index
    %187 = vector.load %arg6[%c9_113, %c0_114] : memref<27x2048xf32, #tpu.memory_space<vmem>>, vector<1x2048xf32>
    %188 = vector.broadcast %187 : vector<1x2048xf32> to vector<8x2048xf32>
    %189 = arith.mulf %186, %188 : vector<8x2048xf32>
    %c72_115 = arith.constant 72 : index
    %c0_116 = arith.constant 0 : index
    %190 = vector.load %arg8[%c72_115, %c0_116] : memref<216x2048xf32, #tpu.memory_space<vmem>>, vector<8x2048xf32>
    tpu.vector_store %arg8[%c72_115, %c0_116], %189 {strides = array<i32>} : memref<216x2048xf32, #tpu.memory_space<vmem>>, vector<8x2048xf32>,
    %c16_i32_117 = arith.constant 16 : i32
    %191 = tpu.dynamic_rotate %140 by %c16_i32_117 dim 1 : vector<8x2048xf32>, i32 -> vector<8x2048xf32>
    %c10_118 = arith.constant 10 : index
    %c0_119 = arith.constant 0 : index
    %192 = vector.load %arg6[%c10_118, %c0_119] : memref<27x2048xf32, #tpu.memory_space<vmem>>, vector<1x2048xf32>
    %193 = vector.broadcast %192 : vector<1x2048xf32> to vector<8x2048xf32>
    %194 = arith.mulf %191, %193 : vector<8x2048xf32>
    %c80_120 = arith.constant 80 : index
    %c0_121 = arith.constant 0 : index
    %195 = vector.load %arg8[%c80_120, %c0_121] : memref<216x2048xf32, #tpu.memory_space<vmem>>, vector<8x2048xf32>
    tpu.vector_store %arg8[%c80_120, %c0_121], %194 {strides = array<i32>} : memref<216x2048xf32, #tpu.memory_space<vmem>>, vector<8x2048xf32>,
    %c15_i32_122 = arith.constant 15 : i32
    %196 = tpu.dynamic_rotate %140 by %c15_i32_122 dim 1 : vector<8x2048xf32>, i32 -> vector<8x2048xf32>
    %c11_123 = arith.constant 11 : index
    %c0_124 = arith.constant 0 : index
    %197 = vector.load %arg6[%c11_123, %c0_124] : memref<27x2048xf32, #tpu.memory_space<vmem>>, vector<1x2048xf32>
    %198 = vector.broadcast %197 : vector<1x2048xf32> to vector<8x2048xf32>
    %199 = arith.mulf %196, %198 : vector<8x2048xf32>
    %c88_125 = arith.constant 88 : index
    %c0_126 = arith.constant 0 : index
    %200 = vector.load %arg8[%c88_125, %c0_126] : memref<216x2048xf32, #tpu.memory_space<vmem>>, vector<8x2048xf32>
    tpu.vector_store %arg8[%c88_125, %c0_126], %199 {strides = array<i32>} : memref<216x2048xf32, #tpu.memory_space<vmem>>, vector<8x2048xf32>,
    %c1_i32_127 = arith.constant 1 : i32
    %201 = tpu.dynamic_rotate %140 by %c1_i32_127 dim 1 : vector<8x2048xf32>, i32 -> vector<8x2048xf32>
    %c12_128 = arith.constant 12 : index
    %c0_129 = arith.constant 0 : index
    %202 = vector.load %arg6[%c12_128, %c0_129] : memref<27x2048xf32, #tpu.memory_space<vmem>>, vector<1x2048xf32>
    %203 = vector.broadcast %202 : vector<1x2048xf32> to vector<8x2048xf32>
    %204 = arith.mulf %201, %203 : vector<8x2048xf32>
    %c96_130 = arith.constant 96 : index
    %c0_131 = arith.constant 0 : index
    %205 = vector.load %arg8[%c96_130, %c0_131] : memref<216x2048xf32, #tpu.memory_space<vmem>>, vector<8x2048xf32>
    tpu.vector_store %arg8[%c96_130, %c0_131], %204 {strides = array<i32>} : memref<216x2048xf32, #tpu.memory_space<vmem>>, vector<8x2048xf32>,
    %c104_132 = arith.constant 104 : index
    %c0_133 = arith.constant 0 : index
    %206 = vector.load %arg8[%c104_132, %c0_133] : memref<216x2048xf32, #tpu.memory_space<vmem>>, vector<8x2048xf32>
    tpu.vector_store %arg8[%c104_132, %c0_133], %140 {strides = array<i32>} : memref<216x2048xf32, #tpu.memory_space<vmem>>, vector<8x2048xf32>,
    %c2047_i32_134 = arith.constant 2047 : i32
    %207 = tpu.dynamic_rotate %140 by %c2047_i32_134 dim 1 : vector<8x2048xf32>, i32 -> vector<8x2048xf32>
    %c14_135 = arith.constant 14 : index
    %c0_136 = arith.constant 0 : index
    %208 = vector.load %arg6[%c14_135, %c0_136] : memref<27x2048xf32, #tpu.memory_space<vmem>>, vector<1x2048xf32>
    %209 = vector.broadcast %208 : vector<1x2048xf32> to vector<8x2048xf32>
    %210 = arith.mulf %207, %209 : vector<8x2048xf32>
    %c112_137 = arith.constant 112 : index
    %c0_138 = arith.constant 0 : index
    %211 = vector.load %arg8[%c112_137, %c0_138] : memref<216x2048xf32, #tpu.memory_space<vmem>>, vector<8x2048xf32>
    tpu.vector_store %arg8[%c112_137, %c0_138], %210 {strides = array<i32>} : memref<216x2048xf32, #tpu.memory_space<vmem>>, vector<8x2048xf32>,
    %c2033_i32_139 = arith.constant 2033 : i32
    %212 = tpu.dynamic_rotate %140 by %c2033_i32_139 dim 1 : vector<8x2048xf32>, i32 -> vector<8x2048xf32>
    %c15_140 = arith.constant 15 : index
    %c0_141 = arith.constant 0 : index
    %213 = vector.load %arg6[%c15_140, %c0_141] : memref<27x2048xf32, #tpu.memory_space<vmem>>, vector<1x2048xf32>
    %214 = vector.broadcast %213 : vector<1x2048xf32> to vector<8x2048xf32>
    %215 = arith.mulf %212, %214 : vector<8x2048xf32>
    %c120_142 = arith.constant 120 : index
    %c0_143 = arith.constant 0 : index
    %216 = vector.load %arg8[%c120_142, %c0_143] : memref<216x2048xf32, #tpu.memory_space<vmem>>, vector<8x2048xf32>
    tpu.vector_store %arg8[%c120_142, %c0_143], %215 {strides = array<i32>} : memref<216x2048xf32, #tpu.memory_space<vmem>>, vector<8x2048xf32>,
    %c2032_i32_144 = arith.constant 2032 : i32
    %217 = tpu.dynamic_rotate %140 by %c2032_i32_144 dim 1 : vector<8x2048xf32>, i32 -> vector<8x2048xf32>
    %c16_145 = arith.constant 16 : index
    %c0_146 = arith.constant 0 : index
    %218 = vector.load %arg6[%c16_145, %c0_146] : memref<27x2048xf32, #tpu.memory_space<vmem>>, vector<1x2048xf32>
    %219 = vector.broadcast %218 : vector<1x2048xf32> to vector<8x2048xf32>
    %220 = arith.mulf %217, %219 : vector<8x2048xf32>
    %c128_147 = arith.constant 128 : index
    %c0_148 = arith.constant 0 : index
    %221 = vector.load %arg8[%c128_147, %c0_148] : memref<216x2048xf32, #tpu.memory_space<vmem>>, vector<8x2048xf32>
    tpu.vector_store %arg8[%c128_147, %c0_148], %220 {strides = array<i32>} : memref<216x2048xf32, #tpu.memory_space<vmem>>, vector<8x2048xf32>,
    %c2031_i32_149 = arith.constant 2031 : i32
    %222 = tpu.dynamic_rotate %140 by %c2031_i32_149 dim 1 : vector<8x2048xf32>, i32 -> vector<8x2048xf32>
    %c17_150 = arith.constant 17 : index
    %c0_151 = arith.constant 0 : index
    %223 = vector.load %arg6[%c17_150, %c0_151] : memref<27x2048xf32, #tpu.memory_space<vmem>>, vector<1x2048xf32>
    %224 = vector.broadcast %223 : vector<1x2048xf32> to vector<8x2048xf32>
    %225 = arith.mulf %222, %224 : vector<8x2048xf32>
    %c136_152 = arith.constant 136 : index
    %c0_153 = arith.constant 0 : index
    %226 = vector.load %arg8[%c136_152, %c0_153] : memref<216x2048xf32, #tpu.memory_space<vmem>>, vector<8x2048xf32>
    tpu.vector_store %arg8[%c136_152, %c0_153], %225 {strides = array<i32>} : memref<216x2048xf32, #tpu.memory_space<vmem>>, vector<8x2048xf32>,
    %c1809_i32_154 = arith.constant 1809 : i32
    %227 = tpu.dynamic_rotate %140 by %c1809_i32_154 dim 1 : vector<8x2048xf32>, i32 -> vector<8x2048xf32>
    %c18_155 = arith.constant 18 : index
    %c0_156 = arith.constant 0 : index
    %228 = vector.load %arg6[%c18_155, %c0_156] : memref<27x2048xf32, #tpu.memory_space<vmem>>, vector<1x2048xf32>
    %229 = vector.broadcast %228 : vector<1x2048xf32> to vector<8x2048xf32>
    %230 = arith.mulf %227, %229 : vector<8x2048xf32>
    %c144_157 = arith.constant 144 : index
    %c0_158 = arith.constant 0 : index
    %231 = vector.load %arg8[%c144_157, %c0_158] : memref<216x2048xf32, #tpu.memory_space<vmem>>, vector<8x2048xf32>
    tpu.vector_store %arg8[%c144_157, %c0_158], %230 {strides = array<i32>} : memref<216x2048xf32, #tpu.memory_space<vmem>>, vector<8x2048xf32>,
    %c1808_i32_159 = arith.constant 1808 : i32
    %232 = tpu.dynamic_rotate %140 by %c1808_i32_159 dim 1 : vector<8x2048xf32>, i32 -> vector<8x2048xf32>
    %c19_160 = arith.constant 19 : index
    %c0_161 = arith.constant 0 : index
    %233 = vector.load %arg6[%c19_160, %c0_161] : memref<27x2048xf32, #tpu.memory_space<vmem>>, vector<1x2048xf32>
    %234 = vector.broadcast %233 : vector<1x2048xf32> to vector<8x2048xf32>
    %235 = arith.mulf %232, %234 : vector<8x2048xf32>
    %c152_162 = arith.constant 152 : index
    %c0_163 = arith.constant 0 : index
    %236 = vector.load %arg8[%c152_162, %c0_163] : memref<216x2048xf32, #tpu.memory_space<vmem>>, vector<8x2048xf32>
    tpu.vector_store %arg8[%c152_162, %c0_163], %235 {strides = array<i32>} : memref<216x2048xf32, #tpu.memory_space<vmem>>, vector<8x2048xf32>,
    %c1807_i32_164 = arith.constant 1807 : i32
    %237 = tpu.dynamic_rotate %140 by %c1807_i32_164 dim 1 : vector<8x2048xf32>, i32 -> vector<8x2048xf32>
    %c20_165 = arith.constant 20 : index
    %c0_166 = arith.constant 0 : index
    %238 = vector.load %arg6[%c20_165, %c0_166] : memref<27x2048xf32, #tpu.memory_space<vmem>>, vector<1x2048xf32>
    %239 = vector.broadcast %238 : vector<1x2048xf32> to vector<8x2048xf32>
    %240 = arith.mulf %237, %239 : vector<8x2048xf32>
    %c160_167 = arith.constant 160 : index
    %c0_168 = arith.constant 0 : index
    %241 = vector.load %arg8[%c160_167, %c0_168] : memref<216x2048xf32, #tpu.memory_space<vmem>>, vector<8x2048xf32>
    tpu.vector_store %arg8[%c160_167, %c0_168], %240 {strides = array<i32>} : memref<216x2048xf32, #tpu.memory_space<vmem>>, vector<8x2048xf32>,
    %c1793_i32_169 = arith.constant 1793 : i32
    %242 = tpu.dynamic_rotate %140 by %c1793_i32_169 dim 1 : vector<8x2048xf32>, i32 -> vector<8x2048xf32>
    %c21_170 = arith.constant 21 : index
    %c0_171 = arith.constant 0 : index
    %243 = vector.load %arg6[%c21_170, %c0_171] : memref<27x2048xf32, #tpu.memory_space<vmem>>, vector<1x2048xf32>
    %244 = vector.broadcast %243 : vector<1x2048xf32> to vector<8x2048xf32>
    %245 = arith.mulf %242, %244 : vector<8x2048xf32>
    %c168_172 = arith.constant 168 : index
    %c0_173 = arith.constant 0 : index
    %246 = vector.load %arg8[%c168_172, %c0_173] : memref<216x2048xf32, #tpu.memory_space<vmem>>, vector<8x2048xf32>
    tpu.vector_store %arg8[%c168_172, %c0_173], %245 {strides = array<i32>} : memref<216x2048xf32, #tpu.memory_space<vmem>>, vector<8x2048xf32>,
    %c1792_i32_174 = arith.constant 1792 : i32
    %247 = tpu.dynamic_rotate %140 by %c1792_i32_174 dim 1 : vector<8x2048xf32>, i32 -> vector<8x2048xf32>
    %c22_175 = arith.constant 22 : index
    %c0_176 = arith.constant 0 : index
    %248 = vector.load %arg6[%c22_175, %c0_176] : memref<27x2048xf32, #tpu.memory_space<vmem>>, vector<1x2048xf32>
    %249 = vector.broadcast %248 : vector<1x2048xf32> to vector<8x2048xf32>
    %250 = arith.mulf %247, %249 : vector<8x2048xf32>
    %c176_177 = arith.constant 176 : index
    %c0_178 = arith.constant 0 : index
    %251 = vector.load %arg8[%c176_177, %c0_178] : memref<216x2048xf32, #tpu.memory_space<vmem>>, vector<8x2048xf32>
    tpu.vector_store %arg8[%c176_177, %c0_178], %250 {strides = array<i32>} : memref<216x2048xf32, #tpu.memory_space<vmem>>, vector<8x2048xf32>,
    %c1791_i32_179 = arith.constant 1791 : i32
    %252 = tpu.dynamic_rotate %140 by %c1791_i32_179 dim 1 : vector<8x2048xf32>, i32 -> vector<8x2048xf32>
    %c23_180 = arith.constant 23 : index
    %c0_181 = arith.constant 0 : index
    %253 = vector.load %arg6[%c23_180, %c0_181] : memref<27x2048xf32, #tpu.memory_space<vmem>>, vector<1x2048xf32>
    %254 = vector.broadcast %253 : vector<1x2048xf32> to vector<8x2048xf32>
    %255 = arith.mulf %252, %254 : vector<8x2048xf32>
    %c184_182 = arith.constant 184 : index
    %c0_183 = arith.constant 0 : index
    %256 = vector.load %arg8[%c184_182, %c0_183] : memref<216x2048xf32, #tpu.memory_space<vmem>>, vector<8x2048xf32>
    tpu.vector_store %arg8[%c184_182, %c0_183], %255 {strides = array<i32>} : memref<216x2048xf32, #tpu.memory_space<vmem>>, vector<8x2048xf32>,
    %c1777_i32_184 = arith.constant 1777 : i32
    %257 = tpu.dynamic_rotate %140 by %c1777_i32_184 dim 1 : vector<8x2048xf32>, i32 -> vector<8x2048xf32>
    %c24_185 = arith.constant 24 : index
    %c0_186 = arith.constant 0 : index
    %258 = vector.load %arg6[%c24_185, %c0_186] : memref<27x2048xf32, #tpu.memory_space<vmem>>, vector<1x2048xf32>
    %259 = vector.broadcast %258 : vector<1x2048xf32> to vector<8x2048xf32>
    %260 = arith.mulf %257, %259 : vector<8x2048xf32>
    %c192_187 = arith.constant 192 : index
    %c0_188 = arith.constant 0 : index
    %261 = vector.load %arg8[%c192_187, %c0_188] : memref<216x2048xf32, #tpu.memory_space<vmem>>, vector<8x2048xf32>
    tpu.vector_store %arg8[%c192_187, %c0_188], %260 {strides = array<i32>} : memref<216x2048xf32, #tpu.memory_space<vmem>>, vector<8x2048xf32>,
    %c1776_i32_189 = arith.constant 1776 : i32
    %262 = tpu.dynamic_rotate %140 by %c1776_i32_189 dim 1 : vector<8x2048xf32>, i32 -> vector<8x2048xf32>
    %c25_190 = arith.constant 25 : index
    %c0_191 = arith.constant 0 : index
    %263 = vector.load %arg6[%c25_190, %c0_191] : memref<27x2048xf32, #tpu.memory_space<vmem>>, vector<1x2048xf32>
    %264 = vector.broadcast %263 : vector<1x2048xf32> to vector<8x2048xf32>
    %265 = arith.mulf %262, %264 : vector<8x2048xf32>
    %c200_192 = arith.constant 200 : index
    %c0_193 = arith.constant 0 : index
    %266 = vector.load %arg8[%c200_192, %c0_193] : memref<216x2048xf32, #tpu.memory_space<vmem>>, vector<8x2048xf32>
    tpu.vector_store %arg8[%c200_192, %c0_193], %265 {strides = array<i32>} : memref<216x2048xf32, #tpu.memory_space<vmem>>, vector<8x2048xf32>,
    %c1775_i32_194 = arith.constant 1775 : i32
    %267 = tpu.dynamic_rotate %140 by %c1775_i32_194 dim 1 : vector<8x2048xf32>, i32 -> vector<8x2048xf32>
    %c26_195 = arith.constant 26 : index
    %c0_196 = arith.constant 0 : index
    %268 = vector.load %arg6[%c26_195, %c0_196] : memref<27x2048xf32, #tpu.memory_space<vmem>>, vector<1x2048xf32>
    %269 = vector.broadcast %268 : vector<1x2048xf32> to vector<8x2048xf32>
    %270 = arith.mulf %267, %269 : vector<8x2048xf32>
    %c208_197 = arith.constant 208 : index
    %c0_198 = arith.constant 0 : index
    %271 = vector.load %arg8[%c208_197, %c0_198] : memref<216x2048xf32, #tpu.memory_space<vmem>>, vector<8x2048xf32>
    tpu.vector_store %arg8[%c208_197, %c0_198], %270 {strides = array<i32>} : memref<216x2048xf32, #tpu.memory_space<vmem>>, vector<8x2048xf32>,
    %c0_199 = arith.constant 0 : index
    %c0_200 = arith.constant 0 : index
    %272 = vector.load %arg4[%c0_199, %c0_200] : memref<8x216xf32, #tpu.memory_space<vmem>>, vector<8x216xf32>
    %c0_201 = arith.constant 0 : index
    %c0_202 = arith.constant 0 : index
    %273 = vector.load %arg8[%c0_201, %c0_202] : memref<216x2048xf32, #tpu.memory_space<vmem>>, vector<216x2048xf32>
    %cst_203 = arith.constant dense<0.000000e+00> : vector<8x2048xf32>
    %274 = tpu.matmul %272, %273, %cst_203 {dimension_numbers = #tpu.dot_dimension_numbers<[1], [0], [0], [1], [0, 0, 1, 1], [], []>} : vector<8x216xf32>, vector<216x2048xf32>, vector<8x2048xf32> -> vector<8x2048xf32>
    %c0_204 = arith.constant 0 : index
    %c0_205 = arith.constant 0 : index
    %275 = vector.load %arg5[%c0_204, %c0_205] : memref<8x1xf32, #tpu.memory_space<vmem>>, vector<8x1xf32>
    %276 = vector.broadcast %275 : vector<8x1xf32> to vector<8x2048xf32>
    %277 = arith.addf %274, %276 : vector<8x2048xf32>
    %cst_206 = arith.constant 0.000000e+00 : f32
    %278 = vector.broadcast %cst_206 : f32 to vector<8x2048xf32>
    %279 = arith.maximumf %277, %278 : vector<8x2048xf32>
    %c0_207 = arith.constant 0 : index
    %c0_208 = arith.constant 0 : index
    %c0_209 = arith.constant 0 : index
    %280 = vector.load %arg7[%c0_207, %c0_208, %c0_209] : memref<1x8x2048xf32, #tpu.memory_space<vmem>>, vector<1x8x2048xf32>
    %281 = vector.shape_cast %280 : vector<1x8x2048xf32> to vector<8x2048xf32>
    %282 = vector.shape_cast %279 : vector<8x2048xf32> to vector<1x8x2048xf32>
    tpu.vector_store %arg7[%c0_207, %c0_208, %c0_209], %282 {strides = array<i32>} : memref<1x8x2048xf32, #tpu.memory_space<vmem>>, vector<1x8x2048xf32>,
    return
  }
  func.func @transform_0(%arg0: i32) -> (i32, i32, i32) {
    %c0_i32 = arith.constant 0 : i32
    %c0_i32_0 = arith.constant 0 : i32
    %c0_i32_1 = arith.constant 0 : i32
    return %arg0, %c0_i32, %c0_i32_0 : i32, i32, i32
  }
  func.func @transform_1(%arg0: i32) -> (i32, i32) {
    %c0_i32 = arith.constant 0 : i32
    %c0_i32_0 = arith.constant 0 : i32
    %c0_i32_1 = arith.constant 0 : i32
    return %c0_i32, %c0_i32_0 : i32, i32
  }
  func.func @transform_2(%arg0: i32) -> (i32, i32) {
    %c0_i32 = arith.constant 0 : i32
    %c0_i32_0 = arith.constant 0 : i32
    %c0_i32_1 = arith.constant 0 : i32
    return %c0_i32, %c0_i32_0 : i32, i32
  }
  func.func @transform_3(%arg0: i32) -> (i32, i32) {
    %c0_i32 = arith.constant 0 : i32
    %c0_i32_0 = arith.constant 0 : i32
    %c0_i32_1 = arith.constant 0 : i32
    return %c0_i32, %c0_i32_0 : i32, i32
  }
  func.func @transform_4(%arg0: i32) -> (i32, i32) {
    %c0_i32 = arith.constant 0 : i32
    %c0_i32_0 = arith.constant 0 : i32
    %c0_i32_1 = arith.constant 0 : i32
    return %c0_i32, %c0_i32_0 : i32, i32
  }
  func.func @transform_5(%arg0: i32) -> (i32, i32) {
    %c0_i32 = arith.constant 0 : i32
    %c0_i32_0 = arith.constant 0 : i32
    %c0_i32_1 = arith.constant 0 : i32
    return %c0_i32, %c0_i32_0 : i32, i32
  }
  func.func @transform_6(%arg0: i32) -> (i32, i32, i32) {
    %c0_i32 = arith.constant 0 : i32
    %c0_i32_0 = arith.constant 0 : i32
    %c0_i32_1 = arith.constant 0 : i32
    return %arg0, %c0_i32, %c0_i32_0 : i32, i32, i32
  }
}

</mosaic_0001>

<bundles_post_ra>
// kernel: tpu_custom_call.1
= control target key start
LH: loop header
LB: loop body
LE: loop exit
PB: predicated region body
PF: predicated region fallthrough
CT: control target
= control target key end

     0   :  { %11 = vsyncpa [#allocation4], 0  ;;  %s18938_s0 = inlined_call_operand.hbm [shape: f32[2,8,2048], index: 0, kind: input, shape index: {}]   ;;  %s18939_s1 = inlined_call_operand.vmem [shape: f32[8,216], index: 1, kind: input, shape index: {}]   ;;  %s18940_s2 = inlined_call_operand.vmem [shape: f32[8,1], index: 2, kind: input, shape index: {}]   ;;  %s18941_s3 = inlined_call_operand.hbm [shape: f32[8,216], index: 3, kind: input, shape index: {}]   ;;  %s18942_s4 = inlined_call_operand.vmem [shape: f32[8,1], index: 4, kind: input, shape index: {}]   ;;  %s18943_s5 = inlined_call_operand.hbm [shape: f32[27,2048], index: 5, kind: input, shape index: {}]   ;;  %s18944_s6 = inlined_call_operand.hbm [shape: f32[2,8,2048], index: 6, kind: output, shape index: {}]  }
   0x1   :  { %13 = vsyncpa [#allocation4 + $0x1], 0 }
   0x2   :  { %14 = vsyncpa [#allocation7], 0 }
   0x3   :  { %15 = vsyncpa [#allocation5], 0 }
   0x4   :  { %17 = vsyncpa [#allocation5 + $0x1], 0  ;;  %s10767_s21 = smov 0   ;;  %s10769_s22 = smov 0  }
   0x5   :  { %s10771_s23 = smov 0   ;;  %s10773_s24 = smov 0  }
   0x6 LB: > { %s10788_s25 = sadd.s32 4294967295, %s10715_s24   ;;  %s9587_s26 = sadd.s32 4294967294, %s10715_s24   ;;  %s10715_s24 = sphi %s10773_s24, %s21582_s24   ;;  %s10711_s23 = sphi %s10771_s23, %s21581_s23   ;;  %s10707_s22 = sphi %s10769_s22, %s21580_s22   ;;  %s10703_s21 = sphi %s10767_s21, %s21579_s21  }
   0x7   : > { %p43_p0 = scmp.ne.s32.totalorder %s10707_s22, %s10703_s21  ;;  %p18945_p1 = scmp.eq.s32.totalorder %s10788_s25, 0 }
   0x8   : > { %p178_p3 = scmp.eq.s32.totalorder %s9587_s26, 1  ;;  %p9588_p5 = scmp.ge.s32.totalorder %s10715_s24, 1 }
   0x9   : > { %p10797_p4 = por %p18945_p1, %p43_p0  ;;  %p185_p7 = scmp.lt.s32.totalorder %s10715_s24, 3 }
   0xa   : > { %p10802_p6 = por %p178_p3, %p43_p0  ;;  %s10717_s30 = smov [#allocation6]  }
   0xb   : > { %s19618_s27 = scalar_select %p10797_p4, 1, 0 }
   0xc   : > { %s19619_s28 = scalar_select %p10802_p6, 1, 0 }
   0xd   : > { %p10807_p8 = pnand %p9588_p5, %p185_p7  ;;  %s204_s7 = sshll.u32 %s10717_s30, 4  ;;  %s205_s7 = int_to_ptr.vmem [resolvable:$true] %s204_s7 }
   0xe   : > { %s10718_s8 = smov [#allocation8]   ;;  %s10559_s13 = scalar_lea.hbm %s18941_s3, 256 }
   0xf   : > { %s19620_s29 = scalar_select %p10807_p8, 1, 0 }
  0x10   : > { %p10467_p10 = pneg %p10807_p8  ;;  %s217_s9 = sshll.u32 %s10718_s8, 4  ;;  %s10820_s9 = int_to_ptr.vmem [resolvable:$true] %s217_s9 }
  0x11   : > { %p10560_p12 = scmp.ne.s32.totalorder %s18941_s3, %s10559_s13  ;;  %p10566_p5 = scmp.lt.u32.totalorder %s10559_s13, %s18941_s3 }
  0x12   : > { %p10816_p11 = pnand %p10467_p10, %p18945_p1 }
  0x14   : > { %p10561_p13 = pneg %p10816_p11 }
  0x16   : > { %p10562_p0 = pnand %p10561_p13, %p10560_p12 }
  0x18   : > { %p10563_p3 = pneg %p10562_p0 }
  0x1a   : > { %p10568_p7 = pnand %p10566_p5, %p10563_p3 }
  0x1c   : > { %10571 = shalt.err (!%p10568_p7)
}
  0x1d   : > { %s10572_s18 = scalar_lea.vmem %s205_s7, 256  ;;  %p10580_p2 = scmp.lt.s32.totalorder %s205_s7, %s205_s7 }
  0x1e   : > { %p10573_p10 = scmp.ne.s32.totalorder %s205_s7, %s10572_s18  ;;  %p10581_p6 = scmp.lt.s32.totalorder %s10572_s18, %s10572_s18 }
  0x20   : > { %p10575_p9 = pnand %p10573_p10, %p10561_p13  ;;  %p10582_p4 = por %p10581_p6, %p10580_p2 }
  0x22   : > { %p10576_p1 = pneg %p10575_p9 }
  0x24   : > { %p10583_p8 = pnand %p10582_p4, %p10576_p1 }
  0x26   : > { %10586 = shalt.err (!%p10583_p8)
}
  0x27   : > { %10470 = dma.hbm_to_vmem [thread:$0]  (!%p10816_p11), %s18941_s3, 256, %s205_s7, [#allocation7]  }
  0x28   : > { %s10587_s8 = scalar_lea.hbm %s18943_s5, 8192 }
  0x29   : > { %p10588_p9 = scmp.ne.s32.totalorder %s18943_s5, %s10587_s8  ;;  %p10594_p4 = scmp.lt.u32.totalorder %s10587_s8, %s18943_s5 }
  0x2b   : > { %p10590_p2 = pnand %p10588_p9, %p10561_p13 }
  0x2d   : > { %p10591_p1 = pneg %p10590_p2 }
  0x2f   : > { %p10596_p6 = pnand %p10594_p4, %p10591_p1 }
  0x31   : > { %10599 = shalt.err (!%p10596_p6)
}
  0x32   : > { %s10600_s7 = scalar_lea.vmem %s10820_s9, 8192  ;;  %p10608_p3 = scmp.lt.s32.totalorder %s10820_s9, %s10820_s9 }
  0x33   : > { %p10601_p8 = scmp.ne.s32.totalorder %s10820_s9, %s10600_s7  ;;  %p10609_p5 = scmp.lt.s32.totalorder %s10600_s7, %s10600_s7 }
  0x35   : > { %p10603_p12 = pnand %p10601_p8, %p10561_p13  ;;  %p10610_p7 = por %p10609_p5, %p10608_p3 }
  0x37   : > { %p10604_p0 = pneg %p10603_p12 }
  0x39   : > { %p10611_p10 = pnand %p10610_p7, %p10604_p0 }
  0x3b   : > { %10614 = shalt.err (!%p10611_p10)
}
  0x3c   : > { %s10719_s15 = smov 2048   ;;  %s10720_s16 = smov 128  }
  0x3d   : > { %10473 = dma.hbm_to_vmem [thread:$0]  (!%p10816_p11), %s18943_s5, 8192, %s10820_s9, [#allocation7], %s10719_s15, %s10719_s15, %s10720_s16  }
  0x3e   : > { %s10870_s19 = sadd.s32 1, %s10715_s24   ;;  %s30_s20 = sadd.s32 1, %s10711_s23 }
  0x3f   : > { %s27_s26 = ssub.s32 %s10715_s24, %s10870_s19  ;;  %p37_p13 = scmp.ne.s32.totalorder %s10711_s23, %s10707_s22 }
  0x40   : > { %p28_p9 = scmp.eq.s32.totalorder %s27_s26, 0  ;;  %p38_p2 = scmp.eq.s32.totalorder %s10715_s24, 0 }
  0x41   : > { %p19622_p1 = scmp.eq.s32.totalorder %s10788_s25, 1  ;;  %p10484_p6 = scmp.lt.s32.totalorder %s10715_s24, 2 }
  0x42   : > { %s10886_s8 = scalar_select %p28_p9, %s10711_s23, %s30_s20  }
  0x43   : > { %p10880_p4 = por %p19622_p1, %p37_p13  ;;  %p39_p8 = por %p38_p2, %p37_p13 }
  0x44   : > { %s231_s10 = sand.u32 1, %s10711_s23   ;;  %s9621_s9 = sshll.u32 %s10715_s24, 11 }
  0x45   : > { %s9592_s11 = sshll.u32 %s231_s10, 7  ;;  %s10893_s14 = scalar_lea.hbm %s18938_s0, %s9621_s9 }
  0x46   : > { %s235_s7 = scalar_lea.vmem [#allocation3], %s9592_s11  ;;  %p10897_p11 = pnand %p10484_p6, %p39_p8 }
  0x47   : > { %s243_s15 = sshll.u32 %s235_s7, 4  ;;  %s232_s17 = scalar_lea.sflag [#allocation4], %s231_s10  ;;  %s10895_s15 = int_to_ptr.vmem [resolvable:$true] %s243_s15 }
  0x48   : > { %s10615_s18 = scalar_lea.hbm %s10893_s14, 2048  ;;  %p10617_p0 = pneg %p10897_p11 }
  0x49   : > { %p10616_p12 = scmp.ne.s32.totalorder %s10893_s14, %s10615_s18  ;;  %s10620_s11 = scalar_lea.hbm %s18938_s0, 4096 }
  0x4a   : > { %p10621_p7 = scmp.lt.u32.totalorder %s10893_s14, %s18938_s0  ;;  %p10622_p10 = scmp.lt.u32.totalorder %s10620_s11, %s10615_s18 }
  0x4b   : > { %p10618_p3 = pnand %p10617_p0, %p10616_p12  ;;  %p10624_p9 = scmp.lt.u32.totalorder %s10615_s18, %s10893_s14 }
  0x4c   : > { %p10623_p13 = por %p10622_p10, %p10621_p7 }
  0x4d   : > { %p10619_p5 = pneg %p10618_p3 }
  0x4e   : > { %p10625_p2 = por %p10624_p9, %p10623_p13 }
  0x50   : > { %p10626_p1 = pnand %p10625_p2, %p10619_p5 }
  0x52   : > { %10629 = shalt.err (!%p10626_p1)
}
  0x53   : > { %s10630_s10 = scalar_lea.vmem %s10895_s15, 2048  ;;  %s10721_s13 = smov [#allocation3]  }
  0x54   : > { %p10631_p6 = scmp.ne.s32.totalorder %s10895_s15, %s10630_s10  ;;  %s10635_s7 = sshll.u32 %s10721_s13, 4  ;;  %s10636_s7 = int_to_ptr.vmem [resolvable:$false] %s10635_s7 }
  0x55   : > { %s10637_s20 = scalar_lea.vmem %s10636_s7, 4096  ;;  %p10638_p3 = scmp.lt.s32.totalorder %s10895_s15, %s10636_s7 }
  0x56   : > { %p10633_p8 = pnand %p10631_p6, %p10617_p0  ;;  %p10639_p7 = scmp.lt.s32.totalorder %s10637_s20, %s10630_s10 }
  0x58   : > { %p10634_p12 = pneg %p10633_p8  ;;  %p10640_p10 = por %p10639_p7, %p10638_p3 }
  0x5a   : > { %p10641_p13 = pnand %p10640_p10, %p10634_p12 }
  0x5c   : > { %10644 = shalt.err (!%p10641_p13)
}
  0x5d   : > { %10477 = dma.hbm_to_vmem [thread:$0]  (!%p10897_p11), %s10893_s14, 2048, %s10895_s15, %s232_s17  }
  0x5e   : > { %p19625_p5 = scmp.ne.s32.totalorder %s19620_s29, 0 }
  0x60   : > { %252 = sbr.rel (%p19625_p5) target bundleno = 1502 (0x5de), region = 44 }
  0x67   : > { %s10929_s18 = sand.u32 1, %s10707_s22   ;;  %p19626_p0 = scmp.ne.s32.totalorder %s19618_s27, 0 }
  0x68   : > { %s9596_s26 = sshll.u32 %s10929_s18, 7  ;;  %s255_s11 = scalar_lea.sflag [#allocation4], %s10929_s18 }
  0x69   : > { %s10935_s9 = scalar_lea.vmem [#allocation3], %s9596_s26 }
  0x6a   : > { %10690 = dma.done.wait (%p19626_p0), %s255_s11, 2048  }
  0x6b   : > { %10692 = vsyncadd (%p19626_p0), %s255_s11, 4294965248  ;;  %p19627_p11 = scmp.eq.s32.totalorder %s10788_s25, 0 }
  0x6d   : > { %10694 = dma.done.wait (%p19627_p11), [#allocation7], 8448   ;;  %p19628_p9 = pmov %p19627_p11 }
  0x6e   : > { %v10946_v0 = vld [vmem:[%s10935_s9] sm:$0xff]  ;;  %s10722_s29 = smov 16   ;;  %s10723_s14 = smov 17   ;;  %v10953_v1 = vld [vmem:[%s10935_s9 + $0x8] sm:$0xff]  ;;  %v10960_v2 = vld [vmem:[%s10935_s9 + $0x78] sm:$0xff]  ;;  %v343_v6 = vlaneseq  ;;  %vm4332_vm1 = vcmask 719872  }
  0x6f   : > { %10696 = vsyncadd (%p19628_p9), [#allocation7], 4294958848  ;;  %483 = vrot.lane.b32.xlu1 %v10946_v0, %s10722_s29  ;;  %311 = vrot.lane.b32.xlu0 %v10946_v0, %s10723_s14  ;;  %v10963_v3 = vld [vmem:[%s10935_s9 + $0x70] sm:$0xff]  ;;  %v308_v4 = vld [vmem:[%s10935_s9 + $0x68] sm:$0xff]  ;;  %s10724_s27 = smov 15   ;;  %s10725_s15 = smov 1  }
  0x70   : > { %v10995_v5 = vld [vmem:[%s10935_s9 + $0x10] sm:$0xff]  ;;  %s10726_s16 = smov 127   ;;  %s10727_s17 = smov 113   ;;  %v372_v7 = vshrl.u32 %v343_v6, 7  ;;  %v11031_v8 = vld [vmem:[%s10935_s9 + $0x18] sm:$0xff]  ;;  %v11152_v44 = vld [vmem:[%s10935_s9 + $0x20] sm:$0xff] }
  0x71   : > { %s10728_s12 = smov 112   ;;  %s10729_s10 = smov 111   ;;  %v1925_v17 = vld [vmem:[#allocation8 + $0x82] ss:$8 sm:$0xf] }
  0x72   : > { %v11037_v9 = vsub.s32 1, %v372_v7  ;;  %v11039_v10 = vsub.s32 7, %v372_v7  ;;  %v11041_v11 = vsub.s32 0, %v372_v7  ;;  %v11043_v12 = vsub.s32 6, %v372_v7 }
  0x73   : > { %485 = vrot.lane.b32.xlu1 %v10953_v1, %s10722_s29  ;;  %313 = vrot.lane.b32.xlu0 %v10953_v1, %s10723_s14  ;;  %v11045_v13 = vsub.s32 5, %v372_v7  ;;  %v11047_v14 = vsub.s32 2, %v372_v7  ;;  %v11049_v15 = vsub.s32 3, %v372_v7  ;;  %v11051_v16 = vsub.s32 4, %v372_v7 }
  0x74   : > { %19629 = vst [vmem:[#allocation13_spill] sm:$0xff] %v11037_v9  ;;  %19630 = vst [vmem:[#allocation14_spill] sm:$0xff] %v11039_v10  ;;  %v1926_v18 = vld [vmem:[#allocation8 + $0x82] ss:$8 sm:$0xf0] }
  0x75   : > { %19631 = vst [vmem:[#allocation15_spill] sm:$0xff] %v11041_v11  ;;  %19632 = vst [vmem:[#allocation16_spill] sm:$0xff] %v11043_v12  ;;  %v2921_v19 = vld [vmem:[#allocation8 + $0x143] ss:$8 sm:$0xf]  ;;  %v11057_v23 = vor.u32 %v1926_v18, %v1925_v17 }
  0x76   : > { %19633 = vst [vmem:[#allocation17_spill] sm:$0xff] %v11047_v14  ;;  %19634 = vst [vmem:[#allocation18_spill] sm:$0xff] %v11049_v15  ;;  %v2922_v20 = vld [vmem:[#allocation8 + $0x143] ss:$8 sm:$0xf0] }
  0x77   : > { %341 = vrot.lane.b32.xlu1 %v10960_v2, %s10723_s14  ;;  %339 = vrot.lane.b32.xlu0 %v10963_v3, %s10723_s14  ;;  %v1803_v21 = vld [vmem:[#allocation8 + $0x81] ss:$8 sm:$0xf]  ;;  %19635 = vst [vmem:[#allocation19_spill] sm:$0xff] %v11057_v23  ;;  %v11059_v26 = vor.u32 %v2922_v20, %v2921_v19 }
  0x78   : > { %v1804_v22 = vld [vmem:[#allocation8 + $0x81] ss:$8 sm:$0xf0]  ;;  %v2799_v24 = vld [vmem:[#allocation8 + $0x142] ss:$8 sm:$0xf] }
  0x79   : > { %v2800_v25 = vld [vmem:[#allocation8 + $0x142] ss:$8 sm:$0xf0]  ;;  %19636 = vst [vmem:[#allocation20_spill] sm:$0xff] %v11059_v26  ;;  %v11061_v31 = vor.u32 %v1804_v22, %v1803_v21 }
  0x7a   : > { %v1807_v27 = vld [vmem:[#allocation8 + $0xc1] ss:$8 sm:$0xf]  ;;  %v362_v29 = vld [vmem:[#allocation8] ss:$8 sm:$0xf]  ;;  %v11067_v34 = vor.u32 %v2800_v25, %v2799_v24 }
  0x7b   : > { %513 = vrot.lane.b32.xlu1 %v10960_v2, %s10722_s29  ;;  %511 = vrot.lane.b32.xlu0 %v10963_v3, %s10722_s29  ;;  %v1808_v28 = vld [vmem:[#allocation8 + $0xc1] ss:$8 sm:$0xf0]  ;;  %v363_v30 = vld [vmem:[#allocation8] ss:$8 sm:$0xf0] }
  0x7c   : > { %19637 = vst [vmem:[#allocation21_spill] sm:$0xff] %v11061_v31  ;;  %v533_v32 = vld [vmem:[#allocation8 + $0x1] ss:$8 sm:$0xf]  ;;  %19638 = vst [vmem:[#allocation22_spill] sm:$0xff] %v11067_v34  ;;  %v11071_v38 = vor.u32 %v363_v30, %v362_v29  ;;  %v11087_v50 = vor.u32 %v1808_v28, %v1807_v27 }
  0x7d   : > { %v534_v33 = vld [vmem:[#allocation8 + $0x1] ss:$8 sm:$0xf0]  ;;  %v1929_v35 = vld [vmem:[#allocation8 + $0xc2] ss:$8 sm:$0xf] }
  0x7e   : > { %v1930_v36 = vld [vmem:[#allocation8 + $0xc2] ss:$8 sm:$0xf0]  ;;  %19639 = vst [vmem:[#allocation23_spill] sm:$0xff] %v11071_v38  ;;  %v11077_v43 = vor.u32 %v534_v33, %v533_v32  ;;  %19641 = vst [vmem:[#allocation25_spill] sm:$0xff] %v11087_v50 }
  0x7f   : > { %509 = vrot.lane.b32.xlu1 %v308_v4, %s10722_s29  ;;  %337 = vrot.lane.b32.xlu0 %v308_v4, %s10723_s14  ;;  %v704_v40 = vld [vmem:[#allocation8 + $0x2] ss:$8 sm:$0xf]  ;;  %v2047_v46 = vld [vmem:[#allocation8 + $0x83] ss:$8 sm:$0xf]  ;;  %v11089_v51 = vor.u32 %v1930_v36, %v1929_v35 }
  0x80   : > { %v705_v41 = vld [vmem:[#allocation8 + $0x2] ss:$8 sm:$0xf0]  ;;  %19640 = vst [vmem:[#allocation24_spill] sm:$0xff] %v11077_v43 }
  0x81   : > { %v2048_v47 = vld [vmem:[#allocation8 + $0x83] ss:$8 sm:$0xf0]  ;;  %19642 = vst [vmem:[#allocation26_spill] sm:$0xff] %v11089_v51  ;;  %v11107_v62 = vor.u32 %v705_v41, %v704_v40 }
  0x82   : > { %v3043_v52 = vld [vmem:[#allocation8 + $0x144] ss:$8 sm:$0xf]  ;;  %v875_v57 = vld [vmem:[#allocation8 + $0x3] ss:$8 sm:$0xf]  ;;  %v11113_v18 = vor.u32 %v2048_v47, %v2047_v46 }
  0x83   : > { %656 = vrot.lane.b32.xlu1 %v10953_v1, %s10724_s27  ;;  %654 = vrot.lane.b32.xlu0 %v10946_v0, %s10724_s27  ;;  %v3044_v53 = vld [vmem:[#allocation8 + $0x144] ss:$8 sm:$0xf0]  ;;  %v876_v58 = vld [vmem:[#allocation8 + $0x3] ss:$8 sm:$0xf0] }
  0x84   : > { %19643 = vst [vmem:[#allocation27_spill] sm:$0xff] %v11107_v62  ;;  %v2169_v63 = vld [vmem:[#allocation8 + $0x84] ss:$8 sm:$0xf]  ;;  %19644 = vst [vmem:[#allocation28_spill] sm:$0xff] %v11113_v18  ;;  %v11115_v19 = vor.u32 %v3044_v53, %v3043_v52  ;;  %v11123_v27 = vor.u32 %v876_v58, %v875_v57 }
  0x85   : > { %v3165_v20 = vld [vmem:[#allocation8 + $0x145] ss:$8 sm:$0xf]  ;;  %v2051_v28 = vld [vmem:[#allocation8 + $0xc3] ss:$8 sm:$0xf] }
  0x86   : > { %19645 = vst [vmem:[#allocation29_spill] sm:$0xff] %v11115_v19  ;;  %v3166_v21 = vld [vmem:[#allocation8 + $0x145] ss:$8 sm:$0xf0]  ;;  %19646 = vst [vmem:[#allocation30_spill] sm:$0xff] %v11123_v27 }
  0x87   : > { %827 = vrot.lane.b32.xlu1 %v10953_v1, %s10725_s15  ;;  %825 = vrot.lane.b32.xlu0 %v10946_v0, %s10725_s15  ;;  %v2052_v29 = vld [vmem:[#allocation8 + $0xc3] ss:$8 sm:$0xf0]  ;;  %v11141_v41 = vor.u32 %v3166_v21, %v3165_v20  ;;  %v2173_v46 = vld [vmem:[#allocation8 + $0xc4] ss:$8 sm:$0xf] }
  0x88   : > { %v2174_v47 = vld [vmem:[#allocation8 + $0xc4] ss:$8 sm:$0xf0]  ;;  %v1168_v52 = vld [vmem:[#allocation8 + $0x5] ss:$8 sm:$0xf] }
  0x89   : > { %19648 = vst [vmem:[#allocation32_spill] sm:$0xff] %v11141_v41  ;;  %v1169_v53 = vld [vmem:[#allocation8 + $0x5] ss:$8 sm:$0xf0] }
  0x8a   : > { %v2307_v24 = vld [vmem:[#allocation8 + $0x86] ss:$8 sm:$0xf]  ;;  %v997_v39 = vld [vmem:[#allocation8 + $0x4] ss:$8 sm:$0xf]  ;;  %v11176_v42 = vor.u32 %v1169_v53, %v1168_v52 }
  0x8b   : > { %684 = vrot.lane.b32.xlu1 %v10960_v2, %s10724_s27  ;;  %682 = vrot.lane.b32.xlu0 %v10963_v3, %s10724_s27  ;;  %v2308_v22 = vld [vmem:[#allocation8 + $0x86] ss:$8 sm:$0xf0]  ;;  %v998_v55 = vld [vmem:[#allocation8 + $0x4] ss:$8 sm:$0xf0] }
  0x8c   : > { %v3409_v21 = vld [vmem:[#allocation8 + $0x147] ss:$8 sm:$0xf]  ;;  %19650 = vst [vmem:[#allocation34_spill] sm:$0xff] %v11176_v42  ;;  %v11178_v37 = vor.u32 %v2308_v22, %v2307_v24  ;;  %v11186_v20 = vor.u32 %v998_v55, %v997_v39 }
  0x8d   : > { %v3410_v49 = vld [vmem:[#allocation8 + $0x147] ss:$8 sm:$0xf0]  ;;  %v2311_v58 = vld [vmem:[#allocation8 + $0xc6] ss:$8 sm:$0xf] }
  0x8e   : > { %19651 = vst [vmem:[#allocation35_spill] sm:$0xff] %v11178_v37  ;;  %v1339_v54 = vld [vmem:[#allocation8 + $0x6] ss:$8 sm:$0xf]  ;;  %v11212_v61 = vor.u32 %v3410_v49, %v3409_v21  ;;  %v1013_v24 = vrot.slane %v11186_v20, %v11037_v9  ;;  %v1017_v21 = vrot.slane %v11186_v20, %v11047_v14  ;;  %v1009_v55 = vrot.slane %v11186_v20, %v11041_v11 }
  0x8f   : > { %855 = vrot.lane.b32.xlu1 %v10960_v2, %s10725_s15  ;;  %853 = vrot.lane.b32.xlu0 %v10963_v3, %s10725_s15  ;;  %v1340_v35 = vld [vmem:[#allocation8 + $0x6] ss:$8 sm:$0xf0]  ;;  %v2429_v48 = vld [vmem:[#allocation8 + $0x87] ss:$8 sm:$0xf] }
  0x90   : > { %v2430_v57 = vld [vmem:[#allocation8 + $0x87] ss:$8 sm:$0xf0]  ;;  %v3532_v53 = vld [vmem:[#allocation8 + $0x1c0] ss:$8 sm:$0xf0]  ;;  %v11226_v59 = vor.u32 %v1340_v35, %v1339_v54 }
  0x91   : > { %19654 = vst [vmem:[#allocation38_spill] sm:$0xff] %v11212_v61  ;;  %v1510_v56 = vld [vmem:[#allocation8 + $0x7] ss:$8 sm:$0xf]  ;;  %v11236_v49 = vor.u32 %v2430_v57, %v2429_v48  ;;  %v11254_v57 = vmul.f32 %v1013_v24, %v10960_v2 }
  0x92   : > { %v1511_v39 = vld [vmem:[#allocation8 + $0x7] ss:$8 sm:$0xf0]  ;;  %v2551_v52 = vld [vmem:[#allocation8 + $0x100] ss:$8 sm:$0xf] }
  0x93   : > { %851 = vrot.lane.b32.xlu1 %v308_v4, %s10725_s15  ;;  %680 = vrot.lane.b32.xlu0 %v308_v4, %s10724_s27  ;;  %v2170_v4 = vld [vmem:[#allocation8 + $0x84] ss:$8 sm:$0xf0]  ;;  %v2552_v45 = vld [vmem:[#allocation8 + $0x100] ss:$8 sm:$0xf0]  ;;  %v11244_v17 = vor.u32 %v1511_v39, %v1510_v56 }
  0x94   : > { %v11133_v33 = vor.u32 %v2170_v4, %v2169_v63  ;;  %v11149_v4 = vor.u32 %v2052_v29, %v2051_v28  ;;  %v2312_v28 = vld [vmem:[#allocation8 + $0xc6] ss:$8 sm:$0xf0]  ;;  %v11184_v63 = vor.u32 %v2174_v47, %v2173_v46  ;;  %v3531_v29 = vld [vmem:[#allocation8 + $0x1c0] ss:$8 sm:$0xf]  ;;  %v11246_v7 = vor.u32 %v2552_v45, %v2551_v52 }
  0x95   : > { %v3287_v46 = vld [vmem:[#allocation8 + $0x146] ss:$8 sm:$0xf]  ;;  %v11204_v22 = vor.u32 %v2312_v28, %v2311_v58  ;;  %v1021_v28 = vrot.slane %v11186_v20, %v11049_v15  ;;  %19655 = vst [vmem:[#allocation39_spill] sm:$0xff] %v11226_v59  ;;  %19656 = vst [vmem:[#allocation40_spill] sm:$0xff] %v11236_v49  ;;  %v11242_v25 = vor.u32 %v3532_v53, %v3531_v29 }
  0x96   : > { %19647 = vst [vmem:[#allocation31_spill] sm:$0xff] %v11133_v33  ;;  %19649 = vst [vmem:[#allocation33_spill] sm:$0xff] %v11149_v4  ;;  %v3288_v47 = vld [vmem:[#allocation8 + $0x146] ss:$8 sm:$0xf0]  ;;  %v11264_v45 = vmul.f32 %v1009_v55, %v10963_v3 }
  0x97   : > { %1122 = vrot.lane.b32.xlu1 %v10995_v5, %s10726_s16  ;;  %1120 = vrot.lane.b32.xlu0 %v10953_v1, %s10726_s16  ;;  %19652 = vst [vmem:[#allocation36_spill] sm:$0xff] %v11184_v63  ;;  %19653 = vst [vmem:[#allocation37_spill] sm:$0xff] %v11204_v22  ;;  %v3653_v58 = vld [vmem:[#allocation8 + $0x1c1] ss:$8 sm:$0xf]  ;;  %v11238_v54 = vor.u32 %v3288_v47, %v3287_v46  ;;  %v11249_v60 = vmul.f32 %v1021_v28, %v10953_v1 }
  0x98   : > { %v3654_v40 = vld [vmem:[#allocation8 + $0x1c1] ss:$8 sm:$0xf0]  ;;  %v2433_v32 = vld [vmem:[#allocation8 + $0xc7] ss:$8 sm:$0xf]  ;;  %v11259_v47 = vmul.f32 %v1017_v21, %v10946_v0 }
  0x99   : > { %v2434_v30 = vld [vmem:[#allocation8 + $0xc7] ss:$8 sm:$0xf0]  ;;  %19657 = vst [vmem:[#allocation41_spill] sm:$0xff] %v11238_v54  ;;  %19658 = vst [vmem:[#allocation42_spill] sm:$0xff] %v11242_v25  ;;  %v11256_v46 = vor.u32 %v3654_v40, %v3653_v58 }
  0x9a   : > { %19659 = vst [vmem:[#allocation43_spill] sm:$0xff] %v11244_v17  ;;  %19660 = vst [vmem:[#allocation44_spill] sm:$0xff] %v11246_v7  ;;  %v11266_v29 = vor.u32 %v2434_v30, %v2433_v32  ;;  %v2796_v52 = vld [vmem:[#allocation8 + $0x102] ss:$8 sm:$0xf0] }
  0x9b   : > { %1148 = vrot.lane.b32.xlu1 %v10960_v2, %s10726_s16  ;;  %1118 = vrot.lane.b32.xlu0 %v10946_v0, %s10726_s16  ;;  %19661 = vst [vmem:[#allocation45_spill] sm:$0xff] %v11249_v60  ;;  %19662 = vst [vmem:[#allocation46_spill] sm:$0xff] %v11254_v57  ;;  %v2555_v53 = vld [vmem:[#allocation8 + $0x140] ss:$8 sm:$0xf] }
  0x9c   : > { %19663 = vst [vmem:[#allocation47_spill] sm:$0xff] %v11256_v46  ;;  %19664 = vst [vmem:[#allocation48_spill] sm:$0xff] %v11259_v47  ;;  %v2556_v39 = vld [vmem:[#allocation8 + $0x140] ss:$8 sm:$0xf0] }
  0x9d   : > { %19665 = vst [vmem:[#allocation49_spill] sm:$0xff] %v11264_v45  ;;  %19666 = vst [vmem:[#allocation50_spill] sm:$0xff] %v11266_v29  ;;  %v1681_v40 = vld [vmem:[#allocation8 + $0x80] ss:$8 sm:$0xf]  ;;  %v11321_v58 = vor.u32 %v2556_v39, %v2555_v53 }
  0x9e   : > { %v1682_v30 = vld [vmem:[#allocation8 + $0x80] ss:$8 sm:$0xf0]  ;;  %v2673_v48 = vld [vmem:[#allocation8 + $0x101] ss:$8 sm:$0xf] }
  0x9f   : > { %1291 = vrot.lane.b32.xlu1 %v10953_v1, %s10727_s17  ;;  %1146 = vrot.lane.b32.xlu0 %v10963_v3, %s10726_s16  ;;  %v2674_v36 = vld [vmem:[#allocation8 + $0x101] ss:$8 sm:$0xf0]  ;;  %19669 = vst [vmem:[#allocation53_spill] sm:$0xff] %v11321_v58  ;;  %v11325_v24 = vor.u32 %v1682_v30, %v1681_v40 }
  0xa0   : > { %v2678_v32 = vld [vmem:[#allocation8 + $0x141] ss:$8 sm:$0xf0]  ;;  %v11333_v35 = vor.u32 %v2674_v36, %v2673_v48  ;;  %v2918_v53 = vld [vmem:[#allocation8 + $0x103] ss:$8 sm:$0xf0] }
  0xa1   : > { %v11317_v28 = vld [vmem:[%s10935_s9 + $0x28] sm:$0xff]  ;;  %19670 = vst [vmem:[#allocation54_spill] sm:$0xff] %v11325_v24  ;;  %v11470_v50 = vld [vmem:[%s10935_s9 + $0x30] sm:$0xff] }
  0xa2   : > { %19671 = vst [vmem:[#allocation55_spill] sm:$0xff] %v11333_v35  ;;  %v3776_v40 = vld [vmem:[#allocation8 + $0x1c2] ss:$8 sm:$0xf0] }
  0xa3   : > { %1462 = vrot.lane.b32.xlu1 %v10953_v1, %s10728_s12  ;;  %1293 = vrot.lane.b32.xlu0 %v10995_v5, %s10727_s17  ;;  %v3040_v30 = vld [vmem:[#allocation8 + $0x104] ss:$8 sm:$0xf0]  ;;  %v3405_v55 = vld [vmem:[#allocation8 + $0x107] ss:$8 sm:$0xf] }
  0xa4   : > { %v3527_v29 = vld [vmem:[#allocation8 + $0x180] ss:$8 sm:$0xf]  ;;  %v3771_v19 = vld [vmem:[#allocation8 + $0x182] ss:$8 sm:$0xf] }
  0xa7   : > { %1289 = vrot.lane.b32.xlu1 %v10946_v0, %s10727_s17  ;;  %1464 = vrot.lane.b32.xlu0 %v10995_v5, %s10728_s12 }
  0xab   : > { %1460 = vrot.lane.b32.xlu1 %v10946_v0, %s10728_s12  ;;  %1319 = vrot.lane.b32.xlu0 %v10960_v2, %s10727_s17 }
  0xaf   : > { %1317 = vrot.lane.b32.xlu1 %v10963_v3, %s10727_s17  ;;  %1490 = vrot.lane.b32.xlu0 %v10960_v2, %s10728_s12 }
  0xb3   : > { %315 = vrot.lane.b32.xlu1 %v10995_v5, %s10723_s14  ;;  %1488 = vrot.lane.b32.xlu0 %v10963_v3, %s10728_s12 }
  0xb7   : > { %1633 = vrot.lane.b32.xlu1 %v10953_v1, %s10729_s10  ;;  %317 = vrot.lane.b32.xlu0 %v11031_v8, %s10723_s14  ;;  %v2795_v1 = vld [vmem:[#allocation8 + $0x102] ss:$8 sm:$0xf] }
  0xb8   : > { %v11295_v21 = vor.u32 %v2796_v52, %v2795_v1  ;;  %v3775_v1 = vld [vmem:[#allocation8 + $0x1c2] ss:$8 sm:$0xf] }
  0xb9   : > { %v3893_v52 = vld [vmem:[%s18939_s1 + $0x8] sm:$0xff]  ;;  %v11369_v54 = vor.u32 %v3776_v40, %v3775_v1 }
  0xba   : > { %19668 = vst [vmem:[#allocation52_spill] sm:$0xff] %v11295_v21  ;;  %9600 = vmatprep.mubr.msk.f32.mxu0 %vm4332_vm1, %v3893_v52  ;;  %9601 = vmatprep.mubr.msk.f32.mxu1 %vm4332_vm1, %v3893_v52  ;;  %v3162_v1 = vld [vmem:[#allocation8 + $0x105] ss:$8 sm:$0xf0]  ;;  %v19681_v52 = vrot.slane %v11071_v38, %v11049_v15 }
  0xbb   : > { %1631 = vrot.lane.b32.xlu1 %v10946_v0, %s10729_s10  ;;  %1635 = vrot.lane.b32.xlu0 %v10995_v5, %s10729_s10  ;;  %v2677_v0 = vld [vmem:[#allocation8 + $0x141] ss:$8 sm:$0xf]  ;;  %19674 = vst [vmem:[#allocation58_spill] sm:$0xff] %v11369_v54 }
  0xbc   : > { %v3283_v54 = vld [vmem:[#allocation8 + $0x106] ss:$8 sm:$0xf] }
  0xbf   : > { %1659 = vrot.lane.b32.xlu1 %v10963_v3, %s10729_s10  ;;  %1661 = vrot.lane.b32.xlu0 %v10960_v2, %s10729_s10  ;;  %v11273_v2 = vand.u32 127, %v343_v6  ;;  %v2917_v6 = vld [vmem:[#allocation8 + $0x103] ss:$8 sm:$0xf]  ;;  %v11339_v3 = vor.u32 %v2678_v32, %v2677_v0 }
  0xc0   : > { %v3039_v32 = vld [vmem:[#allocation8 + $0x104] ss:$8 sm:$0xf]  ;;  %v11359_v39 = vor.u32 %v2918_v53, %v2917_v6  ;;  %v3161_v0 = vld [vmem:[#allocation8 + $0x105] ss:$8 sm:$0xf] }
  0xc1   : > { %19667 = vst [vmem:[#allocation51_spill] sm:$0xff] %v11273_v2  ;;  %vm515_vm0 = vcmp.lt.s32.totalorder %v11273_v2, 16  ;;  %19672 = vst [vmem:[#allocation56_spill] sm:$0xff] %v11339_v3  ;;  %vm345_vm2 = vcmp.lt.s32.totalorder %v11273_v2, 17  ;;  %v11381_v61 = vor.u32 %v3040_v30, %v3039_v32  ;;  %v11411_v63 = vor.u32 %v3162_v1, %v3161_v0 }
  0xc2   : > { %19673 = vst [vmem:[#allocation57_spill] sm:$0xff] %v11359_v39  ;;  %v3406_v30 = vld [vmem:[#allocation8 + $0x107] ss:$8 sm:$0xf0]  ;;  %v19682_v0 = vrot.slane %v11077_v43, %v11049_v15  ;;  %vm686_vm3 = vcmp.lt.s32.totalorder %v11273_v2, 15  ;;  %vm857_vm4 = vcmp.lt.s32.totalorder %v11273_v2, 1 }
  0xc3   : > { %489 = vrot.lane.b32.xlu1 %v11031_v8, %s10722_s29  ;;  %487 = vrot.lane.b32.xlu0 %v10995_v5, %s10722_s29  ;;  %19675 = vst [vmem:[#allocation59_spill] sm:$0xff] %v11381_v61  ;;  %v3284_v3 = vld [vmem:[#allocation8 + $0x106] ss:$8 sm:$0xf0]  ;;  %19678 = vst [vmem:[#allocation62_spill] sm:$0xff] %v11411_v63  ;;  %v11435_v32 = vor.u32 %v3406_v30, %v3405_v55  ;;  %vm1150_vm5 = vcmp.lt.s32.totalorder %v11273_v2, 127 }
  0xc4   : > { %v11437_v46 = vor.u32 %v3284_v3, %v3283_v54  ;;  %v3649_v54 = vld [vmem:[#allocation8 + $0x181] ss:$8 sm:$0xf]  ;;  %vm1321_vm6 = vcmp.lt.s32.totalorder %v11273_v2, 113  ;;  %vm1492_vm7 = vcmp.lt.s32.totalorder %v11273_v2, 112  ;;  %vm1663_vm8 = vcmp.lt.s32.totalorder %v11273_v2, 111 }
  0xc5   : > { %19679 = vst [vmem:[#allocation63_spill] sm:$0xff] %v11435_v32  ;;  %v3650_v55 = vld [vmem:[#allocation8 + $0x181] ss:$8 sm:$0xf0] }
  0xc6   : > { %19680 = vst [vmem:[#allocation64_spill] sm:$0xff] %v11437_v46 }
  0xc7   : > { %660 = vrot.lane.b32.xlu1 %v11031_v8, %s10724_s27  ;;  %658 = vrot.lane.b32.xlu0 %v10995_v5, %s10724_s27 }
  0xcb   : > { %831 = vrot.lane.b32.xlu1 %v11031_v8, %s10725_s15  ;;  %829 = vrot.lane.b32.xlu0 %v10995_v5, %s10725_s15 }
  0xcf   : > { %1126 = vrot.lane.b32.xlu1 %v11152_v44, %s10726_s16  ;;  %1124 = vrot.lane.b32.xlu0 %v11031_v8, %s10726_s16 }
  0xd3   : > { %1297 = vrot.lane.b32.xlu1 %v11152_v44, %s10727_s17  ;;  %1295 = vrot.lane.b32.xlu0 %v11031_v8, %s10727_s17 }
  0xd7   : > { %1468 = vrot.lane.b32.xlu1 %v11152_v44, %s10728_s12  ;;  %1466 = vrot.lane.b32.xlu0 %v11031_v8, %s10728_s12 }
  0xdb   : > { %1639 = vrot.lane.b32.xlu1 %v11152_v44, %s10729_s10  ;;  %1637 = vrot.lane.b32.xlu0 %v11031_v8, %s10729_s10 }
  0xdf   : > { %321 = vrot.lane.b32.xlu1 %v11317_v28, %s10723_s14  ;;  %319 = vrot.lane.b32.xlu0 %v11152_v44, %s10723_s14 }
  0xe1   : > { %v11363_v48 = vpop.permute.xlu1 %483  ;;  %v11365_v36 = vpop.permute.xlu0 %311 }
  0xe3   : > { %493 = vrot.lane.b32.xlu1 %v11317_v28, %s10722_s29  ;;  %491 = vrot.lane.b32.xlu0 %v11152_v44, %s10722_s29 }
  0xe5   : > { %v11401_v6 = vpop.permute.xlu1 %485  ;;  %v11403_v58 = vpop.permute.xlu0 %313 }
  0xe6   : > { %19676 = vst [vmem:[#allocation60_spill] sm:$0xff] %v11401_v6  ;;  %19677 = vst [vmem:[#allocation61_spill] sm:$0xff] %v11403_v58  ;;  %v11417_v40 = vsel %vm515_vm0, %v11363_v48, %v11401_v6  ;;  %v11423_v56 = vsel %vm345_vm2, %v11365_v36, %v11403_v58  ;;  %v3528_v6 = vld [vmem:[#allocation8 + $0x180] ss:$8 sm:$0xf0] }
  0xe7   : > { %664 = vrot.lane.b32.xlu1 %v11317_v28, %s10724_s27  ;;  %662 = vrot.lane.b32.xlu0 %v11152_v44, %s10724_s27  ;;  %v454_v53 = vmul.f32 %v19681_v52, %v11423_v56  ;;  %v625_v1 = vmul.f32 %v19682_v0, %v11417_v40  ;;  %v11465_v22 = vor.u32 %v3528_v6, %v3527_v29  ;;  %v3772_v6 = vld [vmem:[#allocation8 + $0x182] ss:$8 sm:$0xf0] }
  0xe8   : > { %v3299_v0 = vrot.slane %v11437_v46, %v11037_v9  ;;  %v11517_v52 = vor.u32 %v3650_v55, %v3649_v54  ;;  %v19690_v55 = vrot.slane %v11077_v43, %v11037_v9  ;;  %v11553_v60 = vor.u32 %v3772_v6, %v3771_v19 }
  0xe9   : > { %v342_v3 = vpop.permute.xlu1 %341  ;;  %v340_v30 = vpop.permute.xlu0 %339  ;;  %v9675_v58 = vpack.c.bf16 %v625_v1, %v454_v53  ;;  %19683 = vst [vmem:[#allocation65_spill] sm:$0xff] %v11465_v22  ;;  %v1029_v53 = vrot.slane %v11186_v20, %v11045_v13  ;;  %v1025_v1 = vrot.slane %v11186_v20, %v11051_v16 }
  0xea   : > { %v11491_v25 = vsel %vm345_vm2, %v342_v3, %v11365_v36  ;;  %v11495_v4 = vsel %vm345_vm2, %v340_v30, %v342_v3  ;;  %19686 = vst [vmem:[#allocation68_spill] sm:$0xff] %v11517_v52  ;;  %v19689_v3 = vrot.slane %v11071_v38, %v11037_v9  ;;  %19695 = vst [vmem:[#allocation73_spill] sm:$0xff] %v11553_v60 }
  0xeb   : > { %835 = vrot.lane.b32.xlu1 %v11317_v28, %s10725_s15  ;;  %833 = vrot.lane.b32.xlu0 %v11152_v44, %s10725_s15  ;;  %19684 = vst [vmem:[#allocation66_spill] sm:$0xff] %v11495_v4  ;;  %v11525_v47 = vmul.f32 %v1029_v53, %v11031_v8  ;;  %v11556_v51 = vmul.f32 %v1025_v1, %v10995_v5 }
  0xec   : > { %9676 = vmatprep.subr.bf16.mxu1 %v9675_v58  ;;  %v452_v45 = vmul.f32 %v19689_v3, %v11495_v4 }
  0xed   : > { %v514_v58 = vpop.permute.xlu1 %513  ;;  %v512_v41 = vpop.permute.xlu0 %511  ;;  %19688 = vst [vmem:[#allocation70_spill] sm:$0xff] %v11525_v47  ;;  %19696 = vst [vmem:[#allocation74_spill] sm:$0xff] %v11556_v51  ;;  %v3307_v51 = vrot.slane %v11437_v46, %v11049_v15 }
  0xee   : > { %v11505_v29 = vsel %vm515_vm0, %v514_v58, %v11363_v48  ;;  %v11509_v36 = vsel %vm515_vm0, %v512_v41, %v514_v58  ;;  %v11520_v48 = vmul.f32 %v3299_v0, %v11031_v8  ;;  %v3295_v58 = vrot.slane %v11437_v46, %v11041_v11 }
  0xef   : > { %19685 = vst [vmem:[#allocation67_spill] sm:$0xff] %v11505_v29  ;;  %1130 = vrot.lane.b32.xlu1 %v11470_v50, %s10726_s16  ;;  %1128 = vrot.lane.b32.xlu0 %v11317_v28, %s10726_s16  ;;  %v623_v54 = vmul.f32 %v19690_v55, %v11509_v36  ;;  %v19691_v0 = vrot.slane %v11071_v38, %v11047_v14 }
  0xf0   : > { %19687 = vst [vmem:[#allocation69_spill] sm:$0xff] %v11520_v48  ;;  %v19692_v8 = vrot.slane %v11077_v43, %v11047_v14 }
  0xf1   : > { %v453_v48 = vmul.f32 %v19691_v0, %v11491_v25  ;;  %v11545_v47 = vpop.permute.xlu1 %509  ;;  %v11547_v57 = vpop.permute.xlu0 %337 }
  0xf2   : > { %v624_v53 = vmul.f32 %v19692_v8, %v11505_v29  ;;  %19693 = vst [vmem:[#allocation71_spill] sm:$0xff] %v11545_v47  ;;  %19694 = vst [vmem:[#allocation72_spill] sm:$0xff] %v11547_v57  ;;  %v11561_v0 = vsel %vm515_vm0, %v11545_v47, %v512_v41  ;;  %v11566_v8 = vsel %vm345_vm2, %v11547_v57, %v340_v30 }
  0xf3   : > { %19697 = vst [vmem:[#allocation75_spill] sm:$0xff] %v11566_v8  ;;  %v9623_v29 = vpack.c.bf16 %v623_v54, %v452_v45  ;;  %1301 = vrot.lane.b32.xlu1 %v11470_v50, %s10727_s17  ;;  %1299 = vrot.lane.b32.xlu0 %v11317_v28, %s10727_s17  ;;  %v19698_v45 = vrot.slane %v11071_v38, %v11041_v11 }
  0xf4   : > { %v9677_v3 = vpack.c.bf16 %v624_v53, %v453_v48  ;;  %v19699_v48 = vrot.slane %v11077_v43, %v11041_v11  ;;  %v11590_v53 = vmul.f32 %v3295_v58, %v10995_v5  ;;  %v19702_v5 = vrot.slane %v11059_v26, %v11045_v13 }
  0xf5   : > { %9624 = vmatprep.subr.bf16.mxu0 %v9623_v29  ;;  %v451_v30 = vmul.f32 %v19698_v45, %v11566_v8  ;;  %v11592_v55 = vpop.permute.xlu1 %656  ;;  %v655_v41 = vpop.permute.xlu0 %654  ;;  %v19704_v45 = vrot.slane %v11059_v26, %v11051_v16  ;;  %v19711_v29 = vrot.slane %v11107_v62, %v11049_v15 }
  0xf6   : > { %v622_v54 = vmul.f32 %v19699_v48, %v11561_v0  ;;  %19700 = vst [vmem:[#allocation76_spill] sm:$0xff] %v11590_v53  ;;  %9678 = vmatpush1.bf16.msra.mxu1 %v9677_v3  ;;  %19701 = vst [vmem:[#allocation77_spill] sm:$0xff] %v11592_v55  ;;  %v11622_v3 = vmul.f32 %v19702_v5, %v11509_v36  ;;  %v11627_v58 = vsel %vm686_vm3, %v655_v41, %v11592_v55 }
  0xf7   : > { %1472 = vrot.lane.b32.xlu1 %v11470_v50, %s10728_s12  ;;  %1470 = vrot.lane.b32.xlu0 %v11317_v28, %s10728_s12  ;;  %v19706_v5 = vrot.slane %v11067_v34, %v11051_v16  ;;  %v796_v57 = vmul.f32 %v19711_v29, %v11627_v58 }
  0xf8   : > { %v9625_v1 = vpack.c.bf16 %v622_v54, %v451_v30  ;;  %19703 = vst [vmem:[#allocation78_spill] sm:$0xff] %v11622_v3  ;;  %v11637_v30 = vmul.f32 %v19704_v45, %v11561_v0  ;;  %v19709_v45 = vrot.slane %v11067_v34, %v11045_v13  ;;  %v19724_v3 = vrot.slane %v11061_v31, %v11037_v9 }
  0xf9   : > { %v11643_v54 = vmul.f32 %v19706_v5, %v11566_v8  ;;  %v11645_v48 = vpop.permute.xlu1 %827  ;;  %v826_v6 = vpop.permute.xlu0 %825 }
  0xfa   : > { %9626 = vmatpush1.bf16.msra.mxu0 %v9625_v1  ;;  %19705 = vst [vmem:[#allocation79_spill] sm:$0xff] %v11637_v30  ;;  %19708 = vst [vmem:[#allocation81_spill] sm:$0xff] %v11645_v48  ;;  %v11655_v19 = vmul.f32 %v19709_v45, %v11495_v4  ;;  %v11660_v5 = vsel %vm857_vm4, %v826_v6, %v11645_v48  ;;  %v19712_v45 = vrot.slane %v11123_v27, %v11049_v15  ;;  %v11683_v1 = vld [vmem:[%s10935_s9 + $0x38] sm:$0xff] }
  0xfb   : > { %19707 = vst [vmem:[#allocation80_spill] sm:$0xff] %v11643_v54  ;;  %1643 = vrot.lane.b32.xlu1 %v11470_v50, %s10729_s10  ;;  %1641 = vrot.lane.b32.xlu0 %v11317_v28, %s10729_s10  ;;  %v19717_v30 = vrot.slane %v11123_v27, %v11037_v9 }
  0xfc   : > { %19710 = vst [vmem:[#allocation82_spill] sm:$0xff] %v11655_v19  ;;  %v967_v4 = vmul.f32 %v19712_v45, %v11660_v5 }
  0xfd   : > { %v685_v43 = vpop.permute.xlu1 %684  ;;  %v683_v53 = vpop.permute.xlu0 %682 }
  0xfe   : > { %v9679_v8 = vpack.c.bf16 %v967_v4, %v796_v57  ;;  %v11719_v47 = vsel %vm686_vm3, %v685_v43, %v655_v41  ;;  %v11723_v4 = vsel %vm686_vm3, %v683_v53, %v685_v43  ;;  %v3303_v41 = vrot.slane %v11437_v46, %v11047_v14 }
  0xff   : > { %325 = vrot.lane.b32.xlu1 %v11683_v1, %s10723_s14  ;;  %323 = vrot.lane.b32.xlu0 %v11470_v50, %s10723_s14  ;;  %v19714_v43 = vrot.slane %v11107_v62, %v11047_v14  ;;  %v19720_v46 = vrot.slane %v11059_v26, %v11039_v10 }
 0x100   : > { %9680 = vmatprep.subr.bf16.mxu1 %v9679_v8 }
 0x101   : > { %v856_v38 = vpop.permute.xlu1 %855  ;;  %v854_v29 = vpop.permute.xlu0 %853  ;;  %v795_v48 = vmul.f32 %v19714_v43, %v11719_v47  ;;  %v11788_v43 = vmul.f32 %v19720_v46, %v11417_v40 }
 0x102   : > { %v11740_v8 = vsel %vm857_vm4, %v856_v38, %v826_v6  ;;  %v11744_v57 = vsel %vm857_vm4, %v854_v29, %v856_v38  ;;  %v19715_v6 = vrot.slane %v11107_v62, %v11037_v9  ;;  %v19716_v38 = vrot.slane %v11123_v27, %v11047_v14 }
 0x103   : > { %19713 = vst [vmem:[#allocation83_spill] sm:$0xff] %v11744_v57  ;;  %v965_v19 = vmul.f32 %v19717_v30, %v11744_v57  ;;  %497 = vrot.lane.b32.xlu1 %v11683_v1, %s10722_s29  ;;  %495 = vrot.lane.b32.xlu0 %v11470_v50, %s10722_s29  ;;  %v19718_v30 = vrot.slane %v11057_v23, %v11037_v9  ;;  %19721 = vst [vmem:[#allocation85_spill] sm:$0xff] %v11788_v43 }
 0x104   : > { %v794_v45 = vmul.f32 %v19715_v6, %v11723_v4  ;;  %v966_v54 = vmul.f32 %v19716_v38, %v11740_v8  ;;  %v11798_v57 = vmul.f32 %v19724_v3, %v11423_v56  ;;  %v19742_v43 = vrot.slane %v11059_v26, %v11043_v12  ;;  %v19761_v26 = vld [vmem:[#allocation48_spill] sm:$0xff] }
 0x105   : > { %v11782_v55 = vmul.f32 %v19718_v30, %v11417_v40  ;;  %v11790_v32 = vpop.permute.xlu1 %851  ;;  %v11792_v6 = vpop.permute.xlu0 %680  ;;  %v19725_v30 = vrot.slane %v11067_v34, %v11039_v10 }
 0x106   : > { %19722 = vst [vmem:[#allocation86_spill] sm:$0xff] %v11790_v32  ;;  %19723 = vst [vmem:[#allocation87_spill] sm:$0xff] %v11792_v6  ;;  %v9627_v38 = vpack.c.bf16 %v965_v19, %v794_v45  ;;  %v9681_v37 = vpack.c.bf16 %v966_v54, %v795_v48  ;;  %v11809_v46 = vsel %vm857_vm4, %v11790_v32, %v854_v29  ;;  %v367_v45 = vld [vmem:[#allocation8 + $0x40] ss:$8 sm:$0xf0] }
 0x107   : > { %19719 = vst [vmem:[#allocation84_spill] sm:$0xff] %v11782_v55  ;;  %v11804_v63 = vmul.f32 %v19725_v30, %v11423_v56  ;;  %19727 = vst [vmem:[#allocation89_spill] sm:$0xff] %v11809_v46  ;;  %v11814_v40 = vsel %vm686_vm3, %v11792_v6, %v683_v53  ;;  %v19728_v19 = vrot.slane %v11123_v27, %v11041_v11  ;;  %668 = vrot.lane.b32.xlu1 %v11683_v1, %s10724_s27 }
 0x108   : > { %v19729_v56 = vrot.slane %v11107_v62, %v11041_v11  ;;  %666 = vrot.lane.b32.xlu0 %v11470_v50, %s10724_s27  ;;  %9628 = vmatprep.subr.bf16.mxu0 %v9627_v38  ;;  %v11837_v30 = vmul.f32 %v3307_v51, %v11317_v28  ;;  %v11848_v29 = vmul.f32 %v3303_v41, %v11152_v44 }
 0x109   : > { %19726 = vst [vmem:[#allocation88_spill] sm:$0xff] %v11804_v63  ;;  %v964_v48 = vmul.f32 %v19728_v19, %v11809_v46  ;;  %v19731_v19 = vrot.slane %v11061_v31, %v11041_v11  ;;  %9682 = vmatpush1.bf16.msra.mxu1 %v9681_v37  ;;  %v11845_v54 = vpop.permute.xlu1 %1122  ;;  %v1121_v38 = vpop.permute.xlu0 %1120  ;;  %v19734_v51 = vrot.slane %v11067_v34, %v11043_v12  ;;  %v19744_v63 = vld [vmem:[#allocation26_spill] sm:$0xff] }
 0x10a   : > { %v793_v3 = vmul.f32 %v19729_v56, %v11814_v40  ;;  %19730 = vst [vmem:[#allocation90_spill] sm:$0xff] %v11837_v30  ;;  %19732 = vst [vmem:[#allocation91_spill] sm:$0xff] %v11845_v54  ;;  %v11861_v37 = vsel %vm1150_vm5, %v1121_v38, %v11845_v54  ;;  %v19740_v41 = vrot.slane %v11057_v23, %v11041_v11 }
 0x10b   : > { %v11843_v56 = vmul.f32 %v19731_v19, %v11491_v25  ;;  %19733 = vst [vmem:[#allocation92_spill] sm:$0xff] %v11848_v29  ;;  %v11856_v6 = vmul.f32 %v19734_v51, %v11491_v25  ;;  %19736 = vst [vmem:[#allocation94_spill] sm:$0xff] %v11861_v37  ;;  %839 = vrot.lane.b32.xlu1 %v11683_v1, %s10725_s15  ;;  %v11874_v25 = vld [vmem:[%s10935_s9 + $0x40] sm:$0xff]  ;;  %v19745_v29 = vrot.slane %v19744_v63, %v11039_v10 }
 0x10c   : > { %v9629_v53 = vpack.c.bf16 %v964_v48, %v793_v3  ;;  %v19737_v3 = vrot.slane %v11176_v42, %v11049_v15  ;;  %19738 = vst [vmem:[#allocation95_spill] sm:$0xff] %v11874_v25  ;;  %v19739_v48 = vld [vmem:[#allocation67_spill] sm:$0xff]  ;;  %837 = vrot.lane.b32.xlu0 %v11470_v50, %s10725_s15 }
 0x10d   : > { %19735 = vst [vmem:[#allocation93_spill] sm:$0xff] %v11856_v6  ;;  %v11884_v32 = vmul.f32 %v19740_v41, %v19739_v48  ;;  %v366_v6 = vld [vmem:[#allocation8 + $0x40] ss:$8 sm:$0xf]  ;;  %v11898_v41 = vmul.f32 %v19742_v43, %v19739_v48  ;;  %v11904_v30 = vmul.f32 %v19745_v29, %v11509_v36  ;;  %v1119_v62 = vpop.permute.xlu0 %1118  ;;  %v19750_v29 = vrot.slane %v11176_v42, %v11037_v9 }
 0x10e   : > { %v1260_v19 = vmul.f32 %v19737_v3, %v11861_v37  ;;  %9630 = vmatpush1.bf16.msra.mxu0 %v9629_v53  ;;  %v1149_v53 = vpop.permute.xlu1 %1148  ;;  %v19747_v3 = vld [vmem:[#allocation45_spill] sm:$0xff]  ;;  %v11911_v27 = vsel %vm1150_vm5, %v1119_v62, %v1121_v38  ;;  %v19751_v38 = vrot.slane %v11176_v42, %v11047_v14 }
 0x10f   : > { %19741 = vst [vmem:[#allocation67_spill] sm:$0xff] %v11884_v32  ;;  %19743 = vst [vmem:[#allocation96_spill] sm:$0xff] %v11898_v41  ;;  %v11915_v43 = vsel %vm1150_vm5, %v1149_v53, %v1119_v62  ;;  %1134 = vrot.lane.b32.xlu1 %v11874_v25, %s10726_s16  ;;  %v11931_v62 = vor.u32 %v367_v45, %v366_v6  ;;  %v537_v48 = vld [vmem:[#allocation8 + $0x41] ss:$8 sm:$0xf]  ;;  %v19753_v41 = vrot.slane %v19744_v63, %v11043_v12 }
 0x110   : > { %19746 = vst [vmem:[#allocation97_spill] sm:$0xff] %v11904_v30  ;;  %v9683_v34 = vpack.c.bf16 %v1260_v19, %v19747_v3  ;;  %19748 = vst [vmem:[#allocation45_spill] sm:$0xff] %v11911_v27  ;;  %v1258_v19 = vmul.f32 %v19750_v29, %v11915_v43  ;;  %v1259_v3 = vmul.f32 %v19751_v38, %v11911_v27  ;;  %v538_v36 = vld [vmem:[#allocation8 + $0x41] ss:$8 sm:$0xf0]  ;;  %1132 = vrot.lane.b32.xlu0 %v11683_v1, %s10726_s16 }
 0x111   : > { %19749 = vst [vmem:[#allocation98_spill] sm:$0xff] %v11915_v43  ;;  %19752 = vst [vmem:[#allocation99_spill] sm:$0xff] %v11931_v62  ;;  %v11939_v29 = vmul.f32 %v19753_v41, %v11561_v0  ;;  %v19755_v6 = vrot.slane %v11186_v20, %v11039_v10  ;;  %v19757_v38 = vrot.slane %v11186_v20, %v11043_v12  ;;  %v11957_v0 = vpop.permute.xlu0 %1146  ;;  %v19760_v41 = vld [vmem:[#allocation46_spill] sm:$0xff] }
 0x112   : > { %9684 = vmatprep.subr.bf16.mxu1 %v9683_v34  ;;  %v11955_v30 = vpop.permute.xlu1 %1291  ;;  %19759 = vst [vmem:[#allocation103_spill] sm:$0xff] %v11957_v0  ;;  %v9685_v34 = vpack.c.bf16 %v1259_v3, %v19761_v26  ;;  %v19762_v20 = vrot.slane %v11113_v18, %v11037_v9  ;;  %v708_v3 = vld [vmem:[#allocation8 + $0x42] ss:$8 sm:$0xf] }
 0x113   : > { %19754 = vst [vmem:[#allocation100_spill] sm:$0xff] %v11939_v29  ;;  %v11947_v45 = vmul.f32 %v19755_v6, %v11317_v28  ;;  %v11953_v51 = vmul.f32 %v19757_v38, %v11152_v44  ;;  %v9631_v29 = vpack.c.bf16 %v1258_v19, %v19760_v41  ;;  %v11974_v6 = vsel %vm1150_vm5, %v11957_v0, %v1149_v53  ;;  %v709_v38 = vld [vmem:[#allocation8 + $0x42] ss:$8 sm:$0xf0] }
 0x114   : > { %v11969_v44 = vmul.f32 %v19762_v20, %v11627_v58  ;;  %19764 = vst [vmem:[#allocation48_spill] sm:$0xff] %v11974_v6  ;;  %v11978_v19 = vor.u32 %v538_v36, %v537_v48  ;;  %v19766_v41 = vrot.slane %v11176_v42, %v11041_v11  ;;  %1305 = vrot.lane.b32.xlu1 %v11874_v25, %s10727_s17  ;;  %v19767_v48 = vld [vmem:[#allocation29_spill] sm:$0xff] }
 0x115   : > { %19756 = vst [vmem:[#allocation101_spill] sm:$0xff] %v11947_v45  ;;  %19758 = vst [vmem:[#allocation102_spill] sm:$0xff] %v11953_v51  ;;  %9632 = vmatprep.subr.bf16.mxu0 %v9631_v29  ;;  %v19768_v36 = vrot.slane %v19767_v48, %v11039_v10  ;;  %1303 = vrot.lane.b32.xlu0 %v11683_v1, %s10727_s17  ;;  %v12003_v28 = vpop.permute.xlu0 %1293  ;;  %v19771_v20 = vld [vmem:[#allocation49_spill] sm:$0xff]  ;;  %v19773_v29 = vrot.slane %v11133_v33, %v11037_v9 }
 0x116   : > { %19763 = vst [vmem:[#allocation46_spill] sm:$0xff] %v11969_v44  ;;  %19765 = vst [vmem:[#allocation104_spill] sm:$0xff] %v11978_v19  ;;  %v1257_v54 = vmul.f32 %v19766_v41, %v11974_v6  ;;  %9686 = vmatpush1.bf16.msra.mxu1 %v9685_v34  ;;  %v1463_v53 = vpop.permute.xlu1 %1462  ;;  %v12010_v34 = vor.u32 %v709_v38, %v708_v3  ;;  %v880_v51 = vld [vmem:[#allocation8 + $0x43] ss:$8 sm:$0xf0] }
 0x117   : > { %v11994_v26 = vmul.f32 %v19768_v36, %v11627_v58  ;;  %19770 = vst [vmem:[#allocation106_spill] sm:$0xff] %v12003_v28  ;;  %v12016_v41 = vmul.f32 %v19773_v29, %v11660_v5  ;;  %v1172_v36 = vld [vmem:[#allocation8 + $0x45] ss:$8 sm:$0xf] }
 0x118   : > { %v9633_v0 = vpack.c.bf16 %v1257_v54, %v19771_v20  ;;  %19772 = vst [vmem:[#allocation49_spill] sm:$0xff] %v12010_v34  ;;  %1476 = vrot.lane.b32.xlu1 %v11874_v25, %s10728_s12  ;;  %v19775_v54 = vld [vmem:[#allocation32_spill] sm:$0xff]  ;;  %v19890_v19 = vld [vmem:[#allocation62_spill] sm:$0xff] }
 0x119   : > { %19769 = vst [vmem:[#allocation105_spill] sm:$0xff] %v11994_v26  ;;  %v879_v26 = vld [vmem:[#allocation8 + $0x43] ss:$8 sm:$0xf]  ;;  %19774 = vst [vmem:[#allocation107_spill] sm:$0xff] %v12016_v41  ;;  %v19776_v58 = vrot.slane %v19775_v54, %v11039_v10  ;;  %1474 = vrot.lane.b32.xlu0 %v11683_v1, %s10728_s12 }
 0x11a   : > { %9634 = vmatpush1.bf16.msra.mxu0 %v9633_v0  ;;  %v12043_v0 = vsel %vm1321_vm6, %v11955_v30, %v12003_v28  ;;  %v12049_v29 = vor.u32 %v880_v51, %v879_v26  ;;  %v1173_v3 = vld [vmem:[#allocation8 + $0x45] ss:$8 sm:$0xf0]  ;;  %v1290_v45 = vpop.permute.xlu1 %1289  ;;  %v19782_v26 = vrot.slane %v19767_v48, %v11043_v12  ;;  %v1343_v41 = vld [vmem:[#allocation8 + $0x46] ss:$8 sm:$0xf] }
 0x11b   : > { %v12037_v20 = vmul.f32 %v19776_v58, %v11660_v5  ;;  %v19779_v5 = vrot.slane %v11113_v18, %v11041_v11  ;;  %v12077_v18 = vld [vmem:[%s10935_s9 + $0x8] sm:$0xff]  ;;  %v19785_v51 = vld [vmem:[#allocation33_spill] sm:$0xff]  ;;  %v12099_v28 = vor.u32 %v1173_v3, %v1172_v36 }
 0x11c   : > { %19778 = vst [vmem:[#allocation109_spill] sm:$0xff] %v12049_v29  ;;  %v12069_v38 = vmul.f32 %v19782_v26, %v11719_v47  ;;  %19784 = vst [vmem:[#allocation113_spill] sm:$0xff] %v12077_v18  ;;  %v19786_v23 = vrot.slane %v19785_v51, %v11039_v10  ;;  %1647 = vrot.lane.b32.xlu1 %v11874_v25, %s10729_s10  ;;  %v12121_v36 = vld [vmem:[%s10935_s9 + $0x48] sm:$0xff]  ;;  %v19795_v18 = vrot.slane %v19775_v54, %v11043_v12 }
 0x11d   : > { %19777 = vst [vmem:[#allocation108_spill] sm:$0xff] %v12037_v20  ;;  %v12055_v58 = vmul.f32 %v19779_v5, %v11719_v47  ;;  %v12057_v20 = vpop.permute.xlu0 %1464  ;;  %v19788_v47 = vrot.slane %v11226_v59, %v11049_v15  ;;  %19790 = vst [vmem:[#allocation115_spill] sm:$0xff] %v12099_v28  ;;  %1645 = vrot.lane.b32.xlu0 %v11683_v1, %s10729_s10  ;;  %v1514_v29 = vld [vmem:[#allocation8 + $0x47] ss:$8 sm:$0xf] }
 0x11e   : > { %19781 = vst [vmem:[#allocation111_spill] sm:$0xff] %v12057_v20  ;;  %19783 = vst [vmem:[#allocation112_spill] sm:$0xff] %v12069_v38  ;;  %v12074_v5 = vsel %vm1492_vm7, %v1463_v53, %v12057_v20  ;;  %v12087_v55 = vmul.f32 %v19786_v23, %v11723_v4  ;;  %v19789_v38 = vrot.slane %v11244_v17, %v11049_v15  ;;  %v1461_v3 = vpop.permute.xlu1 %1460 }
 0x11f   : > { %19780 = vst [vmem:[#allocation110_spill] sm:$0xff] %v12055_v58  ;;  %v1431_v26 = vmul.f32 %v19788_v47, %v12043_v0  ;;  %v19791_v23 = vrot.slane %v19767_v48, %v11045_v13  ;;  %v19793_v47 = vrot.slane %v11133_v33, %v11041_v11  ;;  %v12135_v44 = vmul.f32 %v19795_v18, %v11740_v8  ;;  %v19805_v58 = vld [vmem:[#allocation35_spill] sm:$0xff] }
 0x120   : > { %19787 = vst [vmem:[#allocation114_spill] sm:$0xff] %v12087_v55  ;;  %v1602_v20 = vmul.f32 %v19789_v38, %v12074_v5  ;;  %v12116_v38 = vsel %vm1321_vm6, %v1290_v45, %v11955_v30  ;;  %v19800_v30 = vrot.slane %v19775_v54, %v11045_v13  ;;  %v19802_v18 = vrot.slane %v11226_v59, %v11047_v14 }
 0x121   : > { %v12105_v42 = vmul.f32 %v19791_v23, %v11723_v4  ;;  %v12111_v55 = vmul.f32 %v19793_v47, %v11740_v8  ;;  %v1320_v23 = vpop.permute.xlu0 %1319  ;;  %19796 = vst [vmem:[#allocation118_spill] sm:$0xff] %v12135_v44  ;;  %v12139_v4 = vsel %vm1492_vm7, %v1461_v3, %v1463_v53  ;;  %v19799_v47 = vld [vmem:[#allocation83_spill] sm:$0xff]  ;;  %v19803_v53 = vrot.slane %v11244_v17, %v11047_v14 }
 0x122   : > { %19797 = vst [vmem:[#allocation119_spill] sm:$0xff] %v12139_v4  ;;  %v12149_v33 = vmul.f32 %v19800_v30, %v19799_v47  ;;  %v1430_v8 = vmul.f32 %v19802_v18, %v12116_v38  ;;  %329 = vrot.lane.b32.xlu1 %v12121_v36, %s10723_s14  ;;  %v12165_v30 = vsel %vm1321_vm6, %v1320_v23, %v1290_v45  ;;  %v12170_v18 = vld [vmem:[%s10935_s9] sm:$0xff] }
 0x123   : > { %19792 = vst [vmem:[#allocation116_spill] sm:$0xff] %v12105_v42  ;;  %19794 = vst [vmem:[#allocation117_spill] sm:$0xff] %v12111_v55  ;;  %v9687_v42 = vpack.c.bf16 %v1602_v20, %v1431_v26  ;;  %v1601_v44 = vmul.f32 %v19803_v53, %v12139_v4  ;;  %v1344_v20 = vld [vmem:[#allocation8 + $0x46] ss:$8 sm:$0xf0]  ;;  %327 = vrot.lane.b32.xlu0 %v11874_v25, %s10723_s14  ;;  %v19807_v53 = vrot.slane %v19775_v54, %v11051_v16 }
 0x124   : > { %19801 = vst [vmem:[#allocation120_spill] sm:$0xff] %v12149_v33  ;;  %v12176_v33 = vpop.permute.xlu1 %1317  ;;  %v19809_v47 = vrot.slane %v19785_v51, %v11043_v12  ;;  %v12200_v45 = vor.u32 %v1344_v20, %v1343_v41  ;;  %v1515_v4 = vld [vmem:[#allocation8 + $0x47] ss:$8 sm:$0xf0]  ;;  %v19813_v54 = vrot.slane %v19767_v48, %v11051_v16 }
 0x125   : > { %9688 = vmatprep.subr.bf16.mxu1 %v9687_v42  ;;  %19804 = vst [vmem:[#allocation121_spill] sm:$0xff] %v12176_v33  ;;  %v1491_v26 = vpop.permute.xlu0 %1490  ;;  %v9689_v32 = vpack.c.bf16 %v1601_v44, %v1430_v8  ;;  %v19806_v42 = vld [vmem:[#allocation63_spill] sm:$0xff]  ;;  %v12188_v55 = vmul.f32 %v19807_v53, %v11809_v46  ;;  %v19815_v46 = vrot.slane %v11226_v59, %v11037_v9  ;;  %v19817_v41 = vld [vmem:[#allocation64_spill] sm:$0xff] }
 0x126   : > { %v12194_v44 = vmul.f32 %v19809_v47, %v11814_v40  ;;  %v12198_v8 = vsel %vm1492_vm7, %v1491_v26, %v1461_v3  ;;  %19812 = vst [vmem:[#allocation125_spill] sm:$0xff] %v12200_v45  ;;  %v12206_v53 = vmul.f32 %v19813_v54, %v11814_v40  ;;  %v19816_v3 = vrot.slane %v11244_v17, %v11037_v9  ;;  %v19975_v45 = vld [vmem:[#allocation27_spill] sm:$0xff] }
 0x127   : > { %19808 = vst [vmem:[#allocation122_spill] sm:$0xff] %v12188_v55  ;;  %19811 = vst [vmem:[#allocation124_spill] sm:$0xff] %v12198_v8  ;;  %v1429_v47 = vmul.f32 %v19815_v46, %v12165_v30  ;;  %501 = vrot.lane.b32.xlu1 %v12121_v36, %s10722_s29  ;;  %v3315_v20 = vrot.slane %v19817_v41, %v11045_v13  ;;  %v12223_v40 = vsel %vm1321_vm6, %v12176_v33, %v1320_v23  ;;  %v1685_v23 = vld [vmem:[#allocation8 + $0xc0] ss:$8 sm:$0xf] }
 0x128   : > { %19810 = vst [vmem:[#allocation123_spill] sm:$0xff] %v12194_v44  ;;  %19814 = vst [vmem:[#allocation126_spill] sm:$0xff] %v12206_v53  ;;  %v1600_v44 = vmul.f32 %v19816_v3, %v12198_v8  ;;  %499 = vrot.lane.b32.xlu0 %v11874_v25, %s10722_s29  ;;  %9690 = vmatpush1.bf16.msra.mxu1 %v9689_v32  ;;  %v316_v3 = vpop.permute.xlu1 %315  ;;  %v12237_v33 = vor.u32 %v1515_v4, %v1514_v29  ;;  %v1686_v29 = vld [vmem:[#allocation8 + $0xc0] ss:$8 sm:$0xf0] }
 0x129   : > { %v12231_v55 = vpop.permute.xlu0 %1488  ;;  %v19820_v32 = vrot.slane %v19805_v58, %v11037_v9  ;;  %v19821_v4 = vrot.slane %v11226_v59, %v11041_v11 }
 0x12a   : > { %19818 = vst [vmem:[#allocation127_spill] sm:$0xff] %v12231_v55  ;;  %v9635_v53 = vpack.c.bf16 %v1600_v44, %v1429_v47  ;;  %19819 = vst [vmem:[#allocation128_spill] sm:$0xff] %v12237_v33  ;;  %v12248_v54 = vsel %vm1492_vm7, %v12231_v55, %v1491_v26  ;;  %v12267_v44 = vmul.f32 %v3315_v20, %v11683_v1  ;;  %v19832_v20 = vld [vmem:[#allocation61_spill] sm:$0xff] }
 0x12b   : > { %v12243_v46 = vmul.f32 %v19820_v32, %v11861_v37  ;;  %v1428_v48 = vmul.f32 %v19821_v4, %v12223_v40  ;;  %v19822_v32 = vrot.slane %v11244_v17, %v11041_v11  ;;  %672 = vrot.lane.b32.xlu1 %v12121_v36, %s10724_s27  ;;  %v19826_v4 = vrot.slane %v19805_v58, %v11041_v11  ;;  %v19827_v17 = vld [vmem:[#allocation37_spill] sm:$0xff] }
 0x12c   : > { %19823 = vst [vmem:[#allocation129_spill] sm:$0xff] %v12267_v44  ;;  %670 = vrot.lane.b32.xlu0 %v11874_v25, %s10724_s27  ;;  %9636 = vmatprep.subr.bf16.mxu0 %v9635_v53  ;;  %v1634_v55 = vpop.permute.xlu1 %1633  ;;  %v12283_v53 = vor.u32 %v1686_v29, %v1685_v23 }
 0x12d   : > { %v1599_v37 = vmul.f32 %v19822_v32, %v12248_v54  ;;  %v3311_v32 = vrot.slane %v19817_v41, %v11051_v16  ;;  %v12277_v59 = vpop.permute.xlu0 %317  ;;  %v12289_v47 = vmul.f32 %v19826_v4, %v11911_v27  ;;  %v19828_v41 = vrot.slane %v19827_v17, %v11039_v10 }
 0x12e   : > { %19824 = vst [vmem:[#allocation130_spill] sm:$0xff] %v12277_v59  ;;  %19825 = vst [vmem:[#allocation131_spill] sm:$0xff] %v12283_v53  ;;  %v19830_v4 = vrot.slane %v19827_v17, %v11043_v12  ;;  %v12324_v23 = vsel %vm345_vm2, %v316_v3, %v12277_v59 }
 0x12f   : > { %v9637_v26 = vpack.c.bf16 %v1599_v37, %v1428_v48  ;;  %v12295_v37 = vmul.f32 %v19828_v41, %v11915_v43  ;;  %843 = vrot.lane.b32.xlu1 %v12121_v36, %s10725_s15  ;;  %v12329_v41 = vld [vmem:[%s10935_s9 + $0x50] sm:$0xff]  ;;  %v12332_v29 = vmul.f32 %v3311_v32, %v11470_v50  ;;  %v19835_v32 = vrot.slane %v11236_v49, %v11037_v9 }
 0x130   : > { %v12314_v48 = vmul.f32 %v19830_v4, %v11974_v6  ;;  %841 = vrot.lane.b32.xlu0 %v11874_v25, %s10725_s15  ;;  %v1632_v4 = vpop.permute.xlu1 %1631  ;;  %v19838_v6 = vrot.slane %v11061_v31, %v11047_v14 }
 0x131   : > { %19829 = vst [vmem:[#allocation132_spill] sm:$0xff] %v12295_v37  ;;  %9638 = vmatpush1.bf16.msra.mxu0 %v9637_v26  ;;  %v12319_v26 = vsel %vm345_vm2, %v19832_v20, %v316_v3  ;;  %19833 = vst [vmem:[#allocation61_spill] sm:$0xff] %v12332_v29  ;;  %v12334_v44 = vpop.permute.xlu0 %1635  ;;  %v12348_v43 = vmul.f32 %v19835_v32, %v12043_v0  ;;  %v19839_v32 = vrot.slane %v11061_v31, %v11049_v15 }
 0x132   : > { %19831 = vst [vmem:[#allocation133_spill] sm:$0xff] %v12314_v48  ;;  %19834 = vst [vmem:[#allocation134_spill] sm:$0xff] %v12334_v44  ;;  %v12352_v48 = vsel %vm1663_vm8, %v1632_v4, %v1634_v55  ;;  %v12357_v20 = vsel %vm1663_vm8, %v1634_v55, %v12334_v44  ;;  %v1894_v3 = vmul.f32 %v19838_v6, %v12319_v26  ;;  %v19842_v6 = vld [vmem:[#allocation42_spill] sm:$0xff] }
 0x133   : > { %19836 = vst [vmem:[#allocation135_spill] sm:$0xff] %v12352_v48  ;;  %19837 = vst [vmem:[#allocation136_spill] sm:$0xff] %v12357_v20  ;;  %v1895_v37 = vmul.f32 %v19839_v32, %v12324_v23  ;;  %v19840_v29 = vrot.slane %v11325_v24, %v11047_v14  ;;  %v19841_v55 = vrot.slane %v11325_v24, %v11049_v15  ;;  %1138 = vrot.lane.b32.xlu1 %v12329_v41, %s10726_s16  ;;  %v1002_v44 = vld [vmem:[#allocation8 + $0x44] ss:$8 sm:$0xf0] }
 0x134   : > { %v19843_v62 = vrot.slane %v19842_v6, %v11039_v10  ;;  %1136 = vrot.lane.b32.xlu0 %v12121_v36, %s10726_s16  ;;  %v12393_v53 = vpop.permute.xlu1 %1659  ;;  %v19887_v32 = vld [vmem:[#allocation110_spill] sm:$0xff] }
 0x135   : > { %v1772_v60 = vmul.f32 %v19840_v29, %v12352_v48  ;;  %v1773_v27 = vmul.f32 %v19841_v55, %v12357_v20  ;;  %19846 = vst [vmem:[#allocation138_spill] sm:$0xff] %v12393_v53  ;;  %v1662_v25 = vpop.permute.xlu0 %1661 }
 0x136   : > { %v12383_v59 = vmul.f32 %v19843_v62, %v12043_v0  ;;  %v12402_v29 = vsel %vm1663_vm8, %v12393_v53, %v1662_v25  ;;  %v12406_v31 = vsel %vm1663_vm8, %v1662_v25, %v1632_v4  ;;  %v19850_v0 = vrot.slane %v11325_v24, %v11041_v11 }
 0x137   : > { %v9691_v33 = vpack.c.bf16 %v1895_v37, %v1773_v27  ;;  %v9693_v52 = vpack.c.bf16 %v1894_v3, %v1772_v60  ;;  %19847 = vst [vmem:[#allocation139_spill] sm:$0xff] %v12402_v29  ;;  %19848 = vst [vmem:[#allocation140_spill] sm:$0xff] %v12406_v31  ;;  %v19849_v37 = vrot.slane %v11236_v49, %v11041_v11  ;;  %1309 = vrot.lane.b32.xlu1 %v12329_v41, %s10727_s17 }
 0x138   : > { %19844 = vst [vmem:[#allocation137_spill] sm:$0xff] %v12383_v59  ;;  %v1001_v59 = vld [vmem:[#allocation8 + $0x44] ss:$8 sm:$0xf]  ;;  %v1770_v62 = vmul.f32 %v19850_v0, %v12402_v29  ;;  %v19851_v25 = vrot.slane %v11325_v24, %v11037_v9  ;;  %1307 = vrot.lane.b32.xlu0 %v12121_v36, %s10727_s17 }
 0x139   : > { %v12416_v3 = vmul.f32 %v19849_v37, %v12116_v38  ;;  %9692 = vmatprep.subr.bf16.mxu1 %v9691_v33  ;;  %v12436_v27 = vor.u32 %v1002_v44, %v1001_v59  ;;  %v488_v55 = vpop.permute.xlu0 %487  ;;  %v19854_v37 = vrot.slane %v19842_v6, %v11043_v12  ;;  %v19862_v33 = vrot.slane %v11246_v7, %v11041_v11 }
 0x13a   : > { %v1771_v4 = vmul.f32 %v19851_v25, %v12406_v31  ;;  %9694 = vmatpush1.bf16.msra.mxu1 %v9693_v52  ;;  %v12438_v25 = vpop.permute.xlu1 %489  ;;  %v9641_v60 = vpack.c.bf16 %v11843_v56, %v1770_v62  ;;  %v19856_v52 = vrot.slane %v11246_v7, %v11037_v9 }
 0x13b   : > { %19852 = vst [vmem:[#allocation141_spill] sm:$0xff] %v12436_v27  ;;  %19853 = vst [vmem:[#allocation142_spill] sm:$0xff] %v12438_v25  ;;  %v12450_v59 = vmul.f32 %v19854_v37, %v12116_v38  ;;  %1480 = vrot.lane.b32.xlu1 %v12329_v41, %s10728_s12  ;;  %v1045_v37 = vrot.slane %v12436_v27, %v11037_v9 }
 0x13c   : > { %v9639_v31 = vpack.c.bf16 %v11798_v57, %v1771_v4  ;;  %v12456_v44 = vmul.f32 %v19856_v52, %v12074_v5  ;;  %v19857_v57 = vld [vmem:[#allocation47_spill] sm:$0xff]  ;;  %1478 = vrot.lane.b32.xlu0 %v12121_v36, %s10728_s12 }
 0x13d   : > { %19855 = vst [vmem:[#allocation143_spill] sm:$0xff] %v12450_v59  ;;  %v19858_v56 = vrot.slane %v19857_v57, %v11039_v10  ;;  %v19861_v52 = vld [vmem:[#allocation119_spill] sm:$0xff]  ;;  %v19863_v0 = vrot.slane %v19857_v57, %v11043_v12 }
 0x13e   : > { %9640 = vmatprep.subr.bf16.mxu0 %v9639_v31  ;;  %v12494_v53 = vmul.f32 %v19862_v33, %v19861_v52  ;;  %v659_v31 = vpop.permute.xlu0 %658  ;;  %v19867_v33 = vld [vmem:[#allocation50_spill] sm:$0xff] }
 0x13f   : > { %v12462_v62 = vmul.f32 %v19858_v56, %v12074_v5  ;;  %v12479_v5 = vsel %vm515_vm0, %v488_v55, %v12438_v25  ;;  %v19860_v56 = vld [vmem:[#allocation60_spill] sm:$0xff]  ;;  %v12500_v38 = vmul.f32 %v19863_v0, %v19861_v52  ;;  %9642 = vmatpush1.bf16.msra.mxu0 %v9641_v60  ;;  %v19868_v24 = vrot.slane %v19867_v33, %v11039_v10  ;;  %v19872_v52 = vld [vmem:[#allocation46_spill] sm:$0xff]  ;;  %v19888_v25 = vld [vmem:[#allocation67_spill] sm:$0xff] }
 0x140   : > { %v12484_v4 = vsel %vm515_vm0, %v19860_v56, %v488_v55  ;;  %v12502_v55 = vpop.permute.xlu1 %660  ;;  %v19870_v60 = vrot.slane %v19842_v6, %v11045_v13  ;;  %v19875_v56 = vld [vmem:[#allocation77_spill] sm:$0xff]  ;;  %1651 = vrot.lane.b32.xlu1 %v12329_v41, %s10729_s10  ;;  %1649 = vrot.lane.b32.xlu0 %v12121_v36, %s10729_s10  ;;  %v19889_v29 = vpack.c.bf16 %v19887_v32, %v19888_v25  ;;  %v19896_v25 = vld [vmem:[#allocation107_spill] sm:$0xff] }
 0x141   : > { %19859 = vst [vmem:[#allocation144_spill] sm:$0xff] %v12462_v62  ;;  %19864 = vst [vmem:[#allocation60_spill] sm:$0xff] %v12500_v38  ;;  %v12512_v51 = vmul.f32 %v19868_v24, %v12165_v30  ;;  %v19873_v38 = vld [vmem:[#allocation84_spill] sm:$0xff]  ;;  %v12526_v62 = vsel %vm686_vm3, %v659_v31, %v12502_v55  ;;  %v12531_v24 = vsel %vm686_vm3, %v19875_v56, %v659_v31 }
 0x142   : > { %19865 = vst [vmem:[#allocation119_spill] sm:$0xff] %v12502_v55  ;;  %v12518_v0 = vmul.f32 %v19870_v60, %v12165_v30  ;;  %v19874_v34 = vpack.c.bf16 %v19872_v52, %v19873_v38  ;;  %v19879_v60 = vld [vmem:[#allocation28_spill] sm:$0xff] }
 0x143   : > { %19869 = vst [vmem:[#allocation145_spill] sm:$0xff] %v12512_v51  ;;  %v19876_v51 = vld [vmem:[#allocation19_spill] sm:$0xff]  ;;  %v19880_v52 = vrot.slane %v19879_v60, %v11047_v14  ;;  %v19881_v31 = vrot.slane %v19879_v60, %v11049_v15  ;;  %v19885_v60 = vrot.slane %v19867_v33, %v11043_v12 }
 0x144   : > { %19871 = vst [vmem:[#allocation146_spill] sm:$0xff] %v12518_v0  ;;  %9644 = vmatprep.subr.bf16.mxu0 %v19874_v34  ;;  %v19877_v63 = vrot.slane %v19876_v51, %v11047_v14  ;;  %v19878_v38 = vrot.slane %v19876_v51, %v11049_v15  ;;  %331 = vrot.lane.b32.xlu0 %v12329_v41, %s10723_s14 }
 0x145   : > { %v2138_v0 = vmul.f32 %v19880_v52, %v12531_v24  ;;  %v2139_v56 = vmul.f32 %v19881_v31, %v12526_v62  ;;  %v12569_v55 = vmul.f32 %v19885_v60, %v12223_v40  ;;  %9646 = vmatpush1.bf16.msra.mxu0 %v19889_v29  ;;  %v19891_v31 = vrot.slane %v19842_v6, %v11051_v16  ;;  %v19895_v29 = vld [vmem:[#allocation113_spill] sm:$0xff] }
 0x146   : > { %v2016_v30 = vmul.f32 %v19877_v63, %v12484_v4  ;;  %v2017_v34 = vmul.f32 %v19878_v38, %v12479_v5  ;;  %v12554_v63 = vld [vmem:[%s10935_s9 + $0x58] sm:$0xff]  ;;  %v12557_v38 = vmul.f32 %v1045_v37, %v11683_v1  ;;  %v12574_v1 = vpop.permute.xlu1 %831  ;;  %v830_v37 = vpop.permute.xlu0 %829  ;;  %v19893_v60 = vrot.slane %v19857_v57, %v11045_v13  ;;  %v10537_v6 = vld [vmem:[%s10935_s9 + $0x10] sm:$0xff] }
 0x147   : > { %19882 = vst [vmem:[#allocation46_spill] sm:$0xff] %v12554_v63  ;;  %19886 = vst [vmem:[#allocation77_spill] sm:$0xff] %v12569_v55  ;;  %v12582_v52 = vmul.f32 %v19891_v31, %v12223_v40  ;;  %v19897_v55 = vpack.c.bf16 %v19895_v29, %v19896_v25  ;;  %v19900_v31 = vld [vmem:[#allocation31_spill] sm:$0xff]  ;;  %333 = vrot.lane.b32.xlu1 %v12554_v63, %s10723_s14 }
 0x148   : > { %19883 = vst [vmem:[#allocation84_spill] sm:$0xff] %v12557_v38  ;;  %v9695_v51 = vpack.c.bf16 %v2139_v56, %v2017_v34  ;;  %v9697_v38 = vpack.c.bf16 %v2138_v0, %v2016_v30  ;;  %v12588_v32 = vmul.f32 %v19893_v60, %v12198_v8  ;;  %v12596_v0 = vsel %vm857_vm4, %v830_v37, %v12574_v1  ;;  %v19898_v30 = vld [vmem:[#allocation81_spill] sm:$0xff] }
 0x149   : > { %19892 = vst [vmem:[#allocation110_spill] sm:$0xff] %v12582_v52  ;;  %9648 = vmatprep.subr.bf16.mxu0 %v19897_v55  ;;  %v12601_v40 = vsel %vm857_vm4, %v19898_v30, %v830_v37  ;;  %v19899_v34 = vrot.slane %v11333_v35, %v11037_v9  ;;  %v19901_v55 = vrot.slane %v19900_v31, %v11047_v14  ;;  %v10536_v30 = vld [vmem:[%s10935_s9 + $0x18] sm:$0xff] }
 0x14a   : > { %19894 = vst [vmem:[#allocation67_spill] sm:$0xff] %v12588_v32  ;;  %v19902_v29 = vrot.slane %v19900_v31, %v11049_v15  ;;  %v1041_v37 = vrot.slane %v12436_v27, %v11041_v11  ;;  %9696 = vmatprep.subr.bf16.mxu1 %v9695_v51  ;;  %v12634_v51 = vpop.permute.xlu1 %1126  ;;  %v1125_v52 = vpop.permute.xlu0 %1124  ;;  %v19906_v31 = vld [vmem:[#allocation23_spill] sm:$0xff]  ;;  %503 = vrot.lane.b32.xlu0 %v12329_v41, %s10722_s29 }
 0x14b   : > { %v2763_v56 = vmul.f32 %v19899_v34, %v12357_v20  ;;  %v2260_v60 = vmul.f32 %v19901_v55, %v12601_v40  ;;  %v19904_v20 = vld [vmem:[#allocation117_spill] sm:$0xff]  ;;  %9698 = vmatpush1.bf16.msra.mxu1 %v9697_v38  ;;  %v19907_v55 = vrot.slane %v19906_v31, %v11051_v16  ;;  %505 = vrot.lane.b32.xlu1 %v12554_v63, %s10722_s29 }
 0x14c   : > { %v2261_v25 = vmul.f32 %v19902_v29, %v12596_v0  ;;  %v19903_v29 = vrot.slane %v11333_v35, %v11041_v11  ;;  %v19905_v8 = vpack.c.bf16 %v12170_v18, %v19904_v20  ;;  %v19910_v38 = vld [vmem:[#allocation53_spill] sm:$0xff]  ;;  %v19922_v20 = vld [vmem:[#allocation106_spill] sm:$0xff] }
 0x14d   : > { %v9701_v34 = vpack.c.bf16 %v10537_v6, %v2260_v60  ;;  %v12642_v28 = vmul.f32 %v19907_v55, %v12319_v26  ;;  %v19911_v60 = vrot.slane %v19910_v38, %v11043_v12  ;;  %v19916_v55 = vrot.slane %v11359_v39, %v11037_v9 }
 0x14e   : > { %v2762_v59 = vmul.f32 %v19903_v29, %v12352_v48  ;;  %9650 = vmatpush1.bf16.msra.mxu0 %v19905_v8  ;;  %v9699_v32 = vpack.c.bf16 %v10536_v30, %v2261_v25  ;;  %v19908_v29 = vrot.slane %v11295_v21, %v11041_v11  ;;  %v19909_v8 = vpack.c.bf16 %v12348_v43, %v12243_v46 }
 0x14f   : > { %v12659_v25 = vmul.f32 %v19911_v60, %v12248_v54  ;;  %v9655_v43 = vpack.c.bf16 %v2763_v56, %v12456_v44  ;;  %v12671_v46 = vmul.f32 %v1041_v37, %v11470_v50  ;;  %v19918_v50 = vrot.slane %v11295_v21, %v11037_v9  ;;  %676 = vrot.lane.b32.xlu1 %v12554_v63, %s10724_s27 }
 0x150   : > { %v2884_v18 = vmul.f32 %v19908_v29, %v12319_v26  ;;  %9652 = vmatprep.subr.bf16.mxu0 %v19909_v8  ;;  %v19913_v26 = vrot.slane %v19857_v57, %v11051_v16  ;;  %v3007_v29 = vmul.f32 %v19916_v55, %v12479_v5  ;;  %v12680_v8 = vsel %vm1150_vm5, %v1125_v52, %v12634_v51  ;;  %v1296_v55 = vpop.permute.xlu0 %1295 }
 0x151   : > { %19912 = vst [vmem:[#allocation113_spill] sm:$0xff] %v12659_v25  ;;  %19915 = vst [vmem:[#allocation81_spill] sm:$0xff] %v12671_v46  ;;  %9700 = vmatprep.subr.bf16.mxu1 %v9699_v32  ;;  %v2885_v44 = vmul.f32 %v19918_v50, %v12324_v23  ;;  %v19919_v56 = vrot.slane %v11359_v39, %v11041_v11  ;;  %v9657_v32 = vpack.c.bf16 %v2762_v59, %v12494_v53 }
 0x152   : > { %v12665_v30 = vmul.f32 %v19913_v26, %v12248_v54  ;;  %v19917_v54 = vld [vmem:[#allocation91_spill] sm:$0xff]  ;;  %v19920_v26 = vpack.c.bf16 %v12416_v3, %v12289_v47  ;;  %9702 = vmatpush1.bf16.msra.mxu1 %v9701_v34  ;;  %v12715_v47 = vsel %vm1321_vm6, %v19922_v20, %v1296_v55  ;;  %v19923_v53 = vrot.slane %v19805_v58, %v11047_v14 }
 0x153   : > { %v12685_v60 = vsel %vm1150_vm5, %v19917_v54, %v1125_v52  ;;  %v3006_v37 = vmul.f32 %v19919_v56, %v12484_v4  ;;  %v12700_v52 = vpop.permute.xlu1 %1297  ;;  %v19921_v54 = vrot.slane %v19890_v19, %v11037_v9  ;;  %v19924_v59 = vrot.slane %v19805_v58, %v11049_v15  ;;  %674 = vrot.lane.b32.xlu0 %v12329_v41, %s10724_s27 }
 0x154   : > { %19914 = vst [vmem:[#allocation107_spill] sm:$0xff] %v12665_v30  ;;  %9654 = vmatpush1.bf16.msra.mxu0 %v19920_v26  ;;  %v12710_v56 = vsel %vm1321_vm6, %v1296_v55, %v12700_v52  ;;  %v2398_v3 = vmul.f32 %v19923_v53, %v12685_v60  ;;  %v19926_v20 = vrot.slane %v11236_v49, %v11049_v15  ;;  %v1467_v25 = vpop.permute.xlu0 %1466 }
 0x155   : > { %v3251_v50 = vmul.f32 %v19921_v54, %v12596_v0  ;;  %9656 = vmatprep.subr.bf16.mxu0 %v9655_v43  ;;  %v2399_v34 = vmul.f32 %v19924_v59, %v12680_v8  ;;  %v19925_v43 = vrot.slane %v11236_v49, %v11047_v14  ;;  %v9659_v54 = vpack.c.bf16 %v3007_v29, %v2885_v44 }
 0x156   : > { %v2521_v55 = vmul.f32 %v19926_v20, %v12710_v56  ;;  %v19927_v20 = vrot.slane %v11381_v61, %v11037_v9  ;;  %v10730_v44 = vmov 0   ;;  %v19928_v59 = vrot.slane %v19890_v19, %v11041_v11  ;;  %847 = vrot.lane.b32.xlu1 %v12554_v63, %s10725_s15 }
 0x157   : > { %v2520_v26 = vmul.f32 %v19925_v43, %v12715_v47  ;;  %v12747_v48 = vpop.permute.xlu1 %1468  ;;  %10533 = vset.pattern.permute.xlu0 %v10730_v44  ;;  %v19931_v44 = vrot.slane %v19806_v42, %v11037_v9  ;;  %v19938_v46 = vrot.slane %v11333_v35, %v11047_v14 }
 0x158   : > { %v3129_v6 = vmul.f32 %v19927_v20, %v12526_v62  ;;  %9658 = vmatpush1.bf16.msra.mxu0 %v9657_v32  ;;  %v9703_v30 = vpack.c.bf16 %v2521_v55, %v2399_v34  ;;  %v3250_v53 = vmul.f32 %v19928_v59, %v12601_v40  ;;  %845 = vrot.lane.b32.xlu0 %v12329_v41, %s10725_s15 }
 0x159   : > { %v9705_v29 = vpack.c.bf16 %v2520_v26, %v2398_v3  ;;  %9660 = vmatprep.subr.bf16.mxu0 %v9659_v54  ;;  %v19929_v3 = vrot.slane %v19906_v31, %v11045_v13  ;;  %v19930_v26 = vrot.slane %v11381_v61, %v11041_v11  ;;  %v9661_v54 = vpack.c.bf16 %v3006_v37, %v2884_v18  ;;  %v12788_v18 = vld [vmem:[%s10935_s9 + $0x60] sm:$0xff]  ;;  %v1638_v37 = vpop.permute.xlu0 %1637 }
 0x15a   : > { %v9663_v59 = vpack.c.bf16 %v3251_v50, %v3129_v6  ;;  %v3495_v43 = vmul.f32 %v19931_v44, %v12680_v8  ;;  %9704 = vmatprep.subr.bf16.mxu1 %v9703_v30  ;;  %v19934_v41 = vrot.slane %v19806_v42, %v11041_v11  ;;  %1142 = vrot.lane.b32.xlu1 %v12788_v18, %s10726_s16 }
 0x15b   : > { %v12763_v34 = vmul.f32 %v19929_v3, %v12324_v23  ;;  %v3128_v55 = vmul.f32 %v19930_v26, %v12531_v24  ;;  %v12778_v23 = vsel %vm1492_vm7, %v1467_v25, %v12747_v48  ;;  %v19932_v3 = vld [vmem:[#allocation111_spill] sm:$0xff]  ;;  %9706 = vmatpush1.bf16.msra.mxu1 %v9705_v29  ;;  %v12790_v6 = vpop.permute.xlu1 %1639  ;;  %v19933_v26 = vld [vmem:[#allocation64_spill] sm:$0xff] }
 0x15c   : > { %v12783_v32 = vsel %vm1492_vm7, %v19932_v3, %v1467_v25  ;;  %9662 = vmatpush1.bf16.msra.mxu0 %v9661_v54  ;;  %v3323_v44 = vrot.slane %v19933_v26, %v11039_v10  ;;  %v3319_v25 = vrot.slane %v19933_v26, %v11043_v12  ;;  %v3494_v30 = vmul.f32 %v19934_v41, %v12685_v60  ;;  %v19935_v54 = vld [vmem:[#allocation134_spill] sm:$0xff] }
 0x15d   : > { %9664 = vmatprep.subr.bf16.mxu0 %v9663_v59  ;;  %v12805_v29 = vsel %vm1663_vm8, %v1638_v37, %v12790_v6  ;;  %v12810_v3 = vsel %vm1663_vm8, %v19935_v54, %v1638_v37  ;;  %v9665_v50 = vpack.c.bf16 %v3250_v53, %v3128_v55  ;;  %v19936_v26 = vrot.slane %v11246_v7, %v11047_v14  ;;  %v19940_v55 = vld [vmem:[#allocation68_spill] sm:$0xff] }
 0x15e   : > { %v19937_v59 = vrot.slane %v11246_v7, %v11049_v15  ;;  %v2764_v57 = vmul.f32 %v19938_v46, %v12810_v3  ;;  %v19939_v37 = vrot.slane %v11333_v35, %v11049_v15  ;;  %v19941_v54 = vrot.slane %v19940_v55, %v11037_v9  ;;  %1140 = vrot.lane.b32.xlu0 %v12554_v63, %s10726_s16  ;;  %v320_v7 = vpop.permute.xlu0 %319 }
 0x15f   : > { %v2642_v20 = vmul.f32 %v19936_v26, %v12783_v32  ;;  %v12852_v17 = vmul.f32 %v3323_v44, %v12121_v36  ;;  %1313 = vrot.lane.b32.xlu1 %v12788_v18, %s10727_s17 }
 0x160   : > { %v2643_v41 = vmul.f32 %v19937_v59, %v12778_v23  ;;  %v2765_v53 = vmul.f32 %v19939_v37, %v12805_v29  ;;  %v3739_v26 = vmul.f32 %v19941_v54, %v12778_v23  ;;  %v19942_v59 = vld [vmem:[#allocation69_spill] sm:$0xff]  ;;  %9666 = vmatpush1.bf16.msra.mxu0 %v9665_v50  ;;  %v12841_v37 = vpop.permute.xlu1 %321  ;;  %v19947_v50 = vld [vmem:[#allocation95_spill] sm:$0xff] }
 0x161   : > { %v9667_v33 = vpack.c.bf16 %v3495_v43, %v19942_v59  ;;  %19944 = vst [vmem:[#allocation117_spill] sm:$0xff] %v12841_v37  ;;  %v9709_v58 = vpack.c.bf16 %v2764_v57, %v2642_v20  ;;  %v19945_v43 = vrot.slane %v11465_v22, %v11037_v9  ;;  %19946 = vst [vmem:[#allocation23_spill] sm:$0xff] %v12852_v17  ;;  %v19953_v57 = vld [vmem:[#allocation130_spill] sm:$0xff]  ;;  %v19955_v54 = vld [vmem:[#allocation139_spill] sm:$0xff] }
 0x162   : > { %v9707_v35 = vpack.c.bf16 %v2765_v53, %v2643_v41  ;;  %v12855_v46 = vmul.f32 %v3319_v25, %v19947_v50  ;;  %v19949_v20 = vrot.slane %v19940_v55, %v11041_v11  ;;  %v19950_v53 = vld [vmem:[#allocation76_spill] sm:$0xff]  ;;  %1311 = vrot.lane.b32.xlu0 %v12554_v63, %s10727_s17  ;;  %v12883_v49 = vsel %vm345_vm2, %v320_v7, %v12841_v37 }
 0x163   : > { %v3617_v59 = vmul.f32 %v19945_v43, %v12710_v56  ;;  %9668 = vmatprep.subr.bf16.mxu0 %v9667_v33  ;;  %v9669_v43 = vpack.c.bf16 %v3494_v30, %v19950_v53  ;;  %v19952_v30 = vrot.slane %v11465_v22, %v11041_v11  ;;  %1484 = vrot.lane.b32.xlu1 %v12788_v18, %s10728_s12 }
 0x164   : > { %19948 = vst [vmem:[#allocation91_spill] sm:$0xff] %v12855_v46  ;;  %v3738_v41 = vmul.f32 %v19949_v20, %v12783_v32  ;;  %9708 = vmatprep.subr.bf16.mxu1 %v9707_v35  ;;  %v12888_v35 = vsel %vm345_vm2, %v19953_v57, %v320_v7  ;;  %v19956_v20 = vld [vmem:[#allocation56_spill] sm:$0xff]  ;;  %v19959_v46 = vld [vmem:[#allocation142_spill] sm:$0xff] }
 0x165   : > { %v9671_v25 = vpack.c.bf16 %v3739_v26, %v3617_v59  ;;  %v3616_v53 = vmul.f32 %v19952_v30, %v12715_v47  ;;  %9670 = vmatpush1.bf16.msra.mxu0 %v9669_v43  ;;  %9710 = vmatpush1.bf16.msra.mxu1 %v9709_v58  ;;  %v12890_v26 = vpop.permute.xlu1 %493  ;;  %v492_v59 = vpop.permute.xlu0 %491  ;;  %v19957_v44 = vrot.slane %v19956_v20, %v11043_v12  ;;  %v19960_v57 = vld [vmem:[#allocation24_spill] sm:$0xff] }
 0x166   : > { %19954 = vst [vmem:[#allocation106_spill] sm:$0xff] %v12890_v26  ;;  %v12901_v33 = vsel %vm515_vm0, %v492_v59, %v12890_v26  ;;  %v12906_v7 = vsel %vm515_vm0, %v19959_v46, %v492_v59  ;;  %v19961_v43 = vrot.slane %v19960_v57, %v11051_v16  ;;  %v19963_v46 = vld [vmem:[#allocation73_spill] sm:$0xff]  ;;  %v19965_v58 = vrot.slane %v11295_v21, %v11047_v14 }
 0x167   : > { %v12896_v30 = vmul.f32 %v19957_v44, %v19955_v54  ;;  %9672 = vmatprep.subr.bf16.mxu0 %v9671_v25  ;;  %v19962_v25 = vrot.slane %v19960_v57, %v11045_v13  ;;  %v19964_v59 = vrot.slane %v19963_v46, %v11037_v9  ;;  %1482 = vrot.lane.b32.xlu0 %v12554_v63, %s10728_s12 }
 0x168   : > { %v626_v44 = vmul.f32 %v19961_v43, %v12484_v4  ;;  %v2886_v50 = vmul.f32 %v19965_v58, %v12888_v35  ;;  %v19966_v4 = vrot.slane %v11295_v21, %v11049_v15  ;;  %1655 = vrot.lane.b32.xlu1 %v12788_v18, %s10729_s10 }
 0x169   : > { %19958 = vst [vmem:[#allocation111_spill] sm:$0xff] %v12896_v30  ;;  %v627_v54 = vmul.f32 %v19962_v25, %v12479_v5  ;;  %v9673_v30 = vpack.c.bf16 %v3738_v41, %v3616_v53  ;;  %v3861_v17 = vmul.f32 %v19964_v59, %v12805_v29  ;;  %v19967_v5 = vrot.slane %v11359_v39, %v11047_v14  ;;  %v12942_v58 = vpop.permute.xlu1 %664  ;;  %v19971_v59 = vld [vmem:[#allocation30_spill] sm:$0xff] }
 0x16a   : > { %v2887_v43 = vmul.f32 %v19966_v4, %v12883_v49  ;;  %v19968_v53 = vrot.slane %v11359_v39, %v11049_v15  ;;  %v19972_v4 = vrot.slane %v19971_v59, %v11045_v13 }
 0x16b   : > { %v3008_v41 = vmul.f32 %v19967_v5, %v12906_v7  ;;  %9674 = vmatpush1.bf16.msra.mxu0 %v9673_v30  ;;  %v19976_v5 = vrot.slane %v19975_v45, %v11051_v16  ;;  %1653 = vrot.lane.b32.xlu0 %v12554_v63, %s10729_s10  ;;  %v19991_v30 = vld [vmem:[#allocation43_spill] sm:$0xff] }
 0x16c   : > { %v3009_v25 = vmul.f32 %v19968_v53, %v12901_v33  ;;  %4388 = vmatprep.subr.mxu0 %v3861_v17  ;;  %v663_v53 = vpop.permute.xlu0 %662  ;;  %v969_v20 = vmul.f32 %v19972_v4, %v12596_v0  ;;  %v19973_v17 = vrot.slane %v19963_v46, %v11041_v11  ;;  %v12978_v0 = vld [vmem:[%s18939_s1] sm:$0xff]  ;;  %v9729_v4 = vpack.c.bf16 %v626_v44, %v12642_v28  ;;  %v19994_v28 = vld [vmem:[#allocation74_spill] sm:$0xff] }
 0x16d   : > { %v9713_v37 = vpack.c.bf16 %v3008_v41, %v2886_v50  ;;  %v9727_v50 = vpack.c.bf16 %v627_v54, %v12763_v34  ;;  %v797_v39 = vmul.f32 %v19976_v5, %v12531_v24  ;;  %v19977_v24 = vrot.slane %v19975_v45, %v11045_v13  ;;  %507 = vrot.lane.b32.xlu1 %v12788_v18, %s10722_s29 }
 0x16e   : > { %v9711_v21 = vpack.c.bf16 %v3009_v25, %v2887_v43  ;;  %v3860_v43 = vmul.f32 %v19973_v17, %v12810_v3  ;;  %v19978_v17 = vld [vmem:[#allocation119_spill] sm:$0xff]  ;;  %v12994_v25 = vpop.permute.xlu1 %835  ;;  %v19980_v34 = vrot.slane %v19971_v59, %v11051_v16  ;;  %v19992_v63 = vrot.slane %v19991_v30, %v11045_v13 }
 0x16f   : > { %v798_v5 = vmul.f32 %v19977_v24, %v12526_v62  ;;  %v12992_v26 = vsel %vm686_vm3, %v19978_v17, %v663_v53  ;;  %v13005_v62 = vsel %vm686_vm3, %v663_v53, %v12942_v58  ;;  %v19981_v53 = vld [vmem:[#allocation34_spill] sm:$0xff]  ;;  %335 = vrot.lane.b32.xlu0 %v12788_v18, %s10723_s14 }
 0x170   : > { %9712 = vmatprep.subr.bf16.mxu1 %v9711_v21  ;;  %4389 = vmatpush1.msra.mxu0 %v3860_v43  ;;  %v968_v54 = vmul.f32 %v19980_v34, %v12601_v40  ;;  %v834_v24 = vpop.permute.xlu0 %833  ;;  %v19983_v17 = vrot.slane %v19981_v53, %v11045_v13 }
 0x171   : > { %9714 = vmatpush1.bf16.msra.mxu1 %v9713_v37  ;;  %9728 = vmatprep.subr.bf16.mxu0 %v9727_v50  ;;  %v13012_v43 = vsel %vm857_vm4, %v834_v24, %v12994_v25  ;;  %v13017_v40 = vsel %vm857_vm4, %v12574_v1, %v834_v24  ;;  %v9731_v37 = vpack.c.bf16 %v969_v20, %v798_v5 }
 0x172   : > { %4401 = vmatmul.mubr.f32.vlgmr.msra.gmra.mrb[0].mxu0 %v12978_v0  ;;  %v19982_v50 = vrot.slane %v19981_v53, %v11051_v16  ;;  %v1262_v21 = vmul.f32 %v19983_v17, %v12680_v8  ;;  %v19984_v1 = vrot.slane %v11381_v61, %v11047_v14  ;;  %v19986_v20 = vrot.slane %v11381_v61, %v11049_v15  ;;  %v20008_v61 = vld [vmem:[#allocation54_spill] sm:$0xff] }
 0x173   : > { %9730 = vmatpush1.bf16.msra.mxu0 %v9729_v4  ;;  %v19988_v8 = vrot.slane %v19890_v19, %v11049_v15  ;;  %v13050_v4 = vpop.permute.xlu1 %1130  ;;  %v9733_v41 = vpack.c.bf16 %v968_v54, %v797_v39  ;;  %849 = vrot.lane.b32.xlu1 %v12788_v18, %s10725_s15 }
 0x174   : > { %v1261_v34 = vmul.f32 %v19982_v50, %v12685_v60  ;;  %v3130_v24 = vmul.f32 %v19984_v1, %v12992_v26  ;;  %v3131_v5 = vmul.f32 %v19986_v20, %v13005_v62  ;;  %v19987_v60 = vrot.slane %v19890_v19, %v11047_v14  ;;  %9732 = vmatprep.subr.bf16.mxu0 %v9731_v37  ;;  %v1129_v1 = vpop.permute.xlu0 %1128  ;;  %v13055_v20 = vld [vmem:[%s18939_s1 + $0x8] sm:$0xff] }
 0x175   : > { %v3253_v17 = vmul.f32 %v19988_v8, %v13012_v43  ;;  %19989 = vst [vmem:[#allocation64_spill] sm:$0xff] %v13050_v4  ;;  %9602 = vmatprep.mubr.msk.f32.mxu0 %vm4332_vm1, %v13055_v20  ;;  %v13068_v39 = vsel %vm1150_vm5, %v1129_v1, %v13050_v4  ;;  %v13073_v54 = vsel %vm1150_vm5, %v12634_v51, %v1129_v1  ;;  %v19993_v8 = vld [vmem:[#allocation70_spill] sm:$0xff]  ;;  %v20005_v51 = vld [vmem:[#allocation92_spill] sm:$0xff] }
 0x176   : > { %v3252_v50 = vmul.f32 %v19987_v60, %v13017_v40  ;;  %v1604_v37 = vmul.f32 %v19992_v63, %v12778_v23  ;;  %v9735_v38 = vpack.c.bf16 %v1262_v21, %v19993_v8  ;;  %v9737_v4 = vpack.c.bf16 %v1261_v34, %v19994_v28  ;;  %678 = vrot.lane.b32.xlu0 %v12788_v18, %s10724_s27  ;;  %v19999_v28 = vld [vmem:[#allocation39_spill] sm:$0xff]  ;;  %v20002_v18 = vld [vmem:[#allocation21_spill] sm:$0xff] }
 0x177   : > { %v9715_v60 = vpack.c.bf16 %v3253_v17, %v3131_v5  ;;  %9734 = vmatpush1.bf16.msra.mxu0 %v9733_v41  ;;  %v19996_v1 = vrot.slane %v19991_v30, %v11051_v16  ;;  %v19998_v63 = vrot.slane %v19806_v42, %v11049_v15  ;;  %v13099_v41 = vpop.permute.xlu1 %1301  ;;  %v20001_v34 = vrot.slane %v19999_v28, %v11045_v13 }
 0x178   : > { %v9717_v44 = vpack.c.bf16 %v3252_v50, %v3130_v24  ;;  %v19997_v24 = vrot.slane %v19806_v42, %v11047_v14  ;;  %9736 = vmatprep.subr.bf16.mxu0 %v9735_v38  ;;  %v1300_v8 = vpop.permute.xlu0 %1299  ;;  %v20012_v38 = vld [vmem:[#allocation28_spill] sm:$0xff] }
 0x179   : > { %v1603_v5 = vmul.f32 %v19996_v1, %v12783_v32  ;;  %v3497_v23 = vmul.f32 %v19998_v63, %v13068_v39  ;;  %9716 = vmatprep.subr.bf16.mxu1 %v9715_v60  ;;  %v20000_v32 = vrot.slane %v19999_v28, %v11051_v16  ;;  %v1433_v17 = vmul.f32 %v20001_v34, %v12710_v56  ;;  %v10539_v63 = vld [vmem:[%s10935_s9 + $0x68] sm:$0xff] }
 0x17a   : > { %v3496_v50 = vmul.f32 %v19997_v24, %v13073_v54  ;;  %9718 = vmatpush1.bf16.msra.mxu1 %v9717_v44  ;;  %v20003_v60 = vrot.slane %v20002_v18, %v11045_v13  ;;  %1315 = vrot.lane.b32.xlu1 %v10539_v63, %s10727_s17 }
 0x17b   : > { %v1432_v21 = vmul.f32 %v20000_v32, %v12715_v47  ;;  %v20004_v47 = vld [vmem:[#allocation90_spill] sm:$0xff]  ;;  %9738 = vmatpush1.bf16.msra.mxu0 %v9737_v4  ;;  %v9739_v44 = vpack.c.bf16 %v1604_v37, %v1433_v17  ;;  %1144 = vrot.lane.b32.xlu0 %v10539_v63, %s10726_s16  ;;  %v13137_v4 = vpop.permute.xlu1 %1472 }
 0x17c   : > { %v1897_v24 = vmul.f32 %v20003_v60, %v12883_v49  ;;  %v9719_v32 = vpack.c.bf16 %v3497_v23, %v20004_v47  ;;  %v9721_v42 = vpack.c.bf16 %v3496_v50, %v20005_v51  ;;  %v1053_v60 = vrot.slane %v12436_v27, %v11049_v15  ;;  %20010 = vst [vmem:[#allocation134_spill] sm:$0xff] %v13137_v4 }
 0x17d   : > { %v20009_v23 = vrot.slane %v20008_v61, %v11045_v13  ;;  %v13134_v51 = vsel %vm1321_vm6, %v12700_v52, %v1300_v8  ;;  %v9741_v37 = vpack.c.bf16 %v1603_v5, %v1432_v21  ;;  %v20011_v50 = vrot.slane %v20002_v18, %v11051_v16  ;;  %9740 = vmatprep.subr.bf16.mxu0 %v9739_v44 }
 0x17e   : > { %9720 = vmatprep.subr.bf16.mxu1 %v9719_v32  ;;  %v13150_v52 = vsel %vm1321_vm6, %v1300_v8, %v13099_v41  ;;  %v1471_v32 = vpop.permute.xlu0 %1470  ;;  %1657 = vrot.lane.b32.xlu1 %v10539_v63, %s10729_s10 }
 0x17f   : > { %v1775_v47 = vmul.f32 %v20009_v23, %v12805_v29  ;;  %v1896_v17 = vmul.f32 %v20011_v50, %v12888_v35  ;;  %v20013_v29 = vrot.slane %v20012_v38, %v11045_v13  ;;  %9722 = vmatpush1.bf16.msra.mxu1 %v9721_v42  ;;  %v13155_v5 = vsel %vm1492_vm7, %v1471_v32, %v13137_v4 }
 0x180   : > { %v13160_v21 = vsel %vm1492_vm7, %v12747_v48, %v1471_v32  ;;  %v20014_v42 = vrot.slane %v20008_v61, %v11051_v16  ;;  %v20017_v48 = vrot.slane %v11465_v22, %v11047_v14  ;;  %9742 = vmatpush1.bf16.msra.mxu0 %v9741_v37  ;;  %1486 = vrot.lane.b32.xlu0 %v10539_v63, %s10728_s12 }
 0x181   : > { %v2141_v23 = vmul.f32 %v20013_v29, %v13005_v62  ;;  %v9743_v50 = vpack.c.bf16 %v1897_v24, %v1775_v47  ;;  %v20015_v29 = vld [vmem:[#allocation19_spill] sm:$0xff]  ;;  %v13178_v24 = vmul.f32 %v1053_v60, %v12121_v36  ;;  %v20019_v47 = vrot.slane %v11465_v22, %v11049_v15  ;;  %v13193_v36 = vpop.permute.xlu1 %1643 }
 0x182   : > { %v1774_v44 = vmul.f32 %v20014_v42, %v12810_v3  ;;  %v20016_v34 = vrot.slane %v20015_v29, %v11045_v13  ;;  %v3618_v32 = vmul.f32 %v20017_v48, %v13134_v51  ;;  %v20020_v3 = vrot.slane %v19940_v55, %v11047_v14  ;;  %v1642_v48 = vpop.permute.xlu0 %1641  ;;  %v20024_v22 = vld [vmem:[#allocation31_spill] sm:$0xff] }
 0x183   : > { %20018 = vst [vmem:[#allocation69_spill] sm:$0xff] %v13178_v24  ;;  %v3619_v8 = vmul.f32 %v20019_v47, %v13150_v52  ;;  %9744 = vmatprep.subr.bf16.mxu0 %v9743_v50  ;;  %v20022_v60 = vrot.slane %v20012_v38, %v11051_v16  ;;  %v13208_v63 = vsel %vm1663_vm8, %v1642_v48, %v13193_v36 }
 0x184   : > { %v2019_v19 = vmul.f32 %v20016_v34, %v12901_v33  ;;  %v3740_v42 = vmul.f32 %v20020_v3, %v13160_v21  ;;  %v20021_v34 = vrot.slane %v19940_v55, %v11049_v15  ;;  %v9745_v47 = vpack.c.bf16 %v1896_v17, %v1774_v44  ;;  %v20023_v3 = vld [vmem:[#allocation109_spill] sm:$0xff]  ;;  %v4326_v17 = vld [vmem:[%s18940_s2] sm:$0xff] }
 0x185   : > { %v2140_v37 = vmul.f32 %v20022_v60, %v12992_v26  ;;  %v20030_v44 = vrot.slane %v19960_v57, %v11043_v12  ;;  %4329 = vperm.xlu0 %10533, %v4326_v17  }
 0x186   : > { %v3741_v1 = vmul.f32 %v20021_v34, %v13155_v5  ;;  %v9747_v24 = vpack.c.bf16 %v2141_v23, %v2019_v19  ;;  %v20025_v34 = vrot.slane %v20024_v22, %v11045_v13  ;;  %v9725_v4 = vpack.c.bf16 %v3740_v42, %v3618_v32  ;;  %9746 = vmatpush1.bf16.msra.mxu0 %v9745_v47  ;;  %v13232_v47 = vpop.permute.xlu1 %325 }
 0x187   : > { %v20026_v19 = vrot.slane %v20015_v29, %v11051_v16  ;;  %v13230_v42 = vsel %vm1663_vm8, %v12790_v6, %v1642_v48  ;;  %v324_v48 = vpop.permute.xlu0 %323 }
 0x188   : > { %v2263_v55 = vmul.f32 %v20025_v34, %v13012_v43  ;;  %v9723_v50 = vpack.c.bf16 %v3741_v1, %v3619_v8  ;;  %v20028_v8 = vrot.slane %v19960_v57, %v11039_v10  ;;  %9748 = vmatprep.subr.bf16.mxu0 %v9747_v24  ;;  %v628_v34 = vmul.f32 %v20030_v44, %v12906_v7 }
 0x189   : > { %v2018_v23 = vmul.f32 %v20026_v19, %v12906_v7  ;;  %v20029_v19 = vrot.slane %v19963_v46, %v11049_v15  ;;  %v10540_v7 = vld [vmem:[%s10935_s9 + $0x28] sm:$0xff] }
 0x18a   : > { %v629_v32 = vmul.f32 %v20028_v8, %v12901_v33  ;;  %9724 = vmatprep.subr.bf16.mxu1 %v9723_v50  ;;  %v20031_v33 = vrot.slane %v20024_v22, %v11051_v16  ;;  %v20032_v50 = vrot.slane %v19906_v31, %v11039_v10  ;;  %v9751_v44 = vpack.c.bf16 %v10540_v7, %v2263_v55 }
 0x18b   : > { %v3863_v56 = vmul.f32 %v20029_v19, %v13208_v63  ;;  %9726 = vmatpush1.bf16.msra.mxu1 %v9725_v4  ;;  %v9749_v24 = vpack.c.bf16 %v2140_v37, %v2018_v23  ;;  %v20033_v19 = vld [vmem:[#allocation40_spill] sm:$0xff]  ;;  %v20036_v4 = vrot.slane %v19906_v31, %v11043_v12  ;;  %v20039_v31 = vrot.slane %v19971_v59, %v11043_v12 }
 0x18c   : > { %v2262_v6 = vmul.f32 %v20031_v33, %v13017_v40  ;;  %v458_v8 = vmul.f32 %v20032_v50, %v12883_v49  ;;  %v20034_v1 = vrot.slane %v20033_v19, %v11045_v13  ;;  %v20037_v49 = vrot.slane %v19971_v59, %v11039_v10  ;;  %v20045_v33 = vld [vmem:[#allocation55_spill] sm:$0xff] }
 0x18d   : > { %4459 = vmatprep.subr.mxu1 %v3863_v56  ;;  %v457_v37 = vmul.f32 %v20036_v4, %v12888_v35  ;;  %9750 = vmatpush1.bf16.msra.mxu0 %v9749_v24  ;;  %v20038_v56 = vrot.slane %v19963_v46, %v11047_v14  ;;  %v20040_v35 = vld [vmem:[#allocation35_spill] sm:$0xff]  ;;  %v1049_v4 = vrot.slane %v12436_v27, %v11047_v14 }
 0x18e   : > { %v2523_v57 = vmul.f32 %v20034_v1, %v13150_v52  ;;  %v971_v17 = vmul.f32 %v20037_v49, %v13012_v43  ;;  %v970_v1 = vmul.f32 %v20039_v31, %v13017_v40  ;;  %v20041_v50 = vrot.slane %v20040_v35, %v11045_v13  ;;  %9752 = vmatprep.subr.bf16.mxu0 %v9751_v44  ;;  %v13279_v43 = vpop.permute.xlu1 %497  ;;  %v496_v31 = vpop.permute.xlu0 %495 }
 0x18f   : > { %v3862_v55 = vmul.f32 %v20038_v56, %v13230_v42  ;;  %v9779_v24 = vpack.c.bf16 %v629_v32, %v458_v8  ;;  %v20042_v49 = vrot.slane %v19975_v45, %v11039_v10  ;;  %v20043_v59 = vrot.slane %v20033_v19, %v11051_v16 }
 0x190   : > { %v2401_v7 = vmul.f32 %v20041_v50, %v13068_v39  ;;  %v10541_v50 = vld [vmem:[%s10935_s9 + $0x20] sm:$0xff]  ;;  %v9781_v23 = vpack.c.bf16 %v628_v34, %v457_v37  ;;  %v20044_v32 = vrot.slane %v19975_v45, %v11043_v12  ;;  %v20048_v45 = vrot.slane %v20040_v35, %v11051_v16 }
 0x191   : > { %v800_v56 = vmul.f32 %v20042_v49, %v13005_v62  ;;  %v2522_v40 = vmul.f32 %v20043_v59, %v13134_v51  ;;  %4460 = vmatpush1.msra.mxu1 %v3862_v55  ;;  %v9753_v44 = vpack.c.bf16 %v10541_v50, %v2262_v6  ;;  %v20046_v62 = vrot.slane %v20045_v33, %v11045_v13 }
 0x192   : > { %v799_v8 = vmul.f32 %v20044_v32, %v12992_v26  ;;  %4472 = vmatmul.mubr.f32.vlgmr.msra.gmra.mrb[0].mxu1 %v12978_v0  ;;  %9780 = vmatprep.subr.bf16.mxu1 %v9779_v24  ;;  %v9755_v59 = vpack.c.bf16 %v2523_v57, %v2401_v7  ;;  %v20047_v6 = vrot.slane %v19981_v53, %v11039_v10  ;;  %v20049_v24 = vld [vmem:[#allocation44_spill] sm:$0xff]  ;;  %v13321_v32 = vld [vmem:[%s10935_s9 + $0x40] sm:$0xff] }
 0x193   : > { %v2767_v49 = vmul.f32 %v20046_v62, %v13208_v63  ;;  %v2400_v37 = vmul.f32 %v20048_v45, %v13073_v54  ;;  %v13312_v26 = vsel %vm515_vm0, %v496_v31, %v13279_v43  ;;  %9754 = vmatpush1.bf16.msra.mxu0 %v9753_v44  ;;  %v9783_v55 = vpack.c.bf16 %v971_v17, %v800_v56  ;;  %v20056_v45 = vld [vmem:[#allocation57_spill] sm:$0xff] }
 0x194   : > { %v1264_v34 = vmul.f32 %v20047_v6, %v13068_v39  ;;  %v20050_v57 = vrot.slane %v20049_v24, %v11045_v13  ;;  %9782 = vmatpush1.bf16.msra.mxu1 %v9781_v23  ;;  %9756 = vmatprep.subr.bf16.mxu0 %v9755_v59  ;;  %v13318_v39 = vpop.permute.xlu1 %668  ;;  %v9785_v50 = vpack.c.bf16 %v970_v1, %v799_v8  ;;  %v667_v23 = vpop.permute.xlu0 %666  ;;  %v20055_v8 = vld [vmem:[#allocation106_spill] sm:$0xff] }
 0x195   : > { %20051 = vst [vmem:[#allocation95_spill] sm:$0xff] %v13321_v32  ;;  %v13324_v62 = vmul.f32 %v13321_v32, %v1049_v4  ;;  %v20053_v44 = vrot.slane %v20045_v33, %v11051_v16  ;;  %v13333_v56 = vsel %vm345_vm2, %v324_v48, %v13232_v47  ;;  %9784 = vmatprep.subr.bf16.mxu1 %v9783_v55 }
 0x196   : > { %v2645_v7 = vmul.f32 %v20050_v57, %v13155_v5  ;;  %v9757_v59 = vpack.c.bf16 %v2522_v40, %v2400_v37  ;;  %9603 = vmatprep.mubr.msk.f32.mxu1 %vm4332_vm1, %v13055_v20  ;;  %v20054_v1 = vrot.slane %v19981_v53, %v11043_v12  ;;  %v13344_v6 = vsel %vm515_vm0, %v20055_v8, %v496_v31  ;;  %v20061_v8 = vld [vmem:[#allocation115_spill] sm:$0xff] }
 0x197   : > { %20052 = vst [vmem:[#allocation76_spill] sm:$0xff] %v13324_v62  ;;  %v2766_v17 = vmul.f32 %v20053_v44, %v13230_v42  ;;  %v20057_v57 = vrot.slane %v20056_v45, %v11045_v13  ;;  %v20058_v40 = vrot.slane %v19991_v30, %v11039_v10  ;;  %v20059_v53 = vrot.slane %v20049_v24, %v11051_v16 }
 0x198   : > { %v1263_v4 = vmul.f32 %v20054_v1, %v13073_v54  ;;  %v9759_v44 = vpack.c.bf16 %v2767_v49, %v2645_v7  ;;  %9758 = vmatpush1.bf16.msra.mxu0 %v9757_v59  ;;  %v20060_v1 = vld [vmem:[#allocation101_spill] sm:$0xff]  ;;  %v20062_v49 = vrot.slane %v19999_v28, %v11039_v10  ;;  %9786 = vmatpush1.bf16.msra.mxu1 %v9785_v50  ;;  %v838_v50 = vpop.permute.xlu0 %837 }
 0x199   : > { %v3011_v55 = vmul.f32 %v20057_v57, %v13312_v26  ;;  %v1606_v37 = vmul.f32 %v20058_v40, %v13155_v5  ;;  %v2644_v54 = vmul.f32 %v20059_v53, %v13160_v21  ;;  %v9787_v31 = vpack.c.bf16 %v1264_v34, %v20060_v1  ;;  %v20063_v57 = vld [vmem:[#allocation117_spill] sm:$0xff]  ;;  %v20064_v40 = vld [vmem:[#allocation52_spill] sm:$0xff]  ;;  %v13374_v34 = vpop.permute.xlu1 %839 }
 0x19a   : > { %v1435_v7 = vmul.f32 %v20062_v49, %v13150_v52  ;;  %v13368_v5 = vsel %vm345_vm2, %v20063_v57, %v324_v48  ;;  %v20065_v53 = vrot.slane %v20064_v40, %v11045_v13  ;;  %9760 = vmatprep.subr.bf16.mxu0 %v9759_v44  ;;  %v20066_v1 = vrot.slane %v19991_v30, %v11043_v12 }
 0x19b   : > { %v20067_v52 = vrot.slane %v20056_v45, %v11051_v16  ;;  %v13387_v49 = vsel %vm686_vm3, %v667_v23, %v13318_v39  ;;  %9788 = vmatprep.subr.bf16.mxu1 %v9787_v31  ;;  %v9761_v44 = vpack.c.bf16 %v2766_v17, %v2644_v54  ;;  %v13392_v57 = vsel %vm857_vm4, %v838_v50, %v13374_v34 }
 0x19c   : > { %v2889_v59 = vmul.f32 %v20065_v53, %v13333_v56  ;;  %v1605_v27 = vmul.f32 %v20066_v1, %v13160_v21  ;;  %v13397_v30 = vsel %vm857_vm4, %v12994_v25, %v838_v50  ;;  %v20068_v21 = vld [vmem:[#allocation102_spill] sm:$0xff]  ;;  %v20070_v17 = vrot.slane %v20002_v18, %v11039_v10 }
 0x19d   : > { %v3010_v48 = vmul.f32 %v20067_v52, %v13344_v6  ;;  %v9789_v53 = vpack.c.bf16 %v1263_v4, %v20068_v21  ;;  %v20069_v52 = vrot.slane %v19999_v28, %v11043_v12  ;;  %v20071_v62 = vrot.slane %v20064_v40, %v11051_v16  ;;  %9762 = vmatpush1.bf16.msra.mxu0 %v9761_v44  ;;  %v20072_v28 = vld [vmem:[#allocation59_spill] sm:$0xff]  ;;  %v1133_v44 = vpop.permute.xlu0 %1132 }
 0x19e   : > { %v9763_v1 = vpack.c.bf16 %v3011_v55, %v2889_v59  ;;  %v1899_v54 = vmul.f32 %v20070_v17, %v13333_v56  ;;  %v9791_v25 = vpack.c.bf16 %v1606_v37, %v1435_v7  ;;  %v13415_v4 = vsel %vm686_vm3, %v12942_v58, %v667_v23  ;;  %v20074_v59 = vld [vmem:[#allocation62_spill] sm:$0xff] }
 0x19f   : > { %v1434_v31 = vmul.f32 %v20069_v52, %v13134_v51  ;;  %v2888_v60 = vmul.f32 %v20071_v62, %v13368_v5  ;;  %v20073_v51 = vrot.slane %v20072_v28, %v11045_v13  ;;  %v20075_v50 = vrot.slane %v20074_v59, %v11045_v13  ;;  %9790 = vmatpush1.bf16.msra.mxu1 %v9789_v53  ;;  %v13425_v62 = vpop.permute.xlu1 %1134 }
 0x1a0   : > { %9764 = vmatprep.subr.bf16.mxu0 %v9763_v1  ;;  %20076 = vst [vmem:[#allocation130_spill] sm:$0xff] %v13425_v62  ;;  %v20077_v37 = vrot.slane %v20008_v61, %v11039_v10  ;;  %v20078_v23 = vrot.slane %v20074_v59, %v11051_v16  ;;  %9792 = vmatprep.subr.bf16.mxu1 %v9791_v25 }
 0x1a1   : > { %v3133_v55 = vmul.f32 %v20073_v51, %v13387_v49  ;;  %v3255_v21 = vmul.f32 %v20075_v50, %v13392_v57  ;;  %v9765_v52 = vpack.c.bf16 %v3010_v48, %v2888_v60  ;;  %v9793_v17 = vpack.c.bf16 %v1605_v27, %v1434_v31 }
 0x1a2   : > { %v1777_v58 = vmul.f32 %v20077_v37, %v13208_v63  ;;  %v3254_v7 = vmul.f32 %v20078_v23, %v13397_v30  ;;  %v20079_v53 = vrot.slane %v20002_v18, %v11043_v12  ;;  %v13442_v51 = vsel %vm1150_vm5, %v1133_v44, %v13425_v62  ;;  %v20080_v63 = vld [vmem:[#allocation64_spill] sm:$0xff] }
 0x1a3   : > { %v13447_v50 = vsel %vm1150_vm5, %v20080_v63, %v1133_v44  ;;  %v9767_v37 = vpack.c.bf16 %v3255_v21, %v3133_v55  ;;  %v20081_v27 = vrot.slane %v20012_v38, %v11039_v10  ;;  %v20082_v18 = vrot.slane %v20072_v28, %v11051_v16  ;;  %9766 = vmatpush1.bf16.msra.mxu0 %v9765_v52  ;;  %v20084_v21 = vld [vmem:[#allocation63_spill] sm:$0xff]  ;;  %v13467_v63 = vpop.permute.xlu1 %1305  ;;  %v10544_v52 = vld [vmem:[%s10935_s9 + $0x30] sm:$0xff] }
 0x1a4   : > { %v1898_v1 = vmul.f32 %v20079_v53, %v13368_v5  ;;  %v9795_v31 = vpack.c.bf16 %v1899_v54, %v1777_v58  ;;  %v20083_v23 = vrot.slane %v20008_v61, %v11043_v12  ;;  %v20085_v44 = vrot.slane %v20084_v21, %v11045_v13  ;;  %9794 = vmatpush1.bf16.msra.mxu1 %v9793_v17  ;;  %v20091_v54 = vld [vmem:[#allocation129_spill] sm:$0xff] }
 0x1a5   : > { %v2143_v60 = vmul.f32 %v20081_v27, %v13387_v49  ;;  %v3132_v48 = vmul.f32 %v20082_v18, %v13415_v4  ;;  %9768 = vmatprep.subr.bf16.mxu0 %v9767_v37  ;;  %20086 = vst [vmem:[#allocation142_spill] sm:$0xff] %v13467_v63  ;;  %v20088_v58 = vrot.slane %v20015_v29, %v11039_v10  ;;  %v1304_v18 = vpop.permute.xlu0 %1303  ;;  %v20094_v17 = vld [vmem:[#allocation125_spill] sm:$0xff] }
 0x1a6   : > { %v1776_v55 = vmul.f32 %v20083_v23, %v13230_v42  ;;  %v3499_v53 = vmul.f32 %v20085_v44, %v13442_v51  ;;  %v20089_v61 = vrot.slane %v20084_v21, %v11051_v16  ;;  %9796 = vmatprep.subr.bf16.mxu1 %v9795_v31  ;;  %v20090_v37 = vrot.slane %v20012_v38, %v11043_v12 }
 0x1a7   : > { %v2021_v27 = vmul.f32 %v20088_v58, %v13312_v26  ;;  %v9769_v23 = vpack.c.bf16 %v3254_v7, %v3132_v48  ;;  %v20093_v31 = vrot.slane %v20024_v22, %v11039_v10 }
 0x1a8   : > { %v3498_v42 = vmul.f32 %v20089_v61, %v13447_v50  ;;  %v2142_v44 = vmul.f32 %v20090_v37, %v13415_v4  ;;  %v9797_v25 = vpack.c.bf16 %v1898_v1, %v1776_v55  ;;  %v9771_v32 = vpack.c.bf16 %v3499_v53, %v20091_v54  ;;  %v20100_v54 = vld [vmem:[#allocation134_spill] sm:$0xff] }
 0x1a9   : > { %v2265_v61 = vmul.f32 %v20093_v31, %v13392_v57  ;;  %9770 = vmatpush1.bf16.msra.mxu0 %v9769_v23  ;;  %v9799_v7 = vpack.c.bf16 %v2143_v60, %v2021_v27  ;;  %v20095_v1 = vrot.slane %v20015_v29, %v11043_v12  ;;  %v13503_v53 = vsel %vm1321_vm6, %v1304_v18, %v13467_v63  ;;  %v13505_v60 = vpop.permute.xlu1 %1476  ;;  %v1475_v37 = vpop.permute.xlu0 %1474 }
 0x1aa   : > { %9798 = vmatpush1.bf16.msra.mxu1 %v9797_v25  ;;  %9772 = vmatprep.subr.bf16.mxu0 %v9771_v32  ;;  %20096 = vst [vmem:[#allocation24_spill] sm:$0xff] %v13505_v60  ;;  %v20097_v27 = vrot.slane %v20024_v22, %v11043_v12  ;;  %v13516_v29 = vsel %vm1321_vm6, %v13099_v41, %v1304_v18  ;;  %v20098_v25 = vld [vmem:[#allocation61_spill] sm:$0xff] }
 0x1ab   : > { %v2020_v55 = vmul.f32 %v20095_v1, %v13344_v6  ;;  %9800 = vmatprep.subr.bf16.mxu1 %v9799_v7  ;;  %v9773_v31 = vpack.c.bf16 %v3498_v42, %v20098_v25  ;;  %v13524_v38 = vsel %vm1492_vm7, %v1475_v37, %v13505_v60  ;;  %v13529_v22 = vsel %vm1492_vm7, %v20100_v54, %v1475_v37  ;;  %v10543_v7 = vld [vmem:[%s10935_s9 + $0x38] sm:$0xff] }
 0x1ac   : > { %v2264_v23 = vmul.f32 %v20097_v27, %v13397_v30  ;;  %v20101_v42 = vrot.slane %v20033_v19, %v11039_v10  ;;  %v9803_v25 = vpack.c.bf16 %v10543_v7, %v2265_v61 }
 0x1ad   : > { %v9801_v27 = vpack.c.bf16 %v2142_v44, %v2020_v55  ;;  %9774 = vmatpush1.bf16.msra.mxu0 %v9773_v31  ;;  %v20103_v44 = vld [vmem:[#allocation65_spill] sm:$0xff]  ;;  %v20106_v31 = vld [vmem:[#allocation68_spill] sm:$0xff]  ;;  %v13558_v62 = vpop.permute.xlu1 %1647 }
 0x1ae   : > { %v2525_v18 = vmul.f32 %v20101_v42, %v13503_v53  ;;  %v20104_v55 = vrot.slane %v20103_v44, %v11051_v16  ;;  %v20105_v41 = vrot.slane %v20103_v44, %v11045_v13  ;;  %v20107_v61 = vrot.slane %v20106_v31, %v11051_v16  ;;  %20109 = vst [vmem:[#allocation73_spill] sm:$0xff] %v13558_v62 }
 0x1af   : > { %v20108_v48 = vrot.slane %v20106_v31, %v11045_v13  ;;  %9802 = vmatpush1.bf16.msra.mxu1 %v9801_v27  ;;  %v9805_v60 = vpack.c.bf16 %v10544_v52, %v2264_v23  ;;  %v20113_v31 = vld [vmem:[#allocation41_spill] sm:$0xff]  ;;  %v20114_v27 = vrot.slane %v20033_v19, %v11043_v12  ;;  %v20116_v19 = vrot.slane %v20045_v33, %v11039_v10 }
 0x1b0   : > { %v3620_v37 = vmul.f32 %v20104_v55, %v13516_v29  ;;  %v3621_v42 = vmul.f32 %v20105_v41, %v13503_v53  ;;  %v3742_v7 = vmul.f32 %v20107_v61, %v13529_v22  ;;  %v20110_v55 = vld [vmem:[#allocation104_spill] sm:$0xff]  ;;  %v20112_v41 = vrot.slane %v20040_v35, %v11039_v10  ;;  %9804 = vmatprep.subr.bf16.mxu1 %v9803_v25  ;;  %v1646_v61 = vpop.permute.xlu0 %1645 }
 0x1b1   : > { %v3743_v54 = vmul.f32 %v20108_v48, %v13524_v38  ;;  %v20111_v58 = vrot.slane %v20110_v55, %v11037_v9  ;;  %v3331_v48 = vrot.slane %v20113_v31, %v11037_v9  ;;  %v2524_v32 = vmul.f32 %v20114_v27, %v13516_v29 }
 0x1b2   : > { %v2403_v44 = vmul.f32 %v20112_v41, %v13442_v51  ;;  %v9777_v63 = vpack.c.bf16 %v3742_v7, %v3620_v37  ;;  %v20115_v25 = vrot.slane %v20049_v24, %v11039_v10  ;;  %v13587_v23 = vsel %vm1663_vm8, %v13193_v36, %v1646_v61  ;;  %v13601_v36 = vpop.permute.xlu1 %329 }
 0x1b3   : > { %v631_v1 = vmul.f32 %v20111_v58, %v13312_v26  ;;  %v13578_v26 = vsel %vm1663_vm8, %v1646_v61, %v13558_v62  ;;  %v9775_v58 = vpack.c.bf16 %v3743_v54, %v3621_v42  ;;  %v20117_v54 = vrot.slane %v20110_v55, %v11041_v11  ;;  %9806 = vmatpush1.bf16.msra.mxu1 %v9805_v60 }
 0x1b4   : > { %v2647_v52 = vmul.f32 %v20115_v25, %v13524_v38  ;;  %v2769_v41 = vmul.f32 %v20116_v19, %v13578_v26  ;;  %v9807_v27 = vpack.c.bf16 %v2525_v18, %v2403_v44  ;;  %v20118_v42 = vrot.slane %v20040_v35, %v11043_v12  ;;  %v20120_v18 = vld [vmem:[#allocation99_spill] sm:$0xff]  ;;  %v328_v60 = vpop.permute.xlu0 %327 }
 0x1b5   : > { %v630_v37 = vmul.f32 %v20117_v54, %v13344_v6  ;;  %9776 = vmatprep.subr.bf16.mxu0 %v9775_v58  ;;  %v20119_v61 = vrot.slane %v19963_v46, %v11045_v13  ;;  %v20121_v44 = vrot.slane %v20120_v18, %v11037_v9  ;;  %v20122_v6 = vrot.slane %v20023_v3, %v11037_v9 }
 0x1b6   : > { %v2402_v7 = vmul.f32 %v20118_v42, %v13447_v50  ;;  %9808 = vmatprep.subr.bf16.mxu1 %v9807_v27  ;;  %9778 = vmatpush1.bf16.msra.mxu0 %v9777_v63  ;;  %v9811_v58 = vpack.c.bf16 %v2769_v41, %v2647_v52  ;;  %v20123_v54 = vrot.slane %v20120_v18, %v11041_v11 }
 0x1b7   : > { %v3865_v25 = vmul.f32 %v20119_v61, %v13578_v26  ;;  %v460_v19 = vmul.f32 %v20121_v44, %v13333_v56  ;;  %v973_v35 = vmul.f32 %v20122_v6, %v13392_v57  ;;  %v20124_v61 = vrot.slane %v20045_v33, %v11043_v12  ;;  %v20125_v57 = vld [vmem:[#allocation49_spill] sm:$0xff]  ;;  %v20128_v6 = vld [vmem:[#allocation46_spill] sm:$0xff] }
 0x1b8   : > { %v459_v42 = vmul.f32 %v20123_v54, %v13368_v5  ;;  %v9809_v56 = vpack.c.bf16 %v2524_v32, %v2402_v7  ;;  %v3327_v44 = vrot.slane %v20113_v31, %v11041_v11  ;;  %v20126_v63 = vrot.slane %v20125_v57, %v11037_v9 }
 0x1b9   : > { %v2768_v62 = vmul.f32 %v20124_v61, %v13587_v23  ;;  %4530 = vmatprep.subr.mxu0 %v3865_v25  ;;  %v20127_v41 = vrot.slane %v19963_v46, %v11051_v16  ;;  %v9831_v27 = vpack.c.bf16 %v631_v1, %v460_v19  ;;  %v13634_v54 = vmul.f32 %v3331_v48, %v20128_v6  ;;  %v13649_v1 = vpop.permute.xlu1 %501  ;;  %v500_v61 = vpop.permute.xlu0 %499 }
 0x1ba   : > { %v802_v52 = vmul.f32 %v20126_v63, %v13387_v49  ;;  %v20130_v33 = vrot.slane %v20023_v3, %v11041_v11  ;;  %v20131_v7 = vrot.slane %v20049_v24, %v11043_v12  ;;  %v13647_v49 = vsel %vm345_vm2, %v13232_v47, %v328_v60  ;;  %9810 = vmatpush1.bf16.msra.mxu1 %v9809_v56 }
 0x1bb   : > { %v3864_v5 = vmul.f32 %v20127_v41, %v13587_v23  ;;  %20129 = vst [vmem:[#allocation30_spill] sm:$0xff] %v13634_v54  ;;  %v9833_v48 = vpack.c.bf16 %v630_v37, %v459_v42  ;;  %v20132_v19 = vrot.slane %v20061_v8, %v11037_v9  ;;  %v13658_v24 = vsel %vm345_vm2, %v328_v60, %v13601_v36 }
 0x1bc   : > { %v972_v32 = vmul.f32 %v20130_v33, %v13397_v30  ;;  %v2646_v25 = vmul.f32 %v20131_v7, %v13529_v22  ;;  %9812 = vmatprep.subr.bf16.mxu1 %v9811_v58  ;;  %v9835_v47 = vpack.c.bf16 %v973_v35, %v802_v52  ;;  %v13663_v37 = vsel %vm515_vm0, %v500_v61, %v13649_v1 }
 0x1bd   : > { %v1266_v30 = vmul.f32 %v20132_v19, %v13442_v51  ;;  %4531 = vmatpush1.msra.mxu0 %v3864_v5  ;;  %v13668_v42 = vsel %vm515_vm0, %v13279_v43, %v500_v61  ;;  %v20133_v60 = vrot.slane %v20125_v57, %v11041_v11  ;;  %v20134_v35 = vrot.slane %v20061_v8, %v11041_v11  ;;  %v13684_v43 = vld [vmem:[%s10935_s9 + $0x50] sm:$0xff]  ;;  %v13701_v33 = vpop.permute.xlu1 %672 }
 0x1be   : > { %9832 = vmatprep.subr.bf16.mxu0 %v9831_v27  ;;  %4543 = vmatmul.mubr.f32.vlgmr.msra.gmra.mrb[2].mxu0 %v12978_v0  ;;  %v9813_v51 = vpack.c.bf16 %v2768_v62, %v2646_v25  ;;  %v20135_v63 = vrot.slane %v20064_v40, %v11043_v12  ;;  %20136 = vst [vmem:[#allocation27_spill] sm:$0xff] %v13684_v43  ;;  %v20141_v25 = vld [vmem:[#allocation128_spill] sm:$0xff]  ;;  %v20142_v19 = vld [vmem:[#allocation53_spill] sm:$0xff] }
 0x1bf   : > { %v801_v58 = vmul.f32 %v20133_v60, %v13415_v4  ;;  %v1265_v56 = vmul.f32 %v20134_v35, %v13447_v50  ;;  %9834 = vmatpush1.bf16.msra.mxu0 %v9833_v48  ;;  %v13687_v62 = vmul.f32 %v13684_v43, %v3327_v44  ;;  %v20138_v4 = vrot.slane %v20064_v40, %v11039_v10  ;;  %v671_v44 = vpop.permute.xlu0 %670  ;;  %v20144_v60 = vld [vmem:[#allocation84_spill] sm:$0xff] }
 0x1c0   : > { %v2890_v52 = vmul.f32 %v20135_v63, %v13647_v49  ;;  %v20139_v50 = vrot.slane %v20056_v45, %v11043_v12  ;;  %v20140_v27 = vrot.slane %v20056_v45, %v11039_v10  ;;  %9814 = vmatpush1.bf16.msra.mxu1 %v9813_v51  ;;  %9836 = vmatprep.subr.bf16.mxu0 %v9835_v47  ;;  %v20184_v63 = vld [vmem:[#allocation24_spill] sm:$0xff] }
 0x1c1   : > { %20137 = vst [vmem:[#allocation119_spill] sm:$0xff] %v13687_v62  ;;  %v2891_v41 = vmul.f32 %v20138_v4, %v13658_v24  ;;  %v9837_v7 = vpack.c.bf16 %v972_v32, %v801_v58  ;;  %9604 = vmatprep.mubr.msk.f32.mxu0 %vm4332_vm1, %v13055_v20  ;;  %v20143_v45 = vrot.slane %v20141_v25, %v11037_v9 }
 0x1c2   : > { %v3012_v5 = vmul.f32 %v20139_v50, %v13668_v42  ;;  %v3013_v6 = vmul.f32 %v20140_v27, %v13663_v37  ;;  %v9839_v32 = vpack.c.bf16 %v1266_v30, %v20144_v60  ;;  %v20146_v27 = vld [vmem:[#allocation131_spill] sm:$0xff]  ;;  %v13728_v30 = vpop.permute.xlu1 %843  ;;  %v20151_v60 = vld [vmem:[#allocation25_spill] sm:$0xff] }
 0x1c3   : > { %v1608_v47 = vmul.f32 %v20143_v45, %v13524_v38  ;;  %9838 = vmatpush1.bf16.msra.mxu0 %v9837_v7  ;;  %v20147_v38 = vrot.slane %v20094_v17, %v11037_v9  ;;  %20148 = vst [vmem:[#allocation34_spill] sm:$0xff] %v13728_v30  ;;  %v20150_v7 = vrot.slane %v20141_v25, %v11041_v11 }
 0x1c4   : > { %v9815_v51 = vpack.c.bf16 %v3013_v6, %v2891_v41  ;;  %v9817_v58 = vpack.c.bf16 %v3012_v5, %v2890_v52  ;;  %9840 = vmatprep.subr.bf16.mxu0 %v9839_v32  ;;  %v20149_v52 = vld [vmem:[#allocation81_spill] sm:$0xff]  ;;  %v20152_v40 = vrot.slane %v20151_v60, %v11037_v9  ;;  %v20166_v31 = vrot.slane %v20146_v27, %v11041_v11 }
 0x1c5   : > { %v1437_v41 = vmul.f32 %v20147_v38, %v13503_v53  ;;  %v9841_v5 = vpack.c.bf16 %v1265_v56, %v20149_v52  ;;  %v1607_v45 = vmul.f32 %v20150_v7, %v13529_v22  ;;  %v13744_v53 = vsel %vm686_vm3, %v671_v44, %v13701_v33  ;;  %v20153_v38 = vld [vmem:[#allocation56_spill] sm:$0xff] }
 0x1c6   : > { %9816 = vmatprep.subr.bf16.mxu1 %v9815_v51  ;;  %v1901_v48 = vmul.f32 %v20152_v40, %v13658_v24  ;;  %v13749_v56 = vsel %vm686_vm3, %v13318_v39, %v671_v44  ;;  %v842_v51 = vpop.permute.xlu0 %841  ;;  %v20154_v39 = vrot.slane %v20094_v17, %v11041_v11  ;;  %v13791_v52 = vpop.permute.xlu1 %1138 }
 0x1c7   : > { %9818 = vmatpush1.bf16.msra.mxu1 %v9817_v58  ;;  %v13754_v22 = vsel %vm857_vm4, %v842_v51, %v13728_v30  ;;  %v13759_v40 = vsel %vm857_vm4, %v13374_v34, %v842_v51  ;;  %v9843_v32 = vpack.c.bf16 %v1608_v47, %v1437_v41  ;;  %v20155_v58 = vrot.slane %v20146_v27, %v11037_v9 }
 0x1c8   : > { %v1436_v44 = vmul.f32 %v20154_v39, %v13516_v29  ;;  %9842 = vmatpush1.bf16.msra.mxu0 %v9841_v5  ;;  %v20157_v41 = vrot.slane %v20072_v28, %v11043_v12  ;;  %v20158_v29 = vrot.slane %v20072_v28, %v11039_v10  ;;  %20161 = vst [vmem:[#allocation43_spill] sm:$0xff] %v13791_v52  ;;  %v20163_v28 = vld [vmem:[#allocation33_spill] sm:$0xff] }
 0x1c9   : > { %v1779_v7 = vmul.f32 %v20155_v58, %v13578_v26  ;;  %v20159_v26 = vrot.slane %v20074_v59, %v11043_v12  ;;  %v20160_v58 = vrot.slane %v20074_v59, %v11039_v10  ;;  %9844 = vmatprep.subr.bf16.mxu0 %v9843_v32  ;;  %v20165_v32 = vld [vmem:[#allocation130_spill] sm:$0xff] }
 0x1ca   : > { %v3134_v51 = vmul.f32 %v20157_v41, %v13749_v56  ;;  %v3135_v39 = vmul.f32 %v20158_v29, %v13744_v53  ;;  %v20162_v41 = vrot.slane %v20151_v60, %v11041_v11  ;;  %v20164_v29 = vrot.slane %v20163_v28, %v11037_v9  ;;  %v1137_v35 = vpop.permute.xlu0 %1136 }
 0x1cb   : > { %v3256_v5 = vmul.f32 %v20159_v26, %v13759_v40  ;;  %v3257_v61 = vmul.f32 %v20160_v58, %v13754_v22  ;;  %v9845_v26 = vpack.c.bf16 %v1607_v45, %v1436_v44  ;;  %v9847_v50 = vpack.c.bf16 %v1901_v48, %v1779_v7  ;;  %v20167_v45 = vld [vmem:[#allocation26_spill] sm:$0xff]  ;;  %v20175_v7 = vld [vmem:[#allocation23_spill] sm:$0xff] }
 0x1cc   : > { %v1900_v47 = vmul.f32 %v20162_v41, %v13647_v49  ;;  %v2145_v6 = vmul.f32 %v20164_v29, %v13744_v53  ;;  %v13804_v59 = vsel %vm1150_vm5, %v1137_v35, %v13791_v52  ;;  %v13809_v58 = vsel %vm1150_vm5, %v20165_v32, %v1137_v35 }
 0x1cd   : > { %v9819_v4 = vpack.c.bf16 %v3257_v61, %v3135_v39  ;;  %v9821_v41 = vpack.c.bf16 %v3256_v5, %v3134_v51  ;;  %v1778_v29 = vmul.f32 %v20166_v31, %v13587_v23  ;;  %v20168_v48 = vrot.slane %v20167_v45, %v11037_v9  ;;  %9846 = vmatpush1.bf16.msra.mxu0 %v9845_v26  ;;  %v13831_v39 = vpop.permute.xlu1 %1309 }
 0x1ce   : > { %v20169_v61 = vrot.slane %v20084_v21, %v11043_v12  ;;  %v20170_v31 = vrot.slane %v20084_v21, %v11039_v10  ;;  %9848 = vmatprep.subr.bf16.mxu0 %v9847_v50  ;;  %20171 = vst [vmem:[#allocation70_spill] sm:$0xff] %v13831_v39  ;;  %v20172_v26 = vrot.slane %v20163_v28, %v11041_v11 }
 0x1cf   : > { %v2023_v44 = vmul.f32 %v20168_v48, %v13663_v37  ;;  %9820 = vmatprep.subr.bf16.mxu1 %v9819_v4  ;;  %v1308_v48 = vpop.permute.xlu0 %1307  ;;  %v20173_v4 = vld [vmem:[#allocation36_spill] sm:$0xff] }
 0x1d0   : > { %v3500_v51 = vmul.f32 %v20169_v61, %v13809_v58  ;;  %v3501_v23 = vmul.f32 %v20170_v31, %v13804_v59  ;;  %v2144_v32 = vmul.f32 %v20172_v26, %v13749_v56  ;;  %9822 = vmatpush1.bf16.msra.mxu1 %v9821_v41  ;;  %v9849_v61 = vpack.c.bf16 %v1900_v47, %v1778_v29  ;;  %v20176_v26 = vld [vmem:[#allocation91_spill] sm:$0xff]  ;;  %v20178_v29 = vld [vmem:[#allocation20_spill] sm:$0xff] }
 0x1d1   : > { %v9851_v35 = vpack.c.bf16 %v2145_v6, %v2023_v44  ;;  %v20174_v50 = vrot.slane %v20173_v4, %v11037_v9  ;;  %v13848_v5 = vsel %vm1321_vm6, %v1308_v48, %v13831_v39  ;;  %v20177_v6 = vrot.slane %v20167_v45, %v11041_v11  ;;  %v20181_v44 = vld [vmem:[#allocation142_spill] sm:$0xff] }
 0x1d2   : > { %v9823_v43 = vpack.c.bf16 %v3501_v23, %v20175_v7  ;;  %v9825_v41 = vpack.c.bf16 %v3500_v51, %v20176_v26  ;;  %9850 = vmatpush1.bf16.msra.mxu0 %v9849_v61  ;;  %v13862_v7 = vpop.permute.xlu1 %1480  ;;  %v20180_v26 = vrot.slane %v20173_v4, %v11041_v11  ;;  %v20185_v39 = vld [vmem:[#allocation22_spill] sm:$0xff] }
 0x1d3   : > { %v2267_v31 = vmul.f32 %v20174_v50, %v13754_v22  ;;  %v2022_v47 = vmul.f32 %v20177_v6, %v13668_v42  ;;  %9852 = vmatprep.subr.bf16.mxu0 %v9851_v35  ;;  %20179 = vst [vmem:[#allocation74_spill] sm:$0xff] %v13862_v7  ;;  %v20182_v35 = vld [vmem:[#allocation50_spill] sm:$0xff]  ;;  %v1479_v23 = vpop.permute.xlu0 %1478 }
 0x1d4   : > { %9824 = vmatprep.subr.bf16.mxu1 %v9823_v43  ;;  %v2266_v6 = vmul.f32 %v20180_v26, %v13759_v40  ;;  %v13877_v43 = vsel %vm1321_vm6, %v20181_v44, %v1308_v48  ;;  %v20183_v21 = vrot.slane %v20182_v35, %v11037_v9  ;;  %v13886_v61 = vsel %vm1492_vm7, %v1479_v23, %v13862_v7  ;;  %v10546_v48 = vld [vmem:[%s10935_s9 + $0x48] sm:$0xff] }
 0x1d5   : > { %9826 = vmatpush1.bf16.msra.mxu1 %v9825_v41  ;;  %v9853_v50 = vpack.c.bf16 %v2144_v32, %v2022_v47  ;;  %v13891_v26 = vsel %vm1492_vm7, %v20184_v63, %v1479_v23  ;;  %v9855_v44 = vpack.c.bf16 %v10546_v48, %v2267_v31  ;;  %v20188_v31 = vld [vmem:[#allocation65_spill] sm:$0xff] }
 0x1d6   : > { %v2527_v51 = vmul.f32 %v20183_v21, %v13848_v5  ;;  %v20186_v21 = vld [vmem:[#allocation37_spill] sm:$0xff]  ;;  %v20189_v23 = vrot.slane %v20188_v31, %v11043_v12  ;;  %v20190_v62 = vrot.slane %v20188_v31, %v11039_v10  ;;  %v13922_v34 = vpop.permute.xlu1 %1651 }
 0x1d7   : > { %v20187_v41 = vrot.slane %v20186_v21, %v11037_v9  ;;  %9854 = vmatpush1.bf16.msra.mxu0 %v9853_v50  ;;  %v20191_v50 = vld [vmem:[#allocation68_spill] sm:$0xff]  ;;  %20194 = vst [vmem:[#allocation39_spill] sm:$0xff] %v13922_v34  ;;  %v1650_v31 = vpop.permute.xlu0 %1649 }
 0x1d8   : > { %v3622_v48 = vmul.f32 %v20189_v23, %v13877_v43  ;;  %v20192_v47 = vrot.slane %v20191_v50, %v11043_v12  ;;  %v20193_v7 = vrot.slane %v20191_v50, %v11039_v10  ;;  %9856 = vmatprep.subr.bf16.mxu0 %v9855_v44  ;;  %v20195_v23 = vrot.slane %v20182_v35, %v11041_v11 }
 0x1d9   : > { %v2405_v32 = vmul.f32 %v20187_v41, %v13804_v59  ;;  %v3623_v41 = vmul.f32 %v20190_v62, %v13848_v5  ;;  %v20196_v62 = vld [vmem:[#allocation95_spill] sm:$0xff]  ;;  %v13934_v50 = vsel %vm1663_vm8, %v1650_v31, %v13922_v34  ;;  %v20254_v34 = vld [vmem:[#allocation38_spill] sm:$0xff] }
 0x1da   : > { %v3744_v54 = vmul.f32 %v20192_v47, %v13891_v26  ;;  %v3745_v63 = vmul.f32 %v20193_v7, %v13886_v61  ;;  %v2526_v45 = vmul.f32 %v20195_v23, %v13877_v43  ;;  %v9857_v52 = vpack.c.bf16 %v20196_v62, %v2266_v6  ;;  %v20197_v7 = vld [vmem:[#allocation73_spill] sm:$0xff] }
 0x1db   : > { %v9859_v27 = vpack.c.bf16 %v2527_v51, %v2405_v32  ;;  %v13939_v44 = vsel %vm1663_vm8, %v20197_v7, %v1650_v31  ;;  %v20198_v6 = vrot.slane %v20186_v21, %v11041_v11  ;;  %v20199_v32 = vrot.slane %v20142_v19, %v11037_v9  ;;  %v13963_v7 = vpop.permute.xlu1 %333 }
 0x1dc   : > { %v9827_v60 = vpack.c.bf16 %v3745_v63, %v3623_v41  ;;  %v9829_v30 = vpack.c.bf16 %v3744_v54, %v3622_v48  ;;  %v20200_v62 = vrot.slane %v20153_v38, %v11037_v9  ;;  %9858 = vmatpush1.bf16.msra.mxu0 %v9857_v52  ;;  %v20201_v54 = vrot.slane %v20110_v55, %v11047_v14 }
 0x1dd   : > { %v2404_v51 = vmul.f32 %v20198_v6, %v13809_v58  ;;  %v2649_v23 = vmul.f32 %v20199_v32, %v13886_v61  ;;  %v20202_v41 = vrot.slane %v20110_v55, %v11049_v15  ;;  %9860 = vmatprep.subr.bf16.mxu0 %v9859_v27  ;;  %v20203_v52 = vrot.slane %v19963_v46, %v11039_v10 }
 0x1de   : > { %v2771_v47 = vmul.f32 %v20200_v62, %v13934_v50  ;;  %v632_v48 = vmul.f32 %v20201_v54, %v13668_v42  ;;  %9828 = vmatprep.subr.bf16.mxu1 %v9827_v60  ;;  %v20204_v32 = vrot.slane %v20153_v38, %v11041_v11  ;;  %v332_v42 = vpop.permute.xlu0 %331  ;;  %v20205_v27 = vrot.slane %v20120_v18, %v11047_v14 }
 0x1df   : > { %v633_v31 = vmul.f32 %v20202_v41, %v13663_v37  ;;  %v3867_v6 = vmul.f32 %v20203_v52, %v13934_v50  ;;  %9830 = vmatpush1.bf16.msra.mxu1 %v9829_v30  ;;  %v9861_v54 = vpack.c.bf16 %v2526_v45, %v2404_v51  ;;  %v20206_v41 = vrot.slane %v20120_v18, %v11049_v15 }
 0x1e0   : > { %v2770_v62 = vmul.f32 %v20204_v32, %v13939_v44  ;;  %v9863_v63 = vpack.c.bf16 %v2771_v47, %v2649_v23  ;;  %v461_v60 = vmul.f32 %v20205_v27, %v13647_v49  ;;  %v20211_v51 = vrot.slane %v20023_v3, %v11049_v15  ;;  %v20264_v32 = vld [vmem:[#allocation119_spill] sm:$0xff] }
 0x1e1   : > { %v462_v52 = vmul.f32 %v20206_v41, %v13658_v24  ;;  %4601 = vmatprep.subr.mxu1 %v3867_v6  ;;  %v20212_v49 = vrot.slane %v20142_v19, %v11041_v11  ;;  %v20213_v24 = vrot.slane %v19963_v46, %v11043_v12  ;;  %9862 = vmatpush1.bf16.msra.mxu0 %v9861_v54  ;;  %v20214_v41 = vld [vmem:[#allocation32_spill] sm:$0xff] }
 0x1e2   : > { %v975_v23 = vmul.f32 %v20211_v51, %v13754_v22  ;;  %v20215_v47 = vrot.slane %v20125_v57, %v11047_v14  ;;  %v14008_v22 = vsel %vm345_vm2, %v13601_v36, %v332_v42  ;;  %9864 = vmatprep.subr.bf16.mxu0 %v9863_v63  ;;  %v14010_v51 = vpop.permute.xlu1 %505  ;;  %v9885_v46 = vpack.c.bf16 %v632_v48, %v461_v60 }
 0x1e3   : > { %v2648_v27 = vmul.f32 %v20212_v49, %v13891_v26  ;;  %v3866_v6 = vmul.f32 %v20213_v24, %v13939_v44  ;;  %v9883_v49 = vpack.c.bf16 %v633_v31, %v462_v52  ;;  %v20216_v54 = vrot.slane %v20125_v57, %v11049_v15 }
 0x1e4   : > { %v803_v37 = vmul.f32 %v20215_v47, %v13749_v56  ;;  %v20217_v30 = vrot.slane %v20023_v3, %v11047_v14  ;;  %v504_v47 = vpop.permute.xlu0 %503 }
 0x1e5   : > { %v804_v24 = vmul.f32 %v20216_v54, %v13744_v53  ;;  %4602 = vmatpush1.msra.mxu1 %v3866_v6  ;;  %v9865_v38 = vpack.c.bf16 %v2770_v62, %v2648_v27  ;;  %v14025_v48 = vsel %vm515_vm0, %v504_v47, %v14010_v51  ;;  %v14030_v53 = vsel %vm515_vm0, %v13649_v1, %v504_v47 }
 0x1e6   : > { %v974_v56 = vmul.f32 %v20217_v30, %v13759_v40  ;;  %4614 = vmatmul.mubr.f32.vlgmr.msra.gmra.mrb[2].mxu1 %v12978_v0  ;;  %9884 = vmatprep.subr.bf16.mxu1 %v9883_v49  ;;  %v20222_v62 = vrot.slane %v20061_v8, %v11049_v15  ;;  %v14042_v30 = vsel %vm345_vm2, %v332_v42, %v13963_v7 }
 0x1e7   : > { %v20223_v1 = vrot.slane %v20185_v39, %v11041_v11  ;;  %9866 = vmatpush1.bf16.msra.mxu0 %v9865_v38  ;;  %v9887_v0 = vpack.c.bf16 %v975_v23, %v804_v24  ;;  %v20224_v6 = vrot.slane %v20185_v39, %v11037_v9  ;;  %v20226_v42 = vrot.slane %v20178_v29, %v11037_v9 }
 0x1e8   : > { %v1268_v52 = vmul.f32 %v20222_v62, %v13804_v59  ;;  %v20225_v59 = vrot.slane %v20178_v29, %v11041_v11  ;;  %9886 = vmatpush1.bf16.msra.mxu1 %v9885_v46  ;;  %v14060_v62 = vpop.permute.xlu1 %676  ;;  %9605 = vmatprep.mubr.msk.f32.mxu1 %vm4332_vm1, %v13055_v20  ;;  %v20227_v38 = vrot.slane %v20061_v8, %v11047_v14  ;;  %v675_v24 = vpop.permute.xlu0 %674 }
 0x1e9   : > { %v2892_v27 = vmul.f32 %v20223_v1, %v14008_v22  ;;  %v2893_v49 = vmul.f32 %v20224_v6, %v14042_v30  ;;  %v3015_v47 = vmul.f32 %v20226_v42, %v14025_v48  ;;  %9888 = vmatprep.subr.bf16.mxu1 %v9887_v0  ;;  %v20230_v6 = vld [vmem:[#allocation29_spill] sm:$0xff] }
 0x1ea   : > { %v3014_v54 = vmul.f32 %v20225_v59, %v14030_v53  ;;  %v1267_v23 = vmul.f32 %v20227_v38, %v13809_v58  ;;  %v9889_v59 = vpack.c.bf16 %v974_v56, %v803_v37  ;;  %v20228_v58 = vrot.slane %v20141_v25, %v11049_v15  ;;  %v20229_v38 = vld [vmem:[#allocation69_spill] sm:$0xff] }
 0x1eb   : > { %v9867_v42 = vpack.c.bf16 %v3015_v47, %v2893_v49  ;;  %v9891_v63 = vpack.c.bf16 %v1268_v52, %v20229_v38  ;;  %v14088_v37 = vsel %vm686_vm3, %v13701_v33, %v675_v24  ;;  %v20232_v33 = vrot.slane %v20141_v25, %v11047_v14 }
 0x1ec   : > { %v9869_v60 = vpack.c.bf16 %v3014_v54, %v2892_v27  ;;  %v1610_v0 = vmul.f32 %v20228_v58, %v13886_v61  ;;  %9890 = vmatpush1.bf16.msra.mxu1 %v9889_v59  ;;  %v14090_v56 = vpop.permute.xlu1 %847  ;;  %v20231_v27 = vrot.slane %v20094_v17, %v11049_v15  ;;  %v846_v47 = vpop.permute.xlu0 %845  ;;  %v20233_v59 = vld [vmem:[#allocation76_spill] sm:$0xff]  ;;  %v20234_v58 = vrot.slane %v20094_v17, %v11047_v14  ;;  %v20247_v61 = vld [vmem:[#allocation131_spill] sm:$0xff] }
 0x1ed   : > { %9868 = vmatprep.subr.bf16.mxu0 %v9867_v42  ;;  %v1609_v54 = vmul.f32 %v20232_v33, %v13891_v26  ;;  %9892 = vmatprep.subr.bf16.mxu1 %v9891_v63  ;;  %v9893_v42 = vpack.c.bf16 %v1267_v23, %v20233_v59  ;;  %v14112_v52 = vsel %vm857_vm4, %v846_v47, %v14090_v56  ;;  %v20238_v23 = vld [vmem:[#allocation25_spill] sm:$0xff] }
 0x1ee   : > { %v1439_v49 = vmul.f32 %v20231_v27, %v13848_v5  ;;  %9870 = vmatpush1.bf16.msra.mxu0 %v9869_v60  ;;  %v1438_v38 = vmul.f32 %v20234_v58, %v13877_v43  ;;  %v20235_v5 = vld [vmem:[#allocation34_spill] sm:$0xff]  ;;  %v20239_v33 = vrot.slane %v20238_v23, %v11049_v15  ;;  %v14128_v43 = vsel %vm686_vm3, %v675_v24, %v14060_v62 }
 0x1ef   : > { %v14117_v27 = vsel %vm857_vm4, %v20235_v5, %v846_v47  ;;  %v20240_v58 = vrot.slane %v20230_v6, %v11041_v11  ;;  %v20241_v5 = vrot.slane %v20230_v6, %v11037_v9  ;;  %v20243_v24 = vrot.slane %v20214_v41, %v11037_v9 }
 0x1f0   : > { %v1903_v59 = vmul.f32 %v20239_v33, %v14042_v30  ;;  %v9895_v47 = vpack.c.bf16 %v1610_v0, %v1439_v49  ;;  %v20242_v33 = vrot.slane %v20214_v41, %v11041_v11  ;;  %9894 = vmatpush1.bf16.msra.mxu1 %v9893_v42  ;;  %v14146_v40 = vpop.permute.xlu1 %1142  ;;  %v1141_v31 = vpop.permute.xlu0 %1140  ;;  %v9897_v36 = vpack.c.bf16 %v1609_v54, %v1438_v38  ;;  %v20250_v49 = vld [vmem:[#allocation43_spill] sm:$0xff]  ;;  %v20253_v0 = vld [vmem:[#allocation42_spill] sm:$0xff] }
 0x1f1   : > { %v3136_v46 = vmul.f32 %v20240_v58, %v14088_v37  ;;  %v3137_v60 = vmul.f32 %v20241_v5, %v14128_v43  ;;  %v3259_v1 = vmul.f32 %v20243_v24, %v14112_v52  ;;  %20244 = vst [vmem:[#allocation21_spill] sm:$0xff] %v14146_v40  ;;  %v20248_v5 = vrot.slane %v20247_v61, %v11049_v15 }
 0x1f2   : > { %v3258_v20 = vmul.f32 %v20242_v33, %v14117_v27  ;;  %v20249_v33 = vrot.slane %v20238_v23, %v11047_v14  ;;  %9896 = vmatprep.subr.bf16.mxu1 %v9895_v47  ;;  %v14163_v24 = vsel %vm1150_vm5, %v1141_v31, %v14146_v40  ;;  %v20251_v47 = vrot.slane %v20247_v61, %v11047_v14 }
 0x1f3   : > { %v1781_v26 = vmul.f32 %v20248_v5, %v13934_v50  ;;  %v14168_v50 = vsel %vm1150_vm5, %v20250_v49, %v1141_v31  ;;  %v9871_v5 = vpack.c.bf16 %v3259_v1, %v3137_v60  ;;  %v20252_v38 = vrot.slane %v20163_v28, %v11049_v15  ;;  %v20263_v60 = vld [vmem:[#allocation30_spill] sm:$0xff] }
 0x1f4   : > { %v1902_v63 = vmul.f32 %v20249_v33, %v14008_v22  ;;  %v9873_v58 = vpack.c.bf16 %v3258_v20, %v3136_v46  ;;  %v1780_v54 = vmul.f32 %v20251_v47, %v13939_v44  ;;  %v20255_v31 = vrot.slane %v20254_v34, %v11041_v11  ;;  %9898 = vmatpush1.bf16.msra.mxu1 %v9897_v36  ;;  %v14188_v44 = vpop.permute.xlu1 %1313  ;;  %v20274_v36 = vld [vmem:[#allocation74_spill] sm:$0xff] }
 0x1f5   : > { %v2147_v33 = vmul.f32 %v20252_v38, %v14128_v43  ;;  %v9899_v42 = vpack.c.bf16 %v1903_v59, %v1781_v26  ;;  %v20256_v46 = vrot.slane %v20254_v34, %v11037_v9  ;;  %9872 = vmatprep.subr.bf16.mxu0 %v9871_v5  ;;  %20257 = vst [vmem:[#allocation90_spill] sm:$0xff] %v14188_v44  ;;  %v20260_v59 = vld [vmem:[#allocation26_spill] sm:$0xff] }
 0x1f6   : > { %v3502_v1 = vmul.f32 %v20255_v31, %v14168_v50  ;;  %v20261_v47 = vrot.slane %v20260_v59, %v11049_v15  ;;  %9874 = vmatpush1.bf16.msra.mxu0 %v9873_v58  ;;  %v1312_v31 = vpop.permute.xlu0 %1311  ;;  %v20262_v5 = vrot.slane %v20163_v28, %v11047_v14  ;;  %v9901_v26 = vpack.c.bf16 %v1902_v63, %v1780_v54 }
 0x1f7   : > { %v3503_v20 = vmul.f32 %v20256_v46, %v14163_v24  ;;  %9900 = vmatprep.subr.bf16.mxu1 %v9899_v42  ;;  %v20265_v58 = vrot.slane %v20173_v4, %v11049_v15  ;;  %v20266_v63 = vrot.slane %v20260_v59, %v11047_v14  ;;  %v20339_v59 = vld [vmem:[#allocation121_spill] sm:$0xff] }
 0x1f8   : > { %v2025_v38 = vmul.f32 %v20261_v47, %v14025_v48  ;;  %v2146_v46 = vmul.f32 %v20262_v5, %v14088_v37  ;;  %v9877_v61 = vpack.c.bf16 %v3502_v1, %v20264_v32  ;;  %v14221_v32 = vsel %vm1321_vm6, %v1312_v31, %v14188_v44  ;;  %v20268_v1 = vld [vmem:[#allocation70_spill] sm:$0xff]  ;;  %9902 = vmatpush1.bf16.msra.mxu1 %v9901_v26 }
 0x1f9   : > { %v9875_v49 = vpack.c.bf16 %v3503_v20, %v20263_v60  ;;  %v2269_v42 = vmul.f32 %v20265_v58, %v14112_v52  ;;  %v2024_v54 = vmul.f32 %v20266_v63, %v14030_v53  ;;  %20267 = vst [vmem:[#allocation92_spill] sm:$0xff] %v14221_v32  ;;  %v14228_v20 = vpop.permute.xlu1 %1484  ;;  %v20270_v60 = vrot.slane %v20110_v55, %v11051_v16 }
 0x1fa   : > { %v9903_v47 = vpack.c.bf16 %v2147_v33, %v2025_v38  ;;  %v14226_v33 = vsel %vm1321_vm6, %v20268_v1, %v1312_v31  ;;  %20269 = vst [vmem:[#allocation54_spill] sm:$0xff] %v14228_v20  ;;  %v20271_v5 = vrot.slane %v20173_v4, %v11047_v14  ;;  %v1483_v31 = vpop.permute.xlu0 %1482  ;;  %v20278_v1 = vrot.slane %v20253_v0, %v11041_v11 }
 0x1fb   : > { %9876 = vmatprep.subr.bf16.mxu0 %v9875_v49  ;;  %v14234_v38 = vmul.f32 %v20270_v60, %v14030_v53  ;;  %v14245_v49 = vsel %vm1492_vm7, %v1483_v31, %v14228_v20  ;;  %v14250_v53 = vsel %vm1492_vm7, %v20274_v36, %v1483_v31  ;;  %v9905_v60 = vpack.c.bf16 %v2146_v46, %v2024_v54  ;;  %v14267_v31 = vld [vmem:[%s10935_s9 + $0x58] sm:$0xff]  ;;  %v20280_v54 = vld [vmem:[#allocation47_spill] sm:$0xff] }
 0x1fc   : > { %v2268_v58 = vmul.f32 %v20271_v5, %v14117_v27  ;;  %9904 = vmatprep.subr.bf16.mxu1 %v9903_v47  ;;  %9878 = vmatpush1.bf16.msra.mxu0 %v9877_v61  ;;  %v20277_v61 = vrot.slane %v20182_v35, %v11049_v15  ;;  %v3624_v63 = vmul.f32 %v20278_v1, %v14226_v33 }
 0x1fd   : > { %v20279_v26 = vrot.slane %v20253_v0, %v11037_v9  ;;  %v9907_v46 = vpack.c.bf16 %v14267_v31, %v2269_v42  ;;  %v20281_v5 = vrot.slane %v20280_v54, %v11041_v11  ;;  %9906 = vmatpush1.bf16.msra.mxu1 %v9905_v60  ;;  %v14278_v1 = vpop.permute.xlu1 %1655  ;;  %v20287_v42 = vrot.slane %v20186_v21, %v11049_v15  ;;  %v20288_v0 = vld [vmem:[#allocation27_spill] sm:$0xff] }
 0x1fe   : > { %v2529_v47 = vmul.f32 %v20277_v61, %v14221_v32  ;;  %v20282_v61 = vrot.slane %v20280_v54, %v11037_v9  ;;  %v9909_v23 = vpack.c.bf16 %v20288_v0, %v2268_v58  ;;  %v20294_v58 = vrot.slane %v20110_v55, %v11045_v13 }
 0x1ff   : > { %v3625_v36 = vmul.f32 %v20279_v26, %v14221_v32  ;;  %v3746_v45 = vmul.f32 %v20281_v5, %v14250_v53  ;;  %v2407_v20 = vmul.f32 %v20287_v42, %v14163_v24  ;;  %9908 = vmatprep.subr.bf16.mxu1 %v9907_v46  ;;  %v1654_v5 = vpop.permute.xlu0 %1653  ;;  %v20293_v26 = vrot.slane %v20182_v35, %v11047_v14  ;;  %v20296_v32 = vld [vmem:[#allocation56_spill] sm:$0xff] }
 0x200   : > { %v3747_v12 = vmul.f32 %v20282_v61, %v14245_v49  ;;  %v14300_v44 = vsel %vm1663_vm8, %v1654_v5, %v14278_v1  ;;  %v635_v60 = vmul.f32 %v20294_v58, %v14025_v48  ;;  %v20295_v54 = vrot.slane %v20142_v19, %v11049_v15 }
 0x201   : > { %v2528_v28 = vmul.f32 %v20293_v26, %v14226_v33  ;;  %v9881_v42 = vpack.c.bf16 %v3746_v45, %v3624_v63  ;;  %v20297_v26 = vrot.slane %v20296_v32, %v11049_v15  ;;  %v9911_v61 = vpack.c.bf16 %v2529_v47, %v2407_v20  ;;  %v20299_v63 = vld [vmem:[#allocation39_spill] sm:$0xff]  ;;  %9910 = vmatpush1.bf16.msra.mxu1 %v9909_v23 }
 0x202   : > { %v9879_v46 = vpack.c.bf16 %v3747_v12, %v3625_v36  ;;  %v2651_v17 = vmul.f32 %v20295_v54, %v14245_v49  ;;  %v20298_v12 = vrot.slane %v20186_v21, %v11047_v14  ;;  %v14321_v48 = vsel %vm1663_vm8, %v20299_v63, %v1654_v5  ;;  %v508_v36 = vpop.permute.xlu1 %507  ;;  %v20300_v54 = vld [vmem:[#allocation58_spill] sm:$0xff] }
 0x203   : > { %v2773_v40 = vmul.f32 %v20297_v26, %v14300_v44  ;;  %v20301_v58 = vrot.slane %v20300_v54, %v11037_v9  ;;  %9912 = vmatprep.subr.bf16.mxu1 %v9911_v61  ;;  %v20302_v23 = vrot.slane %v20120_v18, %v11051_v16  ;;  %v336_v63 = vpop.permute.xlu0 %335 }
 0x204   : > { %v2406_v45 = vmul.f32 %v20298_v12, %v14168_v50  ;;  %9880 = vmatprep.subr.bf16.mxu0 %v9879_v46  ;;  %v20303_v46 = vrot.slane %v20120_v18, %v11045_v13 }
 0x205   : > { %v3869_v10 = vmul.f32 %v20301_v58, %v14300_v44  ;;  %9882 = vmatpush1.bf16.msra.mxu0 %v9881_v42  ;;  %v9915_v20 = vpack.c.bf16 %v2773_v40, %v2651_v17  ;;  %v463_v5 = vmul.f32 %v20302_v23, %v14008_v22  ;;  %v20304_v40 = vrot.slane %v20023_v3, %v11045_v13  ;;  %v20306_v23 = vld [vmem:[#allocation71_spill] sm:$0xff]  ;;  %v20318_v17 = vld [vmem:[#allocation41_spill] sm:$0xff] }
 0x206   : > { %v464_v12 = vmul.f32 %v20303_v46, %v14042_v30  ;;  %v9913_v61 = vpack.c.bf16 %v2528_v28, %v2406_v45  ;;  %v20305_v22 = vrot.slane %v20300_v54, %v11041_v11  ;;  %v14352_v30 = vsel %vm515_vm0, %v508_v36, %v20306_v23  ;;  %v20307_v28 = vld [vmem:[#allocation72_spill] sm:$0xff]  ;;  %v850_v45 = vpop.permute.xlu1 %849 }
 0x207   : > { %4672 = vmatprep.subr.mxu0 %v3869_v10  ;;  %v977_v42 = vmul.f32 %v20304_v40, %v14112_v52  ;;  %v14357_v10 = vsel %vm345_vm2, %v336_v63, %v20307_v28  ;;  %v9937_v52 = vpack.c.bf16 %v14234_v38, %v463_v5  ;;  %v20308_v40 = vld [vmem:[#allocation141_spill] sm:$0xff]  ;;  %v20309_v23 = vrot.slane %v20125_v57, %v11045_v13 }
 0x208   : > { %v3868_v58 = vmul.f32 %v20305_v22, %v14321_v48  ;;  %9914 = vmatpush1.bf16.msra.mxu1 %v9913_v61  ;;  %v9935_v46 = vpack.c.bf16 %v635_v60, %v464_v12  ;;  %v1061_v47 = vrot.slane %v20308_v40, %v11045_v13  ;;  %v1057_v22 = vrot.slane %v20308_v40, %v11051_v16 }
 0x209   : > { %v806_v26 = vmul.f32 %v20309_v23, %v14128_v43  ;;  %v20310_v28 = vrot.slane %v20023_v3, %v11051_v16  ;;  %v20311_v38 = vrot.slane %v20296_v32, %v11047_v14  ;;  %9916 = vmatprep.subr.bf16.mxu1 %v9915_v20  ;;  %v14379_v5 = vsel %vm515_vm0, %v14010_v51, %v508_v36  ;;  %v679_v23 = vpop.permute.xlu0 %678 }
 0x20a   : > { %4673 = vmatpush1.msra.mxu0 %v3868_v58  ;;  %v20312_v43 = vrot.slane %v20178_v29, %v11049_v15  ;;  %v20313_v20 = vrot.slane %v20185_v39, %v11049_v15  ;;  %v20314_v51 = vrot.slane %v20142_v19, %v11047_v14  ;;  %v3339_v9 = vrot.slane %v20318_v17, %v11049_v15 }
 0x20b   : > { %v976_v61 = vmul.f32 %v20310_v28, %v14117_v27  ;;  %v2772_v60 = vmul.f32 %v20311_v38, %v14321_v48  ;;  %v14388_v27 = vsel %vm345_vm2, %v13963_v7, %v336_v63  ;;  %9936 = vmatprep.subr.bf16.mxu0 %v9935_v46  ;;  %v20315_v28 = vld [vmem:[#allocation86_spill] sm:$0xff]  ;;  %v14411_v63 = vld [vmem:[%s18939_s1] sm:$0xff]  ;;  %v9939_v46 = vpack.c.bf16 %v977_v42, %v806_v26 }
 0x20c   : > { %v3017_v12 = vmul.f32 %v20312_v43, %v14352_v30  ;;  %v2895_v58 = vmul.f32 %v20313_v20, %v14357_v10  ;;  %v2650_v36 = vmul.f32 %v20314_v51, %v14250_v53  ;;  %v14401_v38 = vsel %vm857_vm4, %v850_v45, %v20315_v28  ;;  %v20316_v43 = vld [vmem:[#allocation87_spill] sm:$0xff]  ;;  %4685 = vmatmul.mubr.f32.vlgmr.msra.gmra.mrb[4].mxu0 %v14411_v63 }
 0x20d   : > { %v14406_v7 = vsel %vm686_vm3, %v679_v23, %v20316_v43  ;;  %v20317_v20 = vrot.slane %v20061_v8, %v11045_v13  ;;  %9938 = vmatpush1.bf16.msra.mxu0 %v9937_v52  ;;  %v1099_v28 = vmul.f32 %v14267_v31, %v1061_v47  ;;  %v20319_v11 = vrot.slane %v20125_v57, %v11051_v16 }
 0x20e   : > { %v20320_v26 = vrot.slane %v20178_v29, %v11047_v14  ;;  %v9917_v47 = vpack.c.bf16 %v2772_v60, %v2650_v36  ;;  %9940 = vmatprep.subr.bf16.mxu0 %v9939_v46  ;;  %v20322_v52 = vrot.slane %v20214_v41, %v11049_v15  ;;  %v9919_v43 = vpack.c.bf16 %v3017_v12, %v2895_v58  ;;  %v1145_v29 = vpop.permute.xlu0 %1144 }
 0x20f   : > { %v1270_v51 = vmul.f32 %v20317_v20, %v14163_v24  ;;  %v805_v4 = vmul.f32 %v20319_v11, %v14088_v37  ;;  %v20321_v24 = vrot.slane %v20185_v39, %v11047_v14  ;;  %v20323_v11 = vrot.slane %v20230_v6, %v11049_v15  ;;  %v14447_v39 = vld [vmem:[%s18939_s1 + $0x8] sm:$0xff] }
 0x210   : > { %v3016_v42 = vmul.f32 %v20320_v26, %v14379_v5  ;;  %v3261_v20 = vmul.f32 %v20322_v52, %v14401_v38  ;;  %v1098_v26 = vmul.f32 %v20288_v0, %v1057_v22  ;;  %9606 = vmatprep.mubr.msk.f32.mxu0 %vm4332_vm1, %v14447_v39  ;;  %v20324_v60 = vrot.slane %v20061_v8, %v11051_v16 }
 0x211   : > { %v2894_v31 = vmul.f32 %v20321_v24, %v14388_v27  ;;  %v3139_v37 = vmul.f32 %v20323_v11, %v14406_v7  ;;  %v14458_v12 = vsel %vm857_vm4, %v14090_v56, %v850_v45  ;;  %v14463_v0 = vsel %vm686_vm3, %v14060_v62, %v679_v23  ;;  %9918 = vmatpush1.bf16.msra.mxu1 %v9917_v47  ;;  %v20326_v24 = vld [vmem:[#allocation103_spill] sm:$0xff]  ;;  %v20328_v11 = vld [vmem:[#allocation92_spill] sm:$0xff]  ;;  %v20329_v62 = vld [vmem:[#allocation125_spill] sm:$0xff] }
 0x212   : > { %v1269_v36 = vmul.f32 %v20324_v60, %v14168_v50  ;;  %v9941_v22 = vpack.c.bf16 %v976_v61, %v805_v4  ;;  %v20325_v58 = vrot.slane %v20141_v25, %v11045_v13  ;;  %9920 = vmatprep.subr.bf16.mxu1 %v9919_v43  ;;  %v14472_v50 = vsel %vm1150_vm5, %v1145_v29, %v20326_v24  ;;  %v20327_v45 = vld [vmem:[#allocation47_spill] sm:$0xff]  ;;  %v1316_v61 = vpop.permute.xlu1 %1315  ;;  %v14481_v60 = vld [vmem:[%s10935_s9 + $0x68] sm:$0xff] }
 0x213   : > { %v9943_v56 = vpack.c.bf16 %v1270_v51, %v1099_v28  ;;  %v3705_v52 = vrot.slane %v20327_v45, %v11049_v15  ;;  %v20330_v23 = vrot.slane %v20329_v62, %v11045_v13  ;;  %v9921_v47 = vpack.c.bf16 %v3016_v42, %v2894_v31 }
 0x214   : > { %v1612_v46 = vmul.f32 %v20325_v58, %v14245_v49  ;;  %9942 = vmatpush1.bf16.msra.mxu0 %v9941_v22  ;;  %v3383_v49 = vmul.f32 %v14481_v60, %v3339_v9  ;;  %v3335_v43 = vrot.slane %v20318_v17, %v11047_v14  ;;  %v20331_v51 = vrot.slane %v20214_v41, %v11047_v14  ;;  %v1487_v9 = vpop.permute.xlu0 %1486  ;;  %v20347_v17 = vld [vmem:[#allocation54_spill] sm:$0xff] }
 0x215   : > { %v1441_v4 = vmul.f32 %v20330_v23, %v20328_v11  ;;  %v20332_v58 = vrot.slane %v20230_v6, %v11047_v14  ;;  %v20333_v42 = vrot.slane %v20254_v34, %v11049_v15  ;;  %v9923_v22 = vpack.c.bf16 %v3261_v20, %v3139_v37  ;;  %9944 = vmatprep.subr.bf16.mxu0 %v9943_v56  ;;  %v20335_v23 = vld [vmem:[#allocation21_spill] sm:$0xff]  ;;  %v20336_v6 = vld [vmem:[#allocation127_spill] sm:$0xff] }
 0x216   : > { %v3260_v28 = vmul.f32 %v20331_v51, %v14458_v12  ;;  %v20334_v11 = vrot.slane %v20141_v25, %v11051_v16  ;;  %v14505_v51 = vsel %vm1150_vm5, %v20335_v23, %v1145_v29  ;;  %9922 = vmatpush1.bf16.msra.mxu1 %v9921_v47  ;;  %v9945_v20 = vpack.c.bf16 %v1269_v36, %v1098_v26  ;;  %v20337_v37 = vld [vmem:[#allocation25_spill] sm:$0xff]  ;;  %v20341_v36 = vld [vmem:[#allocation131_spill] sm:$0xff] }
 0x217   : > { %v3138_v24 = vmul.f32 %v20332_v58, %v14463_v0  ;;  %v3505_v31 = vmul.f32 %v20333_v42, %v14472_v50  ;;  %v14510_v58 = vsel %vm1492_vm7, %v1487_v9, %v20336_v6  ;;  %v20338_v56 = vrot.slane %v20337_v37, %v11045_v13  ;;  %9924 = vmatprep.subr.bf16.mxu1 %v9923_v22 }
 0x218   : > { %v1611_v41 = vmul.f32 %v20334_v11, %v14250_v53  ;;  %v14519_v53 = vsel %vm1321_vm6, %v1316_v61, %v20339_v59  ;;  %v9947_v47 = vpack.c.bf16 %v1612_v46, %v1441_v4  ;;  %v20340_v11 = vrot.slane %v20329_v62, %v11051_v16  ;;  %9946 = vmatpush1.bf16.msra.mxu0 %v9945_v20  ;;  %v14534_v59 = vld [vmem:[%s10935_s9 + $0x60] sm:$0xff]  ;;  %v20345_v20 = vld [vmem:[#allocation42_spill] sm:$0xff] }
 0x219   : > { %v1905_v42 = vmul.f32 %v20338_v56, %v14357_v10  ;;  %v20342_v23 = vrot.slane %v20341_v36, %v11045_v13  ;;  %v3701_v56 = vrot.slane %v20327_v45, %v11047_v14  ;;  %v3382_v22 = vmul.f32 %v14534_v59, %v3335_v43 }
 0x21a   : > { %v1440_v26 = vmul.f32 %v20340_v11, %v14226_v33  ;;  %v20343_v46 = vrot.slane %v20254_v34, %v11047_v14  ;;  %v3749_v33 = vmul.f32 %v3705_v52, %v14510_v58  ;;  %v9925_v11 = vpack.c.bf16 %v3260_v28, %v3138_v24  ;;  %9948 = vmatprep.subr.bf16.mxu0 %v9947_v47  ;;  %v20348_v52 = vld [vmem:[#allocation33_spill] sm:$0xff] }
 0x21b   : > { %v1783_v6 = vmul.f32 %v20342_v23, %v14300_v44  ;;  %v9927_v29 = vpack.c.bf16 %v3505_v31, %v3383_v49  ;;  %v20344_v44 = vrot.slane %v20337_v37, %v11051_v16  ;;  %v20346_v23 = vrot.slane %v20345_v20, %v11049_v15  ;;  %v20350_v31 = vld [vmem:[#allocation14_spill] sm:$0xff] }
 0x21c   : > { %v3504_v4 = vmul.f32 %v20343_v46, %v14505_v51  ;;  %v14553_v34 = vsel %vm1492_vm7, %v20347_v17, %v1487_v9  ;;  %v9949_v46 = vpack.c.bf16 %v1611_v41, %v1440_v26  ;;  %v20349_v49 = vrot.slane %v20348_v52, %v11045_v13  ;;  %9926 = vmatpush1.bf16.msra.mxu1 %v9925_v11  ;;  %v20352_v9 = vld [vmem:[#allocation90_spill] sm:$0xff]  ;;  %v1658_v26 = vpop.permute.xlu1 %1657 }
 0x21d   : > { %v1904_v45 = vmul.f32 %v20344_v44, %v14388_v27  ;;  %v3627_v43 = vmul.f32 %v20346_v23, %v14519_v53  ;;  %v3823_v24 = vrot.slane %v20300_v54, %v11047_v14  ;;  %v9951_v44 = vpack.c.bf16 %v1905_v42, %v1783_v6  ;;  %9928 = vmatprep.subr.bf16.mxu1 %v9927_v29  ;;  %v20353_v37 = vld [vmem:[#allocation26_spill] sm:$0xff] }
 0x21e   : > { %v2149_v28 = vmul.f32 %v20349_v49, %v14406_v7  ;;  %v20351_v23 = vrot.slane %v20341_v36, %v11051_v16  ;;  %v14570_v41 = vsel %vm1321_vm6, %v20352_v9, %v1316_v61  ;;  %9950 = vmatpush1.bf16.msra.mxu0 %v9949_v46  ;;  %v20354_v47 = vrot.slane %v20353_v37, %v11045_v13  ;;  %v20356_v46 = vld [vmem:[#allocation36_spill] sm:$0xff] }
 0x21f   : > { %v9931_v49 = vpack.c.bf16 %v3749_v33, %v3627_v43  ;;  %v3748_v6 = vmul.f32 %v3701_v56, %v14553_v34  ;;  %9952 = vmatprep.subr.bf16.mxu0 %v9951_v44  ;;  %v20355_v61 = vrot.slane %v20348_v52, %v11051_v16  ;;  %v2615_v29 = vrot.slane %v20142_v19, %v11045_v13  ;;  %v20360_v44 = vld [vmem:[#allocation16_spill] sm:$0xff] }
 0x220   : > { %v1782_v17 = vmul.f32 %v20351_v23, %v14321_v48  ;;  %v2027_v11 = vmul.f32 %v20354_v47, %v14352_v30  ;;  %v9929_v48 = vpack.c.bf16 %v3504_v4, %v3382_v22  ;;  %v3827_v43 = vrot.slane %v20300_v54, %v11049_v15  ;;  %v20359_v4 = vld [vmem:[#allocation138_spill] sm:$0xff]  ;;  %v20367_v15 = vld [vmem:[#allocation60_spill] sm:$0xff] }
 0x221   : > { %v2148_v23 = vmul.f32 %v20355_v61, %v14463_v0  ;;  %v20357_v47 = vrot.slane %v20356_v46, %v11045_v13  ;;  %v20358_v56 = vrot.slane %v20345_v20, %v11047_v14  ;;  %v14598_v52 = vsel %vm1663_vm8, %v1658_v26, %v20359_v4  ;;  %v20365_v4 = vld [vmem:[#allocation144_spill] sm:$0xff]  ;;  %v20366_v14 = vld [vmem:[#allocation143_spill] sm:$0xff] }
 0x222   : > { %v9953_v33 = vpack.c.bf16 %v1904_v45, %v1782_v17  ;;  %9930 = vmatpush1.bf16.msra.mxu1 %v9929_v48  ;;  %v9955_v45 = vpack.c.bf16 %v2149_v28, %v2027_v11  ;;  %v20361_v17 = vrot.slane %v20110_v55, %v20360_v44  ;;  %v1069_v20 = vrot.slane %v20308_v40, %v20350_v31 }
 0x223   : > { %v2271_v9 = vmul.f32 %v20357_v47, %v14401_v38  ;;  %v3626_v22 = vmul.f32 %v20358_v56, %v14570_v41  ;;  %v20362_v47 = vrot.slane %v20353_v37, %v11051_v16  ;;  %9932 = vmatprep.subr.bf16.mxu1 %v9931_v49  ;;  %v20363_v48 = vrot.slane %v20110_v55, %v20350_v31  ;;  %v20364_v56 = vld [vmem:[#allocation137_spill] sm:$0xff] }
 0x224   : > { %v636_v61 = vmul.f32 %v20361_v17, %v14379_v5  ;;  %9954 = vmatpush1.bf16.msra.mxu0 %v9953_v33  ;;  %v10035_v17 = vpack.c.bf16 %v20365_v4, %v20364_v56  ;;  %v10037_v54 = vpack.c.bf16 %v20367_v15, %v20366_v14  ;;  %v14625_v49 = vsel %vm1663_vm8, %v14278_v1, %v1658_v26 }
 0x225   : > { %v2026_v42 = vmul.f32 %v20362_v47, %v14379_v5  ;;  %v637_v28 = vmul.f32 %v20363_v48, %v14352_v30  ;;  %v9933_v11 = vpack.c.bf16 %v3748_v6, %v3626_v22  ;;  %9956 = vmatprep.subr.bf16.mxu0 %v9955_v45  ;;  %v20368_v5 = vrot.slane %v20120_v18, %v20350_v31 }
 0x226   : > { %v3871_v55 = vmul.f32 %v3827_v43, %v14598_v52  ;;  %v20369_v6 = vrot.slane %v20120_v18, %v20360_v44  ;;  %v20370_v22 = vrot.slane %v20023_v3, %v20350_v31  ;;  %v9959_v1 = vpack.c.bf16 %v14481_v60, %v2271_v9 }
 0x227   : > { %v466_v37 = vmul.f32 %v20368_v5, %v14357_v10  ;;  %v9957_v30 = vpack.c.bf16 %v2148_v23, %v2026_v42  ;;  %v20371_v10 = vrot.slane %v20356_v46, %v11051_v16  ;;  %9934 = vmatpush1.bf16.msra.mxu1 %v9933_v11  ;;  %v20372_v26 = vrot.slane %v20125_v57, %v20350_v31 }
 0x228   : > { %v465_v33 = vmul.f32 %v20369_v6, %v14388_v27  ;;  %v979_v45 = vmul.f32 %v20370_v22, %v14401_v38  ;;  %v20373_v18 = vrot.slane %v20182_v35, %v11045_v13  ;;  %v20374_v38 = vrot.slane %v20186_v21, %v11045_v13  ;;  %4743 = vmatprep.subr.mxu1 %v3871_v55 }
 0x229   : > { %v2270_v47 = vmul.f32 %v20371_v10, %v14458_v12  ;;  %v808_v42 = vmul.f32 %v20372_v26, %v14406_v7  ;;  %9958 = vmatpush1.bf16.msra.mxu0 %v9957_v30  ;;  %v20375_v43 = vrot.slane %v20023_v3, %v20360_v44  ;;  %v3870_v48 = vmul.f32 %v3823_v24, %v14625_v49 }
 0x22a   : > { %v2531_v27 = vmul.f32 %v20373_v18, %v14519_v53  ;;  %v2409_v23 = vmul.f32 %v20374_v38, %v14472_v50  ;;  %9960 = vmatprep.subr.bf16.mxu0 %v9959_v1  ;;  %v1101_v7 = vmul.f32 %v14481_v60, %v1069_v20  ;;  %v1065_v11 = vrot.slane %v20308_v40, %v20360_v44 }
 0x22b   : > { %v978_v9 = vmul.f32 %v20375_v43, %v14458_v12  ;;  %v20376_v5 = vrot.slane %v20125_v57, %v20360_v44  ;;  %v20377_v55 = vrot.slane %v20182_v35, %v11051_v16  ;;  %v20378_v3 = vrot.slane %v20061_v8, %v20350_v31  ;;  %4744 = vmatpush1.msra.mxu1 %v3870_v48 }
 0x22c   : > { %v9987_v24 = vpack.c.bf16 %v637_v28, %v466_v37  ;;  %v20379_v40 = vrot.slane %v20186_v21, %v11051_v16  ;;  %v20380_v57 = vrot.slane %v20296_v32, %v11045_v13  ;;  %v9989_v20 = vpack.c.bf16 %v636_v61, %v465_v33  ;;  %4756 = vmatmul.mubr.f32.vlgmr.msra.gmra.mrb[4].mxu1 %v14411_v63 }
 0x22d   : > { %v807_v6 = vmul.f32 %v20376_v5, %v14463_v0  ;;  %v2530_v30 = vmul.f32 %v20377_v55, %v14570_v41  ;;  %v1272_v12 = vmul.f32 %v20378_v3, %v14472_v50  ;;  %v9961_v35 = vpack.c.bf16 %v14534_v59, %v2270_v47  ;;  %9607 = vmatprep.mubr.msk.f32.mxu1 %vm4332_vm1, %v14447_v39  ;;  %v20389_v3 = vld [vmem:[#allocation78_spill] sm:$0xff] }
 0x22e   : > { %v2408_v60 = vmul.f32 %v20379_v40, %v14505_v51  ;;  %v2775_v0 = vmul.f32 %v20380_v57, %v14598_v52  ;;  %v2653_v22 = vmul.f32 %v2615_v29, %v14510_v58  ;;  %9988 = vmatprep.subr.bf16.mxu1 %v9987_v24  ;;  %v9991_v50 = vpack.c.bf16 %v979_v45, %v808_v42 }
 0x22f   : > { %v9963_v28 = vpack.c.bf16 %v2531_v27, %v2409_v23  ;;  %v1411_v21 = vrot.slane %v20329_v62, %v20350_v31  ;;  %9990 = vmatpush1.bf16.msra.mxu1 %v9989_v20  ;;  %9962 = vmatpush1.bf16.msra.mxu0 %v9961_v35  ;;  %v20381_v37 = vrot.slane %v20061_v8, %v20360_v44  ;;  %v20385_v23 = vld [vmem:[#allocation25_spill] sm:$0xff] }
 0x230   : > { %v1578_v61 = vrot.slane %v20141_v25, %v20360_v44  ;;  %9992 = vmatprep.subr.bf16.mxu1 %v9991_v50  ;;  %v1100_v29 = vmul.f32 %v14534_v59, %v1065_v11  ;;  %v20382_v33 = vrot.slane %v20296_v32, %v11051_v16  ;;  %v20383_v47 = vrot.slane %v20142_v19, %v11051_v16 }
 0x231   : > { %v1271_v10 = vmul.f32 %v20381_v37, %v14505_v51  ;;  %9964 = vmatprep.subr.bf16.mxu0 %v9963_v28  ;;  %v9993_v26 = vpack.c.bf16 %v978_v9, %v807_v6  ;;  %v9965_v8 = vpack.c.bf16 %v2530_v30, %v2408_v60  ;;  %v1753_v51 = vrot.slane %v20341_v36, %v20350_v31  ;;  %v20387_v6 = vld [vmem:[#allocation41_spill] sm:$0xff]  ;;  %v20393_v28 = vld [vmem:[#allocation75_spill] sm:$0xff] }
 0x232   : > { %v2774_v45 = vmul.f32 %v20382_v33, %v14625_v49  ;;  %v2652_v1 = vmul.f32 %v20383_v47, %v14553_v34  ;;  %v20384_v59 = vrot.slane %v20141_v25, %v20350_v31  ;;  %v9995_v18 = vpack.c.bf16 %v1272_v12, %v1101_v7  ;;  %v20386_v7 = vld [vmem:[#allocation38_spill] sm:$0xff]  ;;  %v20394_v37 = vld [vmem:[#allocation79_spill] sm:$0xff]  ;;  %v20400_v47 = vld [vmem:[#allocation48_spill] sm:$0xff] }
 0x233   : > { %v9967_v27 = vpack.c.bf16 %v2775_v0, %v2653_v22  ;;  %v1407_v38 = vrot.slane %v20329_v62, %v20360_v44  ;;  %9994 = vmatpush1.bf16.msra.mxu1 %v9993_v26  ;;  %9966 = vmatpush1.bf16.msra.mxu0 %v9965_v8  ;;  %v1875_v43 = vrot.slane %v20385_v23, %v20350_v31  ;;  %v20390_v12 = vld [vmem:[#allocation82_spill] sm:$0xff]  ;;  %v10553_v8 = vld [vmem:[%s10935_s9 + $0x70] sm:$0xff] }
 0x234   : > { %v1614_v42 = vmul.f32 %v20384_v59, %v14510_v58  ;;  %v1443_v39 = vmul.f32 %v1411_v21, %v14519_v53  ;;  %9996 = vmatprep.subr.bf16.mxu1 %v9995_v18  ;;  %v1749_v9 = vrot.slane %v20341_v36, %v20360_v44  ;;  %v1613_v25 = vmul.f32 %v1578_v61, %v14553_v34  ;;  %v20388_v34 = vld [vmem:[#allocation66_spill] sm:$0xff]  ;;  %v20401_v59 = vld [vmem:[#allocation83_spill] sm:$0xff] }
 0x235   : > { %9968 = vmatprep.subr.bf16.mxu0 %v9967_v27  ;;  %v9997_v58 = vpack.c.bf16 %v1271_v10, %v1100_v29  ;;  %v9969_v48 = vpack.c.bf16 %v2774_v45, %v2652_v1  ;;  %v3469_v11 = vrot.slane %v20386_v7, %v11045_v13  ;;  %v1785_v62 = vmul.f32 %v1753_v51, %v14598_v52  ;;  %v20392_v0 = vld [vmem:[#allocation98_spill] sm:$0xff]  ;;  %v20395_v10 = vld [vmem:[#allocation80_spill] sm:$0xff] }
 0x236   : > { %v9999_v5 = vpack.c.bf16 %v1614_v42, %v1443_v39  ;;  %v3347_v55 = vrot.slane %v20387_v6, %v11045_v13  ;;  %v1871_v53 = vrot.slane %v20385_v23, %v20360_v44  ;;  %v1442_v30 = vmul.f32 %v1407_v38, %v14570_v41  ;;  %v10552_v22 = vld [vmem:[%s10935_s9 + $0x78] sm:$0xff]  ;;  %v20398_v29 = vld [vmem:[#allocation116_spill] sm:$0xff]  ;;  %v20406_v39 = vld [vmem:[#allocation97_spill] sm:$0xff] }
 0x237   : > { %9998 = vmatpush1.bf16.msra.mxu1 %v9997_v58  ;;  %9970 = vmatpush1.bf16.msra.mxu0 %v9969_v48  ;;  %v1907_v36 = vmul.f32 %v1875_v43, %v20388_v34  ;;  %v20391_v24 = vpack.c.bf16 %v20389_v3, %v20390_v12  ;;  %v3465_v52 = vrot.slane %v20386_v7, %v11051_v16  ;;  %v20402_v27 = vld [vmem:[#allocation122_spill] sm:$0xff] }
 0x238   : > { %10000 = vmatprep.subr.bf16.mxu1 %v9999_v5  ;;  %v1784_v40 = vmul.f32 %v1749_v9, %v14625_v49  ;;  %v10001_v60 = vpack.c.bf16 %v1613_v25, %v1442_v30  ;;  %v3343_v57 = vrot.slane %v20387_v6, %v11051_v16  ;;  %v2241_v41 = vrot.slane %v20356_v46, %v20350_v31  ;;  %v20397_v49 = vld [vmem:[#allocation120_spill] sm:$0xff]  ;;  %v20403_v38 = vld [vmem:[#allocation126_spill] sm:$0xff]  ;;  %v20408_v25 = vld [vmem:[#allocation89_spill] sm:$0xff] }
 0x239   : > { %9972 = vmatprep.subr.bf16.mxu0 %v20391_v24  ;;  %v3507_v20 = vmul.f32 %v3469_v11, %v20392_v0  ;;  %v10003_v35 = vpack.c.bf16 %v1907_v36, %v1785_v62  ;;  %v3385_v50 = vmul.f32 %v10552_v22, %v3347_v55  ;;  %v1906_v21 = vmul.f32 %v1871_v53, %v20393_v28  ;;  %v20405_v43 = vld [vmem:[#allocation114_spill] sm:$0xff]  ;;  %v20410_v55 = vld [vmem:[#allocation123_spill] sm:$0xff]  ;;  %v20411_v53 = vld [vmem:[#allocation100_spill] sm:$0xff] }
 0x23a   : > { %v20396_v61 = vpack.c.bf16 %v20394_v37, %v20395_v10  ;;  %v20399_v33 = vpack.c.bf16 %v20397_v49, %v20398_v29  ;;  %v2237_v45 = vrot.slane %v20356_v46, %v20360_v44  ;;  %v3506_v1 = vmul.f32 %v3465_v52, %v20400_v47  ;;  %v20409_v62 = vld [vmem:[#allocation58_spill] sm:$0xff]  ;;  %v20413_v36 = vld [vmem:[#allocation67_spill] sm:$0xff]  ;;  %v20416_v52 = vld [vmem:[#allocation140_spill] sm:$0xff] }
 0x23b   : > { %10002 = vmatpush1.bf16.msra.mxu1 %v10001_v60  ;;  %v10005_v26 = vpack.c.bf16 %v1906_v21, %v1784_v40  ;;  %v3384_v51 = vmul.f32 %v10553_v8, %v3343_v57  ;;  %v2273_v42 = vmul.f32 %v2241_v41, %v20401_v59  ;;  %v9979_v18 = vpack.c.bf16 %v3507_v20, %v3385_v50  ;;  %v20414_v3 = vld [vmem:[#allocation146_spill] sm:$0xff]  ;;  %v20417_v57 = vld [vmem:[#allocation107_spill] sm:$0xff]  ;;  %v20420_v20 = vld [vmem:[#allocation124_spill] sm:$0xff] }
 0x23c   : > { %9974 = vmatpush1.bf16.msra.mxu0 %v20396_v61  ;;  %10004 = vmatprep.subr.bf16.mxu1 %v10003_v35  ;;  %v20404_v23 = vpack.c.bf16 %v20402_v27, %v20403_v38  ;;  %v20407_v9 = vpack.c.bf16 %v20405_v43, %v20406_v39  ;;  %v2272_v46 = vmul.f32 %v2237_v45, %v20408_v25  ;;  %v20418_v41 = vld [vmem:[#allocation110_spill] sm:$0xff]  ;;  %v20421_v35 = vld [vmem:[#allocation145_spill] sm:$0xff]  ;;  %v20424_v28 = vld [vmem:[#allocation139_spill] sm:$0xff] }
 0x23d   : > { %9976 = vmatprep.subr.bf16.mxu0 %v20399_v33  ;;  %v9981_v58 = vpack.c.bf16 %v3506_v1, %v3384_v51  ;;  %v2745_v48 = vrot.slane %v20296_v32, %v20350_v31  ;;  %v10011_v11 = vpack.c.bf16 %v10552_v22, %v2273_v42  ;;  %v3835_v5 = vrot.slane %v20409_v62, %v11045_v13  ;;  %v20422_v22 = vld [vmem:[#allocation132_spill] sm:$0xff]  ;;  %v20425_v10 = vld [vmem:[#allocation77_spill] sm:$0xff]  ;;  %v20428_v45 = vld [vmem:[#allocation111_spill] sm:$0xff] }
 0x23e   : > { %v20412_v30 = vpack.c.bf16 %v20410_v55, %v20411_v53  ;;  %v2623_v34 = vrot.slane %v20142_v19, %v20350_v31  ;;  %v20415_v12 = vpack.c.bf16 %v20413_v36, %v20414_v3  ;;  %v3831_v32 = vrot.slane %v20409_v62, %v11051_v16  ;;  %v20426_v61 = vld [vmem:[#allocation133_spill] sm:$0xff]  ;;  %v10554_v38 = vld [vmem:[%s10935_s9 + $0x8] sm:$0xff]  ;;  %v20442_v53 = vld [vmem:[#allocation118_spill] sm:$0xff] }
 0x23f   : > { %10006 = vmatpush1.bf16.msra.mxu1 %v10005_v26  ;;  %v10013_v24 = vpack.c.bf16 %v10553_v8, %v2272_v46  ;;  %v2777_v40 = vmul.f32 %v2745_v48, %v20416_v52  ;;  %v3873_v60 = vmul.f32 %v3835_v5, %v20416_v52  ;;  %v20419_v0 = vpack.c.bf16 %v20417_v57, %v20418_v41  ;;  %v20429_v47 = vld [vmem:[#allocation113_spill] sm:$0xff]  ;;  %v20432_v8 = vld [vmem:[#allocation88_spill] sm:$0xff]  ;;  %v10555_v5 = vld [vmem:[%s10935_s9] sm:$0xff] }
 0x240   : > { %9978 = vmatpush1.bf16.msra.mxu0 %v20404_v23  ;;  %10008 = vmatprep.subr.bf16.mxu1 %v20407_v9  ;;  %v2655_v19 = vmul.f32 %v2623_v34, %v20420_v20  ;;  %v20423_v50 = vpack.c.bf16 %v20421_v35, %v20422_v22  ;;  %v3872_v21 = vmul.f32 %v3831_v32, %v20424_v28  ;;  %v20431_v26 = vld [vmem:[#allocation85_spill] sm:$0xff]  ;;  %v20435_v43 = vld [vmem:[#allocation96_spill] sm:$0xff] }
 0x241   : > { %9980 = vmatprep.subr.bf16.mxu0 %v9979_v18  ;;  %v20427_v49 = vpack.c.bf16 %v20425_v10, %v20426_v61  ;;  %v3477_v29 = vrot.slane %v20386_v7, %v20350_v31  ;;  %v3355_v33 = vrot.slane %v20387_v6, %v20350_v31  ;;  %v20430_v1 = vpack.c.bf16 %v20428_v45, %v20429_v47  ;;  %v20434_v18 = vld [vmem:[#allocation94_spill] sm:$0xff]  ;;  %v20436_v39 = vld [vmem:[#allocation93_spill] sm:$0xff]  ;;  %v20438_v25 = vld [vmem:[#allocation108_spill] sm:$0xff] }
 0x242   : > { %v10019_v37 = vpack.c.bf16 %v2777_v40, %v2655_v19  ;;  %v20433_v51 = vpack.c.bf16 %v20431_v26, %v20432_v8  ;;  %v3473_v59 = vrot.slane %v20386_v7, %v20360_v44  ;;  %v3351_v42 = vrot.slane %v20387_v6, %v20360_v44  ;;  %v20439_v46 = vld [vmem:[#allocation105_spill] sm:$0xff]  ;;  %v14825_v40 = vpop.permute.xlu0 %4329 }
 0x243   : > { %10010 = vmatpush1.bf16.msra.mxu1 %v20412_v30  ;;  %v3509_v27 = vmul.f32 %v3477_v29, %v20434_v18  ;;  %v3387_v23 = vmul.f32 %v10554_v38, %v3355_v33  ;;  %v20437_v9 = vpack.c.bf16 %v20435_v43, %v20436_v39  ;;  %v20441_v48 = vld [vmem:[#allocation45_spill] sm:$0xff]  ;;  %v20443_v30 = vld [vmem:[#allocation112_spill] sm:$0xff]  ;;  %v3843_v36 = vrot.slane %v20409_v62, %v20350_v31  ;;  %v20459_v43 = vld [vmem:[#allocation18_spill] sm:$0xff] }
 0x244   : > { %9982 = vmatpush1.bf16.msra.mxu0 %v9981_v58  ;;  %10012 = vmatprep.subr.bf16.mxu1 %v10011_v11  ;;  %v20440_v58 = vpack.c.bf16 %v20438_v25, %v20439_v46  ;;  %v3508_v11 = vmul.f32 %v3473_v59, %v20441_v48  ;;  %v3386_v55 = vmul.f32 %v10555_v5, %v3351_v42  ;;  %v4969_v59 = vld [vmem:[#allocation8] ss:$8 sm:$0xf0]  ;;  %v5136_v42 = vld [vmem:[#allocation8 + $0x1] ss:$8 sm:$0xf] }
 0x245   : > { %9984 = vmatprep.subr.bf16.mxu0 %v20415_v12  ;;  %v10031_v7 = vpack.c.bf16 %v3509_v27, %v3387_v23  ;;  %v20444_v6 = vpack.c.bf16 %v20442_v53, %v20443_v30  ;;  %v3839_v3 = vrot.slane %v20409_v62, %v20360_v44  ;;  %v20445_v12 = vld [vmem:[#allocation136_spill] sm:$0xff] }
 0x246   : > { %v10033_v34 = vpack.c.bf16 %v3508_v11, %v3386_v55  ;;  %v3875_v32 = vmul.f32 %v3843_v36, %v20445_v12  ;;  %v5137_v18 = vld [vmem:[#allocation8 + $0x1] ss:$8 sm:$0xf0]  ;;  %v7604_v44 = vld [vmem:[#allocation8 + $0x144] ss:$8 sm:$0xf0] }
 0x247   : > { %10014 = vmatpush1.bf16.msra.mxu1 %v10013_v24  ;;  %v20446_v24 = vld [vmem:[#allocation135_spill] sm:$0xff]  ;;  %v14946_v23 = vor.u32 %v5137_v18, %v5136_v42 }
 0x248   : > { %9986 = vmatpush1.bf16.msra.mxu0 %v20419_v0  ;;  %10016 = vmatprep.subr.bf16.mxu1 %v20423_v50  ;;  %v3874_v52 = vmul.f32 %v3839_v3, %v20446_v24  ;;  %v7120_v18 = vld [vmem:[#allocation8 + $0x100] ss:$8 sm:$0xf] }
 0x249   : > { %4814 = vmatprep.subr.mxu0 %v3873_v60  ;;  %v4402_v60 = vpop.f32.mrb[0].mxu0  ;;  %20458 = vst [vmem:[#allocation115_spill] sm:$0xff] %v14946_v23  ;;  %v5159_v25 = vrot.slane %v14946_v23, %v20459_v43 }
 0x24a   : > { %v4403_v56 = vadd.f32 %v4402_v60, %v14825_v40  ;;  %v4404_v4 = vpop.f32.mrb[1].mxu0 }
 0x24b   : > { %10018 = vmatpush1.bf16.msra.mxu1 %v20427_v49  ;;  %v4405_v62 = vadd.f32 %v4404_v4, %v14825_v40 }
 0x24c   : > { %4815 = vmatpush1.msra.mxu0 %v3872_v21  ;;  %10020 = vmatprep.subr.bf16.mxu1 %v10019_v37 }
 0x24d   : > { %4827 = vmatmul.mubr.f32.vlgmr.msra.gmra.mrb[6].mxu0 %v14411_v63  ;;  %v14858_v57 = vmax.f32 %v4405_v62, 0.0  ;;  %v7001_v62 = vld [vmem:[#allocation8 + $0x87] ss:$8 sm:$0xf0] }
 0x24f   : > { %10022 = vmatpush1.bf16.msra.mxu1 %v20430_v1  ;;  %20449 = vst [vmem:[#allocation109_spill] sm:$0xff] %v14858_v57 }
 0x250   : > { %10024 = vmatprep.subr.bf16.mxu1 %v20433_v51  ;;  %v4968_v51 = vld [vmem:[#allocation8] ss:$8 sm:$0xf] }
 0x251   : > { %v14942_v27 = vor.u32 %v4969_v59, %v4968_v51  ;;  %v6096_v51 = vld [vmem:[#allocation8 + $0x7] ss:$8 sm:$0xf] }
 0x252   : > { %v6097_v59 = vld [vmem:[#allocation8 + $0x7] ss:$8 sm:$0xf0] }
 0x253   : > { %10026 = vmatpush1.bf16.msra.mxu1 %v20437_v9  ;;  %20457 = vst [vmem:[#allocation101_spill] sm:$0xff] %v14942_v27  ;;  %v4991_v39 = vrot.slane %v14942_v27, %v20459_v43  ;;  %v7603_v27 = vld [vmem:[#allocation8 + $0x144] ss:$8 sm:$0xf] }
 0x254   : > { %10028 = vmatprep.subr.bf16.mxu1 %v20440_v58 }
 0x257   : > { %10030 = vmatpush1.bf16.msra.mxu1 %v20444_v6 }
 0x258   : > { %10032 = vmatprep.subr.bf16.mxu1 %v10031_v7 }
 0x25b   : > { %10034 = vmatpush1.bf16.msra.mxu1 %v10033_v34 }
 0x25c   : > { %10036 = vmatprep.subr.bf16.mxu1 %v10035_v17  ;;  %v14828_v17 = vmax.f32 %v4403_v56, 0.0 }
 0x25e   : > { %20447 = vst [vmem:[#allocation28_spill] sm:$0xff] %v14828_v17  ;;  %5088 = vrot.lane.b32.xlu0 %v14828_v17, %s10722_s29  ;;  %4920 = vrot.lane.b32.xlu1 %v14828_v17, %s10723_s14 }
 0x25f   : > { %10038 = vmatpush1.bf16.msra.mxu1 %v10037_v54 }
 0x260   : > { %4885 = vmatprep.subr.mxu1 %v3875_v32 }
 0x262   : > { %5256 = vrot.lane.b32.xlu0 %v14828_v17, %s10724_s27  ;;  %5880 = vrot.lane.b32.xlu1 %v14828_v17, %s10727_s17 }
 0x263   : > { %4886 = vmatpush1.msra.mxu1 %v3874_v52 }
 0x264   : > { %4898 = vmatmul.mubr.f32.vlgmr.msra.gmra.mrb[6].mxu1 %v14411_v63 }
 0x265   : > { %v4473_v14 = vpop.f32.mrb[0].mxu1 }
 0x266   : > { %5424 = vrot.lane.b32.xlu0 %v14828_v17, %s10725_s15  ;;  %v4474_v15 = vadd.f32 %v4473_v14, %v14825_v40  ;;  %v4475_v54 = vpop.f32.mrb[1].mxu1  ;;  %v5928_v14 = vld [vmem:[#allocation8 + $0x6] ss:$8 sm:$0xf] }
 0x267   : > { %v4476_v41 = vadd.f32 %v4475_v54, %v14825_v40  ;;  %v7000_v54 = vld [vmem:[#allocation8 + $0x87] ss:$8 sm:$0xf] }
 0x268   : > { %v14843_v63 = vmax.f32 %v4474_v15, 0.0  ;;  %v5929_v15 = vld [vmem:[#allocation8 + $0x6] ss:$8 sm:$0xf0] }
 0x269   : > { %v14873_v0 = vmax.f32 %v4476_v41, 0.0  ;;  %v8083_v41 = vld [vmem:[#allocation8 + $0x1c0] ss:$8 sm:$0xf] }
 0x26a   : > { %5712 = vrot.lane.b32.xlu0 %v14828_v17, %s10726_s16  ;;  %20448 = vst [vmem:[#allocation19_spill] sm:$0xff] %v14843_v63  ;;  %5884 = vrot.lane.b32.xlu1 %v14843_v63, %s10727_s17 }
 0x26b   : > { %20450 = vst [vmem:[#allocation31_spill] sm:$0xff] %v14873_v0 }
 0x26e   : > { %5716 = vrot.lane.b32.xlu0 %v14843_v63, %s10726_s16  ;;  %6048 = vrot.lane.b32.xlu1 %v14828_v17, %s10728_s12 }
 0x272   : > { %5092 = vrot.lane.b32.xlu0 %v14843_v63, %s10722_s29  ;;  %6052 = vrot.lane.b32.xlu1 %v14843_v63, %s10728_s12 }
 0x276   : > { %5260 = vrot.lane.b32.xlu0 %v14843_v63, %s10724_s27  ;;  %4924 = vrot.lane.b32.xlu1 %v14843_v63, %s10723_s14 }
 0x27a   : > { %5428 = vrot.lane.b32.xlu0 %v14843_v63, %s10725_s15  ;;  %6216 = vrot.lane.b32.xlu1 %v14828_v17, %s10729_s10 }
 0x27e   : > { %5882 = vrot.lane.b32.xlu0 %v14858_v57, %s10727_s17  ;;  %6220 = vrot.lane.b32.xlu1 %v14843_v63, %s10729_s10 }
 0x282   : > { %6050 = vrot.lane.b32.xlu0 %v14858_v57, %s10728_s12  ;;  %4922 = vrot.lane.b32.xlu1 %v14858_v57, %s10723_s14 }
 0x286   : > { %4926 = vrot.lane.b32.xlu0 %v14873_v0, %s10723_s14  ;;  %5090 = vrot.lane.b32.xlu1 %v14858_v57, %s10722_s29 }
 0x28a   : > { %6218 = vrot.lane.b32.xlu0 %v14858_v57, %s10729_s10  ;;  %5258 = vrot.lane.b32.xlu1 %v14858_v57, %s10724_s27 }
 0x28e   : > { %5718 = vrot.lane.b32.xlu0 %v14873_v0, %s10726_s16  ;;  %5426 = vrot.lane.b32.xlu1 %v14858_v57, %s10725_s15 }
 0x291   : > { %v4544_v20 = vpop.f32.mrb[2].mxu0 }
 0x292   : > { %v14883_v19 = vpop.f32.mrb[3].mxu0  ;;  %5886 = vrot.lane.b32.xlu0 %v14873_v0, %s10727_s17  ;;  %5714 = vrot.lane.b32.xlu1 %v14858_v57, %s10726_s16  ;;  %v4545_v35 = vadd.f32 %v4544_v20, %v14825_v40  ;;  %v8084_v20 = vld [vmem:[#allocation8 + $0x1c0] ss:$8 sm:$0xf0] }
 0x294   : > { %v14904_v22 = vmax.f32 %v4545_v35, 0.0 }
 0x296   : > { %6054 = vrot.lane.b32.xlu0 %v14873_v0, %s10728_s12  ;;  %5094 = vrot.lane.b32.xlu1 %v14873_v0, %s10722_s29  ;;  %20451 = vst [vmem:[#allocation40_spill] sm:$0xff] %v14904_v22 }
 0x29a   : > { %6222 = vrot.lane.b32.xlu0 %v14873_v0, %s10729_s10  ;;  %5262 = vrot.lane.b32.xlu1 %v14873_v0, %s10724_s27 }
 0x29e   : > { %5430 = vrot.lane.b32.xlu1 %v14873_v0, %s10725_s15 }
 0x2a2   : > { %5720 = vrot.lane.b32.xlu1 %v14904_v22, %s10726_s16 }
 0x2a6   : > { %5888 = vrot.lane.b32.xlu1 %v14904_v22, %s10727_s17 }
 0x2aa   : > { %6056 = vrot.lane.b32.xlu1 %v14904_v22, %s10728_s12 }
 0x2b9   : > { %v14910_v50 = vpop.f32.mrb[2].mxu1 }
 0x2ba   : > { %v14912_v28 = vpop.f32.mrb[3].mxu1 }
 0x2d0   : > { %v14922_v10 = vpop.permute.xlu1 %4920  ;;  %v14958_v46 = vpop.permute.xlu0 %5088 }
 0x2d1   : > { %20452 = vst [vmem:[#allocation35_spill] sm:$0xff] %v14922_v10  ;;  %20461 = vst [vmem:[#allocation52_spill] sm:$0xff] %v14958_v46 }
 0x2d4   : > { %v14924_v61 = vpop.permute.xlu1 %5880  ;;  %v14972_v30 = vpop.permute.xlu0 %5256 }
 0x2d5   : > { %20453 = vst [vmem:[#allocation55_spill] sm:$0xff] %v14924_v61  ;;  %20465 = vst [vmem:[#allocation64_spill] sm:$0xff] %v14972_v30  ;;  %v6265_v30 = vld [vmem:[#allocation8 + $0x80] ss:$8 sm:$0xf0] }
 0x2d8   : > { %v14974_v6 = vpop.permute.xlu0 %5424 }
 0x2d9   : > { %20466 = vst [vmem:[#allocation63_spill] sm:$0xff] %v14974_v6 }
 0x2dc   : > { %v14926_v49 = vpop.permute.xlu1 %5884  ;;  %v14976_v36 = vpop.permute.xlu0 %5712 }
 0x2dd   : > { %20467 = vst [vmem:[#allocation129_spill] sm:$0xff] %v14976_v36  ;;  %v7364_v36 = vld [vmem:[#allocation8 + $0x142] ss:$8 sm:$0xf0] }
 0x2df   : > { %v14918_v21 = vpop.f32.mrb[4].mxu0 }
 0x2e0   : > { %v14920_v37 = vpop.f32.mrb[5].mxu0  ;;  %v14930_v33 = vpop.permute.xlu1 %6048 }
 0x2e1   : > { %20454 = vst [vmem:[#allocation44_spill] sm:$0xff] %v14930_v33  ;;  %v14985_v24 = vpop.permute.xlu0 %5716 }
 0x2e2   : > { %20469 = vst [vmem:[#allocation134_spill] sm:$0xff] %v14985_v24 }
 0x2e4   : > { %v14934_v47 = vpop.permute.xlu1 %6052 }
 0x2e5   : > { %v14994_v56 = vpop.permute.xlu0 %5092 }
 0x2e6   : > { %20471 = vst [vmem:[#allocation99_spill] sm:$0xff] %v14994_v56 }
 0x2e8   : > { %v14936_v1 = vpop.permute.xlu1 %4924 }
 0x2e9   : > { %v15005_v35 = vpop.permute.xlu0 %5260 }
 0x2ea   : > { %20472 = vst [vmem:[#allocation49_spill] sm:$0xff] %v15005_v35  ;;  %v6264_v35 = vld [vmem:[#allocation8 + $0x80] ss:$8 sm:$0xf] }
 0x2ec   : > { %v14938_v26 = vpop.permute.xlu1 %6216 }
 0x2ed   : > { %20455 = vst [vmem:[#allocation106_spill] sm:$0xff] %v14938_v26  ;;  %v7241_v26 = vld [vmem:[#allocation8 + $0x101] ss:$8 sm:$0xf0] }
 0x2f0   : > { %v14940_v8 = vpop.permute.xlu1 %6220 }
 0x2f1   : > { %20456 = vst [vmem:[#allocation57_spill] sm:$0xff] %v14940_v8  ;;  %v7601_v8 = vld [vmem:[#allocation8 + $0x104] ss:$8 sm:$0xf0] }
 0x2f4   : > { %v14944_v38 = vpop.permute.xlu1 %4922 }
 0x2f5   : > { %v14954_v9 = vsel %vm345_vm2, %v14922_v10, %v14944_v38  ;;  %v7363_v10 = vld [vmem:[#allocation8 + $0x142] ss:$8 sm:$0xf] }
 0x2f6   : > { %20460 = vst [vmem:[#allocation117_spill] sm:$0xff] %v14954_v9  ;;  %v5059_v48 = vmul.f32 %v4991_v39, %v14954_v9  ;;  %v7121_v39 = vld [vmem:[#allocation8 + $0x100] ss:$8 sm:$0xf0]  ;;  %v15089_v9 = vor.u32 %v6265_v30, %v6264_v35 }
 0x2f7   : > { %v6881_v30 = vld [vmem:[#allocation8 + $0x86] ss:$8 sm:$0xf0]  ;;  %v8321_v35 = vld [vmem:[#allocation8 + $0x182] ss:$8 sm:$0xf0] }
 0x2f8   : > { %v14960_v58 = vpop.permute.xlu1 %5090  ;;  %20490 = vst [vmem:[#allocation65_spill] sm:$0xff] %v15089_v9 }
 0x2f9   : > { %20462 = vst [vmem:[#allocation102_spill] sm:$0xff] %v14960_v58  ;;  %v14967_v11 = vsel %vm515_vm0, %v14958_v46, %v14960_v58  ;;  %v15021_v46 = vor.u32 %v7121_v39, %v7120_v18  ;;  %v20483_v18 = vld [vmem:[#allocation13_spill] sm:$0xff]  ;;  %v4547_v39 = vadd.f32 %v14883_v19, %v14825_v40 }
 0x2fa   : > { %20463 = vst [vmem:[#allocation59_spill] sm:$0xff] %v14967_v11  ;;  %v5227_v5 = vmul.f32 %v5159_v25, %v14967_v11  ;;  %v8203_v25 = vld [vmem:[#allocation8 + $0x1c1] ss:$8 sm:$0xf] }
 0x2fb   : > { %20478 = vst [vmem:[#allocation130_spill] sm:$0xff] %v15021_v46  ;;  %v15109_v19 = vmax.f32 %v4547_v39, 0.0  ;;  %v7960_v39 = vld [vmem:[#allocation8 + $0x107] ss:$8 sm:$0xf] }
 0x2fc   : > { %v10091_v55 = vpack.c.bf16 %v5227_v5, %v5059_v48  ;;  %v8204_v48 = vld [vmem:[#allocation8 + $0x1c1] ss:$8 sm:$0xf0]  ;;  %v15013_v5 = vor.u32 %v5929_v15, %v5928_v14  ;;  %v6504_v14 = vld [vmem:[#allocation8 + $0x82] ss:$8 sm:$0xf] }
 0x2fd   : > { %v15025_v6 = vor.u32 %v8204_v48, %v8203_v25  ;;  %v6505_v15 = vld [vmem:[#allocation8 + $0x82] ss:$8 sm:$0xf0]  ;;  %v7481_v25 = vld [vmem:[#allocation8 + $0x103] ss:$8 sm:$0xf0] }
 0x2fe   : > { %10092 = vmatprep.subr.bf16.mxu1 %v10091_v55  ;;  %20474 = vst [vmem:[#allocation128_spill] sm:$0xff] %v15013_v5  ;;  %v15015_v55 = vor.u32 %v7001_v62, %v7000_v54  ;;  %v7480_v54 = vld [vmem:[#allocation8 + $0x103] ss:$8 sm:$0xf]  ;;  %20493 = vst [vmem:[#allocation73_spill] sm:$0xff] %v15109_v19 }
 0x2ff   : > { %v14928_v29 = vpop.f32.mrb[4].mxu1  ;;  %20480 = vst [vmem:[#allocation91_spill] sm:$0xff] %v15025_v6  ;;  %v20481_v62 = vld [vmem:[#allocation17_spill] sm:$0xff]  ;;  %v15071_v11 = vor.u32 %v7481_v25, %v7480_v54 }
 0x300   : > { %v14932_v45 = vpop.f32.mrb[5].mxu1  ;;  %20475 = vst [vmem:[#allocation53_spill] sm:$0xff] %v15015_v55  ;;  %v7483_v48 = vld [vmem:[#allocation8 + $0x143] ss:$8 sm:$0xf] }
 0x301   : > { %20488 = vst [vmem:[#allocation22_spill] sm:$0xff] %v15071_v11  ;;  %v7600_v54 = vld [vmem:[#allocation8 + $0x104] ss:$8 sm:$0xf] }
 0x302   : > { %v5760_v25 = vld [vmem:[#allocation8 + $0x5] ss:$8 sm:$0xf] }
 0x320   : > { %v14970_v7 = vpop.f32.mrb[6].mxu0 }
 0x321   : > { %20464 = vst [vmem:[#allocation62_spill] sm:$0xff] %v14970_v7  ;;  %v4830_v53 = vpop.f32.mrb[7].mxu0  ;;  %v15023_v7 = vpop.permute.xlu0 %5428 }
 0x322   : > { %v4831_v4 = vadd.f32 %v4830_v53, %v14825_v40  ;;  %v6384_v53 = vld [vmem:[#allocation8 + $0x81] ss:$8 sm:$0xf]  ;;  %20479 = vst [vmem:[#allocation23_spill] sm:$0xff] %v15023_v7 }
 0x324   : > { %v15007_v42 = vmax.f32 %v4831_v4, 0.0  ;;  %v15019_v4 = vor.u32 %v6097_v59, %v6096_v51  ;;  %v20482_v51 = vld [vmem:[#allocation15_spill] sm:$0xff] }
 0x325   : > { %v5304_v59 = vld [vmem:[#allocation8 + $0x2] ss:$8 sm:$0xf] }
 0x326   : > { %20473 = vst [vmem:[#allocation46_spill] sm:$0xff] %v15007_v42  ;;  %20477 = vst [vmem:[#allocation81_spill] sm:$0xff] %v15019_v4 }
 0x337   : > { %v4899_v34 = vpop.f32.mrb[6].mxu1 }
 0x338   : > { %v4900_v3 = vadd.f32 %v4899_v34, %v14825_v40  ;;  %v4901_v12 = vpop.f32.mrb[7].mxu1  ;;  %v6385_v34 = vld [vmem:[#allocation8 + $0x81] ss:$8 sm:$0xf0] }
 0x339   : > { %v4902_v52 = vadd.f32 %v4901_v12, %v14825_v40  ;;  %v7360_v12 = vld [vmem:[#allocation8 + $0x102] ss:$8 sm:$0xf]  ;;  %v15045_v24 = vor.u32 %v6385_v34, %v6384_v53  ;;  %v15059_v34 = vor.u32 %v7364_v36, %v7363_v10  ;;  %v6624_v36 = vld [vmem:[#allocation8 + $0x83] ss:$8 sm:$0xf]  ;;  %v15075_v53 = vpop.permute.xlu0 %5882 }
 0x33a   : > { %v14979_v32 = vmax.f32 %v4900_v3, 0.0  ;;  %v15017_v3 = vor.u32 %v8084_v20, %v8083_v41  ;;  %v7484_v20 = vld [vmem:[#allocation8 + $0x143] ss:$8 sm:$0xf0]  ;;  %v15069_v41 = vor.u32 %v6505_v15, %v6504_v14 }
 0x33b   : > { %v14992_v60 = vmax.f32 %v4902_v52, 0.0  ;;  %v7361_v52 = vld [vmem:[#allocation8 + $0x102] ss:$8 sm:$0xf0]  ;;  %20484 = vst [vmem:[#allocation20_spill] sm:$0xff] %v15045_v24  ;;  %20486 = vst [vmem:[#allocation50_spill] sm:$0xff] %v15059_v34  ;;  %v15081_v58 = vor.u32 %v7484_v20, %v7483_v48 }
 0x33c   : > { %20468 = vst [vmem:[#allocation61_spill] sm:$0xff] %v14979_v32  ;;  %5908 = vrot.lane.b32.xlu1 %v14979_v32, %s10727_s17  ;;  %4948 = vrot.lane.b32.xlu0 %v14979_v32, %s10723_s14  ;;  %20476 = vst [vmem:[#allocation84_spill] sm:$0xff] %v15017_v3  ;;  %v15053_v7 = vor.u32 %v7361_v52, %v7360_v12  ;;  %v5305_v10 = vld [vmem:[#allocation8 + $0x2] ss:$8 sm:$0xf0] }
 0x33d   : > { %20470 = vst [vmem:[#allocation104_spill] sm:$0xff] %v14992_v60  ;;  %20487 = vst [vmem:[#allocation24_spill] sm:$0xff] %v15069_v41  ;;  %v8323_v52 = vld [vmem:[#allocation8 + $0x1c2] ss:$8 sm:$0xf]  ;;  %v15107_v48 = vor.u32 %v5305_v10, %v5304_v59  ;;  %v15125_v24 = vpop.permute.xlu0 %6050 }
 0x33e   : > { %20485 = vst [vmem:[#allocation142_spill] sm:$0xff] %v15053_v7  ;;  %20489 = vst [vmem:[#allocation37_spill] sm:$0xff] %v15081_v58  ;;  %v8324_v14 = vld [vmem:[#allocation8 + $0x1c2] ss:$8 sm:$0xf0] }
 0x33f   : > { %v6625_v15 = vld [vmem:[#allocation8 + $0x83] ss:$8 sm:$0xf0]  ;;  %20492 = vst [vmem:[#allocation95_spill] sm:$0xff] %v15107_v48  ;;  %v15123_v10 = vor.u32 %v8324_v14, %v8323_v52 }
 0x340   : > { %6244 = vrot.lane.b32.xlu1 %v14979_v32, %s10729_s10  ;;  %5116 = vrot.lane.b32.xlu0 %v14979_v32, %s10722_s29  ;;  %v15113_v34 = vor.u32 %v6625_v15, %v6624_v36  ;;  %v7961_v7 = vld [vmem:[#allocation8 + $0x107] ss:$8 sm:$0xf0]  ;;  %v15129_v36 = vor.u32 %v7604_v44, %v7603_v27  ;;  %v5472_v15 = vld [vmem:[#allocation8 + $0x3] ss:$8 sm:$0xf] }
 0x341   : > { %20496 = vst [vmem:[#allocation29_spill] sm:$0xff] %v15123_v10  ;;  %v6744_v27 = vld [vmem:[#allocation8 + $0x84] ss:$8 sm:$0xf] }
 0x342   : > { %20494 = vst [vmem:[#allocation32_spill] sm:$0xff] %v15113_v34  ;;  %20497 = vst [vmem:[#allocation76_spill] sm:$0xff] %v15129_v36  ;;  %v6745_v59 = vld [vmem:[#allocation8 + $0x84] ss:$8 sm:$0xf0]  ;;  %v15299_v34 = vadd.f32 %v14920_v37, %v14825_v40  ;;  %v5926_v37 = vsel %vm1321_vm6, %v14924_v61, %v15075_v53 }
 0x343   : > { %v7720_v14 = vld [vmem:[#allocation8 + $0x105] ss:$8 sm:$0xf]  ;;  %v8200_v52 = vld [vmem:[#allocation8 + $0x181] ss:$8 sm:$0xf]  ;;  %v15185_v41 = vor.u32 %v6745_v59, %v6744_v27 }
 0x344   : > { %4950 = vrot.lane.b32.xlu1 %v14992_v60, %s10723_s14  ;;  %5284 = vrot.lane.b32.xlu0 %v14979_v32, %s10724_s27  ;;  %v7721_v58 = vld [vmem:[#allocation8 + $0x105] ss:$8 sm:$0xf0]  ;;  %v8201_v36 = vld [vmem:[#allocation8 + $0x181] ss:$8 sm:$0xf0] }
 0x345   : > { %20503 = vst [vmem:[#allocation74_spill] sm:$0xff] %v15185_v41  ;;  %v15193_v23 = vor.u32 %v7721_v58, %v7720_v14  ;;  %v7963_v27 = vld [vmem:[#allocation8 + $0x147] ss:$8 sm:$0xf]  ;;  %20513 = vst [vmem:[#allocation47_spill] sm:$0xff] %v15299_v34 }
 0x346   : > { %v7964_v20 = vld [vmem:[#allocation8 + $0x147] ss:$8 sm:$0xf0]  ;;  %v5592_v58 = vld [vmem:[#allocation8 + $0x4] ss:$8 sm:$0xf] }
 0x347   : > { %20504 = vst [vmem:[#allocation27_spill] sm:$0xff] %v15193_v23  ;;  %v5593_v14 = vld [vmem:[#allocation8 + $0x4] ss:$8 sm:$0xf0]  ;;  %v15239_v48 = vor.u32 %v7964_v20, %v7963_v27 }
 0x348   : > { %5118 = vrot.lane.b32.xlu1 %v14992_v60, %s10722_s29  ;;  %5452 = vrot.lane.b32.xlu0 %v14979_v32, %s10725_s15 }
 0x349   : > { %20511 = vst [vmem:[#allocation87_spill] sm:$0xff] %v15239_v48  ;;  %v7844_v48 = vld [vmem:[#allocation8 + $0x146] ss:$8 sm:$0xf0] }
 0x34c   : > { %5114 = vrot.lane.b32.xlu1 %v15007_v42, %s10722_s29  ;;  %5740 = vrot.lane.b32.xlu0 %v14979_v32, %s10726_s16 }
 0x350   : > { %5286 = vrot.lane.b32.xlu1 %v14992_v60, %s10724_s27  ;;  %6076 = vrot.lane.b32.xlu0 %v14979_v32, %s10728_s12  ;;  %v7240_v32 = vld [vmem:[#allocation8 + $0x101] ss:$8 sm:$0xf] }
 0x351   : > { %v15095_v12 = vor.u32 %v7241_v26, %v7240_v32  ;;  %v5761_v26 = vld [vmem:[#allocation8 + $0x5] ss:$8 sm:$0xf0]  ;;  %v6880_v32 = vld [vmem:[#allocation8 + $0x86] ss:$8 sm:$0xf] }
 0x352   : > { %v15143_v44 = vor.u32 %v5761_v26, %v5760_v25  ;;  %v15153_v10 = vor.u32 %v6881_v30, %v6880_v32  ;;  %v15155_v25 = vor.u32 %v7961_v7, %v7960_v39  ;;  %v7723_v26 = vld [vmem:[#allocation8 + $0x145] ss:$8 sm:$0xf]  ;;  %v8080_v30 = vld [vmem:[#allocation8 + $0x180] ss:$8 sm:$0xf]  ;;  %v15181_v39 = vpop.permute.xlu0 %4926 }
 0x353   : > { %20491 = vst [vmem:[#allocation68_spill] sm:$0xff] %v15095_v12  ;;  %v8081_v32 = vld [vmem:[#allocation8 + $0x180] ss:$8 sm:$0xf0]  ;;  %20502 = vst [vmem:[#allocation70_spill] sm:$0xff] %v15181_v39 }
 0x354   : > { %5454 = vrot.lane.b32.xlu1 %v14992_v60, %s10725_s15  ;;  %4946 = vrot.lane.b32.xlu0 %v15007_v42, %s10723_s14  ;;  %20499 = vst [vmem:[#allocation43_spill] sm:$0xff] %v15143_v44  ;;  %20500 = vst [vmem:[#allocation30_spill] sm:$0xff] %v15153_v10  ;;  %v15213_v11 = vor.u32 %v8081_v32, %v8080_v30  ;;  %v15233_v30 = vor.u32 %v5593_v14, %v5592_v58 }
 0x355   : > { %20501 = vst [vmem:[#allocation119_spill] sm:$0xff] %v15155_v25 }
 0x356   : > { %20507 = vst [vmem:[#allocation71_spill] sm:$0xff] %v15213_v11  ;;  %20510 = vst [vmem:[#allocation86_spill] sm:$0xff] %v15233_v30  ;;  %v15235_v32 = vpop.permute.xlu0 %6218  ;;  %v5623_v27 = vrot.slane %v15233_v30, %v11045_v13 }
 0x358   : > { %5450 = vrot.lane.b32.xlu1 %v15007_v42, %s10725_s15  ;;  %5282 = vrot.lane.b32.xlu0 %v15007_v42, %s10724_s27  ;;  %v15115_v42 = vor.u32 %v7601_v8, %v7600_v54  ;;  %v5473_v54 = vld [vmem:[#allocation8 + $0x3] ss:$8 sm:$0xf0]  ;;  %v15141_v8 = vpop.permute.xlu1 %5258 }
 0x359   : > { %20498 = vst [vmem:[#allocation34_spill] sm:$0xff] %v15141_v8  ;;  %v7724_v8 = vld [vmem:[#allocation8 + $0x145] ss:$8 sm:$0xf0]  ;;  %v15175_v56 = vor.u32 %v5473_v54, %v5472_v15 }
 0x35a   : > { %20495 = vst [vmem:[#allocation69_spill] sm:$0xff] %v15115_v42  ;;  %v8320_v54 = vld [vmem:[#allocation8 + $0x182] ss:$8 sm:$0xf]  ;;  %v15201_v9 = vor.u32 %v7724_v8, %v7723_v26  ;;  %v15215_v8 = vor.u32 %v8201_v36, %v8200_v52  ;;  %v15285_v52 = vadd.f32 %v14912_v28, %v14825_v40  ;;  %v15295_v36 = vadd.f32 %v14918_v21, %v14825_v40  ;;  %v15301_v7 = vpop.permute.xlu0 %5718 }
 0x35b   : > { %v15217_v26 = vor.u32 %v8321_v35, %v8320_v54  ;;  %v7840_v15 = vld [vmem:[#allocation8 + $0x106] ss:$8 sm:$0xf]  ;;  %v5619_v35 = vrot.slane %v15233_v30, %v11051_v16  ;;  %20514 = vst [vmem:[#allocation92_spill] sm:$0xff] %v15301_v7  ;;  %v5615_v28 = vrot.slane %v15233_v30, %v20459_v43  ;;  %v5925_v21 = vsel %vm1321_vm6, %v15075_v53, %v14926_v49 }
 0x35c   : > { %5742 = vrot.lane.b32.xlu1 %v14992_v60, %s10726_s16  ;;  %4928 = vrot.lane.b32.xlu0 %v14904_v22, %s10723_s14  ;;  %v15195_v3 = vpop.permute.xlu1 %5426  ;;  %20506 = vst [vmem:[#allocation39_spill] sm:$0xff] %v15201_v9  ;;  %20508 = vst [vmem:[#allocation72_spill] sm:$0xff] %v15215_v8 }
 0x35d   : > { %20505 = vst [vmem:[#allocation56_spill] sm:$0xff] %v15195_v3  ;;  %20509 = vst [vmem:[#allocation141_spill] sm:$0xff] %v15217_v26  ;;  %v7841_v3 = vld [vmem:[#allocation8 + $0x106] ss:$8 sm:$0xf0]  ;;  %v15321_v34 = vmul.f32 %v5619_v35, %v14843_v63  ;;  %v15341_v35 = vadd.f32 %v14928_v29, %v14825_v40  ;;  %v20526_v29 = vrot.slane %v15013_v5, %v20459_v43 }
 0x35e   : > { %v15245_v59 = vor.u32 %v7841_v3, %v7840_v15  ;;  %v4616_v3 = vadd.f32 %v14910_v50, %v14825_v40  ;;  %20512 = vst [vmem:[#allocation103_spill] sm:$0xff] %v15295_v36  ;;  %v7843_v15 = vld [vmem:[#allocation8 + $0x146] ss:$8 sm:$0xf]  ;;  %v5611_v50 = vrot.slane %v15233_v30, %v20481_v62  ;;  %v6093_v30 = vsel %vm1492_vm7, %v15125_v24, %v14934_v47 }
 0x35f   : > { %20517 = vst [vmem:[#allocation127_spill] sm:$0xff] %v15321_v34  ;;  %20521 = vst [vmem:[#allocation54_spill] sm:$0xff] %v15341_v35  ;;  %v15351_v61 = vor.u32 %v7844_v48, %v7843_v15  ;;  %v15361_v34 = vmul.f32 %v20526_v29, %v5925_v21  ;;  %v20532_v15 = vrot.slane %v15015_v55, %v20483_v18  ;;  %v20556_v35 = vld [vmem:[#allocation117_spill] sm:$0xff] }
 0x360   : > { %6224 = vrot.lane.b32.xlu1 %v14904_v22, %s10729_s10  ;;  %5910 = vrot.lane.b32.xlu0 %v14992_v60, %s10727_s17  ;;  %v15249_v58 = vpop.permute.xlu1 %5714  ;;  %v7855_v14 = vrot.slane %v15245_v59, %v20483_v18  ;;  %v7851_v20 = vrot.slane %v15245_v59, %v20482_v51  ;;  %v15323_v36 = vmax.f32 %v4616_v3, 0.0  ;;  %v15345_v3 = vadd.f32 %v14932_v45, %v14825_v40 }
 0x361   : > { %20523 = vst [vmem:[#allocation90_spill] sm:$0xff] %v15351_v61  ;;  %20527 = vst [vmem:[#allocation36_spill] sm:$0xff] %v15361_v34  ;;  %v15364_v45 = vmul.f32 %v5615_v28, %v14858_v57  ;;  %v20534_v29 = vrot.slane %v15025_v6, %v20350_v31  ;;  %v20536_v28 = vld [vmem:[#allocation84_spill] sm:$0xff]  ;;  %v15403_v57 = vpop.permute.xlu0 %5886  ;;  %v20585_v34 = vld [vmem:[#allocation59_spill] sm:$0xff] }
 0x362   : > { %20518 = vst [vmem:[#allocation121_spill] sm:$0xff] %v15323_v36  ;;  %v15334_v53 = vmul.f32 %v7855_v14, %v14873_v0  ;;  %20522 = vst [vmem:[#allocation33_spill] sm:$0xff] %v15345_v3  ;;  %v20524_v14 = vrot.slane %v15013_v5, %v20481_v62 }
 0x363   : > { %20528 = vst [vmem:[#allocation138_spill] sm:$0xff] %v15364_v45 }
 0x364   : > { %4930 = vrot.lane.b32.xlu1 %v15109_v19, %s10723_s14  ;;  %6078 = vrot.lane.b32.xlu0 %v14992_v60, %s10728_s12  ;;  %v15315_v54 = vpop.permute.xlu1 %5094  ;;  %20519 = vst [vmem:[#allocation131_spill] sm:$0xff] %v15334_v53 }
 0x365   : > { %20515 = vst [vmem:[#allocation125_spill] sm:$0xff] %v15315_v54  ;;  %v15528_v45 = vpop.permute.xlu0 %6054 }
 0x368   : > { %5098 = vrot.lane.b32.xlu1 %v15109_v19, %s10722_s29  ;;  %6246 = vrot.lane.b32.xlu0 %v14992_v60, %s10729_s10  ;;  %v15318_v60 = vmul.f32 %v5623_v27, %v14873_v0  ;;  %v15337_v27 = vmul.f32 %v7851_v20, %v14843_v63  ;;  %v15356_v20 = vmul.f32 %v20524_v14, %v5926_v37  ;;  %v15428_v3 = vpop.permute.xlu1 %5262  ;;  %v20553_v0 = vld [vmem:[#allocation101_spill] sm:$0xff] }
 0x369   : > { %v15377_v14 = vmul.f32 %v20532_v15, %v5925_v21  ;;  %v4964_v63 = vsel %vm345_vm2, %v14936_v1, %v15181_v39  ;;  %20550 = vst [vmem:[#allocation98_spill] sm:$0xff] %v15428_v3 }
 0x36a   : > { %20516 = vst [vmem:[#allocation21_spill] sm:$0xff] %v15318_v60  ;;  %20520 = vst [vmem:[#allocation42_spill] sm:$0xff] %v15337_v27  ;;  %v6094_v60 = vsel %vm1492_vm7, %v14930_v33, %v15125_v24  ;;  %v15367_v27 = vmul.f32 %v5611_v50, %v14828_v17  ;;  %v20530_v24 = vrot.slane %v15015_v55, %v20482_v51  ;;  %v20537_v17 = vld [vmem:[#allocation16_spill] sm:$0xff] }
 0x36b   : > { %20525 = vst [vmem:[#allocation26_spill] sm:$0xff] %v15356_v20  ;;  %20533 = vst [vmem:[#allocation143_spill] sm:$0xff] %v15377_v14  ;;  %v15382_v33 = vmul.f32 %v20534_v29, %v6093_v30  ;;  %v4965_v50 = vsel %vm345_vm2, %v14944_v38, %v14936_v1  ;;  %v20538_v53 = vrot.slane %v20536_v28, %v20537_v17  ;;  %v20561_v1 = vld [vmem:[#allocation102_spill] sm:$0xff] }
 0x36c   : > { %5266 = vrot.lane.b32.xlu1 %v15109_v19, %s10724_s27  ;;  %5096 = vrot.lane.b32.xlu0 %v14904_v22, %s10722_s29  ;;  %20529 = vst [vmem:[#allocation137_spill] sm:$0xff] %v15367_v27  ;;  %v15372_v48 = vmul.f32 %v20530_v24, %v5926_v37  ;;  %v20542_v14 = vrot.slane %v15019_v4, %v20481_v62  ;;  %v20567_v20 = vld [vmem:[#allocation50_spill] sm:$0xff]  ;;  %v20586_v27 = vld [vmem:[#allocation24_spill] sm:$0xff] }
 0x36d   : > { %20535 = vst [vmem:[#allocation60_spill] sm:$0xff] %v15382_v33  ;;  %v15391_v24 = vmul.f32 %v20538_v53, %v5926_v37  ;;  %v20544_v38 = vrot.slane %v15019_v4, %v20459_v43  ;;  %v20580_v33 = vld [vmem:[#allocation115_spill] sm:$0xff] }
 0x36e   : > { %20531 = vst [vmem:[#allocation144_spill] sm:$0xff] %v15372_v48  ;;  %v20540_v48 = vrot.slane %v20536_v28, %v20350_v31  ;;  %v15401_v29 = vmul.f32 %v20542_v14, %v6094_v60 }
 0x36f   : > { %20539 = vst [vmem:[#allocation25_spill] sm:$0xff] %v15391_v24  ;;  %v15412_v37 = vmul.f32 %v20544_v38, %v6093_v30  ;;  %v20551_v38 = vrot.slane %v15025_v6, %v20537_v17  ;;  %v20564_v6 = vld [vmem:[#allocation142_spill] sm:$0xff] }
 0x370   : > { %5434 = vrot.lane.b32.xlu1 %v15109_v19, %s10725_s15  ;;  %5264 = vrot.lane.b32.xlu0 %v14904_v22, %s10724_s27  ;;  %v15396_v15 = vmul.f32 %v20540_v48, %v5925_v21  ;;  %20543 = vst [vmem:[#allocation41_spill] sm:$0xff] %v15401_v29  ;;  %v20546_v21 = vrot.slane %v15021_v46, %v20482_v51  ;;  %v20560_v29 = vld [vmem:[#allocation99_spill] sm:$0xff] }
 0x371   : > { %20545 = vst [vmem:[#allocation66_spill] sm:$0xff] %v15412_v37  ;;  %v20548_v48 = vrot.slane %v15021_v46, %v20483_v18  ;;  %v15433_v61 = vmul.f32 %v20551_v38, %v6094_v60  ;;  %v5133_v39 = vsel %vm515_vm0, %v20561_v1, %v20560_v29  ;;  %v20570_v1 = vrot.slane %v20553_v0, %v11045_v13 }
 0x372   : > { %20541 = vst [vmem:[#allocation38_spill] sm:$0xff] %v15396_v15  ;;  %v15417_v53 = vmul.f32 %v20546_v21, %v6094_v60  ;;  %v20554_v21 = vrot.slane %v20553_v0, %v11051_v16  ;;  %v20578_v28 = vrot.slane %v20564_v6, %v20483_v18 }
 0x373   : > { %v15422_v14 = vmul.f32 %v20548_v48, %v6093_v30  ;;  %20552 = vst [vmem:[#allocation75_spill] sm:$0xff] %v15433_v61  ;;  %v20557_v30 = vld [vmem:[#allocation20_spill] sm:$0xff]  ;;  %v15471_v37 = vmul.f32 %v20570_v1, %v4964_v63 }
 0x374   : > { %5724 = vrot.lane.b32.xlu1 %v15323_v36, %s10726_s16  ;;  %5432 = vrot.lane.b32.xlu0 %v14904_v22, %s10725_s15  ;;  %20547 = vst [vmem:[#allocation78_spill] sm:$0xff] %v15417_v53  ;;  %v15438_v53 = vmul.f32 %v20554_v21, %v4965_v50  ;;  %v20558_v48 = vrot.slane %v20557_v30, %v20483_v18  ;;  %v20626_v61 = vld [vmem:[#allocation76_spill] sm:$0xff] }
 0x375   : > { %20549 = vst [vmem:[#allocation82_spill] sm:$0xff] %v15422_v14  ;;  %v20562_v60 = vrot.slane %v20557_v30, %v20481_v62  ;;  %v20565_v21 = vrot.slane %v20564_v6, %v20482_v51  ;;  %20571 = vst [vmem:[#allocation83_spill] sm:$0xff] %v15471_v37  ;;  %v15497_v15 = vmul.f32 %v20578_v28, %v4964_v63  ;;  %v20583_v37 = vld [vmem:[#allocation34_spill] sm:$0xff]  ;;  %v20594_v6 = vld [vmem:[#allocation49_spill] sm:$0xff] }
 0x376   : > { %20555 = vst [vmem:[#allocation79_spill] sm:$0xff] %v15438_v53  ;;  %v15444_v14 = vmul.f32 %v20558_v48, %v20556_v35  ;;  %v20568_v48 = vrot.slane %v20567_v20, %v20350_v31  ;;  %v20627_v24 = vrot.slane %v20626_v61, %v20350_v31 }
 0x377   : > { %v15453_v38 = vmul.f32 %v20562_v60, %v4965_v50  ;;  %v15458_v53 = vmul.f32 %v20565_v21, %v4965_v50  ;;  %v20572_v60 = vld [vmem:[#allocation57_spill] sm:$0xff]  ;;  %v20574_v21 = vld [vmem:[#allocation106_spill] sm:$0xff]  ;;  %20579 = vst [vmem:[#allocation97_spill] sm:$0xff] %v15497_v15 }
 0x378   : > { %20559 = vst [vmem:[#allocation80_spill] sm:$0xff] %v15444_v14  ;;  %v15464_v14 = vmul.f32 %v20568_v48, %v20556_v35  ;;  %v15477_v50 = vsel %vm1663_vm8, %v15235_v32, %v20572_v60  ;;  %v15483_v35 = vsel %vm1663_vm8, %v20574_v21, %v15235_v32  ;;  %5892 = vrot.lane.b32.xlu1 %v15323_v36, %s10727_s17  ;;  %v20591_v15 = vld [vmem:[#allocation22_spill] sm:$0xff] }
 0x379   : > { %20563 = vst [vmem:[#allocation120_spill] sm:$0xff] %v15453_v38  ;;  %20566 = vst [vmem:[#allocation116_spill] sm:$0xff] %v15458_v53  ;;  %5722 = vrot.lane.b32.xlu0 %v15109_v19, %s10726_s16  ;;  %v20576_v48 = vrot.slane %v20557_v30, %v20459_v43  ;;  %v20581_v32 = vrot.slane %v20580_v33, %v11051_v16  ;;  %v20584_v53 = vld [vmem:[#allocation64_spill] sm:$0xff]  ;;  %v20619_v30 = vld [vmem:[#allocation63_spill] sm:$0xff] }
 0x37a   : > { %20569 = vst [vmem:[#allocation48_spill] sm:$0xff] %v15464_v14  ;;  %20573 = vst [vmem:[#allocation122_spill] sm:$0xff] %v15477_v50  ;;  %v5302_v38 = vsel %vm686_vm3, %v20584_v53, %v20583_v37  ;;  %v5301_v53 = vsel %vm686_vm3, %v20583_v37, %v20594_v6  ;;  %v20603_v37 = vrot.slane %v15095_v12, %v20482_v51 }
 0x37b   : > { %20575 = vst [vmem:[#allocation126_spill] sm:$0xff] %v15483_v35  ;;  %v15492_v1 = vmul.f32 %v20576_v48, %v4964_v63  ;;  %v15502_v21 = vmul.f32 %v20581_v32, %v5133_v39  ;;  %v20587_v48 = vrot.slane %v20586_v27, %v20483_v18  ;;  %v20589_v63 = vrot.slane %v20586_v27, %v20481_v62 }
 0x37c   : > { %v20592_v32 = vrot.slane %v20591_v15, %v20482_v51  ;;  %6060 = vrot.lane.b32.xlu1 %v15323_v36, %s10728_s12 }
 0x37d   : > { %20577 = vst [vmem:[#allocation114_spill] sm:$0xff] %v15492_v1  ;;  %20582 = vst [vmem:[#allocation89_spill] sm:$0xff] %v15502_v21  ;;  %v15512_v1 = vmul.f32 %v20587_v48, %v20585_v34  ;;  %v15517_v28 = vmul.f32 %v20589_v63, %v5133_v39  ;;  %v20595_v48 = vld [vmem:[#allocation37_spill] sm:$0xff]  ;;  %5890 = vrot.lane.b32.xlu0 %v15109_v19, %s10727_s17 }
 0x37e   : > { %v15522_v21 = vmul.f32 %v20592_v32, %v5133_v39  ;;  %v20598_v63 = vld [vmem:[#allocation65_spill] sm:$0xff] }
 0x37f   : > { %20588 = vst [vmem:[#allocation58_spill] sm:$0xff] %v15512_v1  ;;  %20590 = vst [vmem:[#allocation123_spill] sm:$0xff] %v15517_v28  ;;  %v20596_v1 = vrot.slane %v20595_v48, %v20350_v31  ;;  %v20599_v28 = vrot.slane %v20598_v63, %v20481_v62  ;;  %v20601_v39 = vrot.slane %v20598_v63, %v20459_v43 }
 0x380   : > { %20593 = vst [vmem:[#allocation100_spill] sm:$0xff] %v15522_v21  ;;  %v15552_v21 = vmul.f32 %v20603_v37, %v15483_v35  ;;  %6228 = vrot.lane.b32.xlu1 %v15323_v36, %s10729_s10 }
 0x381   : > { %v15534_v22 = vmul.f32 %v20596_v1, %v20585_v34  ;;  %v15540_v17 = vmul.f32 %v20599_v28, %v15483_v35  ;;  %v15546_v32 = vmul.f32 %v20601_v39, %v15477_v50  ;;  %v15554_v34 = vpop.permute.xlu1 %5430  ;;  %v20606_v1 = vrot.slane %v15095_v12, %v20483_v18  ;;  %v20611_v39 = vld [vmem:[#allocation134_spill] sm:$0xff]  ;;  %v20614_v35 = vld [vmem:[#allocation32_spill] sm:$0xff]  ;;  %6058 = vrot.lane.b32.xlu0 %v15109_v19, %s10728_s12 }
 0x382   : > { %20604 = vst [vmem:[#allocation107_spill] sm:$0xff] %v15552_v21  ;;  %20605 = vst [vmem:[#allocation110_spill] sm:$0xff] %v15554_v34  ;;  %v20617_v21 = vld [vmem:[#allocation23_spill] sm:$0xff] }
 0x383   : > { %20597 = vst [vmem:[#allocation67_spill] sm:$0xff] %v15534_v22  ;;  %20600 = vst [vmem:[#allocation146_spill] sm:$0xff] %v15540_v17  ;;  %v15560_v28 = vmul.f32 %v20606_v1, %v15477_v50  ;;  %v20608_v17 = vld [vmem:[#allocation95_spill] sm:$0xff]  ;;  %v15610_v22 = vmul.f32 %v20627_v24, %v5302_v38  ;;  %v5924_v24 = vsel %vm1321_vm6, %v14926_v49, %v15403_v57  ;;  %v15649_v49 = vpop.permute.xlu0 %6222 }
 0x384   : > { %20602 = vst [vmem:[#allocation140_spill] sm:$0xff] %v15546_v32  ;;  %v20609_v48 = vrot.slane %v20608_v17, %v20459_v43  ;;  %v5756_v32 = vsel %vm1150_vm5, %v20611_v39, %v15301_v7  ;;  %v20612_v37 = vrot.slane %v20608_v17, %v11051_v16  ;;  %v20620_v7 = vld [vmem:[#allocation62_spill] sm:$0xff]  ;;  %20641 = vst [vmem:[#allocation105_spill] sm:$0xff] %v15649_v49 }
 0x385   : > { %20607 = vst [vmem:[#allocation124_spill] sm:$0xff] %v15560_v28  ;;  %v20618_v28 = vld [vmem:[#allocation56_spill] sm:$0xff]  ;;  %v15595_v17 = vadd.f32 %v20620_v7, %v14825_v40  ;;  %20628 = vst [vmem:[#allocation113_spill] sm:$0xff] %v15610_v22  ;;  %v20631_v7 = vrot.slane %v15153_v10, %v20481_v62  ;;  %6226 = vrot.lane.b32.xlu0 %v15109_v19, %s10729_s10 }
 0x386   : > { %v15565_v20 = vmul.f32 %v20609_v48, %v5302_v38  ;;  %v15578_v1 = vmul.f32 %v20612_v37, %v5301_v53  ;;  %v20615_v48 = vrot.slane %v20614_v35, %v20483_v18  ;;  %v5470_v0 = vsel %vm857_vm4, %v20619_v30, %v20618_v28 }
 0x387   : > { %20621 = vst [vmem:[#allocation77_spill] sm:$0xff] %v15595_v17  ;;  %v20622_v37 = vrot.slane %v20614_v35, %v20481_v62  ;;  %v20633_v30 = vrot.slane %v15155_v25, %v20482_v51  ;;  %v20637_v17 = vrot.slane %v15175_v56, %v11051_v16 }
 0x388   : > { %20610 = vst [vmem:[#allocation145_spill] sm:$0xff] %v15565_v20  ;;  %20613 = vst [vmem:[#allocation132_spill] sm:$0xff] %v15578_v1  ;;  %v15583_v50 = vmul.f32 %v20615_v48, %v5302_v38  ;;  %v5469_v20 = vsel %vm857_vm4, %v20618_v28, %v20617_v21  ;;  %v20624_v48 = vrot.slane %v15115_v42, %v20482_v51  ;;  %v5595_v38 = vld [vmem:[#allocation8 + $0x44] ss:$8 sm:$0xf] }
 0x389   : > { %v15600_v1 = vmul.f32 %v20622_v37, %v5301_v53  ;;  %v20629_v28 = vrot.slane %v15143_v44, %v11051_v16  ;;  %v15620_v37 = vmul.f32 %v20631_v7, %v5756_v32  ;;  %4932 = vrot.lane.b32.xlu0 %v15323_v36, %s10723_s14 }
 0x38a   : > { %20616 = vst [vmem:[#allocation139_spill] sm:$0xff] %v15583_v50  ;;  %v15605_v50 = vmul.f32 %v20624_v48, %v5301_v53  ;;  %v15625_v53 = vmul.f32 %v20633_v30, %v5756_v32  ;;  %v5596_v48 = vld [vmem:[#allocation8 + $0x44] ss:$8 sm:$0xf0]  ;;  %v15642_v30 = vmul.f32 %v20637_v17, %v5469_v20  ;;  %v20644_v17 = vrot.slane %v15193_v23, %v20482_v51 }
 0x38b   : > { %20623 = vst [vmem:[#allocation133_spill] sm:$0xff] %v15600_v1  ;;  %v15615_v40 = vmul.f32 %v20629_v28, %v5756_v32  ;;  %20632 = vst [vmem:[#allocation88_spill] sm:$0xff] %v15620_v37  ;;  %v15632_v28 = vmax.f32 %v15285_v52, 0.0  ;;  %v20639_v32 = vrot.slane %v15185_v41, %v20483_v18  ;;  %v8441_v52 = vld [vmem:[#allocation6 + $0x8] sm:$0xff]  ;;  %v15677_v1 = vpop.permute.xlu1 %5720 }
 0x38c   : > { %20625 = vst [vmem:[#allocation111_spill] sm:$0xff] %v15605_v50  ;;  %20634 = vst [vmem:[#allocation94_spill] sm:$0xff] %v15625_v53  ;;  %9609 = vmatprep.mubr.msk.f32.mxu1 %vm4332_vm1, %v8441_v52  ;;  %9608 = vmatprep.mubr.msk.f32.mxu0 %vm4332_vm1, %v8441_v52 }
 0x38d   : > { %20630 = vst [vmem:[#allocation85_spill] sm:$0xff] %v15615_v40  ;;  %20635 = vst [vmem:[#allocation96_spill] sm:$0xff] %v15632_v28  ;;  %v20636_v40 = vrot.slane %v15175_v56, %v20459_v43  ;;  %v15647_v53 = vmul.f32 %v20639_v32, %v5470_v0  ;;  %v15669_v32 = vsel %vm1150_vm5, %v15249_v58, %v20611_v39  ;;  %4934 = vrot.lane.b32.xlu1 %v15632_v28, %s10723_s14 }
 0x38e   : > { %20638 = vst [vmem:[#allocation93_spill] sm:$0xff] %v15642_v30  ;;  %v15663_v30 = vmul.f32 %v20644_v17, %v5469_v20  ;;  %20646 = vst [vmem:[#allocation112_spill] sm:$0xff] %v15669_v32  ;;  %v20652_v17 = vrot.slane %v15013_v5, %v11051_v16  ;;  %5100 = vrot.lane.b32.xlu0 %v15323_v36, %s10722_s29 }
 0x38f   : > { %v15637_v7 = vmul.f32 %v20636_v40, %v5470_v0  ;;  %20640 = vst [vmem:[#allocation108_spill] sm:$0xff] %v15647_v53  ;;  %v20642_v40 = vrot.slane %v15185_v41, %v20481_v62  ;;  %v20647_v53 = vld [vmem:[#allocation129_spill] sm:$0xff]  ;;  %20649 = vst [vmem:[#allocation135_spill] sm:$0xff] %v15677_v1 }
 0x390   : > { %20645 = vst [vmem:[#allocation118_spill] sm:$0xff] %v15663_v30  ;;  %v15675_v37 = vsel %vm1150_vm5, %v20647_v53, %v15249_v58  ;;  %v15688_v39 = vmul.f32 %v20652_v17, %v5924_v24  ;;  %v6092_v58 = vsel %vm1492_vm7, %v14934_v47, %v15528_v45  ;;  %v15695_v53 = vor.u32 %v5596_v48, %v5595_v38 }
 0x391   : > { %v15658_v50 = vmul.f32 %v20642_v40, %v5469_v20  ;;  %20648 = vst [vmem:[#allocation136_spill] sm:$0xff] %v15675_v37  ;;  %v20650_v20 = vrot.slane %v15201_v9, %v20350_v31  ;;  %v20654_v30 = vrot.slane %v15015_v55, %v20481_v62  ;;  %v5132_v17 = vsel %vm515_vm0, %v20560_v29, %v15315_v54 }
 0x392   : > { %20653 = vst [vmem:[#allocation17_spill] sm:$0xff] %v15688_v39  ;;  %v6260_v47 = vsel %vm1663_vm8, %v20572_v60, %v15649_v49  ;;  %v20658_v38 = vrot.slane %v15143_v44, %v20481_v62  ;;  %v20662_v29 = vrot.slane %v15153_v10, %v20482_v51  ;;  %v20664_v60 = vrot.slane %v15153_v10, %v20483_v18 }
 0x393   : > { %20643 = vst [vmem:[#allocation45_spill] sm:$0xff] %v15658_v50  ;;  %v15683_v40 = vmul.f32 %v20650_v20, %v5470_v0  ;;  %v15700_v50 = vmul.f32 %v20654_v30, %v5924_v24  ;;  %v20656_v0 = vrot.slane %v15213_v11, %v20482_v51  ;;  %v20670_v54 = vrot.slane %v15215_v8, %v20482_v51 }
 0x394   : > { %v15719_v48 = vmul.f32 %v20658_v38, %v15675_v37  ;;  %v15731_v52 = vmul.f32 %v20662_v29, %v15675_v37  ;;  %v20666_v38 = vrot.slane %v15019_v4, %v11051_v16  ;;  %v20668_v29 = vrot.slane %v15021_v46, %v20481_v62  ;;  %5102 = vrot.lane.b32.xlu1 %v15632_v28, %s10722_s29 }
 0x395   : > { %20651 = vst [vmem:[#allocation18_spill] sm:$0xff] %v15683_v40  ;;  %20655 = vst [vmem:[#allocation15_spill] sm:$0xff] %v15700_v50  ;;  %v15705_v20 = vmul.f32 %v20656_v0, %v5924_v24  ;;  %v20660_v24 = vrot.slane %v15143_v44, %v20459_v43  ;;  %v15741_v0 = vmul.f32 %v20664_v60, %v15669_v32  ;;  %v6508_v50 = vld [vmem:[#allocation8 + $0xc2] ss:$8 sm:$0xf0]  ;;  %5268 = vrot.lane.b32.xlu0 %v15323_v36, %s10724_s27 }
 0x396   : > { %20659 = vst [vmem:[#allocation117_spill] sm:$0xff] %v15719_v48  ;;  %20663 = vst [vmem:[#allocation102_spill] sm:$0xff] %v15731_v52  ;;  %v15751_v37 = vmul.f32 %v20668_v29, %v6092_v58  ;;  %v15756_v49 = vmul.f32 %v20670_v54, %v6092_v58  ;;  %v20672_v39 = vrot.slane %v20580_v33, %v11045_v13  ;;  %v20701_v40 = vld [vmem:[#allocation92_spill] sm:$0xff] }
 0x397   : > { %20657 = vst [vmem:[#allocation13_spill] sm:$0xff] %v15705_v20  ;;  %v15725_v30 = vmul.f32 %v20660_v24, %v15669_v32  ;;  %20665 = vst [vmem:[#allocation57_spill] sm:$0xff] %v15741_v0  ;;  %v15746_v24 = vmul.f32 %v20666_v38, %v6092_v58  ;;  %v20674_v32 = vrot.slane %v20586_v27, %v20459_v43  ;;  %v20761_v48 = vld [vmem:[#allocation104_spill] sm:$0xff] }
 0x398   : > { %20669 = vst [vmem:[#allocation59_spill] sm:$0xff] %v15751_v37  ;;  %20671 = vst [vmem:[#allocation49_spill] sm:$0xff] %v15756_v49  ;;  %v15761_v60 = vmul.f32 %v20672_v39, %v5132_v17  ;;  %v5635_v20 = vrot.slane %v15695_v53, %v20482_v51  ;;  %v5300_v54 = vsel %vm686_vm3, %v20594_v6, %v15428_v3  ;;  %v15779_v39 = vpop.permute.xlu1 %5888  ;;  %5270 = vrot.lane.b32.xlu1 %v15632_v28, %s10724_s27  ;;  %v6627_v37 = vld [vmem:[#allocation8 + $0xc3] ss:$8 sm:$0xf] }
 0x399   : > { %20661 = vst [vmem:[#allocation99_spill] sm:$0xff] %v15725_v30  ;;  %20667 = vst [vmem:[#allocation34_spill] sm:$0xff] %v15746_v24  ;;  %v15766_v38 = vmul.f32 %v20674_v32, %v5132_v17  ;;  %v20676_v24 = vrot.slane %v15095_v12, %v20481_v62  ;;  %v7867_v58 = vrot.slane %v15245_v59, %v11051_v16  ;;  %5436 = vrot.lane.b32.xlu0 %v15323_v36, %s10725_s15 }
 0x39a   : > { %20673 = vst [vmem:[#allocation134_spill] sm:$0xff] %v15761_v60  ;;  %20678 = vst [vmem:[#allocation62_spill] sm:$0xff] %v15779_v39  ;;  %v7871_v32 = vrot.slane %v15245_v59, %v11045_v13  ;;  %v20679_v60 = vrot.slane %v20591_v15, %v20483_v18  ;;  %v20681_v52 = vrot.slane %v20598_v63, %v11051_v16  ;;  %v20688_v15 = vld [vmem:[#allocation95_spill] sm:$0xff] }
 0x39b   : > { %20675 = vst [vmem:[#allocation23_spill] sm:$0xff] %v15766_v38  ;;  %v15771_v29 = vmul.f32 %v20676_v24, %v6260_v47  ;;  %v5639_v24 = vrot.slane %v15695_v53, %v20483_v18  ;;  %v20683_v3 = vrot.slane %v15217_v26, %v20482_v51  ;;  %v20689_v38 = vrot.slane %v20688_v15, %v11045_v13 }
 0x39c   : > { %v15790_v49 = vmul.f32 %v20679_v60, %v5132_v17  ;;  %v15795_v6 = vmul.f32 %v20681_v52, %v6260_v47  ;;  %v5468_v17 = vsel %vm857_vm4, %v20617_v21, %v15554_v34  ;;  %v6387_v60 = vld [vmem:[#allocation8 + $0xc1] ss:$8 sm:$0xf]  ;;  %v20691_v21 = vrot.slane %v20614_v35, %v20459_v43  ;;  %v15870_v14 = vpop.permute.xlu1 %6056  ;;  %5438 = vrot.lane.b32.xlu1 %v15632_v28, %s10725_s15 }
 0x39d   : > { %20677 = vst [vmem:[#allocation56_spill] sm:$0xff] %v15771_v29  ;;  %v15800_v0 = vmul.f32 %v20683_v3, %v6260_v47  ;;  %v15821_v12 = vmul.f32 %v20689_v38, %v5300_v54  ;;  %v20694_v3 = vrot.slane %v15115_v42, %v20483_v18  ;;  %v6507_v47 = vld [vmem:[#allocation8 + $0xc2] ss:$8 sm:$0xf]  ;;  %v15840_v38 = vmul.f32 %v7871_v32, %v15632_v28 }
 0x39e   : > { %20680 = vst [vmem:[#allocation147_spill] sm:$0xff] %v15790_v49  ;;  %20682 = vst [vmem:[#allocation148_spill] sm:$0xff] %v15795_v6  ;;  %v6388_v49 = vld [vmem:[#allocation8 + $0xc1] ss:$8 sm:$0xf0]  ;;  %v15826_v34 = vmul.f32 %v20691_v21, %v5300_v54  ;;  %v15829_v6 = vmul.f32 %v5635_v20, %v15323_v36  ;;  %v15843_v22 = vmul.f32 %v5639_v24, %v15632_v28  ;;  %5726 = vrot.lane.b32.xlu0 %v15632_v28, %s10726_s16 }
 0x39f   : > { %20684 = vst [vmem:[#allocation149_spill] sm:$0xff] %v15800_v0  ;;  %20690 = vst [vmem:[#allocation95_spill] sm:$0xff] %v15821_v12  ;;  %v15834_v26 = vmul.f32 %v20694_v3, %v5300_v54  ;;  %v15837_v0 = vmul.f32 %v7867_v58, %v15323_v36  ;;  %v20699_v20 = vrot.slane %v15175_v56, %v11045_v13  ;;  %v6628_v29 = vld [vmem:[#allocation8 + $0xc3] ss:$8 sm:$0xf0] }
 0x3a0   : > { %20692 = vst [vmem:[#allocation150_spill] sm:$0xff] %v15826_v34  ;;  %20693 = vst [vmem:[#allocation151_spill] sm:$0xff] %v15829_v6  ;;  %v5755_v54 = vsel %vm1150_vm5, %v20701_v40, %v15677_v1  ;;  %v15858_v58 = vor.u32 %v6388_v49, %v6387_v60  ;;  %v20703_v32 = vrot.slane %v15185_v41, %v20459_v43  ;;  %v20708_v40 = vld [vmem:[#allocation101_spill] sm:$0xff]  ;;  %v20709_v60 = vld [vmem:[#allocation20_spill] sm:$0xff] }
 0x3a1   : > { %20695 = vst [vmem:[#allocation152_spill] sm:$0xff] %v15834_v26  ;;  %20696 = vst [vmem:[#allocation153_spill] sm:$0xff] %v15837_v0  ;;  %v15848_v21 = vmul.f32 %v20699_v20, %v5468_v17  ;;  %v20705_v3 = vrot.slane %v15193_v23, %v20483_v18  ;;  %v5923_v49 = vsel %vm1321_vm6, %v15403_v57, %v15779_v39  ;;  %v20732_v12 = vld [vmem:[#allocation86_spill] sm:$0xff]  ;;  %v20737_v36 = vld [vmem:[#allocation40_spill] sm:$0xff] }
 0x3a2   : > { %20697 = vst [vmem:[#allocation154_spill] sm:$0xff] %v15840_v38  ;;  %20698 = vst [vmem:[#allocation155_spill] sm:$0xff] %v15843_v22  ;;  %v15863_v24 = vmul.f32 %v20703_v32, %v5468_v17  ;;  %v20710_v22 = vld [vmem:[#allocation50_spill] sm:$0xff]  ;;  %v20712_v0 = vrot.slane %v15143_v44, %v11045_v13  ;;  %v20714_v6 = vrot.slane %v15153_v10, %v20459_v43  ;;  %v20718_v32 = vld [vmem:[#allocation16_spill] sm:$0xff]  ;;  %5894 = vrot.lane.b32.xlu0 %v15632_v28, %s10727_s17 }
 0x3a3   : > { %20700 = vst [vmem:[#allocation156_spill] sm:$0xff] %v15848_v21  ;;  %20702 = vst [vmem:[#allocation92_spill] sm:$0xff] %v15858_v58  ;;  %v15868_v20 = vmul.f32 %v20705_v3, %v5468_v17  ;;  %v15884_v3 = vor.u32 %v6508_v50, %v6507_v47  ;;  %v20716_v57 = vrot.slane %v15155_v25, %v20483_v18  ;;  %v20719_v50 = vld [vmem:[#allocation103_spill] sm:$0xff] }
 0x3a4   : > { %20704 = vst [vmem:[#allocation157_spill] sm:$0xff] %v15863_v24  ;;  %20707 = vst [vmem:[#allocation159_spill] sm:$0xff] %v15870_v14  ;;  %v15889_v52 = vmul.f32 %v20712_v0, %v5755_v54  ;;  %v15894_v38 = vmul.f32 %v20714_v6, %v5755_v54  ;;  %v15904_v47 = vmax.f32 %v20719_v50, 0.0  ;;  %v6091_v0 = vsel %vm1492_vm7, %v15528_v45, %v15870_v14  ;;  %v20723_v14 = vld [vmem:[#allocation37_spill] sm:$0xff]  ;;  %v20809_v24 = vld [vmem:[#allocation35_spill] sm:$0xff] }
 0x3a5   : > { %20706 = vst [vmem:[#allocation158_spill] sm:$0xff] %v15868_v20  ;;  %20711 = vst [vmem:[#allocation160_spill] sm:$0xff] %v15884_v3  ;;  %v15899_v39 = vmul.f32 %v20716_v57, %v5755_v54  ;;  %v20721_v57 = vrot.slane %v15013_v5, %v11045_v13  ;;  %v20724_v6 = vrot.slane %v15015_v55, %v20459_v43  ;;  %v6883_v3 = vld [vmem:[#allocation8 + $0xc6] ss:$8 sm:$0xf] }
 0x3a6   : > { %20713 = vst [vmem:[#allocation161_spill] sm:$0xff] %v15889_v52  ;;  %20715 = vst [vmem:[#allocation162_spill] sm:$0xff] %v15894_v38  ;;  %v20728_v1 = vrot.slane %v15019_v4, %v11045_v13  ;;  %5728 = vrot.lane.b32.xlu1 %v15904_v47, %s10726_s16  ;;  %v15961_v45 = vor.u32 %v6628_v29, %v6627_v37  ;;  %v20734_v17 = vrot.slane %v15215_v8, %v20483_v18  ;;  %v5140_v20 = vld [vmem:[#allocation8 + $0x41] ss:$8 sm:$0xf0] }
 0x3a7   : > { %20717 = vst [vmem:[#allocation163_spill] sm:$0xff] %v15899_v39  ;;  %20720 = vst [vmem:[#allocation16_spill] sm:$0xff] %v15904_v47  ;;  %v15921_v50 = vmul.f32 %v20721_v57, %v5923_v49  ;;  %v15932_v54 = vmul.f32 %v20724_v6, %v5923_v49  ;;  %v20726_v57 = vrot.slane %v15213_v11, %v20483_v18  ;;  %6062 = vrot.lane.b32.xlu0 %v15632_v28, %s10728_s12  ;;  %v5308_v55 = vld [vmem:[#allocation8 + $0x42] ss:$8 sm:$0xf0] }
 0x3a8   : > { %v15946_v52 = vmul.f32 %v20728_v1, %v6091_v0  ;;  %v20730_v6 = vrot.slane %v15021_v46, %v20459_v43  ;;  %20733 = vst [vmem:[#allocation86_spill] sm:$0xff] %v15961_v45  ;;  %v7863_v1 = vrot.slane %v15245_v59, %v20459_v43  ;;  %v7879_v58 = vrot.slane %v15245_v59, %v20350_v31  ;;  %v20852_v5 = vld [vmem:[#allocation63_spill] sm:$0xff] }
 0x3a9   : > { %20722 = vst [vmem:[#allocation103_spill] sm:$0xff] %v15921_v50  ;;  %20725 = vst [vmem:[#allocation164_spill] sm:$0xff] %v15932_v54  ;;  %v15937_v50 = vmul.f32 %v20726_v57, %v5923_v49  ;;  %v5627_v49 = vrot.slane %v20732_v12, %v20718_v32  ;;  %v7859_v57 = vrot.slane %v15245_v59, %v20481_v62  ;;  %v4972_v54 = vld [vmem:[#allocation8 + $0x40] ss:$8 sm:$0xf0] }
 0x3aa   : > { %20729 = vst [vmem:[#allocation166_spill] sm:$0xff] %v15946_v52  ;;  %v15951_v21 = vmul.f32 %v20730_v6, %v6091_v0  ;;  %v5631_v6 = vrot.slane %v20732_v12, %v20350_v31  ;;  %v6748_v52 = vld [vmem:[#allocation8 + $0xc4] ss:$8 sm:$0xf0]  ;;  %5896 = vrot.lane.b32.xlu1 %v15904_v47, %s10727_s17  ;;  %v5647_v2 = vrot.slane %v15695_v53, %v20459_v43 }
 0x3ab   : > { %20727 = vst [vmem:[#allocation165_spill] sm:$0xff] %v15937_v50  ;;  %v15991_v29 = vmul.f32 %v5627_v49, %v20737_v36  ;;  %v15994_v39 = vmul.f32 %v7859_v57, %v20737_v36  ;;  %v5643_v57 = vrot.slane %v15695_v53, %v20481_v62  ;;  %v7875_v36 = vrot.slane %v15245_v59, %v20718_v32  ;;  %v20920_v10 = vld [vmem:[#allocation55_spill] sm:$0xff] }
 0x3ac   : > { %20731 = vst [vmem:[#allocation167_spill] sm:$0xff] %v15951_v21  ;;  %v15970_v21 = vmul.f32 %v20734_v17, %v6091_v0  ;;  %v6747_v0 = vld [vmem:[#allocation8 + $0xc4] ss:$8 sm:$0xf]  ;;  %v16003_v17 = vmul.f32 %v7863_v1, %v15109_v19  ;;  %v16006_v37 = vmul.f32 %v5631_v6, %v15109_v19  ;;  %v5603_v6 = vrot.slane %v20732_v12, %v20482_v51 }
 0x3ad   : > { %20738 = vst [vmem:[#allocation169_spill] sm:$0xff] %v15991_v29  ;;  %20739 = vst [vmem:[#allocation170_spill] sm:$0xff] %v15994_v39  ;;  %v16016_v29 = vor.u32 %v6748_v52, %v6747_v0  ;;  %v7004_v0 = vld [vmem:[#allocation8 + $0xc7] ss:$8 sm:$0xf0]  ;;  %v16077_v39 = vmul.f32 %v5643_v57, %v15904_v47  ;;  %v16080_v49 = vmul.f32 %v7875_v36, %v15904_v47  ;;  %6230 = vrot.lane.b32.xlu0 %v15632_v28, %s10729_s10 }
 0x3ae   : > { %20735 = vst [vmem:[#allocation168_spill] sm:$0xff] %v15970_v21  ;;  %v6884_v21 = vld [vmem:[#allocation8 + $0xc6] ss:$8 sm:$0xf0]  ;;  %20740 = vst [vmem:[#allocation171_spill] sm:$0xff] %v16003_v17  ;;  %6064 = vrot.lane.b32.xlu1 %v15904_v47, %s10728_s12  ;;  %v5655_v30 = vrot.slane %v15695_v53, %v11045_v13  ;;  %v20867_v63 = vrot.slane %v20710_v22, %v11051_v16 }
 0x3af   : > { %20741 = vst [vmem:[#allocation172_spill] sm:$0xff] %v16006_v37  ;;  %20742 = vst [vmem:[#allocation173_spill] sm:$0xff] %v16016_v29  ;;  %v16022_v50 = vor.u32 %v6884_v21, %v6883_v3  ;;  %v7003_v3 = vld [vmem:[#allocation8 + $0xc7] ss:$8 sm:$0xf] }
 0x3b0   : > { %v20745_v19 = vld [vmem:[#allocation61_spill] sm:$0xff]  ;;  %v20750_v52 = vld [vmem:[#allocation142_spill] sm:$0xff]  ;;  %20751 = vst [vmem:[#allocation177_spill] sm:$0xff] %v16077_v39  ;;  %20752 = vst [vmem:[#allocation178_spill] sm:$0xff] %v16080_v49  ;;  %v16202_v39 = vpop.permute.xlu1 %5908 }
 0x3b1   : > { %20743 = vst [vmem:[#allocation174_spill] sm:$0xff] %v16022_v50  ;;  %v16051_v37 = vmul.f32 %v5603_v6, %v20745_v19  ;;  %v16065_v6 = vor.u32 %v7004_v0, %v7003_v3  ;;  %v20748_v19 = vld [vmem:[#allocation47_spill] sm:$0xff]  ;;  %v20758_v50 = vld [vmem:[#allocation26_spill] sm:$0xff]  ;;  %4936 = vrot.lane.b32.xlu0 %v15904_v47, %s10723_s14  ;;  %20786 = vst [vmem:[#allocation183_spill] sm:$0xff] %v16202_v39 }
 0x3b2   : > { %v16068_v17 = vmax.f32 %v20748_v19, 0.0  ;;  %6232 = vrot.lane.b32.xlu1 %v15904_v47, %s10729_s10  ;;  %v5607_v19 = vrot.slane %v20732_v12, %v20483_v18  ;;  %v7123_v21 = vld [vmem:[#allocation8 + $0x140] ss:$8 sm:$0xf] }
 0x3b3   : > { %20746 = vst [vmem:[#allocation175_spill] sm:$0xff] %v16051_v37  ;;  %20747 = vst [vmem:[#allocation176_spill] sm:$0xff] %v16065_v6  ;;  %v7124_v29 = vld [vmem:[#allocation8 + $0x140] ss:$8 sm:$0xf0] }
 0x3b4   : > { %20749 = vst [vmem:[#allocation47_spill] sm:$0xff] %v16068_v17  ;;  %v7243_v37 = vld [vmem:[#allocation8 + $0x141] ss:$8 sm:$0xf]  ;;  %v16114_v57 = vor.u32 %v7124_v29, %v7123_v21  ;;  %v16117_v1 = vmul.f32 %v5607_v19, %v20761_v48  ;;  %v16122_v45 = vmul.f32 %v7879_v58, %v16068_v17  ;;  %v16125_v9 = vmul.f32 %v5647_v2, %v16068_v17  ;;  %v16243_v29 = vpop.permute.xlu1 %6244 }
 0x3b5   : > { %v7244_v36 = vld [vmem:[#allocation8 + $0x141] ss:$8 sm:$0xf0]  ;;  %v5651_v2 = vrot.slane %v15695_v53, %v11051_v16  ;;  %5104 = vrot.lane.b32.xlu0 %v15904_v47, %s10722_s29  ;;  %20794 = vst [vmem:[#allocation187_spill] sm:$0xff] %v16243_v29 }
 0x3b6   : > { %4938 = vrot.lane.b32.xlu1 %v16068_v17, %s10723_s14  ;;  %v20759_v12 = vld [vmem:[#allocation41_spill] sm:$0xff]  ;;  %20760 = vst [vmem:[#allocation26_spill] sm:$0xff] %v16114_v57  ;;  %20765 = vst [vmem:[#allocation179_spill] sm:$0xff] %v16122_v45  ;;  %v16133_v21 = vor.u32 %v7244_v36, %v7243_v37  ;;  %v20769_v48 = vld [vmem:[#allocation54_spill] sm:$0xff] }
 0x3b7   : > { %20762 = vst [vmem:[#allocation41_spill] sm:$0xff] %v16117_v1  ;;  %20766 = vst [vmem:[#allocation180_spill] sm:$0xff] %v16125_v9  ;;  %v16144_v9 = vmax.f32 %v20769_v48, 0.0  ;;  %v20777_v19 = vld [vmem:[#allocation22_spill] sm:$0xff]  ;;  %v20779_v58 = vld [vmem:[#allocation33_spill] sm:$0xff]  ;;  %v16204_v48 = vpop.permute.xlu0 %4948 }
 0x3b8   : > { %20767 = vst [vmem:[#allocation181_spill] sm:$0xff] %v16133_v21  ;;  %v20778_v37 = vld [vmem:[#allocation90_spill] sm:$0xff]  ;;  %v16181_v57 = vmax.f32 %v20779_v58, 0.0  ;;  %v4951_v38 = vpop.permute.xlu1 %4950  ;;  %v20821_v58 = vrot.slane %v20708_v40, %v20481_v62 }
 0x3b9   : > { %20770 = vst [vmem:[#allocation54_spill] sm:$0xff] %v16144_v9  ;;  %v7883_v21 = vrot.slane %v20778_v37, %v20482_v51  ;;  %v7887_v28 = vrot.slane %v20778_v37, %v20483_v18  ;;  %v16200_v59 = vmul.f32 %v5651_v2, %v16144_v9  ;;  %5272 = vrot.lane.b32.xlu0 %v15904_v47, %s10724_s27 }
 0x3ba   : > { %5106 = vrot.lane.b32.xlu1 %v16068_v17, %s10722_s29  ;;  %20780 = vst [vmem:[#allocation33_spill] sm:$0xff] %v16181_v57  ;;  %v16233_v36 = vmul.f32 %v5655_v30, %v16181_v57  ;;  %v16312_v30 = vsel %vm345_vm2, %v16204_v48, %v4951_v38 }
 0x3bb   : > { %20785 = vst [vmem:[#allocation182_spill] sm:$0xff] %v16200_v59  ;;  %v16221_v3 = vmul.f32 %v7883_v21, %v16144_v9  ;;  %v16230_v2 = vmul.f32 %v7887_v28, %v16181_v57  ;;  %v16245_v1 = vpop.permute.xlu0 %5116  ;;  %v4971_v28 = vld [vmem:[#allocation8 + $0x40] ss:$8 sm:$0xf]  ;;  %20808 = vst [vmem:[#allocation51_spill] sm:$0xff] %v16312_v30 }
 0x3bc   : > { %20793 = vst [vmem:[#allocation186_spill] sm:$0xff] %v16233_v36  ;;  %v16317_v36 = vsel %vm345_vm2, %v4951_v38, %v20809_v24  ;;  %v20811_v38 = vld [vmem:[#allocation141_spill] sm:$0xff]  ;;  %v16347_v59 = vor.u32 %v4972_v54, %v4971_v28  ;;  %v20820_v24 = vrot.slane %v20708_v40, %v20483_v18  ;;  %v20823_v54 = vrot.slane %v20580_v33, %v20481_v62 }
 0x3bd   : > { %20789 = vst [vmem:[#allocation184_spill] sm:$0xff] %v16221_v3  ;;  %20792 = vst [vmem:[#allocation185_spill] sm:$0xff] %v16230_v2  ;;  %5440 = vrot.lane.b32.xlu0 %v15904_v47, %s10725_s15  ;;  %v5119_v3 = vpop.permute.xlu1 %5118  ;;  %v20815_v47 = vld [vmem:[#allocation52_spill] sm:$0xff]  ;;  %v5058_v0 = vmul.f32 %v20821_v58, %v16317_v36  ;;  %v20826_v58 = vrot.slane %v20723_v14, %v20718_v32 }
 0x3be   : > { %5274 = vrot.lane.b32.xlu1 %v16068_v17, %s10724_s27  ;;  %20810 = vst [vmem:[#allocation35_spill] sm:$0xff] %v16317_v36  ;;  %v16338_v2 = vsel %vm515_vm0, %v16245_v1, %v5119_v3  ;;  %v16343_v8 = vsel %vm515_vm0, %v5119_v3, %v20815_v47  ;;  %20819 = vst [vmem:[#allocation189_spill] sm:$0xff] %v16347_v59  ;;  %v5057_v45 = vmul.f32 %v20820_v24, %v16312_v30 }
 0x3bf   : > { %v16281_v21 = vpop.permute.xlu0 %5284  ;;  %20814 = vst [vmem:[#allocation188_spill] sm:$0xff] %v16338_v2  ;;  %20816 = vst [vmem:[#allocation52_spill] sm:$0xff] %v16343_v8  ;;  %v20822_v47 = vrot.slane %v20580_v33, %v20483_v18  ;;  %v5226_v28 = vmul.f32 %v20823_v54, %v16343_v8  ;;  %v20824_v24 = vrot.slane %v20710_v22, %v20718_v32  ;;  %v20835_v54 = vld [vmem:[#allocation77_spill] sm:$0xff] }
 0x3c0   : > { %v16377_v30 = vmul.f32 %v20826_v58, %v16343_v8  ;;  %v16410_v58 = vmax.f32 %v20835_v54, 0.0 }
 0x3c1   : > { %5730 = vrot.lane.b32.xlu0 %v16068_v17, %s10726_s16  ;;  %v5225_v3 = vmul.f32 %v20822_v47, %v16338_v2  ;;  %v16371_v11 = vmul.f32 %v20824_v24, %v16317_v36  ;;  %v5139_v2 = vld [vmem:[#allocation8 + $0x41] ss:$8 sm:$0xf]  ;;  %v10093_v46 = vpack.c.bf16 %v5226_v28, %v5058_v0  ;;  %v16385_v24 = vpop.permute.xlu1 %5114  ;;  %v5307_v28 = vld [vmem:[#allocation8 + $0x42] ss:$8 sm:$0xf] }
 0x3c2   : > { %5442 = vrot.lane.b32.xlu1 %v16068_v17, %s10725_s15  ;;  %20827 = vst [vmem:[#allocation191_spill] sm:$0xff] %v16377_v30  ;;  %20828 = vst [vmem:[#allocation192_spill] sm:$0xff] %v16385_v24  ;;  %v16407_v8 = vor.u32 %v5140_v20, %v5139_v2  ;;  %v20837_v47 = vld [vmem:[#allocation145_spill] sm:$0xff]  ;;  %v20846_v0 = vld [vmem:[#allocation64_spill] sm:$0xff] }
 0x3c3   : > { %v16325_v26 = vpop.permute.xlu0 %5452  ;;  %20825 = vst [vmem:[#allocation190_spill] sm:$0xff] %v16371_v11  ;;  %v10039_v36 = vpack.c.bf16 %v5225_v3, %v5057_v45  ;;  %10094 = vmatpush1.bf16.msra.mxu1 %v10093_v46  ;;  %20836 = vst [vmem:[#allocation77_spill] sm:$0xff] %v16410_v58  ;;  %v20838_v20 = vpack.c.bf16 %v15637_v7, %v20837_v47  ;;  %v5659_v45 = vrot.slane %v15695_v53, %v20718_v32 }
 0x3c4   : > { %20834 = vst [vmem:[#allocation194_spill] sm:$0xff] %v16407_v8  ;;  %v5121_v47 = vsel %vm515_vm0, %v16385_v24, %v16245_v1  ;;  %v20855_v24 = vrot.slane %v20688_v15, %v20481_v62 }
 0x3c5   : > { %5898 = vrot.lane.b32.xlu0 %v16068_v17, %s10727_s17  ;;  %10040 = vmatprep.subr.bf16.mxu0 %v10039_v36  ;;  %v5287_v2 = vpop.permute.xlu1 %5286  ;;  %v16427_v36 = vor.u32 %v5308_v55, %v5307_v28 }
 0x3c6   : > { %5732 = vrot.lane.b32.xlu1 %v16144_v9, %s10726_s16  ;;  %10096 = vmatprep.subr.bf16.mxu1 %v20838_v20  ;;  %v16454_v20 = vsel %vm686_vm3, %v16281_v21, %v5287_v2  ;;  %v16459_v46 = vsel %vm686_vm3, %v5287_v2, %v20846_v0  ;;  %v20854_v2 = vrot.slane %v20688_v15, %v20483_v18 }
 0x3c7   : > { %v16387_v49 = vpop.permute.xlu0 %5740  ;;  %20840 = vst [vmem:[#allocation195_spill] sm:$0xff] %v16427_v36  ;;  %20845 = vst [vmem:[#allocation196_spill] sm:$0xff] %v16454_v20 }
 0x3c8   : > { %20829 = vst [vmem:[#allocation193_spill] sm:$0xff] %v16387_v49 }
 0x3c9   : > { %6066 = vrot.lane.b32.xlu0 %v16068_v17, %s10728_s12  ;;  %v5455_v4 = vpop.permute.xlu1 %5454 }
 0x3ca   : > { %5900 = vrot.lane.b32.xlu1 %v16144_v9, %s10727_s17  ;;  %v16483_v28 = vsel %vm857_vm4, %v16325_v26, %v5455_v4  ;;  %v16488_v1 = vsel %vm857_vm4, %v5455_v4, %v20852_v5  ;;  %v5394_v5 = vmul.f32 %v20855_v24, %v16459_v46  ;;  %v20856_v4 = vrot.slane %v15175_v56, %v20483_v18 }
 0x3cb   : > { %v16423_v54 = vpop.permute.xlu0 %6076  ;;  %20851 = vst [vmem:[#allocation198_spill] sm:$0xff] %v16483_v28  ;;  %v20859_v24 = vrot.slane %v20626_v61, %v20718_v32 }
 0x3cc   : > { %20839 = vst [vmem:[#allocation145_spill] sm:$0xff] %v16423_v54  ;;  %v5561_v55 = vmul.f32 %v20856_v4, %v16483_v28  ;;  %v20861_v4 = vld [vmem:[#allocation39_spill] sm:$0xff] }
 0x3cd   : > { %6234 = vrot.lane.b32.xlu0 %v16068_v17, %s10729_s10  ;;  %v16478_v17 = vmul.f32 %v5659_v45, %v16410_v58  ;;  %v16523_v30 = vmul.f32 %v20859_v24, %v16459_v46  ;;  %v20862_v28 = vrot.slane %v20861_v4, %v20718_v32  ;;  %v16548_v29 = vpop.permute.xlu1 %5450 }
 0x3ce   : > { %6068 = vrot.lane.b32.xlu1 %v16144_v9, %s10728_s12  ;;  %20869 = vst [vmem:[#allocation203_spill] sm:$0xff] %v16548_v29 }
 0x3cf   : > { %v16471_v7 = vpop.permute.xlu0 %4946  ;;  %20850 = vst [vmem:[#allocation197_spill] sm:$0xff] %v16478_v17  ;;  %v5393_v17 = vmul.f32 %v20854_v2, %v16454_v20  ;;  %v20858_v2 = vrot.slane %v20580_v33, %v20482_v51  ;;  %20860 = vst [vmem:[#allocation199_spill] sm:$0xff] %v16523_v30  ;;  %v16529_v20 = vmul.f32 %v20862_v28, %v16488_v1  ;;  %v20879_v30 = vld [vmem:[#allocation86_spill] sm:$0xff] }
 0x3d0   : > { %20849 = vst [vmem:[#allocation64_spill] sm:$0xff] %v16471_v7  ;;  %v16494_v0 = vsel %vm345_vm2, %v16471_v7, %v16204_v48  ;;  %v20857_v48 = vrot.slane %v15175_v56, %v20481_v62 }
 0x3d1   : > { %20853 = vst [vmem:[#allocation63_spill] sm:$0xff] %v16494_v0  ;;  %v5224_v7 = vmul.f32 %v20858_v2, %v5121_v47  ;;  %20863 = vst [vmem:[#allocation200_spill] sm:$0xff] %v16529_v20  ;;  %4940 = vrot.lane.b32.xlu0 %v16144_v9, %s10723_s14  ;;  %v20865_v2 = vrot.slane %v20723_v14, %v11051_v16  ;;  %v16546_v28 = vmul.f32 %v20867_v63, %v16494_v0  ;;  %v20976_v14 = vld [vmem:[#allocation31_spill] sm:$0xff] }
 0x3d2   : > { %6236 = vrot.lane.b32.xlu1 %v16144_v9, %s10729_s10  ;;  %v5562_v45 = vmul.f32 %v20857_v48, %v16488_v1  ;;  %v20864_v48 = vrot.slane %v20708_v40, %v20482_v51  ;;  %v20876_v40 = vrot.slane %v20861_v4, %v11051_v16 }
 0x3d3   : > { %v16540_v3 = vmul.f32 %v20865_v2, %v5121_v47  ;;  %20868 = vst [vmem:[#allocation202_spill] sm:$0xff] %v16546_v28  ;;  %v16550_v33 = vpop.permute.xlu0 %5282  ;;  %v5476_v2 = vld [vmem:[#allocation8 + $0x43] ss:$8 sm:$0xf0] }
 0x3d4   : > { %v5056_v11 = vmul.f32 %v20864_v48, %v16494_v0  ;;  %v10097_v24 = vpack.c.bf16 %v5562_v45, %v5394_v5  ;;  %20870 = vst [vmem:[#allocation204_spill] sm:$0xff] %v16550_v33  ;;  %v10043_v48 = vpack.c.bf16 %v5561_v55, %v5393_v17  ;;  %v16558_v45 = vsel %vm857_vm4, %v16548_v29, %v16325_v26  ;;  %v5475_v5 = vld [vmem:[#allocation8 + $0x43] ss:$8 sm:$0xf] }
 0x3d5   : > { %20866 = vst [vmem:[#allocation201_spill] sm:$0xff] %v16540_v3  ;;  %20871 = vst [vmem:[#allocation205_spill] sm:$0xff] %v16558_v45  ;;  %v5289_v63 = vsel %vm686_vm3, %v16550_v33, %v16281_v21  ;;  %v20872_v0 = vld [vmem:[#allocation160_spill] sm:$0xff]  ;;  %v20875_v26 = vrot.slane %v15175_v56, %v20482_v51  ;;  %v16579_v21 = vmul.f32 %v20876_v40, %v16558_v45  ;;  %5108 = vrot.lane.b32.xlu0 %v16144_v9, %s10722_s29  ;;  %v20884_v40 = vld [vmem:[#allocation99_spill] sm:$0xff] }
 0x3d6   : > { %4942 = vrot.lane.b32.xlu1 %v16181_v57, %s10723_s14  ;;  %v10041_v36 = vpack.c.bf16 %v5224_v7, %v5056_v11  ;;  %v20873_v17 = vrot.slane %v20872_v0, %v20718_v32  ;;  %v20880_v11 = vrot.slane %v20879_v30, %v20718_v32  ;;  %10098 = vmatpush1.bf16.msra.mxu1 %v10097_v24  ;;  %v20885_v3 = vld [vmem:[#allocation138_spill] sm:$0xff] }
 0x3d7   : > { %v5560_v7 = vmul.f32 %v20875_v26, %v16558_v45  ;;  %20877 = vst [vmem:[#allocation207_spill] sm:$0xff] %v16579_v21  ;;  %v20882_v26 = vrot.slane %v20626_v61, %v11051_v16  ;;  %v20886_v45 = vpack.c.bf16 %v20884_v40, %v20885_v3  ;;  %v16601_v29 = vpop.permute.xlu0 %4928  ;;  %v16603_v33 = vor.u32 %v5476_v2, %v5475_v5  ;;  %v20891_v5 = vld [vmem:[#allocation129_spill] sm:$0xff] }
 0x3d8   : > { %v16567_v55 = vmul.f32 %v20873_v17, %v5121_v47  ;;  %v20878_v47 = vrot.slane %v20688_v15, %v20482_v51  ;;  %v16589_v20 = vmul.f32 %v20880_v11, %v5289_v63  ;;  %10042 = vmatpush1.bf16.msra.mxu0 %v10041_v36  ;;  %v20888_v24 = vrot.slane %v20778_v37, %v20481_v62  ;;  %v5763_v40 = vld [vmem:[#allocation8 + $0x45] ss:$8 sm:$0xf] }
 0x3d9   : > { %v16594_v28 = vmul.f32 %v20882_v26, %v5289_v63  ;;  %10100 = vmatprep.subr.bf16.mxu1 %v20886_v45  ;;  %20887 = vst [vmem:[#allocation99_spill] sm:$0xff] %v16603_v33  ;;  %10044 = vmatprep.subr.bf16.mxu0 %v10043_v48  ;;  %v20893_v36 = vrot.slane %v15143_v44, %v20482_v51  ;;  %v20895_v3 = vld [vmem:[#allocation137_spill] sm:$0xff] }
 0x3da   : > { %5110 = vrot.lane.b32.xlu1 %v16181_v57, %s10722_s29  ;;  %20874 = vst [vmem:[#allocation206_spill] sm:$0xff] %v16567_v55  ;;  %v5392_v17 = vmul.f32 %v20878_v47, %v5289_v63  ;;  %20881 = vst [vmem:[#allocation208_spill] sm:$0xff] %v16589_v20  ;;  %v5743_v47 = vpop.permute.xlu1 %5742  ;;  %v16611_v63 = vmul.f32 %v20888_v24, %v16410_v58  ;;  %v5764_v24 = vld [vmem:[#allocation8 + $0x45] ss:$8 sm:$0xf0]  ;;  %v5663_v48 = vrot.slane %v15695_v53, %v20350_v31 }
 0x3db   : > { %20883 = vst [vmem:[#allocation209_spill] sm:$0xff] %v16594_v28  ;;  %v16620_v45 = vsel %vm1150_vm5, %v16387_v49, %v5743_v47  ;;  %v16625_v2 = vsel %vm1150_vm5, %v5743_v47, %v20891_v5  ;;  %v20894_v5 = vld [vmem:[#allocation117_spill] sm:$0xff]  ;;  %v20899_v55 = vld [vmem:[#allocation46_spill] sm:$0xff]  ;;  %5276 = vrot.lane.b32.xlu0 %v16144_v9, %s10724_s27  ;;  %v20906_v49 = vld [vmem:[#allocation36_spill] sm:$0xff]  ;;  %v16674_v21 = vor.u32 %v5764_v24, %v5763_v40 }
 0x3dc   : > { %20889 = vst [vmem:[#allocation138_spill] sm:$0xff] %v16611_v63  ;;  %v10045_v26 = vpack.c.bf16 %v5560_v7, %v5392_v17  ;;  %20890 = vst [vmem:[#allocation210_spill] sm:$0xff] %v16620_v45  ;;  %v5848_v47 = vmul.f32 %v20893_v36, %v16620_v45  ;;  %v20896_v11 = vpack.c.bf16 %v20894_v5, %v20895_v3  ;;  %v5911_v3 = vpop.permute.xlu0 %5910 }
 0x3dd   : > { %20892 = vst [vmem:[#allocation129_spill] sm:$0xff] %v16625_v2  ;;  %v20900_v17 = vrot.slane %v20778_v37, %v20459_v43  ;;  %v20902_v36 = vrot.slane %v15143_v44, %v20483_v18  ;;  %20910 = vst [vmem:[#allocation137_spill] sm:$0xff] %v16674_v21  ;;  %v20915_v5 = vrot.slane %v16065_v6, %v20718_v32  ;;  %v20954_v37 = vld [vmem:[#allocation26_spill] sm:$0xff] }
 0x3de   : > { %5278 = vrot.lane.b32.xlu1 %v16181_v57, %s10724_s27  ;;  %10102 = vmatpush1.bf16.msra.mxu1 %v20896_v11  ;;  %v16658_v11 = vpop.permute.xlu1 %6224 }
 0x3df   : > { %v16648_v20 = vmul.f32 %v20900_v17, %v20899_v55  ;;  %v5849_v63 = vmul.f32 %v20902_v36, %v16625_v2  ;;  %10046 = vmatpush1.bf16.msra.mxu0 %v10045_v26  ;;  %v5912_v36 = vsel %vm1321_vm6, %v16202_v39, %v5911_v3  ;;  %v20914_v17 = vld [vmem:[#allocation175_spill] sm:$0xff]  ;;  %v20917_v26 = vpack.c.bf16 %v20759_v12, %v20758_v50 }
 0x3e0   : > { %v10049_v28 = vpack.c.bf16 %v5848_v47, %v20914_v17  ;;  %v16696_v53 = vmul.f32 %v20915_v5, %v5912_v36  ;;  %v16706_v2 = vsel %vm1321_vm6, %v5911_v3, %v20920_v10  ;;  %5444 = vrot.lane.b32.xlu0 %v16144_v9, %s10725_s15  ;;  %v20922_v47 = vld [vmem:[#allocation41_spill] sm:$0xff]  ;;  %v20924_v5 = vld [vmem:[#allocation140_spill] sm:$0xff]  ;;  %v6079_v50 = vpop.permute.xlu0 %6078  ;;  %v16717_v12 = vmul.f32 %v5663_v48, %v20899_v55 }
 0x3e1   : > { %20901 = vst [vmem:[#allocation117_spill] sm:$0xff] %v16648_v20  ;;  %v20905_v20 = vld [vmem:[#allocation66_spill] sm:$0xff]  ;;  %20921 = vst [vmem:[#allocation175_spill] sm:$0xff] %v16706_v2  ;;  %v10047_v17 = vpack.c.bf16 %v5849_v63, %v20922_v47  ;;  %v6080_v10 = vsel %vm1492_vm7, %v16423_v54, %v6079_v50  ;;  %v20928_v3 = vld [vmem:[#allocation44_spill] sm:$0xff] }
 0x3e2   : > { %5446 = vrot.lane.b32.xlu1 %v16181_v57, %s10725_s15  ;;  %v20907_v4 = vpack.c.bf16 %v20905_v20, %v20906_v49  ;;  %20916 = vst [vmem:[#allocation36_spill] sm:$0xff] %v16696_v53  ;;  %v16714_v61 = vpop.permute.xlu1 %4930  ;;  %20927 = vst [vmem:[#allocation41_spill] sm:$0xff] %v16717_v12  ;;  %v16727_v63 = vsel %vm1492_vm7, %v6079_v50, %v20928_v3  ;;  %v5931_v47 = vld [vmem:[#allocation8 + $0x46] ss:$8 sm:$0xf] }
 0x3e3   : > { %20926 = vst [vmem:[#allocation55_spill] sm:$0xff] %v16714_v61  ;;  %10048 = vmatprep.subr.bf16.mxu0 %v10047_v17  ;;  %v20937_v49 = vld [vmem:[#allocation84_spill] sm:$0xff]  ;;  %v20941_v12 = vld [vmem:[#allocation91_spill] sm:$0xff] }
 0x3e4   : > { %10104 = vmatprep.subr.bf16.mxu1 %v20907_v4  ;;  %v20911_v4 = vld [vmem:[#allocation174_spill] sm:$0xff]  ;;  %v20938_v39 = vrot.slane %v20937_v49, %v11051_v16  ;;  %10050 = vmatpush1.bf16.msra.mxu0 %v10049_v28  ;;  %v20942_v7 = vrot.slane %v20941_v12, %v11051_v16  ;;  %v6247_v28 = vpop.permute.xlu0 %6246  ;;  %v20955_v12 = vrot.slane %v20954_v37, %v20718_v32 }
 0x3e5   : > { %v20912_v40 = vrot.slane %v20911_v4, %v20718_v32  ;;  %10106 = vmatpush1.bf16.msra.mxu1 %v20917_v26  ;;  %v20932_v26 = vld [vmem:[#allocation81_spill] sm:$0xff]  ;;  %5734 = vrot.lane.b32.xlu0 %v16181_v57, %s10726_s16 }
 0x3e6   : > { %5736 = vrot.lane.b32.xlu1 %v16410_v58, %s10726_s16  ;;  %v16757_v3 = vmul.f32 %v20942_v7, %v6080_v10  ;;  %v20947_v7 = vld [vmem:[#allocation120_spill] sm:$0xff] }
 0x3e7   : > { %v16690_v24 = vmul.f32 %v20912_v40, %v16620_v45  ;;  %v20923_v40 = vld [vmem:[#allocation114_spill] sm:$0xff] }
 0x3e8   : > { %v20925_v45 = vpack.c.bf16 %v20923_v40, %v20924_v5  ;;  %20929 = vst [vmem:[#allocation114_spill] sm:$0xff] %v16727_v63  ;;  %v5932_v40 = vld [vmem:[#allocation8 + $0x46] ss:$8 sm:$0xf0]  ;;  %20943 = vst [vmem:[#allocation44_spill] sm:$0xff] %v16757_v3 }
 0x3e9   : > { %20913 = vst [vmem:[#allocation66_spill] sm:$0xff] %v16690_v24  ;;  %v20930_v5 = vld [vmem:[#allocation128_spill] sm:$0xff]  ;;  %v20933_v24 = vrot.slane %v20932_v26, %v20482_v51  ;;  %v20960_v3 = vld [vmem:[#allocation65_spill] sm:$0xff]  ;;  %5902 = vrot.lane.b32.xlu0 %v16181_v57, %s10727_s17 }
 0x3ea   : > { %10108 = vmatprep.subr.bf16.mxu1 %v20925_v45  ;;  %v20931_v48 = vrot.slane %v20930_v5, %v20482_v51  ;;  %v20936_v45 = vrot.slane %v20930_v5, %v20483_v18  ;;  %5904 = vrot.lane.b32.xlu1 %v16410_v58, %s10727_s17  ;;  %v6099_v50 = vld [vmem:[#allocation8 + $0x47] ss:$8 sm:$0xf] }
 0x3eb   : > { %v6184_v53 = vmul.f32 %v20933_v24, %v6080_v10  ;;  %v20940_v24 = vrot.slane %v20932_v26, %v20483_v18 }
 0x3ec   : > { %v6016_v20 = vmul.f32 %v20931_v48, %v5912_v36  ;;  %v6017_v9 = vmul.f32 %v20936_v45, %v16706_v2  ;;  %v16748_v48 = vmul.f32 %v20938_v39, %v5912_v36  ;;  %v16763_v39 = vpop.permute.xlu1 %5098  ;;  %v16765_v36 = vor.u32 %v5932_v40, %v5931_v47  ;;  %v20952_v2 = vld [vmem:[#allocation106_spill] sm:$0xff] }
 0x3ed   : > { %v6185_v17 = vmul.f32 %v20940_v24, %v16727_v63  ;;  %20944 = vst [vmem:[#allocation211_spill] sm:$0xff] %v16763_v39  ;;  %v20948_v63 = vld [vmem:[#allocation146_spill] sm:$0xff]  ;;  %v16782_v47 = vsel %vm1663_vm8, %v6247_v28, %v20952_v2  ;;  %6070 = vrot.lane.b32.xlu0 %v16181_v57, %s10728_s12 }
 0x3ee   : > { %20939 = vst [vmem:[#allocation140_spill] sm:$0xff] %v16748_v48  ;;  %v10053_v54 = vpack.c.bf16 %v6184_v53, %v6016_v20  ;;  %20945 = vst [vmem:[#allocation212_spill] sm:$0xff] %v16765_v36  ;;  %v20949_v53 = vpack.c.bf16 %v20947_v7, %v20948_v63  ;;  %v20950_v20 = vld [vmem:[#allocation187_spill] sm:$0xff]  ;;  %v16787_v48 = vmul.f32 %v20955_v12, %v6080_v10  ;;  %v20957_v63 = vld [vmem:[#allocation150_spill] sm:$0xff]  ;;  %6072 = vrot.lane.b32.xlu1 %v16410_v58, %s10728_s12 }
 0x3ef   : > { %v16777_v49 = vsel %vm1663_vm8, %v20950_v20, %v6247_v28  ;;  %20953 = vst [vmem:[#allocation146_spill] sm:$0xff] %v16782_v47  ;;  %v10051_v40 = vpack.c.bf16 %v6185_v17, %v6017_v9  ;;  %v6100_v24 = vld [vmem:[#allocation8 + $0x47] ss:$8 sm:$0xf0]  ;;  %v20961_v20 = vrot.slane %v20960_v3, %v20482_v51  ;;  %v20962_v9 = vrot.slane %v20960_v3, %v20483_v18 }
 0x3f0   : > { %10110 = vmatpush1.bf16.msra.mxu1 %v20949_v53  ;;  %20951 = vst [vmem:[#allocation120_spill] sm:$0xff] %v16777_v49  ;;  %20956 = vst [vmem:[#allocation106_spill] sm:$0xff] %v16787_v48  ;;  %v20958_v7 = vld [vmem:[#allocation23_spill] sm:$0xff]  ;;  %v20963_v17 = vld [vmem:[#allocation181_spill] sm:$0xff]  ;;  %v16825_v26 = vor.u32 %v6100_v24, %v6099_v50 }
 0x3f1   : > { %v20959_v53 = vpack.c.bf16 %v20957_v63, %v20958_v7  ;;  %v6352_v5 = vmul.f32 %v20961_v20, %v16777_v49  ;;  %v6353_v2 = vmul.f32 %v20962_v9, %v16782_v47  ;;  %v20964_v28 = vrot.slane %v20963_v17, %v20718_v32  ;;  %v20966_v10 = vld [vmem:[#allocation35_spill] sm:$0xff]  ;;  %10052 = vmatprep.subr.bf16.mxu0 %v10051_v40  ;;  %v16822_v40 = vpop.permute.xlu1 %5266  ;;  %v20972_v9 = vld [vmem:[#allocation105_spill] sm:$0xff]  ;;  %v20988_v50 = vld [vmem:[#allocation52_spill] sm:$0xff] }
 0x3f2   : > { %v20967_v63 = vrot.slane %v20709_v60, %v20482_v51  ;;  %v6267_v47 = vld [vmem:[#allocation8 + $0xc0] ss:$8 sm:$0xf]  ;;  %20969 = vst [vmem:[#allocation23_spill] sm:$0xff] %v16822_v40  ;;  %20971 = vst [vmem:[#allocation35_spill] sm:$0xff] %v16825_v26  ;;  %10054 = vmatpush1.bf16.msra.mxu0 %v10053_v54  ;;  %v20983_v54 = vrot.slane %v20614_v35, %v20482_v51  ;;  %6240 = vrot.lane.b32.xlu1 %v16410_v58, %s10729_s10 }
 0x3f3   : > { %10112 = vmatprep.subr.bf16.mxu1 %v20959_v53  ;;  %v16804_v12 = vmul.f32 %v20964_v28, %v16777_v49  ;;  %v20968_v53 = vld [vmem:[#allocation71_spill] sm:$0xff]  ;;  %v16831_v49 = vsel %vm1663_vm8, %v20972_v9, %v16658_v11  ;;  %v20973_v48 = vld [vmem:[#allocation133_spill] sm:$0xff]  ;;  %v20994_v60 = vld [vmem:[#allocation162_spill] sm:$0xff]  ;;  %6238 = vrot.lane.b32.xlu0 %v16181_v57, %s10729_s10 }
 0x3f4   : > { %v6472_v7 = vmul.f32 %v20967_v63, %v20966_v10  ;;  %v6268_v3 = vld [vmem:[#allocation8 + $0xc0] ss:$8 sm:$0xf0]  ;;  %v5097_v10 = vpop.permute.xlu0 %5096 }
 0x3f5   : > { %20965 = vst [vmem:[#allocation150_spill] sm:$0xff] %v16804_v12  ;;  %v20970_v63 = vld [vmem:[#allocation80_spill] sm:$0xff]  ;;  %v20974_v12 = vld [vmem:[#allocation123_spill] sm:$0xff]  ;;  %v20977_v17 = vld [vmem:[#allocation157_spill] sm:$0xff]  ;;  %v16847_v44 = vor.u32 %v6268_v3, %v6267_v47 }
 0x3f6   : > { %v10055_v20 = vpack.c.bf16 %v20970_v63, %v6353_v2  ;;  %v10057_v28 = vpack.c.bf16 %v6472_v7, %v6352_v5  ;;  %v20975_v45 = vpack.c.bf16 %v20973_v48, %v20974_v12  ;;  %v20978_v2 = vpack.c.bf16 %v20976_v14, %v20977_v17  ;;  %v20990_v14 = vld [vmem:[#allocation19_spill] sm:$0xff]  ;;  %v20991_v17 = vld [vmem:[#allocation45_spill] sm:$0xff]  ;;  %v20993_v5 = vld [vmem:[#allocation164_spill] sm:$0xff]  ;;  %5112 = vrot.lane.b32.xlu1 %v16410_v58, %s10722_s29 }
 0x3f7   : > { %20982 = vst [vmem:[#allocation80_spill] sm:$0xff] %v16847_v44  ;;  %v6712_v48 = vmul.f32 %v20983_v54, %v16459_v46  ;;  %v16867_v46 = vpop.permute.xlu1 %5434  ;;  %v20989_v12 = vrot.slane %v20586_v27, %v20482_v51  ;;  %v16880_v7 = vsel %vm515_vm0, %v5097_v10, %v16763_v39  ;;  %v20992_v9 = vpack.c.bf16 %v20990_v14, %v20991_v17  ;;  %v20996_v63 = vld [vmem:[#allocation139_spill] sm:$0xff]  ;;  %v20997_v27 = vld [vmem:[#allocation58_spill] sm:$0xff]  ;;  %v21012_v54 = vld [vmem:[#allocation28_spill] sm:$0xff] }
 0x3f8   : > { %10114 = vmatpush1.bf16.msra.mxu1 %v20975_v45  ;;  %10056 = vmatprep.subr.bf16.mxu0 %v10055_v20  ;;  %v20984_v45 = vld [vmem:[#allocation72_spill] sm:$0xff]  ;;  %20987 = vst [vmem:[#allocation105_spill] sm:$0xff] %v16867_v46  ;;  %v5265_v20 = vpop.permute.xlu0 %5264  ;;  %v20995_v24 = vpack.c.bf16 %v20993_v5, %v20994_v60  ;;  %v20999_v14 = vrot.slane %v15185_v41, %v20482_v51  ;;  %v21069_v36 = vld [vmem:[#allocation131_spill] sm:$0xff] }
 0x3f9   : > { %10116 = vmatprep.subr.bf16.mxu1 %v20978_v2  ;;  %v20985_v2 = vld [vmem:[#allocation68_spill] sm:$0xff]  ;;  %10058 = vmatpush1.bf16.msra.mxu0 %v10057_v28  ;;  %v21017_v41 = vrot.slane %v20750_v52, %v20481_v62 }
 0x3fa   : > { %v20986_v3 = vrot.slane %v20985_v2, %v20459_v43  ;;  %v6832_v60 = vmul.f32 %v20999_v14, %v16488_v1  ;;  %v21002_v1 = vld [vmem:[#allocation167_spill] sm:$0xff]  ;;  %5448 = vrot.lane.b32.xlu1 %v16410_v58, %s10725_s15  ;;  %4944 = vrot.lane.b32.xlu0 %v16410_v58, %s10723_s14  ;;  %s18871_s14 = scalar_lea.vmem [#allocation9], %s9596_s26  ;;  %s9622_s26 = sshll.u32 %s10788_s25, 11 }
 0x3fc   : > { %v7331_v47 = vmul.f32 %v20986_v3, %v16831_v49  ;;  %v6592_v3 = vmul.f32 %v20989_v12, %v20988_v50  ;;  %10118 = vmatpush1.bf16.msra.mxu1 %v20992_v9  ;;  %v20998_v50 = vpack.c.bf16 %v20996_v63, %v20997_v27  ;;  %v16907_v27 = vsel %vm345_vm2, %v16601_v29, %v16714_v61  ;;  %v21000_v63 = vld [vmem:[#allocation125_spill] sm:$0xff]  ;;  %v5433_v14 = vpop.permute.xlu0 %5432  ;;  %v21004_v12 = vld [vmem:[#allocation15_spill] sm:$0xff] }
 0x3fd   : > { %10120 = vmatprep.subr.bf16.mxu1 %v20995_v24  ;;  %v16914_v5 = vsel %vm515_vm0, %v21000_v63, %v5097_v10  ;;  %v21005_v24 = vld [vmem:[#allocation88_spill] sm:$0xff]  ;;  %v16933_v63 = vsel %vm857_vm4, %v5433_v14, %v16867_v46  ;;  %v10065_v39 = vpack.c.bf16 %v21012_v54, %v6832_v60  ;;  %v21020_v46 = vld [vmem:[#allocation59_spill] sm:$0xff] }
 0x3fe   : > { %10060 = vmatprep.subr.bf16.mxu0 %v20998_v50  ;;  %v10061_v9 = vpack.c.bf16 %v6712_v48, %v6592_v3  ;;  %v21001_v48 = vrot.slane %v20777_v19, %v20459_v43  ;;  %v10123_v3 = vpack.c.bf16 %v7331_v47, %v21002_v1  ;;  %v16925_v50 = vpop.permute.xlu1 %5724  ;;  %v21006_v10 = vpack.c.bf16 %v21004_v12, %v21005_v24  ;;  %v21007_v47 = vld [vmem:[#allocation70_spill] sm:$0xff] }
 0x3ff   : > { %21003 = vst [vmem:[#allocation133_spill] sm:$0xff] %v16925_v50  ;;  %v16943_v1 = vsel %vm345_vm2, %v21007_v47, %v16601_v29  ;;  %v21008_v12 = vrot.slane %v20750_v52, %v20459_v43  ;;  %v16952_v24 = vsel %vm686_vm3, %v5265_v20, %v16822_v40  ;;  %v21013_v29 = vrot.slane %v20777_v19, %v20481_v62  ;;  %v21024_v40 = vld [vmem:[#allocation57_spill] sm:$0xff]  ;;  %v21045_v52 = vld [vmem:[#allocation159_spill] sm:$0xff]  ;;  %v21049_v19 = vld [vmem:[#allocation170_spill] sm:$0xff] }
 0x400   : > { %v7571_v17 = vmul.f32 %v21001_v48, %v16880_v7  ;;  %10122 = vmatpush1.bf16.msra.mxu1 %v21006_v10  ;;  %10062 = vmatpush1.bf16.msra.mxu0 %v10061_v9  ;;  %v21009_v10 = vld [vmem:[#allocation109_spill] sm:$0xff]  ;;  %v21010_v48 = vld [vmem:[#allocation108_spill] sm:$0xff]  ;;  %v7450_v54 = vmul.f32 %v21017_v41, %v16943_v1  ;;  %v21023_v41 = vld [vmem:[#allocation143_spill] sm:$0xff] }
 0x401   : > { %v7451_v9 = vmul.f32 %v21008_v12, %v16907_v27  ;;  %10124 = vmatprep.subr.bf16.mxu1 %v10123_v3  ;;  %v21011_v28 = vpack.c.bf16 %v21009_v10, %v21010_v48  ;;  %v7570_v47 = vmul.f32 %v21013_v29, %v16914_v5  ;;  %v21014_v12 = vrot.slane %v15193_v23, %v20459_v43  ;;  %v21016_v3 = vld [vmem:[#allocation110_spill] sm:$0xff]  ;;  %v5723_v29 = vpop.permute.xlu0 %5722  ;;  %v21019_v10 = vld [vmem:[#allocation56_spill] sm:$0xff] }
 0x402   : > { %v16971_v48 = vsel %vm857_vm4, %v21016_v3, %v5433_v14  ;;  %v16977_v60 = vpop.permute.xlu1 %5892  ;;  %v21018_v14 = vrot.slane %v15115_v42, %v20459_v43  ;;  %v21021_v35 = vpack.c.bf16 %v21019_v10, %v21020_v46  ;;  %v21025_v61 = vpack.c.bf16 %v21023_v41, %v21024_v40  ;;  %v21028_v40 = vld [vmem:[#allocation135_spill] sm:$0xff]  ;;  %5906 = vrot.lane.b32.xlu1 %v20899_v55, %s10727_s17  ;;  %v21034_v41 = vld [vmem:[#allocation124_spill] sm:$0xff]  ;;  %s18892_s17 = scalar_lea.hbm %s18944_s6, %s9622_s26 }
 0x403   : > { %10064 = vmatprep.subr.bf16.mxu0 %v21011_v28  ;;  %v7811_v57 = vmul.f32 %v21014_v12, %v16933_v63  ;;  %v10127_v28 = vpack.c.bf16 %v7571_v17, %v7451_v9  ;;  %v16995_v17 = vsel %vm1150_vm5, %v5723_v29, %v16925_v50  ;;  %v21022_v9 = vld [vmem:[#allocation98_spill] sm:$0xff]  ;;  %v21026_v10 = vrot.slane %v15193_v23, %v20481_v62 }
 0x404   : > { %v7691_v3 = vmul.f32 %v21018_v14, %v16952_v24  ;;  %10126 = vmatpush1.bf16.msra.mxu1 %v21021_v35  ;;  %10066 = vmatpush1.bf16.msra.mxu0 %v10065_v39  ;;  %v17000_v12 = vsel %vm686_vm3, %v21022_v9, %v5265_v20  ;;  %v10129_v39 = vpack.c.bf16 %v7570_v47, %v7450_v54  ;;  %v21058_v50 = vld [vmem:[#allocation158_spill] sm:$0xff] }
 0x405   : > { %10128 = vmatprep.subr.bf16.mxu1 %v10127_v28  ;;  %10068 = vmatprep.subr.bf16.mxu0 %v21025_v61  ;;  %v7810_v14 = vmul.f32 %v21026_v10, %v16971_v48  ;;  %v21027_v20 = vrot.slane %v15155_v25, %v20459_v43  ;;  %v17020_v61 = vsel %vm1150_vm5, %v21028_v40, %v5723_v29  ;;  %v5891_v47 = vpop.permute.xlu0 %5890  ;;  %v21031_v10 = vld [vmem:[#allocation144_spill] sm:$0xff] }
 0x406   : > { %v10131_v9 = vpack.c.bf16 %v7811_v57, %v7691_v3  ;;  %5280 = vrot.lane.b32.xlu0 %v16410_v58, %s10724_s27  ;;  %v17026_v54 = vpop.permute.xlu1 %6060  ;;  %v21030_v29 = vrot.slane %v15115_v42, %v20481_v62  ;;  %v21035_v58 = vld [vmem:[#allocation82_spill] sm:$0xff]  ;;  %6242 = vrot.lane.b32.xlu1 %v20899_v55, %s10729_s10  ;;  %v21055_v42 = vld [vmem:[#allocation100_spill] sm:$0xff]  ;;  %s9498_s27 = sshll.u32 %s18871_s14, 4  ;;  %s10731_s10 = smov [#allocation9]   ;;  %s18894_s27 = int_to_ptr.vmem [resolvable:$true] %s9498_s27 }
 0x407   : > { %v8051_v28 = vmul.f32 %v21027_v20, %v16995_v17  ;;  %21029 = vst [vmem:[#allocation123_spill] sm:$0xff] %v17026_v54  ;;  %v21032_v20 = vld [vmem:[#allocation102_spill] sm:$0xff]  ;;  %v21036_v57 = vpack.c.bf16 %v21034_v41, %v21035_v58  ;;  %s10645_s25 = scalar_lea.vmem %s18894_s27, 2048  ;;  %s10649_s13 = sshll.u32 %s10731_s10, 4  ;;  %s10650_s13 = int_to_ptr.vmem [resolvable:$false] %s10649_s13 }
 0x408   : > { %v7690_v3 = vmul.f32 %v21030_v29, %v17000_v12  ;;  %10130 = vmatpush1.bf16.msra.mxu1 %v10129_v39  ;;  %v21033_v40 = vpack.c.bf16 %v21031_v10, %v21032_v20  ;;  %v21042_v10 = vld [vmem:[#allocation107_spill] sm:$0xff]  ;;  %v21043_v58 = vld [vmem:[#allocation78_spill] sm:$0xff]  ;;  %p10646_p2 = scmp.ne.s32.totalorder %s18894_s27, %s10645_s25  ;;  %s10651_s7 = scalar_lea.vmem %s10650_s13, 4096 }
 0x409   : > { %10132 = vmatprep.subr.bf16.mxu1 %v10131_v9  ;;  %v21039_v9 = vld [vmem:[#allocation171_spill] sm:$0xff]  ;;  %v21044_v39 = vpack.c.bf16 %v21042_v10, %v21043_v58  ;;  %p10652_p8 = scmp.lt.s32.totalorder %s18894_s27, %s10650_s13  ;;  %p10653_p12 = scmp.lt.s32.totalorder %s10651_s7, %s10645_s25 }
 0x40a   : > { %10070 = vmatpush1.bf16.msra.mxu0 %v21033_v40  ;;  %v10133_v20 = vpack.c.bf16 %v7810_v14, %v7690_v3  ;;  %v21038_v40 = vrot.slane %v15155_v25, %v20481_v62  ;;  %v10135_v46 = vpack.c.bf16 %v8051_v28, %v21039_v9  ;;  %5738 = vrot.lane.b32.xlu0 %v20899_v55, %s10726_s16  ;;  %v17063_v41 = vpop.permute.xlu1 %6228  ;;  %v21047_v28 = vld [vmem:[#allocation97_spill] sm:$0xff]  ;;  %p10647_p1 = pnand %p10646_p2, %p10880_p4 }
 0x40b   : > { %10072 = vmatprep.subr.bf16.mxu0 %v21036_v57  ;;  %21040 = vst [vmem:[#allocation31_spill] sm:$0xff] %v17063_v41  ;;  %v6059_v57 = vpop.permute.xlu0 %6058  ;;  %v21095_v25 = vld [vmem:[#allocation49_spill] sm:$0xff]  ;;  %p10654_p3 = por %p10653_p12, %p10652_p8 }
 0x40c   : > { %v8050_v35 = vmul.f32 %v21038_v40, %v17020_v61  ;;  %v21041_v40 = vld [vmem:[#allocation62_spill] sm:$0xff]  ;;  %10134 = vmatpush1.bf16.msra.mxu1 %v10133_v20  ;;  %v17082_v14 = vsel %vm1492_vm7, %v6059_v57, %v17026_v54  ;;  %v17087_v3 = vsel %vm1492_vm7, %v21045_v52, %v6059_v57  ;;  %v21046_v20 = vld [vmem:[#allocation147_spill] sm:$0xff]  ;;  %v21050_v52 = vrot.slane %v20984_v45, %v20481_v62  ;;  %p10648_p6 = pneg %p10647_p1 }
 0x40d   : > { %v17074_v9 = vsel %vm1321_vm6, %v21041_v40, %v5891_v47  ;;  %v17092_v40 = vsel %vm1321_vm6, %v5891_v47, %v16977_v60  ;;  %10136 = vmatprep.subr.bf16.mxu1 %v10135_v46  ;;  %v21048_v10 = vpack.c.bf16 %v21046_v20, %v21047_v28  ;;  %v21051_v46 = vrot.slane %v20984_v45, %v20459_v43 }
 0x40e   : > { %10074 = vmatpush1.bf16.msra.mxu0 %v21044_v39  ;;  %v10137_v29 = vpack.c.bf16 %v8050_v35, %v21049_v19  ;;  %v8290_v57 = vmul.f32 %v21050_v52, %v17087_v3  ;;  %v21052_v20 = vrot.slane %v20968_v53, %v20481_v62  ;;  %6074 = vrot.lane.b32.xlu0 %v20899_v55, %s10728_s12  ;;  %v17118_v19 = vpop.permute.xlu1 %4934  ;;  %v21056_v55 = vld [vmem:[#allocation116_spill] sm:$0xff]  ;;  %s9484_s12 = scalar_lea.sflag [#allocation5], %s10929_s18  ;;  %p10655_p7 = pnand %p10654_p3, %p10648_p6 }
 0x40f   : > { %10076 = vmatprep.subr.bf16.mxu0 %v21048_v10  ;;  %v8291_v47 = vmul.f32 %v21051_v46, %v17082_v14  ;;  %v6227_v35 = vpop.permute.xlu0 %6226  ;;  %v21054_v39 = vrot.slane %v20968_v53, %v20459_v43  ;;  %v21057_v33 = vpack.c.bf16 %v21055_v42, %v21056_v55  ;;  %v8874_v46 = vld [vmem:[%s18942_s4] sm:$0xff]  ;;  %v21061_v54 = vrot.slane %v20811_v38, %v20459_v43  ;;  %v21064_v42 = vld [vmem:[#allocation118_spill] sm:$0xff] }
 0x410   : > { %v8170_v10 = vmul.f32 %v21052_v20, %v17074_v9  ;;  %10138 = vmatpush1.bf16.msra.mxu1 %v10137_v29  ;;  %v17136_v58 = vsel %vm1663_vm8, %v6227_v35, %v17063_v41  ;;  %v21062_v55 = vld [vmem:[#allocation115_spill] sm:$0xff] }
 0x411   : > { %v8171_v20 = vmul.f32 %v21054_v39, %v17092_v40  ;;  %v21059_v39 = vld [vmem:[#allocation152_spill] sm:$0xff]  ;;  %v8411_v28 = vmul.f32 %v21061_v54, %v17136_v58 }
 0x412   : > { %10078 = vmatpush1.bf16.msra.mxu0 %v21057_v33  ;;  %v10141_v52 = vpack.c.bf16 %v8290_v57, %v8170_v10  ;;  %v21060_v29 = vpack.c.bf16 %v21058_v50, %v21059_v39  ;;  %8877 = vperm.xlu0 %10533, %v8874_v46   ;;  %v17160_v10 = vpop.permute.xlu1 %5102  ;;  %v21063_v46 = vrot.slane %v21062_v55, %v20350_v31 }
 0x413   : > { %v10139_v41 = vpack.c.bf16 %v8291_v47, %v8171_v20  ;;  %v17162_v39 = vpop.permute.xlu0 %4932  ;;  %v17179_v33 = vsel %vm1663_vm8, %v16658_v11, %v6227_v35  ;;  %v21067_v20 = vrot.slane %v21062_v55, %v20718_v32  ;;  %v21071_v35 = vld [vmem:[#allocation101_spill] sm:$0xff]  ;;  %v21073_v55 = vrot.slane %v15175_v56, %v20350_v31  ;;  %v21080_v11 = vld [vmem:[#allocation42_spill] sm:$0xff] }
 0x414   : > { %10080 = vmatprep.subr.bf16.mxu0 %v21060_v29  ;;  %v5231_v57 = vmul.f32 %v21063_v46, %v16880_v7  ;;  %v21065_v29 = vld [vmem:[#allocation111_spill] sm:$0xff] }
 0x415   : > { %10140 = vmatprep.subr.bf16.mxu1 %v10139_v41  ;;  %v21066_v47 = vpack.c.bf16 %v21064_v42, %v21065_v29  ;;  %v5230_v50 = vmul.f32 %v21067_v20, %v16914_v5  ;;  %v21068_v46 = vld [vmem:[#allocation163_spill] sm:$0xff]  ;;  %v21072_v42 = vrot.slane %v21071_v35, %v20350_v31  ;;  %v21079_v41 = vld [vmem:[#allocation94_spill] sm:$0xff] }
 0x416   : > { %10142 = vmatpush1.bf16.msra.mxu1 %v10141_v52  ;;  %v21070_v21 = vpack.c.bf16 %v21068_v46, %v21069_v36  ;;  %v5567_v52 = vmul.f32 %v21073_v55, %v16933_v63  ;;  %v21075_v46 = vrot.slane %v20811_v38, %v20481_v62  ;;  %v17217_v54 = vpop.permute.xlu1 %5270  ;;  %v17219_v55 = vld [vmem:[#allocation6] sm:$0xff]  ;;  %v21083_v36 = vrot.slane %v20710_v22, %v11045_v13 }
 0x417   : > { %10082 = vmatpush1.bf16.msra.mxu0 %v21066_v47  ;;  %v5063_v29 = vmul.f32 %v21072_v42, %v16907_v27  ;;  %9006 = vmatprep.subr.mxu1 %v8411_v28  ;;  %v21074_v47 = vrot.slane %v21071_v35, %v20718_v32  ;;  %21076 = vst [vmem:[#allocation157_spill] sm:$0xff] %v17217_v54  ;;  %21077 = vst [vmem:[#allocation52_spill] sm:$0xff] %v17219_v55  ;;  %v17221_v28 = vpop.permute.xlu0 %5100 }
 0x418   : > { %10084 = vmatprep.subr.bf16.mxu0 %v21070_v21  ;;  %v8410_v42 = vmul.f32 %v21075_v46, %v17179_v33  ;;  %v21078_v35 = vrot.slane %v20688_v15, %v20350_v31  ;;  %v21081_v46 = vpack.c.bf16 %v21079_v41, %v21080_v11  ;;  %v21082_v21 = vld [vmem:[#allocation51_spill] sm:$0xff] }
 0x419   : > { %v5062_v20 = vmul.f32 %v21074_v47, %v16943_v1  ;;  %v10195_v26 = vpack.c.bf16 %v5231_v57, %v5063_v29  ;;  %v17242_v37 = vmul.f32 %v21083_v36, %v21082_v21  ;;  %v21086_v41 = vld [vmem:[#allocation43_spill] sm:$0xff] }
 0x41a   : > { %v5399_v47 = vmul.f32 %v21078_v35, %v16952_v24  ;;  %v21085_v35 = vrot.slane %v15175_v56, %v20718_v32  ;;  %9007 = vmatpush1.msra.mxu1 %v8410_v42  ;;  %v21087_v29 = vrot.slane %v21086_v41, %v20350_v31  ;;  %v21088_v56 = vrot.slane %v20688_v15, %v20718_v32  ;;  %v21089_v42 = vld [vmem:[#allocation168_spill] sm:$0xff]  ;;  %v17264_v23 = vpop.permute.xlu1 %5438  ;;  %v21096_v15 = vld [vmem:[#allocation13_spill] sm:$0xff] }
 0x41b   : > { %10086 = vmatpush1.bf16.msra.mxu0 %v21081_v46  ;;  %21084 = vst [vmem:[#allocation19_spill] sm:$0xff] %v17242_v37  ;;  %v10197_v6 = vpack.c.bf16 %v5230_v50, %v5062_v20  ;;  %9019 = vmatmul.mubr.f32.vlgmr.msra.gmra.mrb[8].mxu1 %v17219_v55  ;;  %21092 = vst [vmem:[#allocation45_spill] sm:$0xff] %v17264_v23  ;;  %v21102_v50 = vld [vmem:[#allocation37_spill] sm:$0xff] }
 0x41c   : > { %v5566_v11 = vmul.f32 %v21085_v35, %v16971_v48  ;;  %v5855_v46 = vmul.f32 %v21087_v29, %v16995_v17  ;;  %10196 = vmatprep.subr.bf16.mxu1 %v10195_v26  ;;  %v10199_v36 = vpack.c.bf16 %v5567_v52, %v5399_v47  ;;  %v5398_v20 = vmul.f32 %v21088_v56, %v17000_v12  ;;  %v21090_v35 = vld [vmem:[#allocation165_spill] sm:$0xff]  ;;  %v5269_v29 = vpop.permute.xlu0 %5268 }
 0x41d   : > { %v21091_v57 = vpack.c.bf16 %v21089_v42, %v21090_v35  ;;  %10198 = vmatpush1.bf16.msra.mxu1 %v10197_v6  ;;  %v21093_v26 = vrot.slane %v20811_v38, %v20483_v18  ;;  %v21097_v56 = vpack.c.bf16 %v21095_v25, %v21096_v15  ;;  %v21098_v35 = vld [vmem:[#allocation188_spill] sm:$0xff]  ;;  %v21101_v25 = vrot.slane %v21086_v41, %v20718_v32  ;;  %v21105_v42 = vld [vmem:[#allocation81_spill] sm:$0xff] }
 0x41e   : > { %10200 = vmatprep.subr.bf16.mxu1 %v10199_v36  ;;  %v10201_v36 = vpack.c.bf16 %v5566_v11, %v5398_v20  ;;  %v21107_v20 = vld [vmem:[#allocation172_spill] sm:$0xff]  ;;  %v21112_v37 = vld [vmem:[#allocation169_spill] sm:$0xff] }
 0x41f   : > { %10088 = vmatprep.subr.bf16.mxu0 %v21091_v57  ;;  %v8409_v52 = vmul.f32 %v21093_v26, %v16831_v49  ;;  %v21099_v26 = vrot.slane %v20872_v0, %v20350_v31  ;;  %v5854_v15 = vmul.f32 %v21101_v25, %v17020_v61  ;;  %v21103_v57 = vrot.slane %v21102_v50, %v11045_v13  ;;  %v21109_v41 = vld [vmem:[#allocation128_spill] sm:$0xff] }
 0x420   : > { %10090 = vmatpush1.bf16.msra.mxu0 %v21097_v56  ;;  %v10203_v47 = vpack.c.bf16 %v5855_v46, %v21107_v20  ;;  %v5437_v25 = vpop.permute.xlu0 %5436  ;;  %v21110_v56 = vrot.slane %v21109_v41, %v20350_v31  ;;  %v21119_v46 = vld [vmem:[#allocation83_spill] sm:$0xff] }
 0x421   : > { %v17285_v21 = vmul.f32 %v21099_v26, %v21098_v35  ;;  %8935 = vmatprep.subr.mxu0 %v8409_v52  ;;  %v17297_v6 = vmul.f32 %v21103_v57, %v21098_v35  ;;  %v21106_v26 = vrot.slane %v21105_v42, %v20350_v31  ;;  %v17306_v52 = vld [vmem:[#allocation6 + $0x8] sm:$0xff]  ;;  %v17314_v57 = vsel %vm345_vm2, %v17162_v39, %v17118_v19  ;;  %v17316_v35 = vpop.permute.xlu1 %5728 }
 0x422   : > { %21108 = vst [vmem:[#allocation139_spill] sm:$0xff] %v17306_v52  ;;  %9611 = vmatprep.mubr.msk.f32.mxu1 %vm4332_vm1, %v17306_v52  ;;  %10202 = vmatpush1.bf16.msra.mxu1 %v10201_v36  ;;  %v6023_v44 = vmul.f32 %v21110_v56, %v17092_v40  ;;  %v21114_v56 = vld [vmem:[#allocation55_spill] sm:$0xff]  ;;  %v17425_v59 = vsel %vm857_vm4, %v5437_v25, %v17264_v23  ;;  %v21152_v23 = vld [vmem:[#allocation76_spill] sm:$0xff] }
 0x423   : > { %21100 = vst [vmem:[#allocation164_spill] sm:$0xff] %v17285_v21  ;;  %21104 = vst [vmem:[#allocation162_spill] sm:$0xff] %v17297_v6  ;;  %v6191_v11 = vmul.f32 %v21106_v26, %v17082_v14  ;;  %10204 = vmatprep.subr.bf16.mxu1 %v10203_v47  ;;  %v21111_v6 = vld [vmem:[#allocation149_spill] sm:$0xff]  ;;  %v10205_v21 = vpack.c.bf16 %v5854_v15, %v21112_v37  ;;  %v21113_v26 = vrot.slane %v21105_v42, %v20718_v32  ;;  %v21116_v37 = vld [vmem:[#allocation20_spill] sm:$0xff] }
 0x424   : > { %8936 = vmatpush1.msra.mxu0 %v21111_v6  ;;  %v17347_v36 = vsel %vm345_vm2, %v21114_v56, %v17162_v39  ;;  %v21117_v15 = vrot.slane %v21116_v37, %v20350_v31  ;;  %v21121_v6 = vrot.slane %v21109_v41, %v20718_v32  ;;  %v17365_v39 = vsel %vm686_vm3, %v5269_v29, %v17217_v54  ;;  %v21123_v56 = vld [vmem:[#allocation89_spill] sm:$0xff] }
 0x425   : > { %v6190_v20 = vmul.f32 %v21113_v26, %v17087_v3  ;;  %8948 = vmatmul.mubr.f32.vlgmr.msra.gmra.mrb[8].mxu0 %v17219_v55  ;;  %21115 = vst [vmem:[#allocation58_spill] sm:$0xff] %v17347_v36  ;;  %v21118_v26 = vld [vmem:[#allocation134_spill] sm:$0xff]  ;;  %v10207_v2 = vpack.c.bf16 %v6191_v11, %v6023_v44  ;;  %21122 = vst [vmem:[#allocation125_spill] sm:$0xff] %v17365_v39  ;;  %v5727_v44 = vpop.permute.xlu0 %5726 }
 0x426   : > { %v6479_v42 = vmul.f32 %v21117_v15, %v17314_v57  ;;  %v21120_v22 = vpack.c.bf16 %v21118_v26, %v21119_v46  ;;  %9610 = vmatprep.mubr.msk.f32.mxu0 %vm4332_vm1, %v17306_v52  ;;  %v6022_v47 = vmul.f32 %v21121_v6, %v17074_v9  ;;  %v21124_v15 = vld [vmem:[#allocation79_spill] sm:$0xff]  ;;  %10206 = vmatpush1.bf16.msra.mxu1 %v10205_v21  ;;  %v21127_v46 = vld [vmem:[#allocation65_spill] sm:$0xff]  ;;  %v21129_v26 = vld [vmem:[#allocation156_spill] sm:$0xff] }
 0x427   : > { %v21125_v55 = vpack.c.bf16 %v21123_v56, %v21124_v15  ;;  %v21128_v41 = vrot.slane %v21127_v46, %v20350_v31  ;;  %v21130_v52 = vld [vmem:[#allocation95_spill] sm:$0xff]  ;;  %10208 = vmatprep.subr.bf16.mxu1 %v10207_v2  ;;  %v21132_v56 = vrot.slane %v21116_v37, %v11051_v16  ;;  %v21137_v21 = vld [vmem:[#allocation196_spill] sm:$0xff] }
 0x428   : > { %10144 = vmatprep.subr.bf16.mxu0 %v21120_v22  ;;  %v17370_v22 = vpop.permute.xlu1 %5896  ;;  %v21131_v38 = vpack.c.bf16 %v21129_v26, %v21130_v52  ;;  %v10209_v11 = vpack.c.bf16 %v6190_v20, %v6022_v47  ;;  %v21134_v2 = vld [vmem:[#allocation23_spill] sm:$0xff] }
 0x429   : > { %10146 = vmatpush1.bf16.msra.mxu0 %v21125_v55  ;;  %21126 = vst [vmem:[#allocation167_spill] sm:$0xff] %v17370_v22  ;;  %v6359_v6 = vmul.f32 %v21128_v41, %v17136_v58  ;;  %v17389_v15 = vmul.f32 %v21132_v56, %v16943_v1  ;;  %v21133_v41 = vrot.slane %v21116_v37, %v20718_v32  ;;  %v21135_v1 = vld [vmem:[#allocation32_spill] sm:$0xff]  ;;  %v5895_v50 = vpop.permute.xlu0 %5894 }
 0x42a   : > { %10148 = vmatprep.subr.bf16.mxu0 %v21131_v38  ;;  %v17399_v38 = vsel %vm515_vm0, %v17221_v28, %v17160_v10  ;;  %v17404_v26 = vsel %vm686_vm3, %v21134_v2, %v5269_v29  ;;  %v21136_v20 = vrot.slane %v21135_v1, %v20350_v31  ;;  %v21138_v55 = vrot.slane %v20879_v30, %v20350_v31 }
 0x42b   : > { %v6478_v52 = vmul.f32 %v21133_v41, %v17347_v36  ;;  %v10211_v56 = vpack.c.bf16 %v6479_v42, %v6359_v6  ;;  %v21140_v29 = vrot.slane %v21127_v46, %v20718_v32  ;;  %v21141_v42 = vld [vmem:[#allocation93_spill] sm:$0xff]  ;;  %v21142_v6 = vld [vmem:[#allocation132_spill] sm:$0xff]  ;;  %10210 = vmatpush1.bf16.msra.mxu1 %v10209_v11  ;;  %v21156_v54 = vrot.slane %v21135_v1, %v20718_v32 }
 0x42c   : > { %v6719_v47 = vmul.f32 %v21136_v20, %v17365_v39  ;;  %v17416_v0 = vmul.f32 %v21138_v55, %v21137_v21  ;;  %v21143_v20 = vpack.c.bf16 %v21141_v42, %v21142_v6  ;;  %v17430_v41 = vpop.permute.xlu1 %6064  ;;  %v21145_v55 = vrot.slane %v21116_v37, %v11045_v13  ;;  %v21147_v39 = vld [vmem:[#allocation24_spill] sm:$0xff]  ;;  %v21149_v11 = vld [vmem:[#allocation161_spill] sm:$0xff] }
 0x42d   : > { %v6358_v2 = vmul.f32 %v21140_v29, %v17179_v33  ;;  %21144 = vst [vmem:[#allocation88_spill] sm:$0xff] %v17430_v41  ;;  %v21146_v29 = vld [vmem:[#allocation211_spill] sm:$0xff]  ;;  %v21148_v42 = vrot.slane %v21147_v39, %v20350_v31  ;;  %10212 = vmatprep.subr.bf16.mxu1 %v10211_v56 }
 0x42e   : > { %21139 = vst [vmem:[#allocation15_spill] sm:$0xff] %v17416_v0  ;;  %10150 = vmatpush1.bf16.msra.mxu0 %v21143_v20  ;;  %v6477_v0 = vmul.f32 %v21145_v55, %v16907_v27  ;;  %v17440_v8 = vsel %vm515_vm0, %v21146_v29, %v17221_v28  ;;  %v21150_v20 = vld [vmem:[#allocation21_spill] sm:$0xff]  ;;  %v21153_v27 = vrot.slane %v21152_v23, %v11045_v13  ;;  %v21155_v55 = vld [vmem:[#allocation148_spill] sm:$0xff] }
 0x42f   : > { %v6599_v6 = vmul.f32 %v21148_v42, %v17399_v38  ;;  %v21151_v36 = vpack.c.bf16 %v21149_v11, %v21150_v20  ;;  %v10161_v28 = vpack.c.bf16 %v17389_v15, %v21155_v55  ;;  %v10213_v29 = vpack.c.bf16 %v6478_v52, %v6358_v2  ;;  %v21158_v11 = vld [vmem:[#allocation105_spill] sm:$0xff]  ;;  %v21165_v55 = vld [vmem:[#allocation127_spill] sm:$0xff] }
 0x430   : > { %v17453_v37 = vmul.f32 %v21153_v27, %v21137_v21  ;;  %v6718_v42 = vmul.f32 %v21156_v54, %v17404_v26  ;;  %v17468_v20 = vsel %vm857_vm4, %v21158_v11, %v5437_v25  ;;  %v21159_v21 = vld [vmem:[#allocation74_spill] sm:$0xff]  ;;  %v21161_v54 = vrot.slane %v21147_v39, %v20718_v32 }
 0x431   : > { %10152 = vmatprep.subr.bf16.mxu0 %v21151_v36  ;;  %v21157_v36 = vrot.slane %v21127_v46, %v11045_v13  ;;  %v21160_v15 = vrot.slane %v21159_v21, %v20350_v31  ;;  %v10215_v2 = vpack.c.bf16 %v6719_v47, %v6599_v6  ;;  %v17486_v25 = vsel %vm1321_vm6, %v16977_v60, %v5895_v50  ;;  %v21164_v46 = vld [vmem:[#allocation85_spill] sm:$0xff]  ;;  %v17491_v47 = vpop.permute.xlu1 %6232  ;;  %v6063_v6 = vpop.permute.xlu0 %6062  ;;  %v21172_v60 = vld [vmem:[#allocation123_spill] sm:$0xff] }
 0x432   : > { %21154 = vst [vmem:[#allocation70_spill] sm:$0xff] %v17453_v37  ;;  %v6598_v27 = vmul.f32 %v21161_v54, %v17440_v8  ;;  %21163 = vst [vmem:[#allocation110_spill] sm:$0xff] %v17486_v25  ;;  %10214 = vmatpush1.bf16.msra.mxu1 %v10213_v29  ;;  %v21168_v11 = vrot.slane %v21147_v39, %v11045_v13  ;;  %v21169_v54 = vld [vmem:[#allocation166_spill] sm:$0xff]  ;;  %v21170_v37 = vld [vmem:[#allocation103_spill] sm:$0xff]  ;;  %v21174_v29 = vrot.slane %v21135_v1, %v11045_v13 }
 0x433   : > { %v6357_v56 = vmul.f32 %v21157_v36, %v16831_v49  ;;  %v6839_v52 = vmul.f32 %v21160_v15, %v17425_v59  ;;  %v17481_v49 = vsel %vm1321_vm6, %v5895_v50, %v17370_v22  ;;  %v21166_v36 = vpack.c.bf16 %v21164_v46, %v21165_v55  ;;  %21167 = vst [vmem:[#allocation56_spill] sm:$0xff] %v17491_v47 }
 0x434   : > { %21162 = vst [vmem:[#allocation108_spill] sm:$0xff] %v17481_v49  ;;  %v6597_v15 = vmul.f32 %v21168_v11, %v16880_v7  ;;  %v21171_v22 = vpack.c.bf16 %v21169_v54, %v21170_v37  ;;  %10216 = vmatprep.subr.bf16.mxu1 %v10215_v2  ;;  %v17503_v50 = vsel %vm1492_vm7, %v21172_v60, %v6063_v6  ;;  %v21176_v37 = vld [vmem:[#allocation53_spill] sm:$0xff]  ;;  %v21182_v54 = vld [vmem:[#allocation96_spill] sm:$0xff] }
 0x435   : > { %10154 = vmatpush1.bf16.msra.mxu0 %v21166_v36  ;;  %21173 = vst [vmem:[#allocation59_spill] sm:$0xff] %v17503_v50  ;;  %v10159_v46 = vpack.c.bf16 %v6477_v0, %v6357_v56  ;;  %v6717_v55 = vmul.f32 %v21174_v29, %v16952_v24  ;;  %v10217_v36 = vpack.c.bf16 %v6718_v42, %v6598_v27 }
 0x436   : > { %10156 = vmatprep.subr.bf16.mxu0 %v21171_v22  ;;  %v21175_v7 = vrot.slane %v21159_v21, %v20718_v32  ;;  %v17516_v22 = vsel %vm1150_vm5, %v5727_v44, %v17316_v35  ;;  %v21177_v0 = vrot.slane %v21176_v37, %v20350_v31  ;;  %v21178_v24 = vrot.slane %v20968_v53, %v11051_v16  ;;  %v21185_v53 = vld [vmem:[#allocation34_spill] sm:$0xff] }
 0x437   : > { %v21180_v2 = vrot.slane %v20984_v45, %v11051_v16  ;;  %v10219_v60 = vpack.c.bf16 %v21182_v54, %v6839_v52  ;;  %v21183_v29 = vrot.slane %v21135_v1, %v11051_v16  ;;  %10218 = vmatpush1.bf16.msra.mxu1 %v10217_v36  ;;  %v17552_v52 = vpop.permute.xlu1 %4938  ;;  %v6231_v54 = vpop.permute.xlu0 %6230  ;;  %v21192_v36 = vrot.slane %v21176_v37, %v20718_v32 }
 0x438   : > { %v6838_v11 = vmul.f32 %v21175_v7, %v17468_v20  ;;  %v7095_v56 = vmul.f32 %v21177_v0, %v17481_v49  ;;  %v17526_v42 = vmul.f32 %v21178_v24, %v17486_v25  ;;  %v21184_v0 = vld [vmem:[#allocation133_spill] sm:$0xff]  ;;  %v17547_v24 = vsel %vm1492_vm7, %v6063_v6, %v17430_v41  ;;  %21188 = vst [vmem:[#allocation57_spill] sm:$0xff] %v17552_v52 }
 0x439   : > { %v17532_v27 = vmul.f32 %v21180_v2, %v17503_v50  ;;  %v6716_v7 = vmul.f32 %v21183_v29, %v17000_v12  ;;  %v17542_v49 = vsel %vm1150_vm5, %v21184_v0, %v5727_v44  ;;  %v21186_v2 = vld [vmem:[#allocation17_spill] sm:$0xff]  ;;  %v21189_v12 = vld [vmem:[#allocation30_spill] sm:$0xff]  ;;  %10220 = vmatprep.subr.bf16.mxu1 %v10219_v60  ;;  %v17563_v6 = vsel %vm1663_vm8, %v6231_v54, %v17491_v47 }
 0x43a   : > { %21179 = vst [vmem:[#allocation98_spill] sm:$0xff] %v17526_v42  ;;  %v21187_v45 = vpack.c.bf16 %v21185_v53, %v21186_v2  ;;  %v21190_v1 = vrot.slane %v21189_v12, %v20350_v31  ;;  %v21191_v53 = vld [vmem:[#allocation121_spill] sm:$0xff]  ;;  %v7094_v0 = vmul.f32 %v21192_v36, %v17486_v25  ;;  %v21193_v2 = vld [vmem:[#allocation68_spill] sm:$0xff]  ;;  %v10163_v44 = vpack.c.bf16 %v6717_v55, %v6597_v15  ;;  %v21196_v47 = vld [vmem:[#allocation130_spill] sm:$0xff] }
 0x43b   : > { %21181 = vst [vmem:[#allocation143_spill] sm:$0xff] %v17532_v27  ;;  %v21198_v42 = vld [vmem:[#allocation31_spill] sm:$0xff]  ;;  %v21199_v15 = vrot.slane %v21147_v39, %v11051_v16  ;;  %v21226_v39 = vrot.slane %v21193_v2, %v11051_v16 }
 0x43c   : > { %10158 = vmatpush1.bf16.msra.mxu0 %v21187_v45  ;;  %v6975_v29 = vmul.f32 %v21190_v1, %v17516_v22  ;;  %v10221_v45 = vpack.c.bf16 %v21191_v53, %v6838_v11  ;;  %v21194_v1 = vrot.slane %v21193_v2, %v20350_v31  ;;  %v21197_v11 = vrot.slane %v21196_v47, %v20350_v31  ;;  %v21202_v27 = vld [vmem:[#allocation195_spill] sm:$0xff] }
 0x43d   : > { %10160 = vmatprep.subr.bf16.mxu0 %v10159_v46  ;;  %v21195_v46 = vrot.slane %v21159_v21, %v11045_v13  ;;  %v17585_v36 = vsel %vm1663_vm8, %v21198_v42, %v6231_v54  ;;  %v6596_v55 = vmul.f32 %v21199_v15, %v16914_v5 }
 0x43e   : > { %v7335_v41 = vmul.f32 %v21194_v1, %v17563_v6  ;;  %v7215_v53 = vmul.f32 %v21197_v11, %v17547_v24  ;;  %v10223_v25 = vpack.c.bf16 %v7095_v56, %v6975_v29  ;;  %10222 = vmatpush1.bf16.msra.mxu1 %v10221_v45  ;;  %v4937_v11 = vpop.permute.xlu0 %4936  ;;  %v21203_v56 = vrot.slane %v21159_v21, %v11051_v16  ;;  %v21207_v21 = vld [vmem:[#allocation73_spill] sm:$0xff] }
 0x43f   : > { %v6837_v60 = vmul.f32 %v21195_v46, %v16933_v63  ;;  %v21200_v63 = vrot.slane %v21189_v12, %v20718_v32  ;;  %v17595_v46 = vpop.permute.xlu1 %5106  ;;  %v10165_v29 = vpack.c.bf16 %v6716_v7, %v6596_v55  ;;  %v21228_v7 = vld [vmem:[#allocation99_spill] sm:$0xff] }
 0x440   : > { %10162 = vmatpush1.bf16.msra.mxu0 %v10161_v28  ;;  %21201 = vst [vmem:[#allocation135_spill] sm:$0xff] %v17595_v46  ;;  %v6836_v54 = vmul.f32 %v21203_v56, %v16971_v48  ;;  %10224 = vmatprep.subr.bf16.mxu1 %v10223_v25  ;;  %v10227_v5 = vpack.c.bf16 %v7335_v41, %v7215_v53 }
 0x441   : > { %v6974_v1 = vmul.f32 %v21200_v63, %v17542_v49  ;;  %10164 = vmatprep.subr.bf16.mxu0 %v10163_v44  ;;  %v21204_v28 = vrot.slane %v21176_v37, %v11045_v13  ;;  %v21205_v63 = vrot.slane %v21193_v2, %v20718_v32  ;;  %v21206_v48 = vrot.slane %v21189_v12, %v11045_v13 }
 0x442   : > { %v10167_v25 = vpack.c.bf16 %v21207_v21, %v6837_v60  ;;  %v17629_v53 = vsel %vm345_vm2, %v4937_v11, %v17552_v52  ;;  %v5105_v55 = vpop.permute.xlu0 %5104  ;;  %v21260_v52 = vld [vmem:[#allocation125_spill] sm:$0xff] }
 0x443   : > { %v7093_v45 = vmul.f32 %v21204_v28, %v17092_v40  ;;  %v10225_v15 = vpack.c.bf16 %v7094_v0, %v6974_v1  ;;  %v7334_v42 = vmul.f32 %v21205_v63, %v17585_v36  ;;  %v6973_v41 = vmul.f32 %v21206_v48, %v16995_v17  ;;  %v17636_v60 = vpop.permute.xlu1 %5274  ;;  %v21210_v1 = vld [vmem:[#allocation40_spill] sm:$0xff]  ;;  %v21213_v48 = vld [vmem:[#allocation142_spill] sm:$0xff] }
 0x444   : > { %v21208_v40 = vrot.slane %v21196_v47, %v20718_v32  ;;  %v17634_v17 = vsel %vm345_vm2, %v17118_v19, %v4937_v11  ;;  %10166 = vmatpush1.bf16.msra.mxu0 %v10165_v29  ;;  %21209 = vst [vmem:[#allocation144_spill] sm:$0xff] %v17636_v60  ;;  %v10169_v56 = vpack.c.bf16 %v21210_v1, %v6836_v54 }
 0x445   : > { %10226 = vmatpush1.bf16.msra.mxu1 %v10225_v15  ;;  %10168 = vmatprep.subr.bf16.mxu0 %v10167_v25  ;;  %v17642_v28 = vsel %vm515_vm0, %v5105_v55, %v17595_v46  ;;  %v17647_v63 = vsel %vm515_vm0, %v17160_v10, %v5105_v55  ;;  %v21211_v19 = vrot.slane %v21176_v37, %v11051_v16  ;;  %v21216_v37 = vld [vmem:[#allocation22_spill] sm:$0xff] }
 0x446   : > { %v7214_v0 = vmul.f32 %v21208_v40, %v17503_v50  ;;  %10228 = vmatprep.subr.bf16.mxu1 %v10227_v5  ;;  %v21212_v54 = vrot.slane %v21193_v2, %v11045_v13  ;;  %v10171_v15 = vpack.c.bf16 %v7093_v45, %v6973_v41  ;;  %v21214_v21 = vrot.slane %v21213_v48, %v20718_v32  ;;  %v5273_v1 = vpop.permute.xlu0 %5272  ;;  %v21276_v50 = vld [vmem:[#allocation154_spill] sm:$0xff] }
 0x447   : > { %v7092_v11 = vmul.f32 %v21211_v19, %v17074_v9  ;;  %v21215_v10 = vrot.slane %v21213_v48, %v20350_v31  ;;  %v21217_v9 = vrot.slane %v21216_v37, %v20718_v32  ;;  %v21219_v45 = vrot.slane %v21189_v12, %v11051_v16 }
 0x448   : > { %v7333_v5 = vmul.f32 %v21212_v54, %v17136_v58  ;;  %v10229_v29 = vpack.c.bf16 %v7334_v42, %v7214_v0  ;;  %v7454_v25 = vmul.f32 %v21214_v21, %v17634_v17  ;;  %v21218_v58 = vrot.slane %v21216_v37, %v20350_v31  ;;  %10170 = vmatpush1.bf16.msra.mxu0 %v10169_v56  ;;  %v17677_v0 = vpop.permute.xlu1 %5442  ;;  %v21221_v21 = vld [vmem:[#allocation198_spill] sm:$0xff] }
 0x449   : > { %v7455_v40 = vmul.f32 %v21215_v10, %v17629_v53  ;;  %v7574_v55 = vmul.f32 %v21217_v9, %v17647_v63  ;;  %v6972_v41 = vmul.f32 %v21219_v45, %v17020_v61  ;;  %21220 = vst [vmem:[#allocation102_spill] sm:$0xff] %v17677_v0  ;;  %v21222_v10 = vld [vmem:[#allocation39_spill] sm:$0xff]  ;;  %v21225_v61 = vrot.slane %v21196_v47, %v11045_v13 }
 0x44a   : > { %v7575_v42 = vmul.f32 %v21218_v58, %v17642_v28  ;;  %10230 = vmatpush1.bf16.msra.mxu1 %v10229_v29  ;;  %v21223_v9 = vrot.slane %v21222_v10, %v11045_v13  ;;  %10172 = vmatprep.subr.bf16.mxu0 %v10171_v15  ;;  %v7332_v19 = vmul.f32 %v21226_v39, %v17179_v33  ;;  %v21247_v39 = vld [vmem:[#allocation69_spill] sm:$0xff] }
 0x44b   : > { %v7213_v12 = vmul.f32 %v21225_v61, %v17082_v14  ;;  %v10233_v56 = vpack.c.bf16 %v7574_v55, %v7454_v25  ;;  %v10173_v45 = vpack.c.bf16 %v7092_v11, %v6972_v41  ;;  %v21227_v54 = vrot.slane %v21216_v37, %v11045_v13  ;;  %v21236_v41 = vld [vmem:[#allocation175_spill] sm:$0xff] }
 0x44c   : > { %v17687_v58 = vmul.f32 %v21223_v9, %v21221_v21  ;;  %v10231_v29 = vpack.c.bf16 %v7575_v42, %v7455_v40  ;;  %v21229_v21 = vld [vmem:[#allocation129_spill] sm:$0xff]  ;;  %v21230_v14 = vrot.slane %v20911_v4, %v20350_v31  ;;  %v21232_v11 = vrot.slane %v21196_v47, %v11051_v16 }
 0x44d   : > { %v7573_v9 = vmul.f32 %v21227_v54, %v17399_v38  ;;  %v10175_v33 = vpack.c.bf16 %v7333_v5, %v7213_v12  ;;  %v21233_v25 = vrot.slane %v21213_v48, %v11045_v13  ;;  %v17722_v55 = vsel %vm686_vm3, %v5273_v1, %v17636_v60  ;;  %v21234_v42 = vld [vmem:[#allocation157_spill] sm:$0xff]  ;;  %10174 = vmatpush1.bf16.msra.mxu0 %v10173_v45  ;;  %v5441_v5 = vpop.permute.xlu0 %5440  ;;  %v21237_v54 = vld [vmem:[#allocation176_spill] sm:$0xff] }
 0x44e   : > { %21224 = vst [vmem:[#allocation124_spill] sm:$0xff] %v17687_v58  ;;  %v17707_v15 = vmul.f32 %v21230_v14, %v21229_v21  ;;  %v7212_v2 = vmul.f32 %v21232_v11, %v17087_v3  ;;  %10232 = vmatprep.subr.bf16.mxu1 %v10231_v29  ;;  %v17727_v47 = vsel %vm686_vm3, %v21234_v42, %v5273_v1  ;;  %v17729_v3 = vpop.permute.xlu1 %5732  ;;  %v21240_v29 = vld [vmem:[#allocation84_spill] sm:$0xff] }
 0x44f   : > { %v7453_v40 = vmul.f32 %v21233_v25, %v17314_v57  ;;  %10234 = vmatpush1.bf16.msra.mxu1 %v10233_v56  ;;  %21235 = vst [vmem:[#allocation171_spill] sm:$0xff] %v17729_v3  ;;  %v21238_v61 = vrot.slane %v21237_v54, %v20350_v31  ;;  %v21241_v14 = vrot.slane %v21240_v29, %v11045_v13  ;;  %v21243_v56 = vld [vmem:[#allocation45_spill] sm:$0xff] }
 0x450   : > { %21231 = vst [vmem:[#allocation82_spill] sm:$0xff] %v17707_v15  ;;  %10176 = vmatprep.subr.bf16.mxu0 %v10175_v33  ;;  %v17746_v1 = vsel %vm857_vm4, %v5441_v5, %v17677_v0  ;;  %v17751_v45 = vsel %vm857_vm4, %v21243_v56, %v5441_v5  ;;  %v10177_v25 = vpack.c.bf16 %v7332_v19, %v7212_v2  ;;  %v21256_v0 = vld [vmem:[#allocation58_spill] sm:$0xff] }
 0x451   : > { %v17735_v12 = vmul.f32 %v21238_v61, %v21236_v41  ;;  %v17741_v11 = vmul.f32 %v21241_v14, %v21236_v41  ;;  %v21244_v42 = vrot.slane %v21216_v37, %v11051_v16  ;;  %v21245_v41 = vld [vmem:[#allocation27_spill] sm:$0xff]  ;;  %v10179_v44 = vpack.c.bf16 %v7573_v9, %v7453_v40  ;;  %v21252_v40 = vld [vmem:[#allocation114_spill] sm:$0xff] }
 0x452   : > { %v21246_v33 = vrot.slane %v21245_v41, %v11045_v13  ;;  %v21248_v21 = vrot.slane %v21247_v39, %v20718_v32  ;;  %v21249_v19 = vrot.slane %v21247_v39, %v20350_v31  ;;  %v21250_v37 = vrot.slane %v21245_v41, %v20718_v32  ;;  %10178 = vmatpush1.bf16.msra.mxu0 %v10177_v25  ;;  %v17787_v60 = vpop.permute.xlu1 %5900  ;;  %v21345_v15 = vld [vmem:[#allocation110_spill] sm:$0xff] }
 0x453   : > { %21239 = vst [vmem:[#allocation62_spill] sm:$0xff] %v17735_v12  ;;  %21242 = vst [vmem:[#allocation107_spill] sm:$0xff] %v17741_v11  ;;  %v7572_v61 = vmul.f32 %v21244_v42, %v17440_v8  ;;  %v21251_v56 = vrot.slane %v21245_v41, %v20350_v31  ;;  %v21253_v42 = vld [vmem:[#allocation91_spill] sm:$0xff]  ;;  %v21261_v11 = vrot.slane %v21247_v39, %v11045_v13  ;;  %10180 = vmatprep.subr.bf16.mxu0 %v10179_v44  ;;  %v21347_v12 = vld [vmem:[#allocation177_spill] sm:$0xff] }
 0x454   : > { %v7813_v14 = vmul.f32 %v21246_v33, %v17425_v59  ;;  %v7694_v23 = vmul.f32 %v21248_v21, %v17727_v47  ;;  %v7695_v2 = vmul.f32 %v21249_v19, %v17722_v55  ;;  %v7814_v5 = vmul.f32 %v21250_v37, %v17751_v45  ;;  %21258 = vst [vmem:[#allocation159_spill] sm:$0xff] %v17787_v60  ;;  %v21263_v44 = vld [vmem:[#allocation119_spill] sm:$0xff] }
 0x455   : > { %v7815_v9 = vmul.f32 %v21251_v56, %v17746_v1  ;;  %v21254_v33 = vrot.slane %v21253_v42, %v11045_v13  ;;  %v21257_v19 = vrot.slane %v21213_v48, %v11051_v16 }
 0x457   : > { %v17781_v21 = vmul.f32 %v21254_v33, %v21252_v40  ;;  %v7452_v46 = vmul.f32 %v21257_v19, %v21256_v0  ;;  %v7693_v33 = vmul.f32 %v21261_v11, %v21260_v52  ;;  %v10237_v40 = vpack.c.bf16 %v7814_v5, %v7694_v23 }
 0x458   : > { %v10235_v58 = vpack.c.bf16 %v7815_v9, %v7695_v2  ;;  %v21262_v19 = vrot.slane %v21245_v41, %v11051_v16  ;;  %v21264_v11 = vrot.slane %v21263_v44, %v11045_v13  ;;  %v21265_v2 = vld [vmem:[#allocation137_spill] sm:$0xff]  ;;  %v21266_v9 = vrot.slane %v21247_v39, %v11051_v16  ;;  %v21274_v39 = vld [vmem:[#allocation72_spill] sm:$0xff] }
 0x459   : > { %21255 = vst [vmem:[#allocation78_spill] sm:$0xff] %v17781_v21  ;;  %v5731_v21 = vpop.permute.xlu0 %5730  ;;  %v10181_v25 = vpack.c.bf16 %v7572_v61, %v7452_v46  ;;  %v10183_v61 = vpack.c.bf16 %v7813_v14, %v7693_v33  ;;  %v17833_v33 = vpop.permute.xlu1 %6068 }
 0x45a   : > { %v7812_v30 = vmul.f32 %v21262_v19, %v17468_v20  ;;  %v17806_v56 = vsel %vm1150_vm5, %v5731_v21, %v17729_v3  ;;  %v17811_v23 = vsel %vm1150_vm5, %v17316_v35, %v5731_v21  ;;  %v8053_v46 = vmul.f32 %v21264_v11, %v17516_v22  ;;  %10236 = vmatprep.subr.bf16.mxu1 %v10235_v58  ;;  %v21273_v3 = vld [vmem:[#allocation179_spill] sm:$0xff] }
 0x45b   : > { %v7692_v19 = vmul.f32 %v21266_v9, %v17404_v26  ;;  %v21267_v35 = vrot.slane %v21263_v44, %v20718_v32  ;;  %v21268_v58 = vrot.slane %v21263_v44, %v20350_v31  ;;  %10182 = vmatpush1.bf16.msra.mxu0 %v10181_v25  ;;  %10238 = vmatpush1.bf16.msra.mxu1 %v10237_v40 }
 0x45c   : > { %21269 = vst [vmem:[#allocation147_spill] sm:$0xff] %v17833_v33  ;;  %10184 = vmatprep.subr.bf16.mxu0 %v10183_v61  ;;  %v21271_v40 = vrot.slane %v21263_v44, %v11051_v16  ;;  %v21272_v61 = vld [vmem:[#allocation178_spill] sm:$0xff]  ;;  %v21275_v9 = vrot.slane %v21274_v39, %v11045_v13 }
 0x45d   : > { %v8054_v21 = vmul.f32 %v21267_v35, %v17811_v23  ;;  %v8055_v14 = vmul.f32 %v21268_v58, %v17806_v56  ;;  %v5899_v11 = vpop.permute.xlu0 %5898  ;;  %v10185_v41 = vpack.c.bf16 %v7812_v30, %v7692_v19  ;;  %v10187_v35 = vpack.c.bf16 %v8053_v46, %v21276_v50  ;;  %v21277_v30 = vld [vmem:[#allocation212_spill] sm:$0xff]  ;;  %v17858_v44 = vpop.permute.xlu1 %6236  ;;  %v21280_v46 = vld [vmem:[#allocation71_spill] sm:$0xff] }
 0x45e   : > { %v8052_v25 = vmul.f32 %v21271_v40, %v17542_v49  ;;  %v8293_v37 = vmul.f32 %v21275_v9, %v17547_v24  ;;  %21278 = vst [vmem:[#allocation97_spill] sm:$0xff] %v17858_v44  ;;  %v21279_v50 = vld [vmem:[#allocation108_spill] sm:$0xff]  ;;  %v21281_v9 = vrot.slane %v21280_v46, %v11045_v13  ;;  %v21290_v5 = vrot.slane %v21280_v46, %v20350_v31 }
 0x45f   : > { %v10241_v58 = vpack.c.bf16 %v8054_v21, %v21272_v61  ;;  %v10239_v10 = vpack.c.bf16 %v8055_v14, %v21273_v3  ;;  %10186 = vmatpush1.bf16.msra.mxu0 %v10185_v41  ;;  %v21282_v41 = vld [vmem:[#allocation167_spill] sm:$0xff]  ;;  %v21284_v3 = vld [vmem:[#allocation153_spill] sm:$0xff] }
 0x460   : > { %v8173_v40 = vmul.f32 %v21281_v9, %v21279_v50  ;;  %v17878_v61 = vsel %vm1321_vm6, %v21282_v41, %v5899_v11  ;;  %10188 = vmatprep.subr.bf16.mxu0 %v10187_v35  ;;  %v10189_v48 = vpack.c.bf16 %v8052_v25, %v21284_v3  ;;  %v21285_v9 = vld [vmem:[#allocation88_spill] sm:$0xff]  ;;  %v21288_v3 = vld [vmem:[#allocation35_spill] sm:$0xff] }
 0x461   : > { %10240 = vmatprep.subr.bf16.mxu1 %v10239_v10  ;;  %v17873_v10 = vsel %vm1321_vm6, %v5899_v11, %v17787_v60  ;;  %21283 = vst [vmem:[#allocation170_spill] sm:$0xff] %v17878_v61  ;;  %v6067_v19 = vpop.permute.xlu0 %6066  ;;  %v21286_v11 = vld [vmem:[#allocation194_spill] sm:$0xff] }
 0x462   : > { %10242 = vmatpush1.bf16.msra.mxu1 %v10241_v58  ;;  %v17884_v21 = vsel %vm1492_vm7, %v6067_v19, %v17833_v33  ;;  %v17889_v14 = vsel %vm1492_vm7, %v21285_v9, %v6067_v19  ;;  %v21287_v35 = vrot.slane %v21286_v11, %v20482_v51  ;;  %v10191_v41 = vpack.c.bf16 %v8293_v37, %v8173_v40  ;;  %v17917_v33 = vpop.permute.xlu1 %4942 }
 0x463   : > { %v21289_v19 = vrot.slane %v21280_v46, %v20718_v32  ;;  %v8175_v60 = vmul.f32 %v21290_v5, %v17873_v10  ;;  %v21292_v40 = vrot.slane %v21274_v39, %v20350_v31  ;;  %10190 = vmatpush1.bf16.msra.mxu0 %v10189_v48  ;;  %v21300_v48 = vld [vmem:[#allocation143_spill] sm:$0xff] }
 0x464   : > { %v5232_v58 = vmul.f32 %v21287_v35, %v17440_v8  ;;  %v21291_v8 = vrot.slane %v21274_v39, %v20718_v32  ;;  %10192 = vmatprep.subr.bf16.mxu0 %v10191_v41 }
 0x465   : > { %v8174_v9 = vmul.f32 %v21289_v19, %v17878_v61  ;;  %v8295_v35 = vmul.f32 %v21292_v40, %v17884_v21  ;;  %v21293_v19 = vld [vmem:[#allocation189_spill] sm:$0xff]  ;;  %v6235_v39 = vpop.permute.xlu0 %6234 }
 0x466   : > { %v8294_v37 = vmul.f32 %v21291_v8, %v17889_v14  ;;  %v21294_v25 = vrot.slane %v21293_v19, %v20482_v51  ;;  %v21295_v5 = vrot.slane %v21293_v19, %v20483_v18  ;;  %v21296_v8 = vrot.slane %v21286_v11, %v20483_v18 }
 0x468   : > { %v5064_v29 = vmul.f32 %v21294_v25, %v21256_v0  ;;  %v5065_v46 = vmul.f32 %v21295_v5, %v17314_v57  ;;  %v5233_v4 = vmul.f32 %v21296_v8, %v17399_v38  ;;  %v10245_v40 = vpack.c.bf16 %v8294_v37, %v8174_v9  ;;  %v21298_v5 = vld [vmem:[#allocation141_spill] sm:$0xff]  ;;  %v17953_v57 = vpop.permute.xlu1 %5110 }
 0x469   : > { %v17936_v0 = vsel %vm1663_vm8, %v6235_v39, %v17858_v44  ;;  %v10243_v25 = vpack.c.bf16 %v8295_v35, %v8175_v60  ;;  %v21299_v61 = vrot.slane %v21298_v5, %v11045_v13  ;;  %v21301_v60 = vld [vmem:[#allocation98_spill] sm:$0xff]  ;;  %v21304_v9 = vrot.slane %v21286_v11, %v20459_v43 }
 0x46a   : > { %v10249_v8 = vpack.c.bf16 %v5232_v58, %v5064_v29  ;;  %v21302_v35 = vpack.c.bf16 %v21300_v48, %v21301_v60  ;;  %v21305_v58 = vld [vmem:[#allocation56_spill] sm:$0xff]  ;;  %v10247_v60 = vpack.c.bf16 %v5233_v4, %v5065_v46  ;;  %v21307_v41 = vrot.slane %v21298_v5, %v11051_v16 }
 0x46b   : > { %v8413_v38 = vmul.f32 %v21299_v61, %v17563_v6  ;;  %10244 = vmatprep.subr.bf16.mxu1 %v10243_v25  ;;  %v21303_v61 = vrot.slane %v21298_v5, %v20350_v31  ;;  %v5235_v29 = vmul.f32 %v21304_v9, %v17642_v28  ;;  %v17968_v48 = vsel %vm1663_vm8, %v21305_v58, %v6235_v39  ;;  %v17970_v25 = vpop.permute.xlu0 %4940 }
 0x46c   : > { %10194 = vmatpush1.bf16.msra.mxu0 %v21302_v35  ;;  %10246 = vmatpush1.bf16.msra.mxu1 %v10245_v40  ;;  %v21306_v35 = vrot.slane %v21228_v7, %v20483_v18  ;;  %v8412_v9 = vmul.f32 %v21307_v41, %v17585_v36  ;;  %v21308_v39 = vrot.slane %v21286_v11, %v20481_v62  ;;  %v18014_v37 = vpop.permute.xlu1 %5278 }
 0x46d   : > { %v8415_v44 = vmul.f32 %v21303_v61, %v17936_v0  ;;  %9077 = vmatprep.subr.mxu0 %v8413_v38  ;;  %v21309_v4 = vrot.slane %v21202_v27, %v20482_v51  ;;  %v21311_v41 = vrot.slane %v21293_v19, %v20459_v43  ;;  %v21313_v40 = vrot.slane %v21202_v27, %v20483_v18 }
 0x46e   : > { %v5569_v61 = vmul.f32 %v21306_v35, %v17425_v59  ;;  %v5234_v58 = vmul.f32 %v21308_v39, %v17647_v63  ;;  %v21310_v59 = vrot.slane %v21228_v7, %v20482_v51  ;;  %v21320_v11 = vrot.slane %v21228_v7, %v20481_v62 }
 0x46f   : > { %9148 = vmatprep.subr.mxu1 %v8415_v44  ;;  %v5400_v46 = vmul.f32 %v21309_v4, %v17404_v26  ;;  %v5067_v35 = vmul.f32 %v21311_v41, %v17629_v53  ;;  %v21312_v44 = vrot.slane %v21228_v7, %v20459_v43  ;;  %v5401_v26 = vmul.f32 %v21313_v40, %v21260_v52 }
 0x470   : > { %v5568_v38 = vmul.f32 %v21310_v59, %v17468_v20  ;;  %v21314_v4 = vrot.slane %v21293_v19, %v20481_v62  ;;  %v21315_v59 = vrot.slane %v21298_v5, %v20718_v32  ;;  %9078 = vmatpush1.msra.mxu0 %v8412_v9  ;;  %v21317_v52 = vrot.slane %v21265_v2, %v20483_v18  ;;  %v21319_v19 = vld [vmem:[#allocation52_spill] sm:$0xff]  ;;  %v18027_v9 = vpop.permute.xlu0 %5108 }
 0x471   : > { %v5571_v39 = vmul.f32 %v21312_v44, %v17746_v1  ;;  %v21316_v44 = vld [vmem:[#allocation160_spill] sm:$0xff]  ;;  %9090 = vmatmul.mubr.f32.vlgmr.msra.gmra.mrb[10].mxu0 %v21319_v19  ;;  %10248 = vmatprep.subr.bf16.mxu0 %v10247_v60  ;;  %v10299_v5 = vpack.c.bf16 %v5235_v29, %v5067_v35  ;;  %v5570_v54 = vmul.f32 %v21320_v11, %v17751_v45  ;;  %v21326_v35 = vld [vmem:[#allocation37_spill] sm:$0xff] }
 0x472   : > { %v5066_v20 = vmul.f32 %v21314_v4, %v17634_v17  ;;  %v8414_v41 = vmul.f32 %v21315_v59, %v17968_v48  ;;  %v5857_v40 = vmul.f32 %v21317_v52, %v17516_v22  ;;  %v21318_v4 = vrot.slane %v21202_v27, %v20459_v43  ;;  %10250 = vmatpush1.bf16.msra.mxu0 %v10249_v8 }
 0x473   : > { %v10251_v22 = vpack.c.bf16 %v5569_v61, %v5401_v26  ;;  %v10253_v52 = vpack.c.bf16 %v5568_v38, %v5400_v46  ;;  %v21322_v60 = vrot.slane %v21265_v2, %v20482_v51  ;;  %v21323_v11 = vrot.slane %v21288_v3, %v20483_v18 }
 0x474   : > { %v5403_v42 = vmul.f32 %v21318_v4, %v17722_v55  ;;  %v10301_v59 = vpack.c.bf16 %v5234_v58, %v5066_v20  ;;  %9149 = vmatpush1.msra.mxu1 %v8414_v41  ;;  %v21321_v4 = vrot.slane %v21265_v2, %v20459_v43  ;;  %v21324_v61 = vrot.slane %v21202_v27, %v20481_v62 }
 0x475   : > { %9161 = vmatmul.mubr.f32.vlgmr.msra.gmra.mrb[10].mxu1 %v21319_v19  ;;  %10300 = vmatprep.subr.bf16.mxu1 %v10299_v5  ;;  %v5856_v58 = vmul.f32 %v21322_v60, %v17542_v49  ;;  %v6193_v8 = vmul.f32 %v21323_v11, %v17547_v24  ;;  %v18050_v19 = vpop.permute.xlu1 %5446  ;;  %v21330_v41 = vrot.slane %v21277_v30, %v20483_v18  ;;  %v21333_v11 = vld [vmem:[#allocation180_spill] sm:$0xff] }
 0x476   : > { %v5859_v31 = vmul.f32 %v21321_v4, %v17806_v56  ;;  %v10303_v29 = vpack.c.bf16 %v5571_v39, %v5403_v42  ;;  %v5402_v46 = vmul.f32 %v21324_v61, %v17727_v47  ;;  %10252 = vmatprep.subr.bf16.mxu0 %v10251_v22  ;;  %10302 = vmatpush1.bf16.msra.mxu1 %v10301_v59  ;;  %v21325_v42 = vld [vmem:[#allocation155_spill] sm:$0xff]  ;;  %v5277_v4 = vpop.permute.xlu0 %5276 }
 0x477   : > { %v10255_v38 = vpack.c.bf16 %v5857_v40, %v21325_v42  ;;  %v21327_v39 = vld [vmem:[#allocation139_spill] sm:$0xff]  ;;  %v6025_v5 = vmul.f32 %v21330_v41, %v21279_v50  ;;  %v21331_v22 = vrot.slane %v21265_v2, %v20481_v62  ;;  %10254 = vmatpush1.bf16.msra.mxu0 %v10253_v52 }
 0x478   : > { %10304 = vmatprep.subr.bf16.mxu1 %v10303_v29  ;;  %9612 = vmatprep.mubr.msk.f32.mxu0 %vm4332_vm1, %v21327_v39  ;;  %v10305_v59 = vpack.c.bf16 %v5570_v54, %v5402_v46  ;;  %v21332_v29 = vrot.slane %v21288_v3, %v20459_v43  ;;  %v10307_v61 = vpack.c.bf16 %v5859_v31, %v21333_v11  ;;  %v21334_v46 = vld [vmem:[#allocation151_spill] sm:$0xff]  ;;  %v21353_v54 = vld [vmem:[#allocation57_spill] sm:$0xff] }
 0x479   : > { %v5858_v40 = vmul.f32 %v21331_v22, %v17811_v23  ;;  %9613 = vmatprep.mubr.msk.f32.mxu1 %vm4332_vm1, %v21327_v39  ;;  %10256 = vmatprep.subr.bf16.mxu0 %v10255_v38  ;;  %v10257_v52 = vpack.c.bf16 %v5856_v58, %v21334_v46  ;;  %v21335_v42 = vld [vmem:[#allocation59_spill] sm:$0xff]  ;;  %v21336_v39 = vrot.slane %v21288_v3, %v20482_v51  ;;  %v18089_v31 = vpop.permute.xlu1 %5736 }
 0x47a   : > { %v6195_v60 = vmul.f32 %v21332_v29, %v17884_v21  ;;  %v18087_v38 = vsel %vm345_vm2, %v17970_v25, %v17917_v33  ;;  %10306 = vmatpush1.bf16.msra.mxu1 %v10305_v59  ;;  %v10259_v22 = vpack.c.bf16 %v6193_v8, %v6025_v5  ;;  %v21338_v29 = vld [vmem:[#allocation92_spill] sm:$0xff]  ;;  %v21340_v46 = vrot.slane %v21277_v30, %v20459_v43 }
 0x47b   : > { %v6192_v41 = vmul.f32 %v21336_v39, %v21335_v42  ;;  %21337 = vst [vmem:[#allocation100_spill] sm:$0xff] %v18087_v38  ;;  %v21339_v11 = vrot.slane %v21338_v29, %v20483_v18  ;;  %10308 = vmatprep.subr.bf16.mxu1 %v10307_v61  ;;  %v21346_v8 = vrot.slane %v21277_v30, %v20482_v51  ;;  %v5445_v61 = vpop.permute.xlu0 %5444  ;;  %v21351_v39 = vld [vmem:[#allocation80_spill] sm:$0xff] }
 0x47c   : > { %v6027_v42 = vmul.f32 %v21340_v46, %v17873_v10  ;;  %v10309_v26 = vpack.c.bf16 %v5858_v40, %v21347_v12  ;;  %10258 = vmatpush1.bf16.msra.mxu0 %v10257_v52  ;;  %v21352_v59 = vrot.slane %v21351_v39, %v20483_v18  ;;  %v21354_v12 = vrot.slane %v21338_v29, %v20459_v43 }
 0x47d   : > { %v6481_v58 = vmul.f32 %v21339_v11, %v17629_v53  ;;  %v6024_v5 = vmul.f32 %v21346_v8, %v21345_v15  ;;  %v21348_v53 = vrot.slane %v21288_v3, %v20481_v62  ;;  %v18122_v15 = vsel %vm345_vm2, %v21353_v54, %v17970_v25  ;;  %10260 = vmatprep.subr.bf16.mxu0 %v10259_v22  ;;  %v21358_v54 = vld [vmem:[#allocation86_spill] sm:$0xff] }
 0x47e   : > { %v6361_v49 = vmul.f32 %v21352_v59, %v17563_v6  ;;  %v6483_v40 = vmul.f32 %v21354_v12, %v18087_v38  ;;  %v10311_v52 = vpack.c.bf16 %v6195_v60, %v6027_v42  ;;  %v21356_v6 = vld [vmem:[#allocation170_spill] sm:$0xff]  ;;  %v21357_v59 = vrot.slane %v21277_v30, %v20481_v62  ;;  %10310 = vmatpush1.bf16.msra.mxu1 %v10309_v26  ;;  %v21394_v30 = vld [vmem:[#allocation39_spill] sm:$0xff] }
 0x47f   : > { %v6194_v11 = vmul.f32 %v21348_v53, %v17889_v14  ;;  %v10261_v8 = vpack.c.bf16 %v6192_v41, %v6024_v5  ;;  %v21355_v53 = vrot.slane %v21338_v29, %v20482_v51  ;;  %v18139_v25 = vsel %vm686_vm3, %v5277_v4, %v18014_v37 }
 0x480   : > { %v6026_v46 = vmul.f32 %v21357_v59, %v21356_v6  ;;  %v21359_v60 = vrot.slane %v21358_v54, %v20483_v18  ;;  %10312 = vmatprep.subr.bf16.mxu1 %v10311_v52  ;;  %v10263_v42 = vpack.c.bf16 %v6481_v58, %v6361_v49  ;;  %v21361_v12 = vrot.slane %v21351_v39, %v20482_v51  ;;  %v18165_v49 = vpop.permute.xlu1 %5904  ;;  %v5735_v58 = vpop.permute.xlu0 %5734 }
 0x481   : > { %v6480_v20 = vmul.f32 %v21355_v53, %v17634_v17  ;;  %v21360_v17 = vrot.slane %v21351_v39, %v20459_v43  ;;  %v18163_v52 = vsel %vm515_vm0, %v18027_v9, %v17953_v57  ;;  %10262 = vmatpush1.bf16.msra.mxu0 %v10261_v8  ;;  %v21366_v5 = vrot.slane %v21358_v54, %v20482_v51 }
 0x482   : > { %v6721_v41 = vmul.f32 %v21359_v60, %v17722_v55  ;;  %v6360_v26 = vmul.f32 %v21361_v12, %v17585_v36  ;;  %v10313_v53 = vpack.c.bf16 %v6194_v11, %v6026_v46  ;;  %v21362_v55 = vrot.slane %v21338_v29, %v20481_v62  ;;  %v21364_v46 = vld [vmem:[#allocation144_spill] sm:$0xff]  ;;  %10264 = vmatprep.subr.bf16.mxu0 %v10263_v42  ;;  %v21368_v42 = vld [vmem:[#allocation173_spill] sm:$0xff] }
 0x483   : > { %v6363_v22 = vmul.f32 %v21360_v17, %v17936_v0  ;;  %v21363_v36 = vrot.slane %v21316_v44, %v20483_v18  ;;  %v18174_v60 = vsel %vm686_vm3, %v21364_v46, %v5277_v4  ;;  %v21365_v17 = vrot.slane %v21358_v54, %v20459_v43  ;;  %v21422_v29 = vld [vmem:[#allocation192_spill] sm:$0xff] }
 0x484   : > { %v6482_v59 = vmul.f32 %v21362_v55, %v18122_v15  ;;  %v10265_v55 = vpack.c.bf16 %v6480_v20, %v6360_v26  ;;  %v6720_v24 = vmul.f32 %v21366_v5, %v17727_v47  ;;  %v18191_v4 = vsel %vm857_vm4, %v5445_v61, %v18050_v19  ;;  %10314 = vmatpush1.bf16.msra.mxu1 %v10313_v53 }
 0x485   : > { %v6601_v11 = vmul.f32 %v21363_v36, %v17642_v28  ;;  %v6723_v12 = vmul.f32 %v21365_v17, %v18139_v25  ;;  %v10315_v8 = vpack.c.bf16 %v6483_v40, %v6363_v22  ;;  %v21367_v28 = vrot.slane %v21351_v39, %v20481_v62  ;;  %v21370_v22 = vld [vmem:[#allocation135_spill] sm:$0xff] }
 0x486   : > { %v21369_v20 = vrot.slane %v21368_v42, %v20483_v18  ;;  %v18201_v47 = vsel %vm515_vm0, %v21370_v22, %v18027_v9  ;;  %v21371_v5 = vrot.slane %v21316_v44, %v20459_v43  ;;  %v21372_v53 = vrot.slane %v21316_v44, %v20482_v51  ;;  %10266 = vmatpush1.bf16.msra.mxu0 %v10265_v55  ;;  %v18215_v9 = vpop.permute.xlu1 %6072  ;;  %v5903_v22 = vpop.permute.xlu0 %5902  ;;  %v21376_v55 = vld [vmem:[#allocation181_spill] sm:$0xff] }
 0x487   : > { %v6362_v36 = vmul.f32 %v21367_v28, %v17968_v48  ;;  %10316 = vmatprep.subr.bf16.mxu1 %v10315_v8  ;;  %v10267_v46 = vpack.c.bf16 %v6721_v41, %v6601_v11  ;;  %v21374_v8 = vld [vmem:[#allocation102_spill] sm:$0xff]  ;;  %v21383_v50 = vrot.slane %v21368_v42, %v20481_v62 }
 0x488   : > { %v6841_v40 = vmul.f32 %v21369_v20, %v17746_v1  ;;  %v6603_v26 = vmul.f32 %v21371_v5, %v18163_v52  ;;  %v6600_v17 = vmul.f32 %v21372_v53, %v17647_v63  ;;  %v21373_v1 = vrot.slane %v21358_v54, %v20481_v62  ;;  %v21391_v54 = vld [vmem:[#allocation16_spill] sm:$0xff] }
 0x489   : > { %v10317_v28 = vpack.c.bf16 %v6482_v59, %v6362_v36  ;;  %v18222_v41 = vsel %vm857_vm4, %v21374_v8, %v5445_v61  ;;  %v21375_v63 = vrot.slane %v21368_v42, %v20459_v43  ;;  %10268 = vmatprep.subr.bf16.mxu0 %v10267_v46  ;;  %v21378_v61 = vrot.slane %v21316_v44, %v20481_v62  ;;  %v21381_v46 = vld [vmem:[#allocation47_spill] sm:$0xff] }
 0x48a   : > { %v6722_v20 = vmul.f32 %v21373_v1, %v18174_v60  ;;  %v10319_v11 = vpack.c.bf16 %v6723_v12, %v6603_v26  ;;  %v10269_v53 = vpack.c.bf16 %v6720_v24, %v6600_v17  ;;  %v21377_v1 = vrot.slane %v21368_v42, %v20482_v51  ;;  %v21379_v12 = vld [vmem:[#allocation176_spill] sm:$0xff]  ;;  %v21390_v42 = vld [vmem:[#allocation33_spill] sm:$0xff] }
 0x48b   : > { %v6843_v59 = vmul.f32 %v21375_v63, %v18191_v4  ;;  %v6602_v8 = vmul.f32 %v21378_v61, %v18201_v47  ;;  %v18241_v63 = vsel %vm1321_vm6, %v5903_v22, %v18165_v49  ;;  %10318 = vmatpush1.bf16.msra.mxu1 %v10317_v28  ;;  %v21380_v24 = vrot.slane %v21379_v12, %v20483_v18 }
 0x48c   : > { %v6840_v5 = vmul.f32 %v21377_v1, %v17751_v45  ;;  %10320 = vmatprep.subr.bf16.mxu1 %v10319_v11  ;;  %v10271_v17 = vpack.c.bf16 %v21381_v46, %v6841_v40  ;;  %v7295_v45 = vrot.slane %v21376_v55, %v20459_v43  ;;  %v21382_v1 = vld [vmem:[#allocation29_spill] sm:$0xff]  ;;  %v6842_v28 = vmul.f32 %v21383_v50, %v18222_v41  ;;  %v21384_v11 = vld [vmem:[#allocation174_spill] sm:$0xff] }
 0x48d   : > { %v7097_v26 = vmul.f32 %v21380_v24, %v17873_v10  ;;  %v10321_v36 = vpack.c.bf16 %v6722_v20, %v6602_v8  ;;  %v18259_v44 = vsel %vm1150_vm5, %v5735_v58, %v18089_v31  ;;  %10270 = vmatpush1.bf16.msra.mxu0 %v10269_v53  ;;  %v6071_v10 = vpop.permute.xlu0 %6070  ;;  %v21385_v24 = vrot.slane %v21384_v11, %v20483_v18  ;;  %v21386_v8 = vld [vmem:[#allocation159_spill] sm:$0xff]  ;;  %v18276_v53 = vpop.permute.xlu1 %6240 }
 0x48e   : > { %v18270_v46 = vsel %vm1321_vm6, %v21386_v8, %v5903_v22  ;;  %v21388_v50 = vrot.slane %v21379_v12, %v20459_v43  ;;  %21389 = vst [vmem:[#allocation158_spill] sm:$0xff] %v18276_v53  ;;  %10272 = vmatprep.subr.bf16.mxu0 %v10271_v17  ;;  %v10323_v40 = vpack.c.bf16 %v21390_v42, %v6843_v59  ;;  %v21393_v22 = vld [vmem:[#allocation14_spill] sm:$0xff]  ;;  %v21396_v42 = vld [vmem:[#allocation171_spill] sm:$0xff] }
 0x48f   : > { %v6977_v20 = vmul.f32 %v21385_v24, %v17806_v56  ;;  %21387 = vst [vmem:[#allocation116_spill] sm:$0xff] %v18270_v46  ;;  %v10273_v39 = vpack.c.bf16 %v21391_v54, %v6840_v5  ;;  %v21392_v56 = vrot.slane %v21379_v12, %v20482_v51  ;;  %10322 = vmatpush1.bf16.msra.mxu1 %v10321_v36  ;;  %v21399_v8 = vld [vmem:[#allocation54_spill] sm:$0xff] }
 0x490   : > { %v7099_v61 = vmul.f32 %v21388_v50, %v18241_v63  ;;  %v21395_v17 = vrot.slane %v21376_v55, %v20483_v18  ;;  %v18295_v54 = vsel %vm1150_vm5, %v21396_v42, %v5735_v58  ;;  %10324 = vmatprep.subr.bf16.mxu1 %v10323_v40  ;;  %v21398_v36 = vrot.slane %v21384_v11, %v20482_v51  ;;  %v21401_v40 = vld [vmem:[#allocation26_spill] sm:$0xff] }
 0x491   : > { %v7096_v24 = vmul.f32 %v21392_v56, %v21356_v6  ;;  %v21397_v6 = vrot.slane %v21384_v11, %v20459_v43  ;;  %v10275_v59 = vpack.c.bf16 %v7097_v26, %v6977_v20  ;;  %v10325_v3 = vpack.c.bf16 %v21399_v8, %v6842_v28  ;;  %10274 = vmatpush1.bf16.msra.mxu0 %v10273_v39 }
 0x492   : > { %v7337_v50 = vmul.f32 %v21395_v17, %v17936_v0  ;;  %v6976_v56 = vmul.f32 %v21398_v36, %v17811_v23  ;;  %v21400_v0 = vrot.slane %v21379_v12, %v20481_v62  ;;  %v6239_v17 = vpop.permute.xlu0 %6238  ;;  %v21402_v26 = vrot.slane %v21401_v40, %v20483_v18  ;;  %v21403_v23 = vld [vmem:[#allocation189_spill] sm:$0xff] }
 0x493   : > { %v6979_v5 = vmul.f32 %v21397_v6, %v18259_v44  ;;  %10276 = vmatprep.subr.bf16.mxu0 %v10275_v59  ;;  %v21404_v39 = vrot.slane %v21376_v55, %v20482_v51  ;;  %v21405_v42 = vrot.slane %v21384_v11, %v20481_v62  ;;  %10326 = vmatpush1.bf16.msra.mxu1 %v10325_v3  ;;  %v21407_v59 = vld [vmem:[#allocation97_spill] sm:$0xff] }
 0x494   : > { %v7098_v58 = vmul.f32 %v21400_v0, %v18270_v46  ;;  %v7217_v20 = vmul.f32 %v21402_v26, %v17884_v21  ;;  %v10277_v36 = vpack.c.bf16 %v7096_v24, %v6976_v56  ;;  %v18331_v21 = vsel %vm1663_vm8, %v6239_v17, %v18276_v53  ;;  %v21412_v56 = vld [vmem:[#allocation147_spill] sm:$0xff] }
 0x495   : > { %v10327_v6 = vpack.c.bf16 %v7099_v61, %v6979_v5  ;;  %v7336_v0 = vmul.f32 %v21404_v39, %v17968_v48  ;;  %v6978_v12 = vmul.f32 %v21405_v42, %v18295_v54  ;;  %v21406_v61 = vrot.slane %v21326_v35, %v20483_v18  ;;  %v5113_v5 = vpop.permute.xlu1 %5112 }
 0x496   : > { %v18340_v48 = vsel %vm1663_vm8, %v21407_v59, %v6239_v17  ;;  %v10279_v42 = vpack.c.bf16 %v7337_v50, %v7217_v20  ;;  %v21409_v3 = vrot.slane %v21401_v40, %v20482_v51  ;;  %10278 = vmatpush1.bf16.msra.mxu0 %v10277_v36  ;;  %v21410_v17 = vld [vmem:[#allocation50_spill] sm:$0xff]  ;;  %v21418_v8 = vrot.slane %v21394_v30, %v20483_v18 }
 0x497   : > { %v7577_v24 = vmul.f32 %v21406_v61, %v18163_v52  ;;  %21408 = vst [vmem:[#allocation152_spill] sm:$0xff] %v18340_v48  ;;  %10328 = vmatprep.subr.bf16.mxu1 %v10327_v6  ;;  %v10329_v39 = vpack.c.bf16 %v7098_v58, %v6978_v12  ;;  %v18351_v61 = vsel %vm1492_vm7, %v6071_v10, %v18215_v9  ;;  %v4945_v6 = vpop.permute.xlu0 %4944 }
 0x498   : > { %v7216_v26 = vmul.f32 %v21409_v3, %v17889_v14  ;;  %v7411_v59 = vrot.slane %v21410_v17, %v20481_v62  ;;  %v21411_v50 = vrot.slane %v21410_v17, %v20483_v18  ;;  %v18362_v14 = vsel %vm1492_vm7, %v21412_v56, %v6071_v10  ;;  %10280 = vmatprep.subr.bf16.mxu0 %v10279_v42 }
 0x499   : > { %v7339_v12 = vmul.f32 %v7295_v45, %v18331_v21  ;;  %v7415_v58 = vrot.slane %v21410_v17, %v20459_v43  ;;  %v21413_v3 = vrot.slane %v21376_v55, %v20481_v62  ;;  %10330 = vmatpush1.bf16.msra.mxu1 %v10329_v39  ;;  %v21415_v45 = vrot.slane %v21326_v35, %v20482_v51 }
 0x49a   : > { %v7457_v20 = vmul.f32 %v21411_v50, %v18087_v38  ;;  %v10281_v36 = vpack.c.bf16 %v7336_v0, %v7216_v26  ;;  %v21414_v50 = vld [vmem:[#allocation84_spill] sm:$0xff]  ;;  %v21416_v0 = vrot.slane %v21401_v40, %v20459_v43  ;;  %v7817_v10 = vmul.f32 %v21418_v8, %v18191_v4 }
 0x49b   : > { %v7338_v28 = vmul.f32 %v21413_v3, %v18340_v48  ;;  %v7576_v56 = vmul.f32 %v21415_v45, %v18201_v47  ;;  %v21417_v26 = vld [vmem:[#allocation64_spill] sm:$0xff]  ;;  %v21419_v45 = vrot.slane %v21401_v40, %v20481_v62  ;;  %v18410_v40 = vsel %vm515_vm0, %v5113_v5, %v21422_v29 }
 0x49c   : > { %v7219_v42 = vmul.f32 %v21416_v0, %v18351_v61  ;;  %v18386_v39 = vsel %vm345_vm2, %v4945_v6, %v21417_v26  ;;  %v10283_v3 = vpack.c.bf16 %v7577_v24, %v7457_v20  ;;  %v18399_v0 = vsel %vm345_vm2, %v17917_v33, %v4945_v6  ;;  %10282 = vmatpush1.bf16.msra.mxu0 %v10281_v36  ;;  %v21420_v26 = vld [vmem:[#allocation76_spill] sm:$0xff]  ;;  %v5281_v24 = vpop.permute.xlu0 %5280 }
 0x49d   : > { %v7218_v55 = vmul.f32 %v21419_v45, %v18362_v14  ;;  %v7651_v11 = vrot.slane %v21420_v26, %v20481_v62  ;;  %v21421_v20 = vrot.slane %v21410_v17, %v20482_v51  ;;  %v5449_v45 = vpop.permute.xlu1 %5448  ;;  %v7655_v33 = vrot.slane %v21420_v26, %v20459_v43  ;;  %v21426_v38 = vld [vmem:[#allocation204_spill] sm:$0xff] }
 0x49e   : > { %v10331_v53 = vpack.c.bf16 %v7339_v12, %v7219_v42  ;;  %10284 = vmatprep.subr.bf16.mxu0 %v10283_v3  ;;  %v21423_v6 = vrot.slane %v21420_v26, %v20483_v18  ;;  %v18421_v17 = vsel %vm515_vm0, %v17953_v57, %v5113_v5  ;;  %v7459_v29 = vmul.f32 %v7415_v58, %v18386_v39 }
 0x49f   : > { %v7456_v8 = vmul.f32 %v21421_v20, %v18122_v15  ;;  %21424 = vst [vmem:[#allocation115_spill] sm:$0xff] %v18421_v17  ;;  %v10333_v20 = vpack.c.bf16 %v7338_v28, %v7218_v55  ;;  %v21425_v12 = vrot.slane %v21394_v30, %v20482_v51  ;;  %v7458_v3 = vmul.f32 %v7411_v59, %v18399_v0  ;;  %v21428_v28 = vld [vmem:[#allocation203_spill] sm:$0xff] }
 0x4a0   : > { %v7697_v36 = vmul.f32 %v21423_v6, %v18139_v25  ;;  %10332 = vmatprep.subr.bf16.mxu1 %v10331_v53  ;;  %v18432_v6 = vsel %vm686_vm3, %v5281_v24, %v21426_v38  ;;  %v21427_v57 = vrot.slane %v21326_v35, %v20459_v43  ;;  %v18441_v5 = vsel %vm857_vm4, %v5449_v45, %v21428_v28  ;;  %v5739_v53 = vpop.permute.xlu0 %5738 }
 0x4a1   : > { %v10285_v48 = vpack.c.bf16 %v7576_v56, %v7456_v8  ;;  %v7816_v42 = vmul.f32 %v21425_v12, %v18222_v41  ;;  %v18446_v59 = vsel %vm686_vm3, %v18014_v37, %v5281_v24  ;;  %10334 = vmatpush1.bf16.msra.mxu1 %v10333_v20  ;;  %v21429_v38 = vrot.slane %v21420_v26, %v20482_v51  ;;  %v21431_v37 = vld [vmem:[#allocation87_spill] sm:$0xff] }
 0x4a2   : > { %v7579_v55 = vmul.f32 %v21427_v57, %v18410_v40  ;;  %v10287_v58 = vpack.c.bf16 %v7817_v10, %v7697_v36  ;;  %v21430_v8 = vrot.slane %v21326_v35, %v20481_v62  ;;  %v8011_v24 = vrot.slane %v21431_v37, %v20481_v62 }
 0x4a3   : > { %v7696_v56 = vmul.f32 %v21429_v38, %v18174_v60  ;;  %10286 = vmatpush1.bf16.msra.mxu0 %v10285_v48  ;;  %v21432_v10 = vrot.slane %v21431_v37, %v20483_v18  ;;  %v18467_v26 = vsel %vm857_vm4, %v18050_v19, %v5449_v45  ;;  %v7699_v35 = vmul.f32 %v7655_v33, %v18432_v6  ;;  %v21440_v33 = vld [vmem:[#allocation183_spill] sm:$0xff] }
 0x4a4   : > { %v7578_v12 = vmul.f32 %v21430_v8, %v18421_v17  ;;  %21433 = vst [vmem:[#allocation118_spill] sm:$0xff] %v18467_v26  ;;  %v10335_v20 = vpack.c.bf16 %v7579_v55, %v7459_v29  ;;  %10288 = vmatprep.subr.bf16.mxu0 %v10287_v58  ;;  %v21434_v48 = vrot.slane %v21394_v30, %v20459_v43  ;;  %v5907_v8 = vpop.permute.xlu1 %5906  ;;  %v21436_v29 = vld [vmem:[#allocation91_spill] sm:$0xff] }
 0x4a5   : > { %v8057_v36 = vmul.f32 %v21432_v10, %v18259_v44  ;;  %v7698_v57 = vmul.f32 %v7651_v11, %v18446_v59  ;;  %v8015_v10 = vrot.slane %v21431_v37, %v20459_v43  ;;  %v10289_v17 = vpack.c.bf16 %v7816_v42, %v7696_v56 }
 0x4a6   : > { %v7819_v28 = vmul.f32 %v21434_v48, %v18441_v5  ;;  %v10337_v38 = vpack.c.bf16 %v7578_v12, %v7458_v3  ;;  %v21435_v19 = vrot.slane %v21431_v37, %v20482_v51  ;;  %10336 = vmatprep.subr.bf16.mxu1 %v10335_v20  ;;  %v8251_v55 = vrot.slane %v21436_v29, %v20481_v62  ;;  %v6075_v3 = vpop.permute.xlu0 %6074  ;;  %v21438_v12 = vld [vmem:[#allocation193_spill] sm:$0xff] }
 0x4a7   : > { %v21437_v11 = vrot.slane %v21394_v30, %v20481_v62  ;;  %v18492_v42 = vsel %vm1150_vm5, %v5739_v53, %v21438_v12  ;;  %v18497_v56 = vsel %vm1150_vm5, %v18089_v31, %v5739_v53  ;;  %v21439_v48 = vrot.slane %v21436_v29, %v20483_v18  ;;  %10290 = vmatpush1.bf16.msra.mxu0 %v10289_v17  ;;  %v21442_v12 = vld [vmem:[#allocation185_spill] sm:$0xff] }
 0x4a8   : > { %v8056_v45 = vmul.f32 %v21435_v19, %v18295_v54  ;;  %10338 = vmatpush1.bf16.msra.mxu1 %v10337_v38  ;;  %v10339_v20 = vpack.c.bf16 %v7819_v28, %v7699_v35  ;;  %v18506_v30 = vsel %vm1321_vm6, %v5907_v8, %v21440_v33  ;;  %v10291_v37 = vpack.c.bf16 %v8057_v36, %v21442_v12  ;;  %v21443_v28 = vld [vmem:[#allocation145_spill] sm:$0xff] }
 0x4a9   : > { %v7818_v58 = vmul.f32 %v21437_v11, %v18467_v26  ;;  %v8297_v19 = vmul.f32 %v21439_v48, %v18351_v61  ;;  %21441 = vst [vmem:[#allocation111_spill] sm:$0xff] %v18506_v30  ;;  %v8255_v11 = vrot.slane %v21436_v29, %v20459_v43  ;;  %v8058_v53 = vmul.f32 %v8011_v24, %v18497_v56  ;;  %v21444_v48 = vld [vmem:[#allocation184_spill] sm:$0xff] }
 0x4aa   : > { %v8059_v35 = vmul.f32 %v8015_v10, %v18492_v42  ;;  %10340 = vmatprep.subr.bf16.mxu1 %v10339_v20  ;;  %v18516_v38 = vsel %vm1492_vm7, %v6075_v3, %v21443_v28  ;;  %v10293_v33 = vpack.c.bf16 %v8056_v45, %v21444_v48  ;;  %v21445_v17 = vrot.slane %v21414_v50, %v20483_v18  ;;  %v21449_v28 = vld [vmem:[#allocation117_spill] sm:$0xff] }
 0x4ab   : > { %v10341_v31 = vpack.c.bf16 %v7818_v58, %v7698_v57  ;;  %v21446_v57 = vrot.slane %v21436_v29, %v20482_v51  ;;  %v18530_v36 = vsel %vm1492_vm7, %v18215_v9, %v6075_v3  ;;  %10292 = vmatprep.subr.bf16.mxu0 %v10291_v37  ;;  %v21447_v10 = vrot.slane %v21414_v50, %v20482_v51  ;;  %v6243_v3 = vpop.permute.xlu1 %6242 }
 0x4ac   : > { %v8177_v26 = vmul.f32 %v21445_v17, %v18241_v63  ;;  %v18539_v58 = vsel %vm1321_vm6, %v18165_v49, %v5907_v8  ;;  %v8371_v29 = vrot.slane %v21382_v1, %v20481_v62  ;;  %v8367_v20 = vrot.slane %v21382_v1, %v20483_v18  ;;  %10294 = vmatpush1.bf16.msra.mxu0 %v10293_v33  ;;  %v21451_v17 = vld [vmem:[#allocation194_spill] sm:$0xff] }
 0x4ad   : > { %v8296_v24 = vmul.f32 %v21446_v57, %v18362_v14  ;;  %v8176_v45 = vmul.f32 %v21447_v10, %v18270_v46  ;;  %10342 = vmatpush1.bf16.msra.mxu1 %v10341_v31  ;;  %v21448_v9 = vrot.slane %v21414_v50, %v20459_v43  ;;  %v8299_v12 = vmul.f32 %v8255_v11, %v18516_v38  ;;  %v21453_v10 = vld [vmem:[#allocation138_spill] sm:$0xff] }
 0x4ae   : > { %v10343_v48 = vpack.c.bf16 %v8059_v35, %v21449_v28  ;;  %v10295_v49 = vpack.c.bf16 %v8297_v19, %v8177_v26  ;;  %v21450_v8 = vrot.slane %v21403_v23, %v11051_v16  ;;  %v21452_v18 = vrot.slane %v21451_v17, %v11051_v16  ;;  %v21461_v28 = vld [vmem:[#allocation152_spill] sm:$0xff] }
 0x4af   : > { %v8179_v37 = vmul.f32 %v21448_v9, %v18506_v30  ;;  %v10345_v46 = vpack.c.bf16 %v8058_v53, %v21453_v10  ;;  %v8298_v9 = vmul.f32 %v8251_v55, %v18530_v36  ;;  %v10297_v30 = vpack.c.bf16 %v8296_v24, %v8176_v45  ;;  %v21456_v53 = vld [vmem:[#allocation187_spill] sm:$0xff] }
 0x4b0   : > { %v5068_v31 = vmul.f32 %v21450_v8, %v18122_v15  ;;  %v5236_v57 = vmul.f32 %v21452_v18, %v18201_v47  ;;  %10344 = vmatprep.subr.bf16.mxu1 %v10343_v48  ;;  %10296 = vmatprep.subr.bf16.mxu0 %v10295_v49  ;;  %v8375_v26 = vrot.slane %v21382_v1, %v20459_v43  ;;  %v21464_v18 = vld [vmem:[#allocation158_spill] sm:$0xff] }
 0x4b1   : > { %v10347_v11 = vpack.c.bf16 %v8299_v12, %v8179_v37  ;;  %v21454_v15 = vrot.slane %v21451_v17, %v11045_v13  ;;  %v21455_v47 = vrot.slane %v21414_v50, %v20481_v62  ;;  %v18574_v55 = vsel %vm1663_vm8, %v6243_v3, %v21456_v53  ;;  %10346 = vmatpush1.bf16.msra.mxu1 %v10345_v46  ;;  %v21458_v50 = vld [vmem:[#allocation100_spill] sm:$0xff]  ;;  %v21471_v53 = vld [vmem:[#allocation115_spill] sm:$0xff] }
 0x4b2   : > { %v8417_v33 = vmul.f32 %v8367_v20, %v18331_v21  ;;  %v21457_v43 = vrot.slane %v21228_v7, %v11045_v13  ;;  %v5831_v62 = vrot.slane %v21265_v2, %v21393_v22  ;;  %10298 = vmatpush1.bf16.msra.mxu0 %v10297_v30  ;;  %v21459_v45 = vrot.slane %v21403_v23, %v11045_v13 }
 0x4b3   : > { %v5237_v19 = vmul.f32 %v21454_v15, %v18163_v52  ;;  %v8178_v35 = vmul.f32 %v21455_v47, %v18539_v58  ;;  %v5827_v52 = vrot.slane %v21265_v2, %v20718_v32  ;;  %10348 = vmatprep.subr.bf16.mxu1 %v10347_v11  ;;  %v10353_v37 = vpack.c.bf16 %v5236_v57, %v5068_v31 }
 0x4b4   : > { %v5573_v24 = vmul.f32 %v21457_v43, %v18191_v4  ;;  %v5069_v46 = vmul.f32 %v21459_v45, %v21458_v50  ;;  %v21460_v20 = vrot.slane %v21202_v27, %v11045_v13  ;;  %9219 = vmatprep.subr.mxu0 %v8417_v33  ;;  %v21462_v48 = vrot.slane %v21382_v1, %v20482_v51  ;;  %v18636_v50 = vld [vmem:[#allocation6] sm:$0xff] }
 0x4b5   : > { %v10349_v4 = vpack.c.bf16 %v8298_v9, %v8178_v35  ;;  %v21463_v30 = vrot.slane %v21403_v23, %v21393_v22  ;;  %v18604_v31 = vsel %vm1663_vm8, %v21464_v18, %v6243_v3  ;;  %v8419_v57 = vmul.f32 %v8375_v26, %v18574_v55 }
 0x4b6   : > { %v5405_v12 = vmul.f32 %v21460_v20, %v18139_v25  ;;  %v8416_v49 = vmul.f32 %v21462_v48, %v21461_v28  ;;  %v21465_v25 = vrot.slane %v21202_v27, %v11051_v16  ;;  %v21466_v51 = vrot.slane %v21228_v7, %v11051_v16 }
 0x4b7   : > { %v5071_v8 = vmul.f32 %v21463_v30, %v18386_v39  ;;  %v21467_v11 = vrot.slane %v21403_v23, %v20718_v32  ;;  %10350 = vmatpush1.bf16.msra.mxu1 %v10349_v4  ;;  %v10351_v34 = vpack.c.bf16 %v5237_v19, %v5069_v46  ;;  %v21468_v3 = vrot.slane %v21451_v17, %v21393_v22  ;;  %v21474_v46 = vld [vmem:[#allocation35_spill] sm:$0xff] }
 0x4b8   : > { %v5404_v10 = vmul.f32 %v21465_v25, %v18174_v60  ;;  %v5572_v9 = vmul.f32 %v21466_v51, %v18222_v41  ;;  %v21469_v60 = vrot.slane %v21202_v27, %v21393_v22  ;;  %9290 = vmatprep.subr.mxu1 %v8419_v57  ;;  %9220 = vmatpush1.msra.mxu0 %v8416_v49  ;;  %v21480_v51 = vld [vmem:[#allocation186_spill] sm:$0xff] }
 0x4b9   : > { %v5070_v15 = vmul.f32 %v21467_v11, %v18399_v0  ;;  %v5239_v26 = vmul.f32 %v21468_v3, %v18410_v40  ;;  %v10355_v41 = vpack.c.bf16 %v5573_v24, %v5405_v12  ;;  %v21470_v23 = vrot.slane %v21265_v2, %v11045_v13  ;;  %9232 = vmatmul.mubr.f32.vlgmr.msra.gmra.mrb[12].mxu0 %v18636_v50  ;;  %v10558_v12 = vld [vmem:[#allocation6 + $0x8] sm:$0xff] }
 0x4ba   : > { %v5407_v47 = vmul.f32 %v21469_v60, %v18432_v6  ;;  %v21472_v19 = vrot.slane %v21451_v17, %v20718_v32  ;;  %v8418_v43 = vmul.f32 %v8371_v29, %v18604_v31  ;;  %10352 = vmatprep.subr.bf16.mxu0 %v10351_v34  ;;  %v21473_v24 = vrot.slane %v21228_v7, %v21393_v22 }
 0x4bb   : > { %v5861_v35 = vmul.f32 %v21470_v23, %v18259_v44  ;;  %v6167_v44 = vrot.slane %v21474_v46, %v21393_v22  ;;  %10354 = vmatpush1.bf16.msra.mxu0 %v10353_v37  ;;  %v10403_v20 = vpack.c.bf16 %v5239_v26, %v5071_v8  ;;  %9614 = vmatprep.mubr.msk.f32.mxu0 %vm4332_vm1, %v10558_v12 }
 0x4bc   : > { %v5238_v33 = vmul.f32 %v21472_v19, %v21471_v53  ;;  %v5575_v45 = vmul.f32 %v21473_v24, %v18441_v5  ;;  %v10357_v17 = vpack.c.bf16 %v5572_v9, %v5404_v10  ;;  %v21475_v4 = vrot.slane %v21202_v27, %v20718_v32  ;;  %9291 = vmatpush1.msra.mxu1 %v8418_v43  ;;  %v21478_v27 = vld [vmem:[#allocation118_spill] sm:$0xff]  ;;  %v21482_v9 = vld [vmem:[#allocation212_spill] sm:$0xff] }
 0x4bd   : > { %10356 = vmatprep.subr.bf16.mxu0 %v10355_v41  ;;  %v21476_v49 = vrot.slane %v21265_v2, %v11051_v16  ;;  %v5863_v37 = vmul.f32 %v5831_v62, %v18492_v42  ;;  %9303 = vmatmul.mubr.f32.vlgmr.msra.gmra.mrb[12].mxu1 %v18636_v50  ;;  %v21477_v18 = vrot.slane %v21474_v46, %v11045_v13 }
 0x4be   : > { %v10405_v29 = vpack.c.bf16 %v5238_v33, %v5070_v15  ;;  %v5406_v48 = vmul.f32 %v21475_v4, %v18446_v59  ;;  %10404 = vmatprep.subr.bf16.mxu1 %v10403_v20  ;;  %v10407_v8 = vpack.c.bf16 %v5575_v45, %v5407_v47  ;;  %v21479_v25 = vrot.slane %v21228_v7, %v20718_v32  ;;  %v21483_v15 = vld [vmem:[#allocation80_spill] sm:$0xff]  ;;  %v21485_v47 = vld [vmem:[#allocation182_spill] sm:$0xff]  ;;  %v21487_v33 = vld [vmem:[#allocation41_spill] sm:$0xff] }
 0x4bf   : > { %v5860_v30 = vmul.f32 %v21476_v49, %v18295_v54  ;;  %v6197_v57 = vmul.f32 %v21477_v18, %v18351_v61  ;;  %v10359_v2 = vpack.c.bf16 %v5861_v35, %v21480_v51  ;;  %9615 = vmatprep.mubr.msk.f32.mxu1 %vm4332_vm1, %v10558_v12  ;;  %v21481_v54 = vld [vmem:[#allocation92_spill] sm:$0xff]  ;;  %v5999_v11 = vrot.slane %v21482_v9, %v21393_v22  ;;  %v21489_v45 = vld [vmem:[#allocation86_spill] sm:$0xff]  ;;  %v21495_v51 = vld [vmem:[#allocation173_spill] sm:$0xff] }
 0x4c0   : > { %v5574_v10 = vmul.f32 %v21479_v25, %v21478_v27  ;;  %10406 = vmatpush1.bf16.msra.mxu1 %v10405_v29  ;;  %v6443_v62 = vrot.slane %v21481_v54, %v11051_v16  ;;  %v6335_v34 = vrot.slane %v21483_v15, %v21393_v22  ;;  %10358 = vmatpush1.bf16.msra.mxu0 %v10357_v17  ;;  %v21490_v17 = vld [vmem:[#allocation116_spill] sm:$0xff] }
 0x4c1   : > { %10408 = vmatprep.subr.bf16.mxu1 %v10407_v8  ;;  %v21484_v7 = vrot.slane %v21482_v9, %v11045_v13  ;;  %v5862_v26 = vmul.f32 %v5827_v52, %v18497_v56  ;;  %v6163_v60 = vrot.slane %v21474_v46, %v20718_v32  ;;  %10360 = vmatprep.subr.bf16.mxu0 %v10359_v2 }
 0x4c2   : > { %v10409_v3 = vpack.c.bf16 %v5574_v10, %v5406_v48  ;;  %v10361_v41 = vpack.c.bf16 %v5860_v30, %v21485_v47  ;;  %v21486_v23 = vrot.slane %v21474_v46, %v11051_v16  ;;  %v6199_v19 = vmul.f32 %v6167_v44, %v18516_v38  ;;  %v21492_v44 = vld [vmem:[#allocation111_spill] sm:$0xff]  ;;  %v21494_v30 = vld [vmem:[#allocation197_spill] sm:$0xff] }
 0x4c3   : > { %v6029_v61 = vmul.f32 %v21484_v7, %v18241_v63  ;;  %v10411_v43 = vpack.c.bf16 %v5863_v37, %v21487_v33  ;;  %v21488_v63 = vrot.slane %v21481_v54, %v11045_v13  ;;  %v5995_v24 = vrot.slane %v21482_v9, %v20718_v32  ;;  %v21496_v7 = vld [vmem:[#allocation51_spill] sm:$0xff] }
 0x4c4   : > { %v6196_v35 = vmul.f32 %v21486_v23, %v18362_v14  ;;  %v6687_v20 = vrot.slane %v21489_v45, %v11045_v13  ;;  %10410 = vmatpush1.bf16.msra.mxu1 %v10409_v3  ;;  %v21491_v14 = vrot.slane %v21482_v9, %v11051_v16  ;;  %v6031_v29 = vmul.f32 %v5999_v11, %v21492_v44  ;;  %v21501_v33 = vld [vmem:[#allocation63_spill] sm:$0xff] }
 0x4c5   : > { %v6485_v52 = vmul.f32 %v21488_v63, %v18386_v39  ;;  %v10363_v12 = vpack.c.bf16 %v6197_v57, %v6029_v61  ;;  %v6683_v4 = vrot.slane %v21489_v45, %v11051_v16  ;;  %10412 = vmatprep.subr.bf16.mxu1 %v10411_v43  ;;  %10362 = vmatpush1.bf16.msra.mxu0 %v10361_v41 }
 0x4c6   : > { %v6028_v46 = vmul.f32 %v21491_v14, %v21490_v17  ;;  %v21493_v39 = vrot.slane %v21483_v15, %v11045_v13  ;;  %v6331_v49 = vrot.slane %v21483_v15, %v20718_v32  ;;  %v10413_v37 = vpack.c.bf16 %v5862_v26, %v21494_v30  ;;  %v21498_v26 = vld [vmem:[#allocation160_spill] sm:$0xff] }
 0x4c7   : > { %v6198_v8 = vmul.f32 %v6163_v60, %v18530_v36  ;;  %10364 = vmatprep.subr.bf16.mxu0 %v10363_v12  ;;  %v6484_v57 = vmul.f32 %v6443_v62, %v18399_v0  ;;  %v6367_v25 = vmul.f32 %v6335_v34, %v18574_v55  ;;  %v10415_v10 = vpack.c.bf16 %v6199_v19, %v6031_v29  ;;  %v21504_v12 = vld [vmem:[#allocation176_spill] sm:$0xff] }
 0x4c8   : > { %v6365_v48 = vmul.f32 %v21493_v39, %v18331_v21  ;;  %v10365_v18 = vpack.c.bf16 %v6196_v35, %v6028_v46  ;;  %v6807_v2 = vrot.slane %v21495_v51, %v11045_v13  ;;  %v6030_v9 = vmul.f32 %v5995_v24, %v18539_v58  ;;  %10414 = vmatpush1.bf16.msra.mxu1 %v10413_v37  ;;  %v21506_v39 = vld [vmem:[#allocation26_spill] sm:$0xff] }
 0x4c9   : > { %v6725_v21 = vmul.f32 %v6687_v20, %v18432_v6  ;;  %v21497_v61 = vrot.slane %v21481_v54, %v21393_v22  ;;  %v6563_v0 = vrot.slane %v21498_v26, %v11051_v16  ;;  %v21499_v62 = vrot.slane %v21483_v15, %v11051_v16  ;;  %10416 = vmatprep.subr.bf16.mxu1 %v10415_v10  ;;  %v21512_v10 = vld [vmem:[#allocation181_spill] sm:$0xff] }
 0x4ca   : > { %v10367_v11 = vpack.c.bf16 %v6485_v52, %v6365_v48  ;;  %10366 = vmatpush1.bf16.msra.mxu0 %v10365_v18  ;;  %v6815_v6 = vrot.slane %v21495_v51, %v21393_v22  ;;  %v21500_v60 = vrot.slane %v21498_v26, %v11045_v13  ;;  %v6366_v41 = vmul.f32 %v6331_v49, %v18604_v31  ;;  %v21507_v49 = vld [vmem:[#allocation46_spill] sm:$0xff]  ;;  %v21509_v18 = vld [vmem:[#allocation164_spill] sm:$0xff] }
 0x4cb   : > { %v6487_v3 = vmul.f32 %v21497_v61, %v21496_v7  ;;  %v6364_v34 = vmul.f32 %v21499_v62, %v21461_v28  ;;  %v10417_v23 = vpack.c.bf16 %v6198_v8, %v6030_v9  ;;  %v6803_v35 = vrot.slane %v21495_v51, %v11051_v16  ;;  %v21508_v8 = vld [vmem:[#allocation15_spill] sm:$0xff]  ;;  %v21513_v9 = vld [vmem:[#allocation77_spill] sm:$0xff]  ;;  %v21514_v61 = vld [vmem:[#allocation104_spill] sm:$0xff] }
 0x4cc   : > { %v6605_v47 = vmul.f32 %v21500_v60, %v18410_v40  ;;  %10368 = vmatprep.subr.bf16.mxu0 %v10367_v11  ;;  %v6724_v28 = vmul.f32 %v6683_v4, %v18446_v59  ;;  %v21502_v43 = vrot.slane %v21481_v54, %v20718_v32  ;;  %v6845_v52 = vmul.f32 %v6807_v2, %v18441_v5  ;;  %v21503_v40 = vld [vmem:[#allocation174_spill] sm:$0xff] }
 0x4cd   : > { %v10369_v19 = vpack.c.bf16 %v6484_v57, %v6364_v34  ;;  %v10419_v15 = vpack.c.bf16 %v6487_v3, %v6367_v25  ;;  %v6943_v24 = vrot.slane %v21503_v40, %v11045_v13  ;;  %10418 = vmatpush1.bf16.msra.mxu1 %v10417_v23  ;;  %v6604_v20 = vmul.f32 %v6563_v0, %v21471_v53  ;;  %v21505_v54 = vld [vmem:[#allocation198_spill] sm:$0xff]  ;;  %v21515_v0 = vld [vmem:[#allocation208_spill] sm:$0xff] }
 0x4ce   : > { %v6486_v63 = vmul.f32 %v21502_v43, %v21501_v33  ;;  %v10371_v45 = vpack.c.bf16 %v6725_v21, %v6605_v47  ;;  %v6811_v59 = vrot.slane %v21495_v51, %v20718_v32  ;;  %v7063_v17 = vrot.slane %v21504_v12, %v11045_v13  ;;  %v21516_v62 = vld [vmem:[#allocation206_spill] sm:$0xff]  ;;  %v21518_v47 = vld [vmem:[#allocation61_spill] sm:$0xff] }
 0x4cf   : > { %10420 = vmatprep.subr.bf16.mxu1 %v10419_v15  ;;  %10370 = vmatpush1.bf16.msra.mxu0 %v10369_v19  ;;  %v6847_v46 = vmul.f32 %v6815_v6, %v21505_v54  ;;  %v6844_v5 = vmul.f32 %v6803_v35, %v21478_v27  ;;  %v10373_v29 = vpack.c.bf16 %v6724_v28, %v6604_v20  ;;  %v21511_v27 = vld [vmem:[#allocation205_spill] sm:$0xff]  ;;  %v21520_v33 = vld [vmem:[#allocation114_spill] sm:$0xff] }
 0x4d0   : > { %v10421_v14 = vpack.c.bf16 %v6486_v63, %v6366_v41  ;;  %10372 = vmatprep.subr.bf16.mxu0 %v10371_v45  ;;  %v6939_v4 = vrot.slane %v21503_v40, %v11051_v16  ;;  %v6981_v53 = vmul.f32 %v6943_v24, %v18492_v42  ;;  %v7183_v48 = vrot.slane %v21506_v39, %v11045_v13  ;;  %v21521_v63 = vld [vmem:[#allocation62_spill] sm:$0xff]  ;;  %v21524_v45 = vld [vmem:[#allocation87_spill] sm:$0xff] }
 0x4d1   : > { %v10375_v30 = vpack.c.bf16 %v21507_v49, %v6845_v52  ;;  %v7059_v37 = vrot.slane %v21504_v12, %v11051_v16  ;;  %v21510_v57 = vpack.c.bf16 %v21508_v8, %v21509_v18  ;;  %v6846_v25 = vmul.f32 %v6811_v59, %v21511_v27  ;;  %v21522_v52 = vld [vmem:[#allocation82_spill] sm:$0xff]  ;;  %v21525_v59 = vld [vmem:[#allocation36_spill] sm:$0xff] }
 0x4d2   : > { %10422 = vmatpush1.bf16.msra.mxu1 %v10421_v14  ;;  %v7311_v51 = vrot.slane %v21512_v10, %v21393_v22  ;;  %v7101_v42 = vmul.f32 %v7063_v17, %v21492_v44  ;;  %v7303_v2 = vrot.slane %v21512_v10, %v11045_v13  ;;  %v10377_v21 = vpack.c.bf16 %v21513_v9, %v6844_v5  ;;  %v21526_v12 = vld [vmem:[#allocation66_spill] sm:$0xff]  ;;  %v21529_v14 = vld [vmem:[#allocation19_spill] sm:$0xff]  ;;  %v21537_v8 = vld [vmem:[#allocation48_spill] sm:$0xff] }
 0x4d3   : > { %10424 = vmatprep.subr.bf16.mxu1 %v21510_v57  ;;  %10374 = vmatpush1.bf16.msra.mxu0 %v10373_v29  ;;  %v6980_v11 = vmul.f32 %v6939_v4, %v18497_v56  ;;  %v7179_v7 = vrot.slane %v21506_v39, %v11051_v16  ;;  %v10427_v3 = vpack.c.bf16 %v21514_v61, %v6847_v46  ;;  %v21528_v17 = vld [vmem:[#allocation162_spill] sm:$0xff]  ;;  %v21532_v4 = vld [vmem:[#allocation129_spill] sm:$0xff] }
 0x4d4   : > { %10376 = vmatprep.subr.bf16.mxu0 %v10375_v30  ;;  %v7221_v26 = vmul.f32 %v7183_v48, %v18516_v38  ;;  %v21517_v34 = vpack.c.bf16 %v21515_v0, %v21516_v62  ;;  %v10379_v44 = vpack.c.bf16 %v7101_v42, %v6981_v53  ;;  %v7191_v6 = vrot.slane %v21506_v39, %v21393_v22  ;;  %v21519_v38 = vld [vmem:[#allocation146_spill] sm:$0xff]  ;;  %v21539_v57 = vld [vmem:[#allocation201_spill] sm:$0xff]  ;;  %v21542_v42 = vld [vmem:[#allocation124_spill] sm:$0xff] }
 0x4d5   : > { %v7100_v60 = vmul.f32 %v7059_v37, %v18539_v58  ;;  %v7299_v56 = vrot.slane %v21512_v10, %v11051_v16  ;;  %v10429_v41 = vpack.c.bf16 %v21518_v47, %v6846_v25  ;;  %v7341_v23 = vmul.f32 %v7303_v2, %v18574_v55  ;;  %v21531_v54 = vld [vmem:[#allocation90_spill] sm:$0xff]  ;;  %v21536_v37 = vld [vmem:[#allocation67_spill] sm:$0xff] }
 0x4d6   : > { %10426 = vmatpush1.bf16.msra.mxu1 %v21517_v34  ;;  %v7343_v35 = vmul.f32 %v7311_v51, %v21519_v38  ;;  %v7220_v28 = vmul.f32 %v7179_v7, %v18530_v36  ;;  %v7223_v43 = vmul.f32 %v7191_v6, %v21520_v33  ;;  %v21523_v40 = vpack.c.bf16 %v21521_v63, %v21522_v52  ;;  %v21533_v39 = vld [vmem:[#allocation150_spill] sm:$0xff]  ;;  %v21547_v0 = vld [vmem:[#allocation191_spill] sm:$0xff]  ;;  %v21557_v33 = vld [vmem:[#allocation136_spill] sm:$0xff] }
 0x4d7   : > { %10428 = vmatprep.subr.bf16.mxu1 %v10427_v3  ;;  %10378 = vmatpush1.bf16.msra.mxu0 %v10377_v21  ;;  %v10381_v19 = vpack.c.bf16 %v7100_v60, %v6980_v11  ;;  %v10383_v15 = vpack.c.bf16 %v7341_v23, %v7221_v26  ;;  %v7340_v58 = vmul.f32 %v7299_v56, %v18604_v31  ;;  %v21534_v48 = vld [vmem:[#allocation106_spill] sm:$0xff]  ;;  %v21545_v11 = vld [vmem:[#allocation112_spill] sm:$0xff] }
 0x4d8   : > { %10380 = vmatprep.subr.bf16.mxu0 %v10379_v44  ;;  %v10435_v55 = vpack.c.bf16 %v7343_v35, %v7223_v43  ;;  %v8023_v20 = vrot.slane %v21524_v45, %v11045_v13  ;;  %v21527_v36 = vpack.c.bf16 %v21525_v59, %v21526_v12  ;;  %v21530_v31 = vpack.c.bf16 %v21528_v17, %v21529_v14  ;;  %v21540_v27 = vld [vmem:[#allocation202_spill] sm:$0xff]  ;;  %v21553_v35 = vld [vmem:[#allocation207_spill] sm:$0xff]  ;;  %v21558_v52 = vld [vmem:[#allocation200_spill] sm:$0xff] }
 0x4d9   : > { %v10385_v24 = vpack.c.bf16 %v7340_v58, %v7220_v28  ;;  %v7903_v46 = vrot.slane %v21531_v54, %v11045_v13  ;;  %v8031_v5 = vrot.slane %v21524_v45, %v21393_v22  ;;  %v8019_v29 = vrot.slane %v21524_v45, %v11051_v16  ;;  %v21543_v2 = vld [vmem:[#allocation70_spill] sm:$0xff]  ;;  %v21556_v28 = vld [vmem:[#allocation109_spill] sm:$0xff]  ;;  %v21563_v59 = vld [vmem:[#allocation107_spill] sm:$0xff] }
 0x4da   : > { %10430 = vmatpush1.bf16.msra.mxu1 %v10429_v41  ;;  %v8061_v53 = vmul.f32 %v8023_v20, %v21532_v4  ;;  %v21535_v49 = vpack.c.bf16 %v21533_v39, %v21534_v48  ;;  %v7899_v30 = vrot.slane %v21531_v54, %v11051_v16  ;;  %v21538_v18 = vpack.c.bf16 %v21536_v37, %v21537_v8  ;;  %v21546_v3 = vld [vmem:[#allocation210_spill] sm:$0xff]  ;;  %v21551_v41 = vld [vmem:[#allocation113_spill] sm:$0xff]  ;;  %v21571_v39 = vld [vmem:[#allocation120_spill] sm:$0xff] }
 0x4db   : > { %10432 = vmatprep.subr.bf16.mxu1 %v21523_v40  ;;  %10382 = vmatpush1.bf16.msra.mxu0 %v10381_v19  ;;  %v21541_v25 = vpack.c.bf16 %v21539_v57, %v21540_v27  ;;  %v7911_v10 = vrot.slane %v21531_v54, %v21393_v22  ;;  %v8027_v51 = vrot.slane %v21524_v45, %v20718_v32  ;;  %v21548_v62 = vld [vmem:[#allocation190_spill] sm:$0xff]  ;;  %v21559_v40 = vld [vmem:[#allocation199_spill] sm:$0xff] }
 0x4dc   : > { %10384 = vmatprep.subr.bf16.mxu0 %v10383_v15  ;;  %v21544_v9 = vpack.c.bf16 %v21542_v42, %v21543_v2  ;;  %v7941_v21 = vmul.f32 %v7903_v46, %v21514_v61  ;;  %v8063_v7 = vmul.f32 %v8031_v5, %v21545_v11  ;;  %v8060_v26 = vmul.f32 %v8019_v29, %v21546_v3  ;;  %v21550_v56 = vld [vmem:[#allocation18_spill] sm:$0xff]  ;;  %v21554_v61 = vld [vmem:[#allocation209_spill] sm:$0xff]  ;;  %v21569_v29 = vld [vmem:[#allocation140_spill] sm:$0xff] }
 0x4dd   : > { %v21549_v34 = vpack.c.bf16 %v21547_v0, %v21548_v62  ;;  %v7907_v6 = vrot.slane %v21531_v54, %v20718_v32  ;;  %v7940_v60 = vmul.f32 %v7899_v30, %v21518_v47  ;;  %v21552_v23 = vpack.c.bf16 %v21550_v56, %v21551_v41  ;;  %v21561_v47 = vld [vmem:[#allocation28_spill] sm:$0xff]  ;;  %v21562_v20 = vld [vmem:[#allocation78_spill] sm:$0xff]  ;;  %v21574_v30 = vld [vmem:[#allocation25_spill] sm:$0xff] }
 0x4de   : > { %10434 = vmatpush1.bf16.msra.mxu1 %v21527_v36  ;;  %v10395_v44 = vpack.c.bf16 %v8061_v53, %v7941_v21  ;;  %v21555_v19 = vpack.c.bf16 %v21553_v35, %v21554_v61  ;;  %v7943_v15 = vmul.f32 %v7911_v10, %v21556_v28  ;;  %v8062_v43 = vmul.f32 %v8027_v51, %v21557_v33  ;;  %v21565_v54 = vld [vmem:[#allocation60_spill] sm:$0xff]  ;;  %v21566_v46 = vld [vmem:[#allocation38_spill] sm:$0xff] }
 0x4df   : > { %10436 = vmatprep.subr.bf16.mxu1 %v10435_v55  ;;  %10386 = vmatpush1.bf16.msra.mxu0 %v10385_v24  ;;  %v10397_v58 = vpack.c.bf16 %v8060_v26, %v7940_v60  ;;  %v21560_v24 = vpack.c.bf16 %v21558_v52, %v21559_v40  ;;  %v7942_v55 = vmul.f32 %v7907_v6, %v21561_v47  ;;  %v21572_v48 = vld [vmem:[#allocation122_spill] sm:$0xff] }
 0x4e0   : > { %10388 = vmatprep.subr.bf16.mxu0 %v21530_v31  ;;  %v10447_v63 = vpack.c.bf16 %v8063_v7, %v7943_v15  ;;  %v8383_v45 = vrot.slane %v21382_v1, %v11045_v13  ;;  %v21564_v12 = vpack.c.bf16 %v21562_v20, %v21563_v59  ;;  %v8379_v17 = vrot.slane %v21382_v1, %v11051_v16  ;;  %v21568_v13 = vld [vmem:[#allocation44_spill] sm:$0xff]  ;;  %v21576_v37 = vld [vmem:[#allocation126_spill] sm:$0xff] }
 0x4e1   : > { %v10449_v36 = vpack.c.bf16 %v8062_v43, %v7942_v55  ;;  %v8391_v14 = vrot.slane %v21382_v1, %v21393_v22  ;;  %v21567_v5 = vpack.c.bf16 %v21565_v54, %v21566_v46  ;;  %v21570_v4 = vpack.c.bf16 %v21568_v13, %v21569_v29 }
 0x4e2   : > { %10438 = vmatpush1.bf16.msra.mxu1 %v21535_v49  ;;  %v8421_v31 = vmul.f32 %v8383_v45, %v21519_v38  ;;  %v8387_v53 = vrot.slane %v21382_v1, %v20718_v32  ;;  %v8420_v16 = vmul.f32 %v8379_v17, %v21571_v39  ;;  %v21573_v49 = vld [vmem:[#allocation75_spill] sm:$0xff]  ;;  %v8878_v32 = vpop.permute.xlu0 %8877 }
 0x4e3   : > { %10440 = vmatprep.subr.bf16.mxu1 %v21538_v18  ;;  %10390 = vmatpush1.bf16.msra.mxu0 %v21541_v25  ;;  %v8423_v22 = vmul.f32 %v8391_v14, %v21572_v48  ;;  %v21575_v38 = vpack.c.bf16 %v21573_v49, %v21574_v30 }
 0x4e4   : > { %10392 = vmatprep.subr.bf16.mxu0 %v21544_v9  ;;  %v8422_v8 = vmul.f32 %v8387_v53, %v21576_v37 }
 0x4e6   : > { %10442 = vmatpush1.bf16.msra.mxu1 %v21549_v34 }
 0x4e7   : > { %10444 = vmatprep.subr.bf16.mxu1 %v21552_v23  ;;  %10394 = vmatpush1.bf16.msra.mxu0 %v21555_v19 }
 0x4e8   : > { %10396 = vmatprep.subr.bf16.mxu0 %v10395_v44 }
 0x4ea   : > { %10446 = vmatpush1.bf16.msra.mxu1 %v21560_v24 }
 0x4eb   : > { %10448 = vmatprep.subr.bf16.mxu1 %v10447_v63  ;;  %10398 = vmatpush1.bf16.msra.mxu0 %v10397_v58 }
 0x4ec   : > { %10400 = vmatprep.subr.bf16.mxu0 %v21564_v12 }
 0x4ee   : > { %10450 = vmatpush1.bf16.msra.mxu1 %v10449_v36  ;;  %v9020_v1 = vpop.f32.mrb[8].mxu1 }
 0x4ef   : > { %10452 = vmatprep.subr.bf16.mxu1 %v21567_v5  ;;  %10402 = vmatpush1.bf16.msra.mxu0 %v21570_v4  ;;  %v9021_v18 = vadd.f32 %v9020_v1, %v8878_v32  ;;  %v9022_v57 = vpop.f32.mrb[9].mxu1 }
 0x4f0   : > { %9361 = vmatprep.subr.mxu0 %v8421_v31  ;;  %v9023_v27 = vadd.f32 %v9022_v57, %v8878_v32 }
 0x4f1   : > { %v9453_v25 = vmax.f32 %v9021_v18, 0.0 }
 0x4f2   : > { %10454 = vmatpush1.bf16.msra.mxu1 %v21575_v38  ;;  %v9454_v10 = vmax.f32 %v9023_v27, 0.0 }
 0x4f3   : > { %9432 = vmatprep.subr.mxu1 %v8423_v22  ;;  %9362 = vmatpush1.msra.mxu0 %v8420_v16  ;;  %9469 = vst [vmem:[%s18871_s14 + $0x10] sm:$0xff] %v9453_v25 }
 0x4f4   : > { %9374 = vmatmul.mubr.f32.vlgmr.msra.gmra.mrb[14].mxu0 %v18636_v50  ;;  %9470 = vst [vmem:[%s18871_s14 + $0x18] sm:$0xff] %v9454_v10 }
 0x4f6   : > { %9433 = vmatpush1.msra.mxu1 %v8422_v8 }
 0x4f7   : > { %9445 = vmatmul.mubr.f32.vlgmr.msra.gmra.mrb[14].mxu1 %v18636_v50 }
 0x4f8   : > { %v8949_v51 = vpop.f32.mrb[8].mxu0 }
 0x4f9   : > { %v8950_v42 = vadd.f32 %v8949_v51, %v8878_v32  ;;  %v8951_v2 = vpop.f32.mrb[9].mxu0 }
 0x4fa   : > { %v8952_v50 = vadd.f32 %v8951_v2, %v8878_v32 }
 0x4fb   : > { %v9451_v9 = vmax.f32 %v8950_v42, 0.0 }
 0x4fc   : > { %v9452_v21 = vmax.f32 %v8952_v50, 0.0 }
 0x4fd   : > { %9467 = vst [vmem:[%s18871_s14] sm:$0xff] %v9451_v9 }
 0x4fe   : > { %9468 = vst [vmem:[%s18871_s14 + $0x8] sm:$0xff] %v9452_v21 }
 0x544   : > { %v9091_v11 = vpop.f32.mrb[10].mxu0 }
 0x545   : > { %v9092_v7 = vadd.f32 %v9091_v11, %v8878_v32  ;;  %v9093_v3 = vpop.f32.mrb[11].mxu0 }
 0x546   : > { %v9094_v26 = vadd.f32 %v9093_v3, %v8878_v32 }
 0x547   : > { %v9455_v62 = vmax.f32 %v9092_v7, 0.0 }
 0x548   : > { %v9162_v0 = vpop.f32.mrb[10].mxu1  ;;  %v9456_v6 = vmax.f32 %v9094_v26, 0.0 }
 0x549   : > { %v9163_v34 = vadd.f32 %v9162_v0, %v8878_v32  ;;  %v9164_v44 = vpop.f32.mrb[11].mxu1  ;;  %9471 = vst [vmem:[%s18871_s14 + $0x20] sm:$0xff] %v9455_v62 }
 0x54a   : > { %v9165_v60 = vadd.f32 %v9164_v44, %v8878_v32  ;;  %9472 = vst [vmem:[%s18871_s14 + $0x28] sm:$0xff] %v9456_v6 }
 0x54b   : > { %v9457_v56 = vmax.f32 %v9163_v34, 0.0 }
 0x54c   : > { %v9458_v41 = vmax.f32 %v9165_v60, 0.0 }
 0x54d   : > { %9473 = vst [vmem:[%s18871_s14 + $0x30] sm:$0xff] %v9457_v56 }
 0x54e   : > { %9474 = vst [vmem:[%s18871_s14 + $0x38] sm:$0xff] %v9458_v41 }
 0x58c   : > { %v9233_v23 = vpop.f32.mrb[12].mxu0 }
 0x58d   : > { %v9234_v35 = vadd.f32 %v9233_v23, %v8878_v32  ;;  %v9235_v61 = vpop.f32.mrb[13].mxu0 }
 0x58e   : > { %v9236_v19 = vadd.f32 %v9235_v61, %v8878_v32 }
 0x58f   : > { %v9459_v28 = vmax.f32 %v9234_v35, 0.0 }
 0x590   : > { %v9304_v15 = vpop.f32.mrb[12].mxu1  ;;  %v9460_v33 = vmax.f32 %v9236_v19, 0.0 }
 0x591   : > { %v9305_v43 = vadd.f32 %v9304_v15, %v8878_v32  ;;  %v9306_v58 = vpop.f32.mrb[13].mxu1  ;;  %9475 = vst [vmem:[%s18871_s14 + $0x40] sm:$0xff] %v9459_v28 }
 0x592   : > { %v9307_v63 = vadd.f32 %v9306_v58, %v8878_v32  ;;  %9476 = vst [vmem:[%s18871_s14 + $0x48] sm:$0xff] %v9460_v33 }
 0x593   : > { %v9461_v52 = vmax.f32 %v9305_v43, 0.0 }
 0x594   : > { %v9462_v40 = vmax.f32 %v9307_v63, 0.0 }
 0x595   : > { %9477 = vst [vmem:[%s18871_s14 + $0x50] sm:$0xff] %v9461_v52 }
 0x596   : > { %9478 = vst [vmem:[%s18871_s14 + $0x58] sm:$0xff] %v9462_v40 }
 0x5c7   : > { %v9375_v24 = vpop.f32.mrb[14].mxu0 }
 0x5c8   : > { %v9376_v47 = vadd.f32 %v9375_v24, %v8878_v32  ;;  %v9377_v55 = vpop.f32.mrb[15].mxu0 }
 0x5c9   : > { %v9378_v45 = vadd.f32 %v9377_v55, %v8878_v32 }
 0x5ca   : > { %v9463_v20 = vmax.f32 %v9376_v47, 0.0  ;;  %v9446_v59 = vpop.f32.mrb[14].mxu1 }
 0x5cb   : > { %v9464_v12 = vmax.f32 %v9378_v45, 0.0  ;;  %v9447_v36 = vadd.f32 %v9446_v59, %v8878_v32  ;;  %v9448_v17 = vpop.f32.mrb[15].mxu1 }
 0x5cc   : > { %9479 = vst [vmem:[%s18871_s14 + $0x60] sm:$0xff] %v9463_v20  ;;  %v9449_v14 = vadd.f32 %v9448_v17, %v8878_v32 }
 0x5cd   : > { %9480 = vst [vmem:[%s18871_s14 + $0x68] sm:$0xff] %v9464_v12  ;;  %v9465_v31 = vmax.f32 %v9447_v36, 0.0 }
 0x5ce   : > { %v9466_v54 = vmax.f32 %v9449_v14, 0.0 }
 0x5cf   : > { %9481 = vst [vmem:[%s18871_s14 + $0x70] sm:$0xff] %v9465_v31 }
 0x5d0   : > { %9482 = vst [vmem:[%s18871_s14 + $0x78] sm:$0xff] %v9466_v54 }
 0x5d1   : > { %10658 = shalt.err (!%p10655_p7)
}
 0x5d2   : > { %s10659_s18 = scalar_lea.hbm %s18892_s17, 2048  ;;  %s10663_s9 = scalar_lea.hbm %s18944_s6, 4096 }
 0x5d3   : > { %p10660_p10 = scmp.ne.s32.totalorder %s18892_s17, %s10659_s18  ;;  %p10664_p0 = scmp.lt.u32.totalorder %s18892_s17, %s18944_s6 }
 0x5d4   : > { %p10665_p11 = scmp.lt.u32.totalorder %s10663_s9, %s10659_s18  ;;  %p10667_p2 = scmp.lt.u32.totalorder %s10659_s18, %s18892_s17 }
 0x5d5   : > { %p10661_p13 = pnand %p10660_p10, %p10880_p4 }
 0x5d6   : > { %p10666_p9 = por %p10665_p11, %p10664_p0 }
 0x5d7   : > { %p10662_p5 = pneg %p10661_p13 }
 0x5d8   : > { %p10668_p1 = por %p10667_p2, %p10666_p9 }
 0x5da   : > { %p10669_p6 = pnand %p10668_p1, %p10662_p5 }
 0x5dc   : > { %10672 = shalt.err (!%p10669_p6)
}
 0x5dd   : > { %10465 = dma.vmem_to_hbm [thread:$0]  (%p10880_p4), %s18894_s27, 2048, %s18892_s17, %s9484_s12  }
 0x5de PF: > { %s9510_s26 = sand.u32 1, %s10703_s21   ;;  %p21577_p8 = scmp.ne.s32.totalorder %s19619_s28, 0 }
 0x5df   : > { %p21578_p12 = scmp.ge.s32.totalorder %s10715_s24, 2  ;;  %s9511_s15 = scalar_lea.sflag [#allocation5], %s9510_s26 }
 0x5e1   : > { %p10479_p3 = pnand %p21578_p12, %p21577_p8 }
 0x5e3   : > { %10698 = dma.done.wait (!%p10479_p3), %s9511_s15, 2048  }
 0x5e4   : > { %10700 = vsyncadd (!%p10479_p3), %s9511_s15, 4294965248  ;;  %p20_p7 = scmp.ge.s32.totalorder %s10870_s19, 4   ;;  %s21579_s21 = smov %s10707_s22 }
 0x5e5   : > { %s21580_s22 = smov %s10711_s23  ;;  %s21581_s23 = smov %s10886_s8 }
 0x5e6   : > { %s21582_s24 = smov %s10870_s19  ;;  %22 = sbr.rel (!%p20_p7) target bundleno = 6 (0x6), region = 148 }
 0x5ed   :  { %9516 = vsyncpa [#allocation4], 1 }
 0x5ee   :  { %9518 = vsyncpa [#allocation4 + $0x1], 1 }
 0x5ef   :  { %9519 = vsyncpa [#allocation7], 1 }
 0x5f0   :  { %9520 = vsyncpa [#allocation5], 1 }
 0x5f1   :  { %9522 = vsyncpa [#allocation5 + $0x1], 1 }

</bundles_post_ra>
